<compile_context>
chip_gen: v6e
topology: v6e:2x2x1
jax: 0.10.0
libtpu: 0.0.40
codegen_flags: <defaults>
</compile_context>

<pallas_src>
import jax
import jax.numpy as jnp
import numpy as np
from jax.experimental import pallas as pl
from jax.experimental.pallas import tpu as pltpu

HIDDEN = 64            # self.hidden in the PyTorch module
Z_DIM = HIDDEN // 4    # 16
LANES = 128            # lane width; every padded operand is 128 wide
TM = 256               # rows (pixels) per grid step

# ---- packed parameter slab layout (all zero-padded to 128 lanes / rows) ----
# weight slab indices
W_CT1, W_CT2 = 0, 1                       # conv_theta: (C,32), (32,64)
W_LE1_S, W_LE1_D = 2, 3                   # latent_encoder L1 split by input
W_LE2_LOC, W_LE2_SCL = 4, 5               # latent_encoder L2 split by output
W_CNN1_S, W_CNN1_D, W_CNN1_Z = 6, 7, 8    # cnn L1 split by input (signal/density/z)
W_CNN2, W_CNN3, W_CNN4, W_CNN5, W_CNN6 = 9, 10, 11, 12, 13
W_CNN7_MEAN, W_CNN7_STD = 14, 15          # cnn L7 split by output (mean/std)
N_W = 16
# bias slab rows
B_CT1, B_CT2 = 0, 1
B_LE1, B_LE2_LOC, B_LE2_SCL = 2, 3, 4
B_CNN1, B_CNN2, B_CNN3, B_CNN4, B_CNN5, B_CNN6 = 5, 6, 7, 8, 9, 10
B_CNN7_MEAN, B_CNN7_STD = 11, 12
N_B = 16  # padded to a sublane-aligned row count


# -----------------------------------------------------------------------------
# Pallas kernel (one grid step = TM pixel rows)
# -----------------------------------------------------------------------------
def cnn_lnp_kernel(in_ref, w_ref, b_ref, out_ref):
    # in_ref : (3, TM, 128)   rows 0/1/2 = x, mask, eps   (zero-padded lanes)
    # w_ref  : (16, 128, 128) zero-padded weights
    # b_ref  : (16, 128)      zero-padded biases
    # out_ref: (2, TM, 128)   [mean, softplus(std)] (first C lanes meaningful)
    w = lambda i: w_ref[i]                       # (128, 128)
    b = lambda i: b_ref[i:i + 1, :]              # (1, 128), broadcasts over rows
    relu = lambda v: jnp.maximum(v, 0.0)
    dot = lambda a, m: jnp.dot(a, m, preferred_element_type=jnp.float32)

    x = in_ref[0]
    mask = in_ref[1]
    eps = in_ref[2]
    tm = x.shape[0]

    # conv_theta applied once to row-stacked [signal_in ; density_in]
    stacked = jnp.concatenate([x * mask, mask], axis=0)          # (2*TM, 128)
    h = relu(dot(stacked, w(W_CT1)) + b(B_CT1))
    ct = dot(h, w(W_CT2)) + b(B_CT2)                             # (2*TM, 128)
    signal = ct[:tm]                                             # (TM, 128)
    density = ct[tm:]                                            # (TM, 128)

    # latent encoder: split-weight form of concat([signal, density]) @ le_w1
    h_le = relu(dot(signal, w(W_LE1_S)) + dot(density, w(W_LE1_D)) + b(B_LE1))
    q_loc = dot(h_le, w(W_LE2_LOC)) + b(B_LE2_LOC)
    q_scale = 0.1 + 0.9 * jax.nn.sigmoid(dot(h_le, w(W_LE2_SCL)) + b(B_LE2_SCL))
    # reparameterized sample; eps padded lanes are zero so z padded lanes stay 0
    z = q_loc + q_scale * eps

    # cnn head, layer 1 in split-weight form of concat([R, z]) @ w1
    hh = relu(dot(signal, w(W_CNN1_S)) + dot(density, w(W_CNN1_D))
              + dot(z, w(W_CNN1_Z)) + b(B_CNN1))
    for wi, bi in ((W_CNN2, B_CNN2), (W_CNN3, B_CNN3), (W_CNN4, B_CNN4),
                   (W_CNN5, B_CNN5), (W_CNN6, B_CNN6)):
        hh = relu(dot(hh, w(wi)) + b(bi))

    mean = dot(hh, w(W_CNN7_MEAN)) + b(B_CNN7_MEAN)
    std = jax.nn.softplus(dot(hh, w(W_CNN7_STD)) + b(B_CNN7_STD))

    out_ref[0] = mean
    out_ref[1] = std


# -----------------------------------------------------------------------------
# Wrapper: layout plumbing (flatten to rows, pad lanes, fold inputs) + pallas_call
# -----------------------------------------------------------------------------
@jax.jit
def cnn_lnp_forward(x, mask, eps, w_slab, b_slab):
    B, C, N, _ = x.shape
    R = B * N * N

    def to_rows(t, width):
        rows = jnp.transpose(t, (0, 2, 3, 1)).reshape(R, width)
        return jnp.pad(rows, ((0, 0), (0, LANES - width)))

    in_slab = jnp.stack([to_rows(x, C), to_rows(mask, C), to_rows(eps, Z_DIM)],
                        axis=0)                                  # (3, R, 128)
    Rp = ((R + TM - 1) // TM) * TM
    if Rp != R:
        in_slab = jnp.pad(in_slab, ((0, 0), (0, Rp - R), (0, 0)))

    out = pl.pallas_call(
        cnn_lnp_kernel,
        out_shape=jax.ShapeDtypeStruct((2, Rp, LANES), jnp.float32),
        grid=(Rp // TM,),
        in_specs=[
            pl.BlockSpec((3, TM, LANES), lambda i: (0, i, 0)),
            pl.BlockSpec((N_W, LANES, LANES), lambda i: (0, 0, 0)),  # resident
            pl.BlockSpec((N_B, LANES), lambda i: (0, 0)),            # resident
        ],
        out_specs=pl.BlockSpec((2, TM, LANES), lambda i: (0, i, 0)),
        compiler_params=pltpu.CompilerParams(
            dimension_semantics=("parallel",)),
    )(in_slab, w_slab, b_slab)

    to_img = lambda r: jnp.transpose(r.reshape(B, N, N, C), (0, 3, 1, 2))
    mean = to_img(out[0, :R, :C])
    std = to_img(out[1, :R, :C])
    return mean, std


# -----------------------------------------------------------------------------
# Deterministic parameter init (nn.Linear-style U(-1/sqrt(fan_in), +)).
# Weights stored as (in, out) so layers compute x @ W + b.
# -----------------------------------------------------------------------------
def init_linear(key, fan_in, fan_out):
    kw, kb = jax.random.split(key)
    bound = 1.0 / np.sqrt(fan_in)
    w = jax.random.uniform(kw, (fan_in, fan_out), jnp.float32, -bound, bound)
    b = jax.random.uniform(kb, (fan_out,), jnp.float32, -bound, bound)
    return w, b


def build_params(key, num_channels):
    h = HIDDEN
    layer_dims = (
        [(num_channels, h // 2), (h // 2, h)]        # conv_theta
        + [(2 * h, h // 2), (h // 2, h // 2)]        # latent_encoder
        + [(h // 4 + 2 * h, h // 2)]                 # cnn head
        + [(h // 2, h // 2)] * 5
        + [(h // 2, 2 * num_channels)]
    )
    keys = jax.random.split(key, len(layer_dims))
    flat = []
    for k, (fi, fo) in zip(keys, layer_dims):
        w, b = init_linear(k, fi, fo)
        flat += [w, b]
    return flat


def pack_params(flat_params, num_channels):
    """Pack the 22 logical parameters into two zero-padded VMEM slabs."""
    ps = [np.asarray(p, np.float32) for p in flat_params]
    (ct_w1, ct_b1, ct_w2, ct_b2,
     le_w1, le_b1, le_w2, le_b2, *cnn) = ps
    h = HIDDEN
    c1_w, c1_b = cnn[0], cnn[1]
    mids = [(cnn[2 + 2 * i], cnn[3 + 2 * i]) for i in range(5)]
    c7_w, c7_b = cnn[12], cnn[13]

    weights = [
        ct_w1, ct_w2,
        le_w1[:h], le_w1[h:],                        # split by input (signal/density)
        le_w2[:, :h // 4], le_w2[:, h // 4:],        # split by output (loc/scale)
        c1_w[:h], c1_w[h:2 * h], c1_w[2 * h:],       # split by input (signal/density/z)
        *[wm for wm, _ in mids],
        c7_w[:, :num_channels], c7_w[:, num_channels:],  # split by output (mean/std)
    ]
    biases = [
        ct_b1, ct_b2,
        le_b1, le_b2[:h // 4], le_b2[h // 4:],
        c1_b, *[bm for _, bm in mids],
        c7_b[:num_channels], c7_b[num_channels:],
    ]
    assert len(weights) == N_W and len(biases) == 13

    w_slab = np.zeros((N_W, LANES, LANES), np.float32)
    for i, wm in enumerate(weights):
        w_slab[i, :wm.shape[0], :wm.shape[1]] = wm
    b_slab = np.zeros((N_B, LANES), np.float32)
    for i, bm in enumerate(biases):
        b_slab[i, :bm.shape[0]] = bm
    return jnp.asarray(w_slab), jnp.asarray(b_slab)


# -----------------------------------------------------------------------------
# Pure-JAX reference (same math, no Pallas, unpadded params) for verification
# -----------------------------------------------------------------------------
def reference_forward(x, mask, eps, flat_params):
    B, C, N, _ = x.shape
    rows = lambda t: jnp.transpose(t, (0, 2, 3, 1)).reshape(B * N * N, t.shape[1])
    xr, mr, er = rows(x), rows(mask), rows(eps)

    (ct_w1, ct_b1, ct_w2, ct_b2,
     le_w1, le_b1, le_w2, le_b2, *cnn_params) = flat_params
    relu = lambda v: jnp.maximum(v, 0.0)
    lin = lambda v, w, b: jnp.dot(v, w, preferred_element_type=jnp.float32) + b

    def conv_theta(inp):
        return lin(relu(lin(inp, ct_w1, ct_b1)), ct_w2, ct_b2)

    signal = conv_theta(xr * mr)
    density = conv_theta(mr)
    Rm = jnp.concatenate([signal, density], axis=-1)

    suff = lin(relu(lin(Rm, le_w1, le_b1)), le_w2, le_b2)
    q_loc = suff[:, :Z_DIM]
    q_scale = 0.1 + 0.9 * jax.nn.sigmoid(suff[:, Z_DIM:])
    z = q_loc + q_scale * er

    hh = jnp.concatenate([Rm, z], axis=-1)
    n_layers = len(cnn_params) // 2
    for i in range(n_layers):
        hh = lin(hh, cnn_params[2 * i], cnn_params[2 * i + 1])
        if i < n_layers - 1:
            hh = relu(hh)
    mean_rows, std_rows = hh[:, :C], jax.nn.softplus(hh[:, C:])
    img = lambda r: jnp.transpose(r.reshape(B, N, N, C), (0, 3, 1, 2))
    return img(mean_rows), img(std_rows)


# -----------------------------------------------------------------------------
if __name__ == "__main__":
    B, C, N = 2, 4, 16
    root = jax.random.PRNGKey(0)
    k_x, k_mask, k_eps, k_params = jax.random.split(root, 4)

    x_trgt = jax.random.normal(k_x, (B, C, N, N), jnp.float32)
    mask = jax.random.bernoulli(k_mask, 0.5, (B, C, N, N)).astype(jnp.float32)
    eps = jax.random.normal(k_eps, (B, Z_DIM, N, N), jnp.float32)  # z-sample noise
    flat_params = build_params(k_params, C)
    w_slab, b_slab = pack_params(flat_params, C)

    mean, std = cnn_lnp_forward(x_trgt, mask, eps, w_slab, b_slab)
    jax.block_until_ready((mean, std))

    ref_mean, ref_std = reference_forward(x_trgt, mask, eps, flat_params)
    np.testing.assert_allclose(np.asarray(mean), np.asarray(ref_mean),
                               rtol=1e-4, atol=1e-4)
    np.testing.assert_allclose(np.asarray(std), np.asarray(ref_std),
                               rtol=1e-4, atol=1e-4)

    print("KERNEL_OK")
</pallas_src>

<mosaic_0001>
module attributes {stable_mosaic.version = 11 : i64} {
  func.func @cnn_lnp_kernel(%arg0: i32, %arg1: memref<3x256x128xf32, #tpu.memory_space<vmem>>, %arg2: memref<16x128x128xf32, #tpu.memory_space<vmem>>, %arg3: memref<16x128xf32, #tpu.memory_space<vmem>>, %arg4: memref<2x256x128xf32, #tpu.memory_space<vmem>>) attributes {dimension_semantics = [#tpu.dimension_semantics<parallel>], iteration_bounds = array<i64: 2>, scalar_prefetch = 0 : i64, scratch_operands = 0 : i64, tpu.core_type = #tpu.core_type<tc>, window_params = [{transform_indices = @transform_0, window_bounds = array<i64: 3, 256, 128>}, {pipeline_mode = #tpu.pipeline_mode<synchronous>, transform_indices = @transform_1, window_bounds = array<i64: 16, 128, 128>}, {pipeline_mode = #tpu.pipeline_mode<synchronous>, transform_indices = @transform_2, window_bounds = array<i64: 16, 128>}, {transform_indices = @transform_3, window_bounds = array<i64: 2, 256, 128>}]} {
    %c0 = arith.constant 0 : index
    %c0_0 = arith.constant 0 : index
    %c0_1 = arith.constant 0 : index
    %0 = vector.load %arg1[%c0, %c0_0, %c0_1] : memref<3x256x128xf32, #tpu.memory_space<vmem>>, vector<1x256x128xf32>
    %1 = vector.shape_cast %0 : vector<1x256x128xf32> to vector<256x128xf32>
    %c1 = arith.constant 1 : index
    %c0_2 = arith.constant 0 : index
    %c0_3 = arith.constant 0 : index
    %2 = vector.load %arg1[%c1, %c0_2, %c0_3] : memref<3x256x128xf32, #tpu.memory_space<vmem>>, vector<1x256x128xf32>
    %3 = vector.shape_cast %2 : vector<1x256x128xf32> to vector<256x128xf32>
    %c2 = arith.constant 2 : index
    %c0_4 = arith.constant 0 : index
    %c0_5 = arith.constant 0 : index
    %4 = vector.load %arg1[%c2, %c0_4, %c0_5] : memref<3x256x128xf32, #tpu.memory_space<vmem>>, vector<1x256x128xf32>
    %5 = vector.shape_cast %4 : vector<1x256x128xf32> to vector<256x128xf32>
    %6 = arith.mulf %1, %3 : vector<256x128xf32>
    %7 = tpu.concatenate %6, %3 in 0 : vector<256x128xf32>, vector<256x128xf32> -> vector<512x128xf32>
    %c0_6 = arith.constant 0 : index
    %c0_7 = arith.constant 0 : index
    %c0_8 = arith.constant 0 : index
    %8 = vector.load %arg2[%c0_6, %c0_7, %c0_8] : memref<16x128x128xf32, #tpu.memory_space<vmem>>, vector<1x128x128xf32>
    %9 = vector.shape_cast %8 : vector<1x128x128xf32> to vector<128x128xf32>
    %cst = arith.constant dense<0.000000e+00> : vector<512x128xf32>
    %10 = tpu.matmul %7, %9, %cst {dimension_numbers = #tpu.dot_dimension_numbers<[1], [0], [0], [1], [0, 0, 1, 1], [], []>} : vector<512x128xf32>, vector<128x128xf32>, vector<512x128xf32> -> vector<512x128xf32>
    %c0_9 = arith.constant 0 : index
    %c0_10 = arith.constant 0 : index
    %11 = vector.load %arg3[%c0_9, %c0_10] : memref<16x128xf32, #tpu.memory_space<vmem>>, vector<1x128xf32>
    %12 = vector.broadcast %11 : vector<1x128xf32> to vector<512x128xf32>
    %13 = arith.addf %10, %12 : vector<512x128xf32>
    %cst_11 = arith.constant 0.000000e+00 : f32
    %14 = vector.broadcast %cst_11 : f32 to vector<512x128xf32>
    %15 = arith.maximumf %13, %14 : vector<512x128xf32>
    %c1_12 = arith.constant 1 : index
    %c0_13 = arith.constant 0 : index
    %c0_14 = arith.constant 0 : index
    %16 = vector.load %arg2[%c1_12, %c0_13, %c0_14] : memref<16x128x128xf32, #tpu.memory_space<vmem>>, vector<1x128x128xf32>
    %17 = vector.shape_cast %16 : vector<1x128x128xf32> to vector<128x128xf32>
    %cst_15 = arith.constant dense<0.000000e+00> : vector<512x128xf32>
    %18 = tpu.matmul %15, %17, %cst_15 {dimension_numbers = #tpu.dot_dimension_numbers<[1], [0], [0], [1], [0, 0, 1, 1], [], []>} : vector<512x128xf32>, vector<128x128xf32>, vector<512x128xf32> -> vector<512x128xf32>
    %c1_16 = arith.constant 1 : index
    %c0_17 = arith.constant 0 : index
    %19 = vector.load %arg3[%c1_16, %c0_17] : memref<16x128xf32, #tpu.memory_space<vmem>>, vector<1x128xf32>
    %20 = vector.broadcast %19 : vector<1x128xf32> to vector<512x128xf32>
    %21 = arith.addf %18, %20 : vector<512x128xf32>
    %22 = vector.extract_strided_slice %21 {offsets = [0, 0], sizes = [256, 128], strides = [1, 1]} : vector<512x128xf32> to vector<256x128xf32>
    %23 = vector.extract_strided_slice %21 {offsets = [256, 0], sizes = [256, 128], strides = [1, 1]} : vector<512x128xf32> to vector<256x128xf32>
    %c2_18 = arith.constant 2 : index
    %c0_19 = arith.constant 0 : index
    %c0_20 = arith.constant 0 : index
    %24 = vector.load %arg2[%c2_18, %c0_19, %c0_20] : memref<16x128x128xf32, #tpu.memory_space<vmem>>, vector<1x128x128xf32>
    %25 = vector.shape_cast %24 : vector<1x128x128xf32> to vector<128x128xf32>
    %cst_21 = arith.constant dense<0.000000e+00> : vector<256x128xf32>
    %26 = tpu.matmul %22, %25, %cst_21 {dimension_numbers = #tpu.dot_dimension_numbers<[1], [0], [0], [1], [0, 0, 1, 1], [], []>} : vector<256x128xf32>, vector<128x128xf32>, vector<256x128xf32> -> vector<256x128xf32>
    %c3 = arith.constant 3 : index
    %c0_22 = arith.constant 0 : index
    %c0_23 = arith.constant 0 : index
    %27 = vector.load %arg2[%c3, %c0_22, %c0_23] : memref<16x128x128xf32, #tpu.memory_space<vmem>>, vector<1x128x128xf32>
    %28 = vector.shape_cast %27 : vector<1x128x128xf32> to vector<128x128xf32>
    %cst_24 = arith.constant dense<0.000000e+00> : vector<256x128xf32>
    %29 = tpu.matmul %23, %28, %cst_24 {dimension_numbers = #tpu.dot_dimension_numbers<[1], [0], [0], [1], [0, 0, 1, 1], [], []>} : vector<256x128xf32>, vector<128x128xf32>, vector<256x128xf32> -> vector<256x128xf32>
    %30 = arith.addf %26, %29 : vector<256x128xf32>
    %c2_25 = arith.constant 2 : index
    %c0_26 = arith.constant 0 : index
    %31 = vector.load %arg3[%c2_25, %c0_26] : memref<16x128xf32, #tpu.memory_space<vmem>>, vector<1x128xf32>
    %32 = vector.broadcast %31 : vector<1x128xf32> to vector<256x128xf32>
    %33 = arith.addf %30, %32 : vector<256x128xf32>
    %cst_27 = arith.constant 0.000000e+00 : f32
    %34 = vector.broadcast %cst_27 : f32 to vector<256x128xf32>
    %35 = arith.maximumf %33, %34 : vector<256x128xf32>
    %c4 = arith.constant 4 : index
    %c0_28 = arith.constant 0 : index
    %c0_29 = arith.constant 0 : index
    %36 = vector.load %arg2[%c4, %c0_28, %c0_29] : memref<16x128x128xf32, #tpu.memory_space<vmem>>, vector<1x128x128xf32>
    %37 = vector.shape_cast %36 : vector<1x128x128xf32> to vector<128x128xf32>
    %cst_30 = arith.constant dense<0.000000e+00> : vector<256x128xf32>
    %38 = tpu.matmul %35, %37, %cst_30 {dimension_numbers = #tpu.dot_dimension_numbers<[1], [0], [0], [1], [0, 0, 1, 1], [], []>} : vector<256x128xf32>, vector<128x128xf32>, vector<256x128xf32> -> vector<256x128xf32>
    %c3_31 = arith.constant 3 : index
    %c0_32 = arith.constant 0 : index
    %39 = vector.load %arg3[%c3_31, %c0_32] : memref<16x128xf32, #tpu.memory_space<vmem>>, vector<1x128xf32>
    %40 = vector.broadcast %39 : vector<1x128xf32> to vector<256x128xf32>
    %41 = arith.addf %38, %40 : vector<256x128xf32>
    %c5 = arith.constant 5 : index
    %c0_33 = arith.constant 0 : index
    %c0_34 = arith.constant 0 : index
    %42 = vector.load %arg2[%c5, %c0_33, %c0_34] : memref<16x128x128xf32, #tpu.memory_space<vmem>>, vector<1x128x128xf32>
    %43 = vector.shape_cast %42 : vector<1x128x128xf32> to vector<128x128xf32>
    %cst_35 = arith.constant dense<0.000000e+00> : vector<256x128xf32>
    %44 = tpu.matmul %35, %43, %cst_35 {dimension_numbers = #tpu.dot_dimension_numbers<[1], [0], [0], [1], [0, 0, 1, 1], [], []>} : vector<256x128xf32>, vector<128x128xf32>, vector<256x128xf32> -> vector<256x128xf32>
    %c4_36 = arith.constant 4 : index
    %c0_37 = arith.constant 0 : index
    %45 = vector.load %arg3[%c4_36, %c0_37] : memref<16x128xf32, #tpu.memory_space<vmem>>, vector<1x128xf32>
    %46 = vector.broadcast %45 : vector<1x128xf32> to vector<256x128xf32>
    %47 = arith.addf %44, %46 : vector<256x128xf32>
    %48 = arith.negf %47 : vector<256x128xf32>
    %49 = math.exp %48 : vector<256x128xf32>
    %cst_38 = arith.constant 1.000000e+00 : f32
    %50 = vector.broadcast %cst_38 : f32 to vector<256x128xf32>
    %51 = arith.addf %50, %49 : vector<256x128xf32>
    %52 = arith.divf %50, %51 : vector<256x128xf32>
    %cst_39 = arith.constant 0.899999976 : f32
    %53 = vector.broadcast %cst_39 : f32 to vector<256x128xf32>
    %54 = arith.mulf %53, %52 : vector<256x128xf32>
    %cst_40 = arith.constant 1.000000e-01 : f32
    %55 = vector.broadcast %cst_40 : f32 to vector<256x128xf32>
    %56 = arith.addf %55, %54 : vector<256x128xf32>
    %57 = arith.mulf %56, %5 : vector<256x128xf32>
    %58 = arith.addf %41, %57 : vector<256x128xf32>
    %c6 = arith.constant 6 : index
    %c0_41 = arith.constant 0 : index
    %c0_42 = arith.constant 0 : index
    %59 = vector.load %arg2[%c6, %c0_41, %c0_42] : memref<16x128x128xf32, #tpu.memory_space<vmem>>, vector<1x128x128xf32>
    %60 = vector.shape_cast %59 : vector<1x128x128xf32> to vector<128x128xf32>
    %cst_43 = arith.constant dense<0.000000e+00> : vector<256x128xf32>
    %61 = tpu.matmul %22, %60, %cst_43 {dimension_numbers = #tpu.dot_dimension_numbers<[1], [0], [0], [1], [0, 0, 1, 1], [], []>} : vector<256x128xf32>, vector<128x128xf32>, vector<256x128xf32> -> vector<256x128xf32>
    %c7 = arith.constant 7 : index
    %c0_44 = arith.constant 0 : index
    %c0_45 = arith.constant 0 : index
    %62 = vector.load %arg2[%c7, %c0_44, %c0_45] : memref<16x128x128xf32, #tpu.memory_space<vmem>>, vector<1x128x128xf32>
    %63 = vector.shape_cast %62 : vector<1x128x128xf32> to vector<128x128xf32>
    %cst_46 = arith.constant dense<0.000000e+00> : vector<256x128xf32>
    %64 = tpu.matmul %23, %63, %cst_46 {dimension_numbers = #tpu.dot_dimension_numbers<[1], [0], [0], [1], [0, 0, 1, 1], [], []>} : vector<256x128xf32>, vector<128x128xf32>, vector<256x128xf32> -> vector<256x128xf32>
    %65 = arith.addf %61, %64 : vector<256x128xf32>
    %c8 = arith.constant 8 : index
    %c0_47 = arith.constant 0 : index
    %c0_48 = arith.constant 0 : index
    %66 = vector.load %arg2[%c8, %c0_47, %c0_48] : memref<16x128x128xf32, #tpu.memory_space<vmem>>, vector<1x128x128xf32>
    %67 = vector.shape_cast %66 : vector<1x128x128xf32> to vector<128x128xf32>
    %cst_49 = arith.constant dense<0.000000e+00> : vector<256x128xf32>
    %68 = tpu.matmul %58, %67, %cst_49 {dimension_numbers = #tpu.dot_dimension_numbers<[1], [0], [0], [1], [0, 0, 1, 1], [], []>} : vector<256x128xf32>, vector<128x128xf32>, vector<256x128xf32> -> vector<256x128xf32>
    %69 = arith.addf %65, %68 : vector<256x128xf32>
    %c5_50 = arith.constant 5 : index
    %c0_51 = arith.constant 0 : index
    %70 = vector.load %arg3[%c5_50, %c0_51] : memref<16x128xf32, #tpu.memory_space<vmem>>, vector<1x128xf32>
    %71 = vector.broadcast %70 : vector<1x128xf32> to vector<256x128xf32>
    %72 = arith.addf %69, %71 : vector<256x128xf32>
    %cst_52 = arith.constant 0.000000e+00 : f32
    %73 = vector.broadcast %cst_52 : f32 to vector<256x128xf32>
    %74 = arith.maximumf %72, %73 : vector<256x128xf32>
    %c9 = arith.constant 9 : index
    %c0_53 = arith.constant 0 : index
    %c0_54 = arith.constant 0 : index
    %75 = vector.load %arg2[%c9, %c0_53, %c0_54] : memref<16x128x128xf32, #tpu.memory_space<vmem>>, vector<1x128x128xf32>
    %76 = vector.shape_cast %75 : vector<1x128x128xf32> to vector<128x128xf32>
    %cst_55 = arith.constant dense<0.000000e+00> : vector<256x128xf32>
    %77 = tpu.matmul %74, %76, %cst_55 {dimension_numbers = #tpu.dot_dimension_numbers<[1], [0], [0], [1], [0, 0, 1, 1], [], []>} : vector<256x128xf32>, vector<128x128xf32>, vector<256x128xf32> -> vector<256x128xf32>
    %c6_56 = arith.constant 6 : index
    %c0_57 = arith.constant 0 : index
    %78 = vector.load %arg3[%c6_56, %c0_57] : memref<16x128xf32, #tpu.memory_space<vmem>>, vector<1x128xf32>
    %79 = vector.broadcast %78 : vector<1x128xf32> to vector<256x128xf32>
    %80 = arith.addf %77, %79 : vector<256x128xf32>
    %cst_58 = arith.constant 0.000000e+00 : f32
    %81 = vector.broadcast %cst_58 : f32 to vector<256x128xf32>
    %82 = arith.maximumf %80, %81 : vector<256x128xf32>
    %c10 = arith.constant 10 : index
    %c0_59 = arith.constant 0 : index
    %c0_60 = arith.constant 0 : index
    %83 = vector.load %arg2[%c10, %c0_59, %c0_60] : memref<16x128x128xf32, #tpu.memory_space<vmem>>, vector<1x128x128xf32>
    %84 = vector.shape_cast %83 : vector<1x128x128xf32> to vector<128x128xf32>
    %cst_61 = arith.constant dense<0.000000e+00> : vector<256x128xf32>
    %85 = tpu.matmul %82, %84, %cst_61 {dimension_numbers = #tpu.dot_dimension_numbers<[1], [0], [0], [1], [0, 0, 1, 1], [], []>} : vector<256x128xf32>, vector<128x128xf32>, vector<256x128xf32> -> vector<256x128xf32>
    %c7_62 = arith.constant 7 : index
    %c0_63 = arith.constant 0 : index
    %86 = vector.load %arg3[%c7_62, %c0_63] : memref<16x128xf32, #tpu.memory_space<vmem>>, vector<1x128xf32>
    %87 = vector.broadcast %86 : vector<1x128xf32> to vector<256x128xf32>
    %88 = arith.addf %85, %87 : vector<256x128xf32>
    %cst_64 = arith.constant 0.000000e+00 : f32
    %89 = vector.broadcast %cst_64 : f32 to vector<256x128xf32>
    %90 = arith.maximumf %88, %89 : vector<256x128xf32>
    %c11 = arith.constant 11 : index
    %c0_65 = arith.constant 0 : index
    %c0_66 = arith.constant 0 : index
    %91 = vector.load %arg2[%c11, %c0_65, %c0_66] : memref<16x128x128xf32, #tpu.memory_space<vmem>>, vector<1x128x128xf32>
    %92 = vector.shape_cast %91 : vector<1x128x128xf32> to vector<128x128xf32>
    %cst_67 = arith.constant dense<0.000000e+00> : vector<256x128xf32>
    %93 = tpu.matmul %90, %92, %cst_67 {dimension_numbers = #tpu.dot_dimension_numbers<[1], [0], [0], [1], [0, 0, 1, 1], [], []>} : vector<256x128xf32>, vector<128x128xf32>, vector<256x128xf32> -> vector<256x128xf32>
    %c8_68 = arith.constant 8 : index
    %c0_69 = arith.constant 0 : index
    %94 = vector.load %arg3[%c8_68, %c0_69] : memref<16x128xf32, #tpu.memory_space<vmem>>, vector<1x128xf32>
    %95 = vector.broadcast %94 : vector<1x128xf32> to vector<256x128xf32>
    %96 = arith.addf %93, %95 : vector<256x128xf32>
    %cst_70 = arith.constant 0.000000e+00 : f32
    %97 = vector.broadcast %cst_70 : f32 to vector<256x128xf32>
    %98 = arith.maximumf %96, %97 : vector<256x128xf32>
    %c12 = arith.constant 12 : index
    %c0_71 = arith.constant 0 : index
    %c0_72 = arith.constant 0 : index
    %99 = vector.load %arg2[%c12, %c0_71, %c0_72] : memref<16x128x128xf32, #tpu.memory_space<vmem>>, vector<1x128x128xf32>
    %100 = vector.shape_cast %99 : vector<1x128x128xf32> to vector<128x128xf32>
    %cst_73 = arith.constant dense<0.000000e+00> : vector<256x128xf32>
    %101 = tpu.matmul %98, %100, %cst_73 {dimension_numbers = #tpu.dot_dimension_numbers<[1], [0], [0], [1], [0, 0, 1, 1], [], []>} : vector<256x128xf32>, vector<128x128xf32>, vector<256x128xf32> -> vector<256x128xf32>
    %c9_74 = arith.constant 9 : index
    %c0_75 = arith.constant 0 : index
    %102 = vector.load %arg3[%c9_74, %c0_75] : memref<16x128xf32, #tpu.memory_space<vmem>>, vector<1x128xf32>
    %103 = vector.broadcast %102 : vector<1x128xf32> to vector<256x128xf32>
    %104 = arith.addf %101, %103 : vector<256x128xf32>
    %cst_76 = arith.constant 0.000000e+00 : f32
    %105 = vector.broadcast %cst_76 : f32 to vector<256x128xf32>
    %106 = arith.maximumf %104, %105 : vector<256x128xf32>
    %c13 = arith.constant 13 : index
    %c0_77 = arith.constant 0 : index
    %c0_78 = arith.constant 0 : index
    %107 = vector.load %arg2[%c13, %c0_77, %c0_78] : memref<16x128x128xf32, #tpu.memory_space<vmem>>, vector<1x128x128xf32>
    %108 = vector.shape_cast %107 : vector<1x128x128xf32> to vector<128x128xf32>
    %cst_79 = arith.constant dense<0.000000e+00> : vector<256x128xf32>
    %109 = tpu.matmul %106, %108, %cst_79 {dimension_numbers = #tpu.dot_dimension_numbers<[1], [0], [0], [1], [0, 0, 1, 1], [], []>} : vector<256x128xf32>, vector<128x128xf32>, vector<256x128xf32> -> vector<256x128xf32>
    %c10_80 = arith.constant 10 : index
    %c0_81 = arith.constant 0 : index
    %110 = vector.load %arg3[%c10_80, %c0_81] : memref<16x128xf32, #tpu.memory_space<vmem>>, vector<1x128xf32>
    %111 = vector.broadcast %110 : vector<1x128xf32> to vector<256x128xf32>
    %112 = arith.addf %109, %111 : vector<256x128xf32>
    %cst_82 = arith.constant 0.000000e+00 : f32
    %113 = vector.broadcast %cst_82 : f32 to vector<256x128xf32>
    %114 = arith.maximumf %112, %113 : vector<256x128xf32>
    %c14 = arith.constant 14 : index
    %c0_83 = arith.constant 0 : index
    %c0_84 = arith.constant 0 : index
    %115 = vector.load %arg2[%c14, %c0_83, %c0_84] : memref<16x128x128xf32, #tpu.memory_space<vmem>>, vector<1x128x128xf32>
    %116 = vector.shape_cast %115 : vector<1x128x128xf32> to vector<128x128xf32>
    %cst_85 = arith.constant dense<0.000000e+00> : vector<256x128xf32>
    %117 = tpu.matmul %114, %116, %cst_85 {dimension_numbers = #tpu.dot_dimension_numbers<[1], [0], [0], [1], [0, 0, 1, 1], [], []>} : vector<256x128xf32>, vector<128x128xf32>, vector<256x128xf32> -> vector<256x128xf32>
    %c11_86 = arith.constant 11 : index
    %c0_87 = arith.constant 0 : index
    %118 = vector.load %arg3[%c11_86, %c0_87] : memref<16x128xf32, #tpu.memory_space<vmem>>, vector<1x128xf32>
    %119 = vector.broadcast %118 : vector<1x128xf32> to vector<256x128xf32>
    %120 = arith.addf %117, %119 : vector<256x128xf32>
    %c15 = arith.constant 15 : index
    %c0_88 = arith.constant 0 : index
    %c0_89 = arith.constant 0 : index
    %121 = vector.load %arg2[%c15, %c0_88, %c0_89] : memref<16x128x128xf32, #tpu.memory_space<vmem>>, vector<1x128x128xf32>
    %122 = vector.shape_cast %121 : vector<1x128x128xf32> to vector<128x128xf32>
    %cst_90 = arith.constant dense<0.000000e+00> : vector<256x128xf32>
    %123 = tpu.matmul %114, %122, %cst_90 {dimension_numbers = #tpu.dot_dimension_numbers<[1], [0], [0], [1], [0, 0, 1, 1], [], []>} : vector<256x128xf32>, vector<128x128xf32>, vector<256x128xf32> -> vector<256x128xf32>
    %c12_91 = arith.constant 12 : index
    %c0_92 = arith.constant 0 : index
    %124 = vector.load %arg3[%c12_91, %c0_92] : memref<16x128xf32, #tpu.memory_space<vmem>>, vector<1x128xf32>
    %125 = vector.broadcast %124 : vector<1x128xf32> to vector<256x128xf32>
    %126 = arith.addf %123, %125 : vector<256x128xf32>
    %cst_93 = arith.constant 0.000000e+00 : f32
    %127 = vector.broadcast %cst_93 : f32 to vector<256x128xf32>
    %128 = arith.maximumf %126, %127 : vector<256x128xf32>
    %129 = vector.broadcast %cst_93 : f32 to vector<256x128xf32>
    %130 = arith.subf %126, %129 : vector<256x128xf32>
    %131 = arith.cmpf one, %130, %130 : vector<256x128xf32>
    %132 = vector.broadcast %cst_93 : f32 to vector<256x128xf32>
    %133 = arith.addf %126, %132 : vector<256x128xf32>
    %134 = math.absf %130 : vector<256x128xf32>
    %cst_94 = arith.constant 0.000000e+00 : f32
    %135 = vector.broadcast %cst_94 : f32 to vector<256x128xf32>
    %136 = arith.subf %135, %134 : vector<256x128xf32>
    %137 = math.exp %136 : vector<256x128xf32>
    %138 = math.log1p %137 : vector<256x128xf32>
    %139 = arith.addf %128, %138 : vector<256x128xf32>
    %140 = arith.select %131, %133, %139 : vector<256x128xi1>, vector<256x128xf32>
    %c0_95 = arith.constant 0 : index
    %c0_96 = arith.constant 0 : index
    %c0_97 = arith.constant 0 : index
    %141 = vector.load %arg4[%c0_95, %c0_96, %c0_97] : memref<2x256x128xf32, #tpu.memory_space<vmem>>, vector<1x256x128xf32>
    %142 = vector.shape_cast %141 : vector<1x256x128xf32> to vector<256x128xf32>
    %143 = vector.shape_cast %120 : vector<256x128xf32> to vector<1x256x128xf32>
    tpu.vector_store %arg4[%c0_95, %c0_96, %c0_97], %143 {strides = array<i32>} : memref<2x256x128xf32, #tpu.memory_space<vmem>>, vector<1x256x128xf32>,
    %c1_98 = arith.constant 1 : index
    %c0_99 = arith.constant 0 : index
    %c0_100 = arith.constant 0 : index
    %144 = vector.load %arg4[%c1_98, %c0_99, %c0_100] : memref<2x256x128xf32, #tpu.memory_space<vmem>>, vector<1x256x128xf32>
    %145 = vector.shape_cast %144 : vector<1x256x128xf32> to vector<256x128xf32>
    %146 = vector.shape_cast %140 : vector<256x128xf32> to vector<1x256x128xf32>
    tpu.vector_store %arg4[%c1_98, %c0_99, %c0_100], %146 {strides = array<i32>} : memref<2x256x128xf32, #tpu.memory_space<vmem>>, vector<1x256x128xf32>,
    return
  }
  func.func @transform_0(%arg0: i32) -> (i32, i32, i32) {
    %c0_i32 = arith.constant 0 : i32
    %c0_i32_0 = arith.constant 0 : i32
    %c0_i32_1 = arith.constant 0 : i32
    return %c0_i32, %arg0, %c0_i32_0 : i32, i32, i32
  }
  func.func @transform_1(%arg0: i32) -> (i32, i32, i32) {
    %c0_i32 = arith.constant 0 : i32
    %c0_i32_0 = arith.constant 0 : i32
    %c0_i32_1 = arith.constant 0 : i32
    %c0_i32_2 = arith.constant 0 : i32
    return %c0_i32, %c0_i32_0, %c0_i32_1 : i32, i32, i32
  }
  func.func @transform_2(%arg0: i32) -> (i32, i32) {
    %c0_i32 = arith.constant 0 : i32
    %c0_i32_0 = arith.constant 0 : i32
    %c0_i32_1 = arith.constant 0 : i32
    return %c0_i32, %c0_i32_0 : i32, i32
  }
  func.func @transform_3(%arg0: i32) -> (i32, i32, i32) {
    %c0_i32 = arith.constant 0 : i32
    %c0_i32_0 = arith.constant 0 : i32
    %c0_i32_1 = arith.constant 0 : i32
    return %c0_i32, %arg0, %c0_i32_0 : i32, i32, i32
  }
}

</mosaic_0001>

<bundles_post_ra>
// kernel: cnn_lnp_forward.1
= control target key start
LH: loop header
LB: loop body
LE: loop exit
PB: predicated region body
PF: predicated region fallthrough
CT: control target
= control target key end

     0   :  { %s9597_s12 = smov 0   ;;  %s9599_s13 = smov 0   ;;  %s12643_s0 = inlined_call_operand.vmem [shape: f32[3,512,128], index: 0, kind: input, shape index: {}]   ;;  %s12644_s1 = inlined_call_operand.vmem [shape: f32[16,128,128], index: 1, kind: input, shape index: {}]   ;;  %s12645_s2 = inlined_call_operand.vmem [shape: f32[16,128], index: 2, kind: input, shape index: {}]   ;;  %s12646_s3 = inlined_call_operand.vmem [shape: f32[2,512,128], index: 3, kind: output, shape index: {}]  }
   0x1   :  { %s9601_s14 = smov 0  }
   0x2 LB: > { %s6665_s15 = sadd.s32 4294967295, %s9575_s14   ;;  %s9614_s16 = sadd.s32 1, %s9575_s14   ;;  %s9575_s14 = sphi %s9601_s14, %s12775_s14   ;;  %s9571_s13 = sphi %s9599_s13, %s12774_s13   ;;  %s9567_s12 = sphi %s9597_s12, %s12773_s12  }
   0x3   : > { %s17_s17 = ssub.s32 %s9575_s14, %s9614_s16  ;;  %s20_s18 = sadd.s32 1, %s9571_s13 }
   0x4   : > { %p18_p0 = scmp.eq.s32.totalorder %s17_s17, 0  ;;  %p27_p1 = scmp.ne.s32.totalorder %s9571_s13, %s9567_s12 }
   0x5   : > { %p28_p2 = scmp.eq.s32.totalorder %s9575_s14, 0  ;;  %p99_p3 = scmp.eq.s32.totalorder %s6665_s15, 1 }
   0x6   : > { %s9625_s19 = scalar_select %p18_p0, %s9571_s13, %s20_s18  }
   0x7   : > { %p29_p4 = por %p28_p2, %p27_p1  ;;  %p9627_p5 = por %p99_p3, %p27_p1 }
   0x8   : > { %p6668_p6 = scmp.ge.s32.totalorder %s9575_s14, 2 }
   0xa   : > { %127 = sbr.rel (%p6668_p6) target bundleno = 68 (0x44), region = 24 }
   0xf   : > { %130 = sbr.rel (!%p29_p4) target bundleno = 68 (0x44), region = 28  ;;  %s132_s21 = sand.u32 (%p29_p4), 1, %s9571_s13  }
  0x10   : > { %s7059_s22 = sshll.u32 (%p29_p4), %s9575_s14, 8  ;;  %s9269_s23 = smul.u32 (%p29_p4), 768, %s132_s21 }
  0x11   : > { %s9637_s26 = scalar_lea.vmem (%p29_p4), %s12643_s0, %s7059_s22 }
  0x12   : > { %v356_v0 = vld [vmem:[%s9637_s26] sm:$0xff] (%p29_p4)  ;;  %v358_v1 = vld [vmem:[%s9637_s26 + $0x8] sm:$0xff] (%p29_p4)  ;;  %v360_v2 = vld [vmem:[%s9637_s26 + $0x10] sm:$0xff] (%p29_p4)  ;;  %s9645_s27 = scalar_lea.vmem (%p29_p4), [#allocation2], %s9269_s23 }
  0x13   : > { %v362_v3 = vld [vmem:[%s9637_s26 + $0x18] sm:$0xff] (%p29_p4)  ;;  %v364_v4 = vld [vmem:[%s9637_s26 + $0x20] sm:$0xff] (%p29_p4)  ;;  %v366_v5 = vld [vmem:[%s9637_s26 + $0x28] sm:$0xff] (%p29_p4)  ;;  %357 = vst [vmem:[%s9645_s27] sm:$0xff] (%p29_p4), %v356_v0 }
  0x14   : > { %359 = vst [vmem:[%s9645_s27 + $0x8] sm:$0xff] %v358_v1  ;;  %361 = vst [vmem:[%s9645_s27 + $0x10] sm:$0xff] %v360_v2  ;;  %v368_v6 = vld [vmem:[%s9637_s26 + $0x30] sm:$0xff]  ;;  %v370_v7 = vld [vmem:[%s9637_s26 + $0x38] sm:$0xff] }
  0x15   : > { %363 = vst [vmem:[%s9645_s27 + $0x18] sm:$0xff] %v362_v3  ;;  %365 = vst [vmem:[%s9645_s27 + $0x20] sm:$0xff] %v364_v4  ;;  %v372_v8 = vld [vmem:[%s9637_s26 + $0x40] sm:$0xff]  ;;  %v374_v9 = vld [vmem:[%s9637_s26 + $0x48] sm:$0xff] }
  0x16   : > { %367 = vst [vmem:[%s9645_s27 + $0x28] sm:$0xff] %v366_v5  ;;  %369 = vst [vmem:[%s9645_s27 + $0x30] sm:$0xff] %v368_v6  ;;  %v376_v10 = vld [vmem:[%s9637_s26 + $0x50] sm:$0xff]  ;;  %v378_v11 = vld [vmem:[%s9637_s26 + $0x58] sm:$0xff] }
  0x17   : > { %371 = vst [vmem:[%s9645_s27 + $0x38] sm:$0xff] %v370_v7  ;;  %373 = vst [vmem:[%s9645_s27 + $0x40] sm:$0xff] %v372_v8  ;;  %v380_v12 = vld [vmem:[%s9637_s26 + $0x60] sm:$0xff]  ;;  %v382_v13 = vld [vmem:[%s9637_s26 + $0x68] sm:$0xff] }
  0x18   : > { %375 = vst [vmem:[%s9645_s27 + $0x48] sm:$0xff] %v374_v9  ;;  %377 = vst [vmem:[%s9645_s27 + $0x50] sm:$0xff] %v376_v10  ;;  %v384_v14 = vld [vmem:[%s9637_s26 + $0x70] sm:$0xff]  ;;  %v386_v15 = vld [vmem:[%s9637_s26 + $0x78] sm:$0xff] }
  0x19   : > { %379 = vst [vmem:[%s9645_s27 + $0x58] sm:$0xff] %v378_v11  ;;  %381 = vst [vmem:[%s9645_s27 + $0x60] sm:$0xff] %v380_v12  ;;  %v388_v16 = vld [vmem:[%s9637_s26 + $0x80] sm:$0xff]  ;;  %v390_v17 = vld [vmem:[%s9637_s26 + $0x88] sm:$0xff] }
  0x1a   : > { %383 = vst [vmem:[%s9645_s27 + $0x68] sm:$0xff] %v382_v13  ;;  %385 = vst [vmem:[%s9645_s27 + $0x70] sm:$0xff] %v384_v14  ;;  %v392_v18 = vld [vmem:[%s9637_s26 + $0x90] sm:$0xff]  ;;  %v394_v19 = vld [vmem:[%s9637_s26 + $0x98] sm:$0xff] }
  0x1b   : > { %387 = vst [vmem:[%s9645_s27 + $0x78] sm:$0xff] %v386_v15  ;;  %389 = vst [vmem:[%s9645_s27 + $0x80] sm:$0xff] %v388_v16  ;;  %v396_v20 = vld [vmem:[%s9637_s26 + $0xa0] sm:$0xff]  ;;  %v398_v21 = vld [vmem:[%s9637_s26 + $0xa8] sm:$0xff] }
  0x1c   : > { %391 = vst [vmem:[%s9645_s27 + $0x88] sm:$0xff] %v390_v17  ;;  %393 = vst [vmem:[%s9645_s27 + $0x90] sm:$0xff] %v392_v18  ;;  %v400_v22 = vld [vmem:[%s9637_s26 + $0xb0] sm:$0xff]  ;;  %v402_v23 = vld [vmem:[%s9637_s26 + $0xb8] sm:$0xff] }
  0x1d   : > { %395 = vst [vmem:[%s9645_s27 + $0x98] sm:$0xff] %v394_v19  ;;  %397 = vst [vmem:[%s9645_s27 + $0xa0] sm:$0xff] %v396_v20  ;;  %v404_v24 = vld [vmem:[%s9637_s26 + $0xc0] sm:$0xff]  ;;  %v406_v25 = vld [vmem:[%s9637_s26 + $0xc8] sm:$0xff] }
  0x1e   : > { %399 = vst [vmem:[%s9645_s27 + $0xa8] sm:$0xff] %v398_v21  ;;  %401 = vst [vmem:[%s9645_s27 + $0xb0] sm:$0xff] %v400_v22  ;;  %v408_v26 = vld [vmem:[%s9637_s26 + $0xd0] sm:$0xff]  ;;  %v410_v27 = vld [vmem:[%s9637_s26 + $0xd8] sm:$0xff] }
  0x1f   : > { %403 = vst [vmem:[%s9645_s27 + $0xb8] sm:$0xff] %v402_v23  ;;  %405 = vst [vmem:[%s9645_s27 + $0xc0] sm:$0xff] %v404_v24  ;;  %v412_v28 = vld [vmem:[%s9637_s26 + $0xe0] sm:$0xff]  ;;  %v414_v29 = vld [vmem:[%s9637_s26 + $0xe8] sm:$0xff] }
  0x20   : > { %407 = vst [vmem:[%s9645_s27 + $0xc8] sm:$0xff] %v406_v25  ;;  %409 = vst [vmem:[%s9645_s27 + $0xd0] sm:$0xff] %v408_v26  ;;  %v416_v30 = vld [vmem:[%s9637_s26 + $0xf0] sm:$0xff]  ;;  %v418_v31 = vld [vmem:[%s9637_s26 + $0xf8] sm:$0xff] }
  0x21   : > { %411 = vst [vmem:[%s9645_s27 + $0xd8] sm:$0xff] %v410_v27  ;;  %413 = vst [vmem:[%s9645_s27 + $0xe0] sm:$0xff] %v412_v28  ;;  %v420_v32 = vld [vmem:[%s9637_s26 + $0x200] sm:$0xff]  ;;  %v422_v33 = vld [vmem:[%s9637_s26 + $0x208] sm:$0xff] }
  0x22   : > { %415 = vst [vmem:[%s9645_s27 + $0xe8] sm:$0xff] %v414_v29  ;;  %417 = vst [vmem:[%s9645_s27 + $0xf0] sm:$0xff] %v416_v30  ;;  %v424_v34 = vld [vmem:[%s9637_s26 + $0x210] sm:$0xff]  ;;  %v426_v35 = vld [vmem:[%s9637_s26 + $0x218] sm:$0xff] }
  0x23   : > { %419 = vst [vmem:[%s9645_s27 + $0xf8] sm:$0xff] %v418_v31  ;;  %421 = vst [vmem:[%s9645_s27 + $0x100] sm:$0xff] %v420_v32  ;;  %v428_v36 = vld [vmem:[%s9637_s26 + $0x220] sm:$0xff]  ;;  %v430_v37 = vld [vmem:[%s9637_s26 + $0x228] sm:$0xff] }
  0x24   : > { %423 = vst [vmem:[%s9645_s27 + $0x108] sm:$0xff] %v422_v33  ;;  %425 = vst [vmem:[%s9645_s27 + $0x110] sm:$0xff] %v424_v34  ;;  %v432_v38 = vld [vmem:[%s9637_s26 + $0x230] sm:$0xff]  ;;  %v434_v39 = vld [vmem:[%s9637_s26 + $0x238] sm:$0xff] }
  0x25   : > { %427 = vst [vmem:[%s9645_s27 + $0x118] sm:$0xff] %v426_v35  ;;  %429 = vst [vmem:[%s9645_s27 + $0x120] sm:$0xff] %v428_v36  ;;  %v436_v40 = vld [vmem:[%s9637_s26 + $0x240] sm:$0xff]  ;;  %v438_v41 = vld [vmem:[%s9637_s26 + $0x248] sm:$0xff] }
  0x26   : > { %431 = vst [vmem:[%s9645_s27 + $0x128] sm:$0xff] %v430_v37  ;;  %433 = vst [vmem:[%s9645_s27 + $0x130] sm:$0xff] %v432_v38  ;;  %v440_v42 = vld [vmem:[%s9637_s26 + $0x250] sm:$0xff]  ;;  %v442_v43 = vld [vmem:[%s9637_s26 + $0x258] sm:$0xff] }
  0x27   : > { %435 = vst [vmem:[%s9645_s27 + $0x138] sm:$0xff] %v434_v39  ;;  %437 = vst [vmem:[%s9645_s27 + $0x140] sm:$0xff] %v436_v40  ;;  %v444_v44 = vld [vmem:[%s9637_s26 + $0x260] sm:$0xff]  ;;  %v446_v45 = vld [vmem:[%s9637_s26 + $0x268] sm:$0xff] }
  0x28   : > { %439 = vst [vmem:[%s9645_s27 + $0x148] sm:$0xff] %v438_v41  ;;  %441 = vst [vmem:[%s9645_s27 + $0x150] sm:$0xff] %v440_v42  ;;  %v448_v46 = vld [vmem:[%s9637_s26 + $0x270] sm:$0xff]  ;;  %v450_v47 = vld [vmem:[%s9637_s26 + $0x278] sm:$0xff] }
  0x29   : > { %443 = vst [vmem:[%s9645_s27 + $0x158] sm:$0xff] %v442_v43  ;;  %445 = vst [vmem:[%s9645_s27 + $0x160] sm:$0xff] %v444_v44  ;;  %v452_v48 = vld [vmem:[%s9637_s26 + $0x280] sm:$0xff]  ;;  %v454_v49 = vld [vmem:[%s9637_s26 + $0x288] sm:$0xff] }
  0x2a   : > { %447 = vst [vmem:[%s9645_s27 + $0x168] sm:$0xff] %v446_v45  ;;  %449 = vst [vmem:[%s9645_s27 + $0x170] sm:$0xff] %v448_v46  ;;  %v456_v50 = vld [vmem:[%s9637_s26 + $0x290] sm:$0xff]  ;;  %v458_v51 = vld [vmem:[%s9637_s26 + $0x298] sm:$0xff] }
  0x2b   : > { %451 = vst [vmem:[%s9645_s27 + $0x178] sm:$0xff] %v450_v47  ;;  %453 = vst [vmem:[%s9645_s27 + $0x180] sm:$0xff] %v452_v48  ;;  %v460_v52 = vld [vmem:[%s9637_s26 + $0x2a0] sm:$0xff]  ;;  %v462_v53 = vld [vmem:[%s9637_s26 + $0x2a8] sm:$0xff] }
  0x2c   : > { %455 = vst [vmem:[%s9645_s27 + $0x188] sm:$0xff] %v454_v49  ;;  %457 = vst [vmem:[%s9645_s27 + $0x190] sm:$0xff] %v456_v50  ;;  %v464_v54 = vld [vmem:[%s9637_s26 + $0x2b0] sm:$0xff]  ;;  %v466_v55 = vld [vmem:[%s9637_s26 + $0x2b8] sm:$0xff] }
  0x2d   : > { %459 = vst [vmem:[%s9645_s27 + $0x198] sm:$0xff] %v458_v51  ;;  %461 = vst [vmem:[%s9645_s27 + $0x1a0] sm:$0xff] %v460_v52  ;;  %v468_v56 = vld [vmem:[%s9637_s26 + $0x2c0] sm:$0xff]  ;;  %v470_v57 = vld [vmem:[%s9637_s26 + $0x2c8] sm:$0xff] }
  0x2e   : > { %463 = vst [vmem:[%s9645_s27 + $0x1a8] sm:$0xff] %v462_v53  ;;  %465 = vst [vmem:[%s9645_s27 + $0x1b0] sm:$0xff] %v464_v54  ;;  %v472_v58 = vld [vmem:[%s9637_s26 + $0x2d0] sm:$0xff]  ;;  %v474_v59 = vld [vmem:[%s9637_s26 + $0x2d8] sm:$0xff] }
  0x2f   : > { %467 = vst [vmem:[%s9645_s27 + $0x1b8] sm:$0xff] %v466_v55  ;;  %469 = vst [vmem:[%s9645_s27 + $0x1c0] sm:$0xff] %v468_v56  ;;  %v476_v60 = vld [vmem:[%s9637_s26 + $0x2e0] sm:$0xff]  ;;  %v478_v61 = vld [vmem:[%s9637_s26 + $0x2e8] sm:$0xff] }
  0x30   : > { %471 = vst [vmem:[%s9645_s27 + $0x1c8] sm:$0xff] %v470_v57  ;;  %473 = vst [vmem:[%s9645_s27 + $0x1d0] sm:$0xff] %v472_v58  ;;  %v480_v62 = vld [vmem:[%s9637_s26 + $0x2f0] sm:$0xff]  ;;  %v482_v63 = vld [vmem:[%s9637_s26 + $0x2f8] sm:$0xff] }
  0x31   : > { %475 = vst [vmem:[%s9645_s27 + $0x1d8] sm:$0xff] %v474_v59  ;;  %477 = vst [vmem:[%s9645_s27 + $0x1e0] sm:$0xff] %v476_v60  ;;  %v484_v0 = vld [vmem:[%s9637_s26 + $0x400] sm:$0xff]  ;;  %v486_v1 = vld [vmem:[%s9637_s26 + $0x408] sm:$0xff] }
  0x32   : > { %479 = vst [vmem:[%s9645_s27 + $0x1e8] sm:$0xff] %v478_v61  ;;  %481 = vst [vmem:[%s9645_s27 + $0x1f0] sm:$0xff] %v480_v62  ;;  %v488_v2 = vld [vmem:[%s9637_s26 + $0x410] sm:$0xff]  ;;  %v490_v3 = vld [vmem:[%s9637_s26 + $0x418] sm:$0xff] }
  0x33   : > { %483 = vst [vmem:[%s9645_s27 + $0x1f8] sm:$0xff] %v482_v63  ;;  %485 = vst [vmem:[%s9645_s27 + $0x200] sm:$0xff] %v484_v0  ;;  %v492_v4 = vld [vmem:[%s9637_s26 + $0x420] sm:$0xff]  ;;  %v494_v5 = vld [vmem:[%s9637_s26 + $0x428] sm:$0xff] }
  0x34   : > { %487 = vst [vmem:[%s9645_s27 + $0x208] sm:$0xff] %v486_v1  ;;  %489 = vst [vmem:[%s9645_s27 + $0x210] sm:$0xff] %v488_v2  ;;  %v496_v6 = vld [vmem:[%s9637_s26 + $0x430] sm:$0xff]  ;;  %v498_v7 = vld [vmem:[%s9637_s26 + $0x438] sm:$0xff] }
  0x35   : > { %491 = vst [vmem:[%s9645_s27 + $0x218] sm:$0xff] %v490_v3  ;;  %493 = vst [vmem:[%s9645_s27 + $0x220] sm:$0xff] %v492_v4  ;;  %v500_v8 = vld [vmem:[%s9637_s26 + $0x440] sm:$0xff]  ;;  %v502_v9 = vld [vmem:[%s9637_s26 + $0x448] sm:$0xff] }
  0x36   : > { %495 = vst [vmem:[%s9645_s27 + $0x228] sm:$0xff] %v494_v5  ;;  %497 = vst [vmem:[%s9645_s27 + $0x230] sm:$0xff] %v496_v6  ;;  %v504_v10 = vld [vmem:[%s9637_s26 + $0x450] sm:$0xff]  ;;  %v506_v11 = vld [vmem:[%s9637_s26 + $0x458] sm:$0xff] }
  0x37   : > { %499 = vst [vmem:[%s9645_s27 + $0x238] sm:$0xff] %v498_v7  ;;  %501 = vst [vmem:[%s9645_s27 + $0x240] sm:$0xff] %v500_v8  ;;  %v508_v12 = vld [vmem:[%s9637_s26 + $0x460] sm:$0xff]  ;;  %v510_v13 = vld [vmem:[%s9637_s26 + $0x468] sm:$0xff] }
  0x38   : > { %503 = vst [vmem:[%s9645_s27 + $0x248] sm:$0xff] %v502_v9  ;;  %505 = vst [vmem:[%s9645_s27 + $0x250] sm:$0xff] %v504_v10  ;;  %v512_v14 = vld [vmem:[%s9637_s26 + $0x470] sm:$0xff]  ;;  %v514_v15 = vld [vmem:[%s9637_s26 + $0x478] sm:$0xff] }
  0x39   : > { %507 = vst [vmem:[%s9645_s27 + $0x258] sm:$0xff] %v506_v11  ;;  %509 = vst [vmem:[%s9645_s27 + $0x260] sm:$0xff] %v508_v12  ;;  %v516_v16 = vld [vmem:[%s9637_s26 + $0x480] sm:$0xff]  ;;  %v518_v17 = vld [vmem:[%s9637_s26 + $0x488] sm:$0xff] }
  0x3a   : > { %511 = vst [vmem:[%s9645_s27 + $0x268] sm:$0xff] %v510_v13  ;;  %513 = vst [vmem:[%s9645_s27 + $0x270] sm:$0xff] %v512_v14  ;;  %v520_v18 = vld [vmem:[%s9637_s26 + $0x490] sm:$0xff]  ;;  %v522_v19 = vld [vmem:[%s9637_s26 + $0x498] sm:$0xff] }
  0x3b   : > { %515 = vst [vmem:[%s9645_s27 + $0x278] sm:$0xff] %v514_v15  ;;  %517 = vst [vmem:[%s9645_s27 + $0x280] sm:$0xff] %v516_v16  ;;  %v524_v20 = vld [vmem:[%s9637_s26 + $0x4a0] sm:$0xff]  ;;  %v526_v21 = vld [vmem:[%s9637_s26 + $0x4a8] sm:$0xff] }
  0x3c   : > { %519 = vst [vmem:[%s9645_s27 + $0x288] sm:$0xff] %v518_v17  ;;  %521 = vst [vmem:[%s9645_s27 + $0x290] sm:$0xff] %v520_v18  ;;  %v528_v22 = vld [vmem:[%s9637_s26 + $0x4b0] sm:$0xff]  ;;  %v530_v23 = vld [vmem:[%s9637_s26 + $0x4b8] sm:$0xff] }
  0x3d   : > { %523 = vst [vmem:[%s9645_s27 + $0x298] sm:$0xff] %v522_v19  ;;  %525 = vst [vmem:[%s9645_s27 + $0x2a0] sm:$0xff] %v524_v20  ;;  %v532_v24 = vld [vmem:[%s9637_s26 + $0x4c0] sm:$0xff]  ;;  %v534_v25 = vld [vmem:[%s9637_s26 + $0x4c8] sm:$0xff] }
  0x3e   : > { %527 = vst [vmem:[%s9645_s27 + $0x2a8] sm:$0xff] %v526_v21  ;;  %529 = vst [vmem:[%s9645_s27 + $0x2b0] sm:$0xff] %v528_v22  ;;  %v536_v26 = vld [vmem:[%s9637_s26 + $0x4d0] sm:$0xff]  ;;  %v538_v27 = vld [vmem:[%s9637_s26 + $0x4d8] sm:$0xff] }
  0x3f   : > { %531 = vst [vmem:[%s9645_s27 + $0x2b8] sm:$0xff] %v530_v23  ;;  %533 = vst [vmem:[%s9645_s27 + $0x2c0] sm:$0xff] %v532_v24  ;;  %v540_v28 = vld [vmem:[%s9637_s26 + $0x4e0] sm:$0xff]  ;;  %v542_v29 = vld [vmem:[%s9637_s26 + $0x4e8] sm:$0xff] }
  0x40   : > { %535 = vst [vmem:[%s9645_s27 + $0x2c8] sm:$0xff] %v534_v25  ;;  %537 = vst [vmem:[%s9645_s27 + $0x2d0] sm:$0xff] %v536_v26  ;;  %v544_v30 = vld [vmem:[%s9637_s26 + $0x4f0] sm:$0xff]  ;;  %v546_v31 = vld [vmem:[%s9637_s26 + $0x4f8] sm:$0xff] }
  0x41   : > { %539 = vst [vmem:[%s9645_s27 + $0x2d8] sm:$0xff] %v538_v27  ;;  %541 = vst [vmem:[%s9645_s27 + $0x2e0] sm:$0xff] %v540_v28 }
  0x42   : > { %543 = vst [vmem:[%s9645_s27 + $0x2e8] sm:$0xff] %v542_v29  ;;  %545 = vst [vmem:[%s9645_s27 + $0x2f0] sm:$0xff] %v544_v30 }
  0x43   : > { %547 = vst [vmem:[%s9645_s27 + $0x2f8] sm:$0xff] %v546_v31 }
  0x44 PF: > { %p6671_p7 = scmp.ge.s32.totalorder %s9575_s14, 1  ;;  %p552_p8 = scmp.lt.s32.totalorder %s9575_s14, 3 }
  0x46   : > { %p553_p9 = pnand %p6671_p7, %p552_p8 }
  0x48   : > { %556 = sbr.rel (%p553_p9) target bundleno = 2598 (0xa26), region = 66 }
  0x4d   : > { %v728_v32 = vld [vmem:[%s12644_s1 + $0x78] sm:$0xff]  ;;  %v727_v33 = vld [vmem:[%s12644_s1 + $0x70] sm:$0xff]  ;;  %s559_s5 = sand.u32 1, %s9567_s12   ;;  %v726_v34 = vld [vmem:[%s12644_s1 + $0x68] sm:$0xff]  ;;  %s7060_s17 = sshll.u32 (%p9627_p5), %s6665_s15, 8 }
  0x4e   : > { %7893 = vmatprep.subr.mxu0 %v728_v32  ;;  %s9270_s6 = smul.u32 768, %s559_s5  ;;  %v725_v35 = vld [vmem:[%s12644_s1 + $0x60] sm:$0xff]  ;;  %v724_v38 = vld [vmem:[%s12644_s1 + $0x58] sm:$0xff]  ;;  %v723_v40 = vld [vmem:[%s12644_s1 + $0x50] sm:$0xff]  ;;  %s6672_s30 = sshll.u32 %s559_s5, 9 }
  0x4f   : > { %7894 = vmatpush3.msra.mxu0 %v728_v32  ;;  %v722_v41 = vld [vmem:[%s12644_s1 + $0x48] sm:$0xff]  ;;  %v721_v42 = vld [vmem:[%s12644_s1 + $0x40] sm:$0xff]  ;;  %v720_v43 = vld [vmem:[%s12644_s1 + $0x38] sm:$0xff]  ;;  %s11852_s12 = scalar_lea.vmem [#allocation3], %s6672_s30  ;;  %s12506_s20 = scalar_lea.vmem (%p9627_p5), %s12646_s3, %s7060_s17 }
  0x50   : > { %7895 = vmatprep.subr.mxu0 %v727_v33  ;;  %s9850_s11 = scalar_lea.vmem [#allocation2], %s9270_s6  ;;  %v719_v44 = vld [vmem:[%s12644_s1 + $0x30] sm:$0xff]  ;;  %v718_v45 = vld [vmem:[%s12644_s1 + $0x28] sm:$0xff]  ;;  %v717_v46 = vld [vmem:[%s12644_s1 + $0x20] sm:$0xff] }
  0x51   : > { %7896 = vmatpush3.msra.mxu0 %v727_v33  ;;  %v583_v36 = vld [vmem:[%s9850_s11] sm:$0xff]  ;;  %v716_v47 = vld [vmem:[%s12644_s1 + $0x18] sm:$0xff]  ;;  %v715_v48 = vld [vmem:[%s12644_s1 + $0x10] sm:$0xff] }
  0x52   : > { %7897 = vmatprep.subr.mxu0 %v726_v34  ;;  %v9854_v37 = vld [vmem:[%s9850_s11 + $0x100] sm:$0xff]  ;;  %v714_v49 = vld [vmem:[%s12644_s1 + $0x8] sm:$0xff]  ;;  %v585_v52 = vld [vmem:[%s9850_s11 + $0x10] sm:$0xff] }
  0x53   : > { %7898 = vmatpush3.msra.mxu0 %v726_v34  ;;  %v681_v39 = vmul.f32 %v9854_v37, %v583_v36  ;;  %v584_v50 = vld [vmem:[%s9850_s11 + $0x8] sm:$0xff]  ;;  %v9896_v53 = vld [vmem:[%s9850_s11 + $0x110] sm:$0xff]  ;;  %v713_v54 = vld [vmem:[%s12644_s1] sm:$0xff] }
  0x54   : > { %7899 = vmatprep.subr.mxu0 %v725_v35  ;;  %v9892_v51 = vld [vmem:[%s9850_s11 + $0x108] sm:$0xff]  ;;  %v6753_v56 = vld [vmem:[%s12644_s1 + $0xf8] sm:$0xff]  ;;  %v6752_v57 = vld [vmem:[%s12644_s1 + $0xf0] sm:$0xff]  ;;  %v683_v58 = vmul.f32 %v9896_v53, %v585_v52 }
  0x55   : > { %7900 = vmatpush3.msra.mxu0 %v725_v35  ;;  %7925 = vmatprep.mubr.f32.mxu0 %v681_v39  ;;  %v682_v55 = vmul.f32 %v9892_v51, %v584_v50  ;;  %v586_v59 = vld [vmem:[%s9850_s11 + $0x18] sm:$0xff]  ;;  %v587_v61 = vld [vmem:[%s9850_s11 + $0x20] sm:$0xff]  ;;  %v6751_v63 = vld [vmem:[%s12644_s1 + $0xe8] sm:$0xff] }
  0x56   : > { %7901 = vmatprep.subr.mxu0 %v724_v38  ;;  %v9911_v60 = vld [vmem:[%s9850_s11 + $0x118] sm:$0xff]  ;;  %8021 = vmatprep.subr.mxu1 %v6753_v56  ;;  %v9915_v62 = vld [vmem:[%s9850_s11 + $0x120] sm:$0xff]  ;;  %v588_v3 = vld [vmem:[%s9850_s11 + $0x28] sm:$0xff] }
  0x57   : > { %7902 = vmatpush3.msra.mxu0 %v724_v38  ;;  %8022 = vmatpush3.msra.mxu1 %v6753_v56  ;;  %v684_v0 = vmul.f32 %v9911_v60, %v586_v59  ;;  %v6750_v1 = vld [vmem:[%s12644_s1 + $0xe0] sm:$0xff]  ;;  %v685_v2 = vmul.f32 %v9915_v62, %v587_v61  ;;  %v9927_v4 = vld [vmem:[%s9850_s11 + $0x128] sm:$0xff]  ;;  %v589_v5 = vld [vmem:[%s9850_s11 + $0x30] sm:$0xff] }
  0x58   : > { %7903 = vmatprep.subr.mxu0 %v723_v40  ;;  %8023 = vmatprep.subr.mxu1 %v6752_v57  ;;  %v9931_v6 = vld [vmem:[%s9850_s11 + $0x130] sm:$0xff]  ;;  %v6749_v7 = vld [vmem:[%s12644_s1 + $0xd8] sm:$0xff]  ;;  %v686_v8 = vmul.f32 %v9927_v4, %v588_v3  ;;  %v591_v13 = vld [vmem:[%s9850_s11 + $0x40] sm:$0xff] }
  0x59   : > { %7904 = vmatpush3.msra.mxu0 %v723_v40  ;;  %8024 = vmatpush3.msra.mxu1 %v6752_v57  ;;  %v6748_v9 = vld [vmem:[%s12644_s1 + $0xd0] sm:$0xff]  ;;  %v687_v10 = vmul.f32 %v9931_v6, %v589_v5  ;;  %v590_v11 = vld [vmem:[%s9850_s11 + $0x38] sm:$0xff]  ;;  %v9947_v14 = vld [vmem:[%s9850_s11 + $0x140] sm:$0xff] }
  0x5a   : > { %7905 = vmatprep.subr.mxu0 %v722_v41  ;;  %8025 = vmatprep.subr.mxu1 %v6751_v63  ;;  %v9943_v12 = vld [vmem:[%s9850_s11 + $0x138] sm:$0xff]  ;;  %v6747_v15 = vld [vmem:[%s12644_s1 + $0xc8] sm:$0xff]  ;;  %v6746_v17 = vld [vmem:[%s12644_s1 + $0xc0] sm:$0xff]  ;;  %v689_v18 = vmul.f32 %v9947_v14, %v591_v13 }
  0x5b   : > { %7906 = vmatpush3.msra.mxu0 %v722_v41  ;;  %8026 = vmatpush3.msra.mxu1 %v6751_v63  ;;  %v688_v16 = vmul.f32 %v9943_v12, %v590_v11  ;;  %v592_v19 = vld [vmem:[%s9850_s11 + $0x48] sm:$0xff]  ;;  %v593_v21 = vld [vmem:[%s9850_s11 + $0x50] sm:$0xff]  ;;  %v6745_v23 = vld [vmem:[%s12644_s1 + $0xb8] sm:$0xff] }
  0x5c   : > { %7907 = vmatprep.subr.mxu0 %v721_v42  ;;  %8027 = vmatprep.subr.mxu1 %v6750_v1  ;;  %v9959_v20 = vld [vmem:[%s9850_s11 + $0x148] sm:$0xff]  ;;  %v9963_v22 = vld [vmem:[%s9850_s11 + $0x150] sm:$0xff]  ;;  %v594_v27 = vld [vmem:[%s9850_s11 + $0x58] sm:$0xff] }
  0x5d   : > { %7908 = vmatpush3.msra.mxu0 %v721_v42  ;;  %8028 = vmatpush3.msra.mxu1 %v6750_v1  ;;  %v690_v24 = vmul.f32 %v9959_v20, %v592_v19  ;;  %v6744_v25 = vld [vmem:[%s12644_s1 + $0xb0] sm:$0xff]  ;;  %v691_v26 = vmul.f32 %v9963_v22, %v593_v21  ;;  %v9975_v28 = vld [vmem:[%s9850_s11 + $0x158] sm:$0xff]  ;;  %v595_v29 = vld [vmem:[%s9850_s11 + $0x60] sm:$0xff] }
  0x5e   : > { %7909 = vmatprep.subr.mxu0 %v720_v43  ;;  %8029 = vmatprep.subr.mxu1 %v6749_v7  ;;  %v9979_v30 = vld [vmem:[%s9850_s11 + $0x160] sm:$0xff]  ;;  %v6743_v31 = vld [vmem:[%s12644_s1 + $0xa8] sm:$0xff]  ;;  %v692_v32 = vmul.f32 %v9975_v28, %v594_v27  ;;  %v597_v38 = vld [vmem:[%s9850_s11 + $0x70] sm:$0xff] }
  0x5f   : > { %7910 = vmatpush3.msra.mxu0 %v720_v43  ;;  %8030 = vmatpush3.msra.mxu1 %v6749_v7  ;;  %v6742_v33 = vld [vmem:[%s12644_s1 + $0xa0] sm:$0xff]  ;;  %v693_v34 = vmul.f32 %v9979_v30, %v595_v29  ;;  %v596_v35 = vld [vmem:[%s9850_s11 + $0x68] sm:$0xff]  ;;  %v9995_v39 = vld [vmem:[%s9850_s11 + $0x170] sm:$0xff] }
  0x60   : > { %7911 = vmatprep.subr.mxu0 %v719_v44  ;;  %8031 = vmatprep.subr.mxu1 %v6748_v9  ;;  %v9991_v36 = vld [vmem:[%s9850_s11 + $0x168] sm:$0xff]  ;;  %v695_v41 = vmul.f32 %v9995_v39, %v597_v38  ;;  %v598_v42 = vld [vmem:[%s9850_s11 + $0x78] sm:$0xff]  ;;  %v601_v50 = vld [vmem:[%s9850_s11 + $0x90] sm:$0xff] }
  0x61   : > { %7912 = vmatpush3.msra.mxu0 %v719_v44  ;;  %8032 = vmatpush3.msra.mxu1 %v6748_v9  ;;  %v694_v40 = vmul.f32 %v9991_v36, %v596_v35  ;;  %v10001_v43 = vld [vmem:[%s9850_s11 + $0x178] sm:$0xff]  ;;  %v599_v44 = vld [vmem:[%s9850_s11 + $0x80] sm:$0xff]  ;;  %v10015_v52 = vld [vmem:[%s9850_s11 + $0x190] sm:$0xff] }
  0x62   : > { %7913 = vmatprep.subr.mxu0 %v718_v45  ;;  %8033 = vmatprep.subr.mxu1 %v6747_v15  ;;  %v602_v56 = vld [vmem:[%s9850_s11 + $0x98] sm:$0xff]  ;;  %v10025_v59 = vld [vmem:[%s9850_s11 + $0x1a0] sm:$0xff]  ;;  %v10031_v1 = vld [vmem:[%s9850_s11 + $0x1a8] sm:$0xff] }
  0x63   : > { %7914 = vmatpush3.msra.mxu0 %v718_v45  ;;  %8034 = vmatpush3.msra.mxu1 %v6747_v15  ;;  %v10005_v45 = vld [vmem:[%s9850_s11 + $0x180] sm:$0xff]  ;;  %v10021_v57 = vld [vmem:[%s9850_s11 + $0x198] sm:$0xff]  ;;  %v10035_v3 = vld [vmem:[%s9850_s11 + $0x1b0] sm:$0xff] }
  0x64   : > { %7915 = vmatprep.subr.mxu0 %v717_v46  ;;  %8035 = vmatprep.subr.mxu1 %v6746_v17  ;;  %v700_v61 = vmul.f32 %v10021_v57, %v602_v56  ;;  %v10041_v9 = vld [vmem:[%s9850_s11 + $0x1b8] sm:$0xff]  ;;  %v10045_v11 = vld [vmem:[%s9850_s11 + $0x1c0] sm:$0xff]  ;;  %v10055_v19 = vld [vmem:[%s9850_s11 + $0x1d0] sm:$0xff] }
  0x65   : > { %7916 = vmatpush3.msra.mxu0 %v717_v46  ;;  %8036 = vmatpush3.msra.mxu1 %v6746_v17  ;;  %v696_v46 = vmul.f32 %v10001_v43, %v598_v42  ;;  %v10051_v17 = vld [vmem:[%s9850_s11 + $0x1c8] sm:$0xff]  ;;  %v6701_v27 = vld [vmem:[%s9850_s11 + $0x1e0] sm:$0xff]  ;;  %v6703_v35 = vld [vmem:[%s9850_s11 + $0x1f0] sm:$0xff] }
  0x66   : > { %7917 = vmatprep.subr.mxu0 %v716_v47  ;;  %8037 = vmatprep.subr.mxu1 %v6745_v23  ;;  %v6704_v42 = vld [vmem:[%s9850_s11 + $0x1f8] sm:$0xff] }
  0x67   : > { %7918 = vmatpush3.msra.mxu0 %v716_v47  ;;  %8038 = vmatpush3.msra.mxu1 %v6745_v23  ;;  %v697_v47 = vmul.f32 %v10005_v45, %v599_v44 }
  0x68   : > { %7919 = vmatprep.subr.mxu0 %v715_v48  ;;  %8039 = vmatprep.subr.mxu1 %v6744_v25 }
  0x69   : > { %7920 = vmatpush3.msra.mxu0 %v715_v48  ;;  %8040 = vmatpush3.msra.mxu1 %v6744_v25  ;;  %v600_v48 = vld [vmem:[%s9850_s11 + $0x88] sm:$0xff]  ;;  %v6700_v25 = vld [vmem:[%s9850_s11 + $0x1d8] sm:$0xff] }
  0x6a   : > { %7921 = vmatprep.subr.mxu0 %v714_v49  ;;  %8041 = vmatprep.subr.mxu1 %v6743_v31 }
  0x6b   : > { %7922 = vmatpush3.msra.mxu0 %v714_v49  ;;  %8042 = vmatpush3.msra.mxu1 %v6743_v31  ;;  %v10011_v49 = vld [vmem:[%s9850_s11 + $0x188] sm:$0xff] }
  0x6c   : > { %7923 = vmatprep.subr.mxu0 %v713_v54  ;;  %8043 = vmatprep.subr.mxu1 %v6742_v33 }
  0x6d   : > { %7924 = vmatpush3.msra.mxu0 %v713_v54  ;;  %8044 = vmatpush3.msra.mxu1 %v6742_v33  ;;  %v698_v54 = vmul.f32 %v10011_v49, %v600_v48  ;;  %v6702_v33 = vld [vmem:[%s9850_s11 + $0x1e8] sm:$0xff]  ;;  %v6769_v48 = vld [vmem:[%s12644_s1 + $0x170] sm:$0xff] }
  0x6e   : > { %7926 = vmatmul.mubr.f32.vlgmr.msra.gmra.mxu0 %v682_v55  ;;  %v699_v55 = vmul.f32 %v10015_v52, %v601_v50 }
  0x6f   : > { %7928 = vmatprep.mubr.f32.mxu0 %v683_v58  ;;  %v603_v58 = vld [vmem:[%s9850_s11 + $0xa0] sm:$0xff] }
  0x70   : > { %v701_v63 = vmul.f32 %v10025_v59, %v603_v58 }
  0x72   : > { %7929 = vmatmul.mubr.f32.gmra.mxu0 %v684_v0  ;;  %v604_v0 = vld [vmem:[%s9850_s11 + $0xa8] sm:$0xff] }
  0x73   : > { %7931 = vmatprep.mubr.f32.mxu0 %v685_v2  ;;  %v605_v2 = vld [vmem:[%s9850_s11 + $0xb0] sm:$0xff]  ;;  %v702_v5 = vmul.f32 %v10031_v1, %v604_v0  ;;  %v6782_v0 = vld [vmem:[%s12644_s1 + $0x1d8] sm:$0xff] }
  0x74   : > { %v703_v7 = vmul.f32 %v10035_v3, %v605_v2 }
  0x76   : > { %7932 = vmatmul.mubr.f32.gmra.mxu0 %v686_v8  ;;  %v606_v8 = vld [vmem:[%s9850_s11 + $0xb8] sm:$0xff] }
  0x77   : > { %7934 = vmatprep.mubr.f32.mxu0 %v687_v10  ;;  %v607_v10 = vld [vmem:[%s9850_s11 + $0xc0] sm:$0xff]  ;;  %v704_v13 = vmul.f32 %v10041_v9, %v606_v8  ;;  %v6781_v8 = vld [vmem:[%s12644_s1 + $0x1d0] sm:$0xff] }
  0x78   : > { %v705_v15 = vmul.f32 %v10045_v11, %v607_v10  ;;  %v6765_v10 = vld [vmem:[%s12644_s1 + $0x150] sm:$0xff] }
  0x7a   : > { %7935 = vmatmul.mubr.f32.gmra.mxu0 %v688_v16  ;;  %v608_v16 = vld [vmem:[%s9850_s11 + $0xc8] sm:$0xff] }
  0x7b   : > { %7937 = vmatprep.mubr.f32.mxu0 %v689_v18  ;;  %v609_v18 = vld [vmem:[%s9850_s11 + $0xd0] sm:$0xff]  ;;  %v706_v21 = vmul.f32 %v10051_v17, %v608_v16 }
  0x7c   : > { %v707_v23 = vmul.f32 %v10055_v19, %v609_v18 }
  0x7e   : > { %7938 = vmatmul.mubr.f32.gmra.mxu0 %v690_v24  ;;  %v610_v24 = vld [vmem:[%s9850_s11 + $0xd8] sm:$0xff] }
  0x7f   : > { %7940 = vmatprep.mubr.f32.mxu0 %v691_v26  ;;  %v611_v26 = vld [vmem:[%s9850_s11 + $0xe0] sm:$0xff]  ;;  %v708_v29 = vmul.f32 %v6700_v25, %v610_v24 }
  0x80   : > { %v709_v31 = vmul.f32 %v6701_v27, %v611_v26  ;;  %v6763_v24 = vld [vmem:[%s12644_s1 + $0x140] sm:$0xff] }
  0x82   : > { %7941 = vmatmul.mubr.f32.gmra.mxu0 %v692_v32  ;;  %v612_v32 = vld [vmem:[%s9850_s11 + $0xe8] sm:$0xff] }
  0x83   : > { %7943 = vmatprep.mubr.f32.mxu0 %v693_v34  ;;  %v613_v34 = vld [vmem:[%s9850_s11 + $0xf0] sm:$0xff]  ;;  %v710_v38 = vmul.f32 %v6702_v33, %v612_v32  ;;  %v6762_v32 = vld [vmem:[%s12644_s1 + $0x138] sm:$0xff] }
  0x86   : > { %7944 = vmatmul.mubr.f32.gmra.mxu0 %v694_v40  ;;  %v711_v40 = vmul.f32 %v6703_v35, %v613_v34 }
  0x87   : > { %7946 = vmatprep.mubr.f32.mxu0 %v695_v41  ;;  %v614_v41 = vld [vmem:[%s9850_s11 + $0xf8] sm:$0xff] }
  0x88   : > { %v712_v44 = vmul.f32 %v6704_v42, %v614_v41 }
  0x8a   : > { %7947 = vmatmul.mubr.f32.gmra.mxu0 %v696_v46  ;;  %v6741_v46 = vld [vmem:[%s12644_s1 + $0x98] sm:$0xff] }
  0x8b   : > { %7949 = vmatprep.mubr.f32.mxu0 %v697_v47  ;;  %8045 = vmatprep.subr.mxu1 %v6741_v46  ;;  %v6740_v47 = vld [vmem:[%s12644_s1 + $0x90] sm:$0xff] }
  0x8c   : > { %8046 = vmatpush3.msra.mxu1 %v6741_v46 }
  0x8d   : > { %8047 = vmatprep.subr.mxu1 %v6740_v47 }
  0x8e   : > { %7950 = vmatmul.mubr.f32.gmra.mxu0 %v698_v54  ;;  %8048 = vmatpush3.msra.mxu1 %v6740_v47 }
  0x8f   : > { %7952 = vmatprep.mubr.f32.mxu0 %v699_v55 }
  0x92   : > { %7953 = vmatmul.mubr.f32.gmra.mxu0 %v700_v61 }
  0x93   : > { %7955 = vmatprep.mubr.f32.mxu0 %v701_v63 }
  0x96   : > { %7956 = vmatmul.mubr.f32.gmra.mxu0 %v702_v5  ;;  %v6766_v5 = vld [vmem:[%s12644_s1 + $0x158] sm:$0xff] }
  0x97   : > { %7958 = vmatprep.mubr.f32.mxu0 %v703_v7 }
  0x9a   : > { %7959 = vmatmul.mubr.f32.gmra.mxu0 %v704_v13 }
  0x9b   : > { %7961 = vmatprep.mubr.f32.mxu0 %v705_v15 }
  0x9e   : > { %7962 = vmatmul.mubr.f32.gmra.mxu0 %v706_v21 }
  0x9f   : > { %7964 = vmatprep.mubr.f32.mxu0 %v707_v23 }
  0xa2   : > { %7965 = vmatmul.mubr.f32.gmra.mxu0 %v708_v29  ;;  %v6779_v29 = vld [vmem:[%s12644_s1 + $0x1c0] sm:$0xff] }
  0xa3   : > { %7967 = vmatprep.mubr.f32.mxu0 %v709_v31 }
  0xa6   : > { %7968 = vmatmul.mubr.f32.gmra.mxu0 %v710_v38 }
  0xa7   : > { %7970 = vmatprep.mubr.f32.mxu0 %v711_v40 }
  0xaa   : > { %7971 = vmatmul.mubr.f32.gmra.mxu0 %v712_v44  ;;  %v6760_v44 = vld [vmem:[%s12644_s1 + $0x128] sm:$0xff] }
  0xab   : > { %7973 = vmatprep.mubr.f32.mxu0 %v9854_v37  ;;  %v6739_v37 = vld [vmem:[%s12644_s1 + $0x88] sm:$0xff] }
  0xac   : > { %8049 = vmatprep.subr.mxu1 %v6739_v37 }
  0xad   : > { %8050 = vmatpush3.msra.mxu1 %v6739_v37  ;;  %v6759_v37 = vld [vmem:[%s12644_s1 + $0x120] sm:$0xff] }
  0xae   : > { %7974 = vmatmul.mubr.f32.gmra.mxu0 %v9892_v51  ;;  %v6738_v51 = vld [vmem:[%s12644_s1 + $0x80] sm:$0xff] }
  0xaf   : > { %7976 = vmatprep.mubr.f32.mxu0 %v9896_v53  ;;  %8051 = vmatprep.subr.mxu1 %v6738_v51  ;;  %v10111_v53 = vld [vmem:[%s12645_s2] ss:$0 sm:$0xff] }
  0xb0   : > { %8052 = vmatpush3.msra.mxu1 %v6738_v51 }
  0xb2   : > { %7977 = vmatmul.mubr.f32.gmra.mxu0 %v9911_v60 }
  0xb3   : > { %7979 = vmatprep.mubr.f32.mxu0 %v9915_v62 }
  0xb6   : > { %7980 = vmatmul.mubr.f32.gmra.mxu0 %v9927_v4 }
  0xb7   : > { %7982 = vmatprep.mubr.f32.mxu0 %v9931_v6 }
  0xba   : > { %7983 = vmatmul.mubr.f32.gmra.mxu0 %v9943_v12 }
  0xbb   : > { %7985 = vmatprep.mubr.f32.mxu0 %v9947_v14  ;;  %v6786_v14 = vld [vmem:[%s12644_s1 + $0x1f8] sm:$0xff] }
  0xbc   : > { %8149 = vmatprep.subr.mxu0 %v6786_v14 }
  0xbd   : > { %8150 = vmatpush3.msra.mxu0 %v6786_v14 }
  0xbe   : > { %7986 = vmatmul.mubr.f32.gmra.mxu0 %v9959_v20  ;;  %v6770_v20 = vld [vmem:[%s12644_s1 + $0x178] sm:$0xff] }
  0xbf   : > { %7988 = vmatprep.mubr.f32.mxu0 %v9963_v22  ;;  %v6785_v22 = vld [vmem:[%s12644_s1 + $0x1f0] sm:$0xff]  ;;  %8229 = vmatprep.subr.mxu1 %v6770_v20 }
  0xc0   : > { %8151 = vmatprep.subr.mxu0 %v6785_v22 }
  0xc1   : > { %8152 = vmatpush3.msra.mxu0 %v6785_v22 }
  0xc2   : > { %7989 = vmatmul.mubr.f32.gmra.mxu0 %v9975_v28 }
  0xc3   : > { %7991 = vmatprep.mubr.f32.mxu0 %v9979_v30 }
  0xc6   : > { %7992 = vmatmul.mubr.f32.gmra.mxu0 %v9991_v36 }
  0xc7   : > { %7994 = vmatprep.mubr.f32.mxu0 %v9995_v39 }
  0xca   : > { %7995 = vmatmul.mubr.f32.gmra.mxu0 %v10001_v43  ;;  %v6784_v43 = vld [vmem:[%s12644_s1 + $0x1e8] sm:$0xff] }
  0xcb   : > { %7997 = vmatprep.mubr.f32.mxu0 %v10005_v45  ;;  %8153 = vmatprep.subr.mxu0 %v6784_v43 }
  0xcc   : > { %8154 = vmatpush3.msra.mxu0 %v6784_v43 }
  0xce   : > { %7998 = vmatmul.mubr.f32.gmra.mxu0 %v10011_v49 }
  0xcf   : > { %8000 = vmatprep.mubr.f32.mxu0 %v10015_v52  ;;  %v6768_v52 = vld [vmem:[%s12644_s1 + $0x168] sm:$0xff] }
  0xd2   : > { %8001 = vmatmul.mubr.f32.gmra.mxu0 %v10021_v57  ;;  %v6783_v57 = vld [vmem:[%s12644_s1 + $0x1e0] sm:$0xff] }
  0xd3   : > { %8003 = vmatprep.mubr.f32.mxu0 %v10025_v59  ;;  %v6767_v59 = vld [vmem:[%s12644_s1 + $0x160] sm:$0xff]  ;;  %8155 = vmatprep.subr.mxu0 %v6783_v57 }
  0xd4   : > { %8156 = vmatpush3.msra.mxu0 %v6783_v57 }
  0xd5   : > { %8157 = vmatprep.subr.mxu0 %v6782_v0 }
  0xd6   : > { %8004 = vmatmul.mubr.f32.gmra.mxu0 %v10031_v1 }
  0xd7   : > { %8006 = vmatprep.mubr.f32.mxu0 %v10035_v3  ;;  %8158 = vmatpush3.msra.mxu0 %v6782_v0 }
  0xd8   : > { %8159 = vmatprep.subr.mxu0 %v6781_v8 }
  0xd9   : > { %8160 = vmatpush3.msra.mxu0 %v6781_v8 }
  0xda   : > { %8007 = vmatmul.mubr.f32.gmra.mxu0 %v10041_v9 }
  0xdb   : > { %8009 = vmatprep.mubr.f32.mxu0 %v10045_v11 }
  0xde   : > { %8010 = vmatmul.mubr.f32.gmra.mxu0 %v10051_v17  ;;  %v6780_v17 = vld [vmem:[%s12644_s1 + $0x1c8] sm:$0xff] }
  0xdf   : > { %8012 = vmatprep.mubr.f32.mxu0 %v10055_v19  ;;  %v6764_v19 = vld [vmem:[%s12644_s1 + $0x148] sm:$0xff]  ;;  %8161 = vmatprep.subr.mxu0 %v6780_v17 }
  0xe0   : > { %8162 = vmatpush3.msra.mxu0 %v6780_v17 }
  0xe1   : > { %8163 = vmatprep.subr.mxu0 %v6779_v29 }
  0xe2   : > { %8013 = vmatmul.mubr.f32.gmra.mxu0 %v6700_v25 }
  0xe3   : > { %8015 = vmatprep.mubr.f32.mxu0 %v6701_v27  ;;  %8164 = vmatpush3.msra.mxu0 %v6779_v29 }
  0xe6   : > { %8016 = vmatmul.mubr.f32.gmra.mxu0 %v6702_v33 }
  0xe7   : > { %8018 = vmatprep.mubr.f32.mxu0 %v6703_v35  ;;  %v6761_v35 = vld [vmem:[%s12644_s1 + $0x130] sm:$0xff] }
  0xea   : > { %8019 = vmatmul.mubr.f32.gmra.mxu0 %v6704_v42 }
 0x12e   : > { %v7927_v60 = vpop.f32.mrf.mxu0 }
 0x12f   : > { %v806_v62 = vadd.f32 %v7927_v60, %v10111_v53 }
 0x130   : > { %v800_v4 = vpop.f32.mrf.mxu0 }
 0x131   : > { %v801_v6 = vadd.f32 %v10111_v53, %v800_v4  ;;  %v1120_v30 = vmax.f32 %v806_v62, 0.0 }
 0x132   : > { %v7930_v12 = vpop.f32.mrf.mxu0 }
 0x133   : > { %v1119_v28 = vmax.f32 %v801_v6, 0.0  ;;  %v816_v36 = vadd.f32 %v7930_v12, %v10111_v53  ;;  %v6758_v6 = vld [vmem:[%s12644_s1 + $0x118] sm:$0xff] }
 0x134   : > { %v810_v39 = vpop.f32.mrf.mxu0 }
 0x135   : > { %v811_v45 = vadd.f32 %v10111_v53, %v810_v39  ;;  %8053 = vmatprep.mubr.f32.mxu1 %v1119_v28  ;;  %v1122_v54 = vmax.f32 %v816_v36, 0.0 }
 0x136   : > { %v7933_v49 = vpop.f32.mrf.mxu0  ;;  %8054 = vmatmul.mubr.f32.vlgmr.msra.gmra.mxu1 %v1120_v30 }
 0x137   : > { %v1121_v50 = vmax.f32 %v811_v45, 0.0  ;;  %8230 = vmatpush3.msra.mxu1 %v6770_v20  ;;  %v826_v55 = vadd.f32 %v7933_v49, %v10111_v53 }
 0x138   : > { %v820_v56 = vpop.f32.mrf.mxu0  ;;  %8231 = vmatprep.subr.mxu1 %v6769_v48 }
 0x139   : > { %v821_v58 = vadd.f32 %v10111_v53, %v820_v56  ;;  %8056 = vmatprep.mubr.f32.mxu1 %v1121_v50  ;;  %8232 = vmatpush3.msra.mxu1 %v6769_v48  ;;  %v1124_v1 = vmax.f32 %v826_v55, 0.0 }
 0x13a   : > { %v7936_v61 = vpop.f32.mrf.mxu0  ;;  %8057 = vmatmul.mubr.f32.gmra.mxu1 %v1122_v54  ;;  %8233 = vmatprep.subr.mxu1 %v6768_v52 }
 0x13b   : > { %v1123_v63 = vmax.f32 %v821_v58, 0.0  ;;  %8234 = vmatpush3.msra.mxu1 %v6768_v52  ;;  %v836_v2 = vadd.f32 %v7936_v61, %v10111_v53 }
 0x13c   : > { %v830_v3 = vpop.f32.mrf.mxu0  ;;  %8235 = vmatprep.subr.mxu1 %v6767_v59 }
 0x13d   : > { %v831_v7 = vadd.f32 %v10111_v53, %v830_v3  ;;  %8059 = vmatprep.mubr.f32.mxu1 %v1123_v63  ;;  %8236 = vmatpush3.msra.mxu1 %v6767_v59  ;;  %v1126_v13 = vmax.f32 %v836_v2, 0.0 }
 0x13e   : > { %v7939_v9 = vpop.f32.mrf.mxu0  ;;  %8060 = vmatmul.mubr.f32.gmra.mxu1 %v1124_v1  ;;  %8237 = vmatprep.subr.mxu1 %v6766_v5 }
 0x13f   : > { %v1125_v11 = vmax.f32 %v831_v7, 0.0  ;;  %v846_v15 = vadd.f32 %v7939_v9, %v10111_v53  ;;  %8238 = vmatpush3.msra.mxu1 %v6766_v5 }
 0x140   : > { %v840_v16 = vpop.f32.mrf.mxu0  ;;  %8239 = vmatprep.subr.mxu1 %v6765_v10 }
 0x141   : > { %v841_v18 = vadd.f32 %v10111_v53, %v840_v16  ;;  %8062 = vmatprep.mubr.f32.mxu1 %v1125_v11  ;;  %8240 = vmatpush3.msra.mxu1 %v6765_v10  ;;  %v1128_v25 = vmax.f32 %v846_v15, 0.0 }
 0x142   : > { %v7942_v21 = vpop.f32.mrf.mxu0  ;;  %8063 = vmatmul.mubr.f32.gmra.mxu1 %v1126_v13  ;;  %8241 = vmatprep.subr.mxu1 %v6764_v19 }
 0x143   : > { %v1127_v23 = vmax.f32 %v841_v18, 0.0  ;;  %v856_v26 = vadd.f32 %v7942_v21, %v10111_v53  ;;  %8242 = vmatpush3.msra.mxu1 %v6764_v19 }
 0x144   : > { %v850_v27 = vpop.f32.mrf.mxu0  ;;  %8243 = vmatprep.subr.mxu1 %v6763_v24 }
 0x145   : > { %v851_v31 = vadd.f32 %v10111_v53, %v850_v27  ;;  %8065 = vmatprep.mubr.f32.mxu1 %v1127_v23  ;;  %8244 = vmatpush3.msra.mxu1 %v6763_v24  ;;  %v1130_v38 = vmax.f32 %v856_v26, 0.0 }
 0x146   : > { %v7945_v33 = vpop.f32.mrf.mxu0  ;;  %8066 = vmatmul.mubr.f32.gmra.mxu1 %v1128_v25  ;;  %8245 = vmatprep.subr.mxu1 %v6762_v32 }
 0x147   : > { %v1129_v34 = vmax.f32 %v851_v31, 0.0  ;;  %v866_v40 = vadd.f32 %v7945_v33, %v10111_v53  ;;  %8246 = vmatpush3.msra.mxu1 %v6762_v32 }
 0x148   : > { %v860_v41 = vpop.f32.mrf.mxu0  ;;  %8247 = vmatprep.subr.mxu1 %v6761_v35 }
 0x149   : > { %v861_v42 = vadd.f32 %v10111_v53, %v860_v41  ;;  %8068 = vmatprep.mubr.f32.mxu1 %v1129_v34  ;;  %8248 = vmatpush3.msra.mxu1 %v6761_v35  ;;  %v1132_v51 = vmax.f32 %v866_v40, 0.0 }
 0x14a   : > { %v7948_v46 = vpop.f32.mrf.mxu0  ;;  %8069 = vmatmul.mubr.f32.gmra.mxu1 %v1130_v38  ;;  %8249 = vmatprep.subr.mxu1 %v6760_v44 }
 0x14b   : > { %v1131_v47 = vmax.f32 %v861_v42, 0.0  ;;  %v876_v60 = vadd.f32 %v7948_v46, %v10111_v53  ;;  %8250 = vmatpush3.msra.mxu1 %v6760_v44 }
 0x14c   : > { %v870_v62 = vpop.f32.mrf.mxu0  ;;  %8251 = vmatprep.subr.mxu1 %v6759_v37 }
 0x14d   : > { %v871_v4 = vadd.f32 %v10111_v53, %v870_v62  ;;  %8071 = vmatprep.mubr.f32.mxu1 %v1131_v47  ;;  %8252 = vmatpush3.msra.mxu1 %v6759_v37  ;;  %v1134_v20 = vmax.f32 %v876_v60, 0.0  ;;  %v6757_v62 = vld [vmem:[%s12644_s1 + $0x110] sm:$0xff] }
 0x14e   : > { %v7951_v12 = vpop.f32.mrf.mxu0  ;;  %8072 = vmatmul.mubr.f32.gmra.mxu1 %v1132_v51  ;;  %8253 = vmatprep.subr.mxu1 %v6758_v6 }
 0x14f   : > { %v1133_v14 = vmax.f32 %v871_v4, 0.0  ;;  %v886_v22 = vadd.f32 %v7951_v12, %v10111_v53  ;;  %8254 = vmatpush3.msra.mxu1 %v6758_v6  ;;  %v6756_v12 = vld [vmem:[%s12644_s1 + $0x108] sm:$0xff] }
 0x150   : > { %v880_v28 = vpop.f32.mrf.mxu0  ;;  %8255 = vmatprep.subr.mxu1 %v6757_v62 }
 0x151   : > { %v881_v30 = vadd.f32 %v10111_v53, %v880_v28  ;;  %8074 = vmatprep.mubr.f32.mxu1 %v1133_v14  ;;  %v1136_v43 = vmax.f32 %v886_v22, 0.0  ;;  %8256 = vmatpush3.msra.mxu1 %v6757_v62  ;;  %v6774_v62 = vld [vmem:[%s12644_s1 + $0x198] sm:$0xff] }
 0x152   : > { %v7954_v36 = vpop.f32.mrf.mxu0  ;;  %8075 = vmatmul.mubr.f32.gmra.mxu1 %v1134_v20  ;;  %8257 = vmatprep.subr.mxu1 %v6756_v12 }
 0x153   : > { %v1135_v39 = vmax.f32 %v881_v30, 0.0  ;;  %v896_v45 = vadd.f32 %v7954_v36, %v10111_v53  ;;  %8258 = vmatpush3.msra.mxu1 %v6756_v12  ;;  %v6755_v30 = vld [vmem:[%s12644_s1 + $0x100] sm:$0xff] }
 0x154   : > { %v890_v48 = vpop.f32.mrf.mxu0  ;;  %8259 = vmatprep.subr.mxu1 %v6755_v30 }
 0x155   : > { %v891_v49 = vadd.f32 %v10111_v53, %v890_v48  ;;  %8077 = vmatprep.mubr.f32.mxu1 %v1135_v39  ;;  %v1138_v54 = vmax.f32 %v896_v45, 0.0  ;;  %8260 = vmatpush3.msra.mxu1 %v6755_v30 }
 0x156   : > { %v7957_v50 = vpop.f32.mrf.mxu0  ;;  %8078 = vmatmul.mubr.f32.gmra.mxu1 %v1136_v43  ;;  %v6778_v43 = vld [vmem:[%s12644_s1 + $0x1b8] sm:$0xff] }
 0x157   : > { %v1137_v52 = vmax.f32 %v891_v49, 0.0  ;;  %v906_v55 = vadd.f32 %v7957_v50, %v10111_v53  ;;  %8165 = vmatprep.subr.mxu0 %v6778_v43 }
 0x158   : > { %v900_v56 = vpop.f32.mrf.mxu0  ;;  %8166 = vmatpush3.msra.mxu0 %v6778_v43 }
 0x159   : > { %v901_v57 = vadd.f32 %v10111_v53, %v900_v56  ;;  %8080 = vmatprep.mubr.f32.mxu1 %v1137_v52  ;;  %v1140_v61 = vmax.f32 %v906_v55, 0.0 }
 0x15a   : > { %v7960_v58 = vpop.f32.mrf.mxu0  ;;  %8081 = vmatmul.mubr.f32.gmra.mxu1 %v1138_v54 }
 0x15b   : > { %v1139_v59 = vmax.f32 %v901_v57, 0.0  ;;  %v916_v63 = vadd.f32 %v7960_v58, %v10111_v53 }
 0x15c   : > { %v910_v0 = vpop.f32.mrf.mxu0 }
 0x15d   : > { %v911_v1 = vadd.f32 %v10111_v53, %v910_v0  ;;  %8083 = vmatprep.mubr.f32.mxu1 %v1139_v59  ;;  %v1142_v5 = vmax.f32 %v916_v63, 0.0  ;;  %v6777_v63 = vld [vmem:[%s12644_s1 + $0x1b0] sm:$0xff] }
 0x15e   : > { %v7963_v2 = vpop.f32.mrf.mxu0  ;;  %8084 = vmatmul.mubr.f32.gmra.mxu1 %v1140_v61  ;;  %8167 = vmatprep.subr.mxu0 %v6777_v63 }
 0x15f   : > { %v1141_v3 = vmax.f32 %v911_v1, 0.0  ;;  %v926_v7 = vadd.f32 %v7963_v2, %v10111_v53  ;;  %8168 = vmatpush3.msra.mxu0 %v6777_v63 }
 0x160   : > { %v920_v8 = vpop.f32.mrf.mxu0 }
 0x161   : > { %v921_v9 = vadd.f32 %v10111_v53, %v920_v8  ;;  %8086 = vmatprep.mubr.f32.mxu1 %v1141_v3  ;;  %v1144_v13 = vmax.f32 %v926_v7, 0.0 }
 0x162   : > { %v7966_v10 = vpop.f32.mrf.mxu0  ;;  %8087 = vmatmul.mubr.f32.gmra.mxu1 %v1142_v5 }
 0x163   : > { %v1143_v11 = vmax.f32 %v921_v9, 0.0  ;;  %v936_v15 = vadd.f32 %v7966_v10, %v10111_v53 }
 0x164   : > { %v930_v16 = vpop.f32.mrf.mxu0 }
 0x165   : > { %v931_v17 = vadd.f32 %v10111_v53, %v930_v16  ;;  %8089 = vmatprep.mubr.f32.mxu1 %v1143_v11  ;;  %v1146_v21 = vmax.f32 %v936_v15, 0.0  ;;  %v6776_v16 = vld [vmem:[%s12644_s1 + $0x1a8] sm:$0xff] }
 0x166   : > { %v7969_v18 = vpop.f32.mrf.mxu0  ;;  %8090 = vmatmul.mubr.f32.gmra.mxu1 %v1144_v13  ;;  %8169 = vmatprep.subr.mxu0 %v6776_v16 }
 0x167   : > { %v1145_v19 = vmax.f32 %v931_v17, 0.0  ;;  %v946_v23 = vadd.f32 %v7969_v18, %v10111_v53  ;;  %8170 = vmatpush3.msra.mxu0 %v6776_v16 }
 0x168   : > { %v940_v24 = vpop.f32.mrf.mxu0 }
 0x169   : > { %v941_v25 = vadd.f32 %v10111_v53, %v940_v24  ;;  %8092 = vmatprep.mubr.f32.mxu1 %v1145_v19  ;;  %v1148_v29 = vmax.f32 %v946_v23, 0.0 }
 0x16a   : > { %v7972_v26 = vpop.f32.mrf.mxu0  ;;  %8093 = vmatmul.mubr.f32.gmra.mxu1 %v1146_v21 }
 0x16b   : > { %v1147_v27 = vmax.f32 %v941_v25, 0.0  ;;  %v956_v31 = vadd.f32 %v7972_v26, %v10111_v53 }
 0x16c   : > { %v950_v32 = vpop.f32.mrf.mxu0 }
 0x16d   : > { %v951_v33 = vadd.f32 %v10111_v53, %v950_v32  ;;  %8095 = vmatprep.mubr.f32.mxu1 %v1147_v27  ;;  %v1150_v38 = vmax.f32 %v956_v31, 0.0 }
 0x16e   : > { %v7975_v34 = vpop.f32.mrf.mxu0  ;;  %8096 = vmatmul.mubr.f32.gmra.mxu1 %v1148_v29 }
 0x16f   : > { %v1149_v35 = vmax.f32 %v951_v33, 0.0  ;;  %v966_v40 = vadd.f32 %v7975_v34, %v10111_v53  ;;  %v6775_v33 = vld [vmem:[%s12644_s1 + $0x1a0] sm:$0xff] }
 0x170   : > { %v960_v41 = vpop.f32.mrf.mxu0  ;;  %8171 = vmatprep.subr.mxu0 %v6775_v33 }
 0x171   : > { %v961_v42 = vadd.f32 %v10111_v53, %v960_v41  ;;  %8098 = vmatprep.mubr.f32.mxu1 %v1149_v35  ;;  %v1152_v47 = vmax.f32 %v966_v40, 0.0  ;;  %8172 = vmatpush3.msra.mxu0 %v6775_v33 }
 0x172   : > { %v7978_v44 = vpop.f32.mrf.mxu0  ;;  %8099 = vmatmul.mubr.f32.gmra.mxu1 %v1150_v38  ;;  %8173 = vmatprep.subr.mxu0 %v6774_v62 }
 0x173   : > { %v1151_v46 = vmax.f32 %v961_v42, 0.0  ;;  %v976_v37 = vadd.f32 %v7978_v44, %v10111_v53  ;;  %8174 = vmatpush3.msra.mxu0 %v6774_v62 }
 0x174   : > { %v970_v51 = vpop.f32.mrf.mxu0 }
 0x175   : > { %v971_v60 = vadd.f32 %v10111_v53, %v970_v51  ;;  %8101 = vmatprep.mubr.f32.mxu1 %v1151_v46  ;;  %v1154_v14 = vmax.f32 %v976_v37, 0.0 }
 0x176   : > { %v7981_v4 = vpop.f32.mrf.mxu0  ;;  %8102 = vmatmul.mubr.f32.gmra.mxu1 %v1152_v47 }
 0x177   : > { %v1153_v6 = vmax.f32 %v971_v60, 0.0  ;;  %v986_v20 = vadd.f32 %v7981_v4, %v10111_v53 }
 0x178   : > { %v980_v22 = vpop.f32.mrf.mxu0 }
 0x179   : > { %v981_v28 = vadd.f32 %v10111_v53, %v980_v22  ;;  %8104 = vmatprep.mubr.f32.mxu1 %v1153_v6  ;;  %v1156_v45 = vmax.f32 %v986_v20, 0.0 }
 0x17a   : > { %v7984_v36 = vpop.f32.mrf.mxu0  ;;  %8105 = vmatmul.mubr.f32.gmra.mxu1 %v1154_v14 }
 0x17b   : > { %v1155_v39 = vmax.f32 %v981_v28, 0.0  ;;  %v996_v48 = vadd.f32 %v7984_v36, %v10111_v53 }
 0x17c   : > { %v990_v49 = vpop.f32.mrf.mxu0 }
 0x17d   : > { %v991_v50 = vadd.f32 %v10111_v53, %v990_v49  ;;  %8107 = vmatprep.mubr.f32.mxu1 %v1155_v39  ;;  %v1158_v55 = vmax.f32 %v996_v48, 0.0  ;;  %v6773_v48 = vld [vmem:[%s12644_s1 + $0x190] sm:$0xff] }
 0x17e   : > { %v7987_v52 = vpop.f32.mrf.mxu0  ;;  %8108 = vmatmul.mubr.f32.gmra.mxu1 %v1156_v45  ;;  %8175 = vmatprep.subr.mxu0 %v6773_v48 }
 0x17f   : > { %v1157_v54 = vmax.f32 %v991_v50, 0.0  ;;  %v1006_v56 = vadd.f32 %v7987_v52, %v10111_v53  ;;  %8176 = vmatpush3.msra.mxu0 %v6773_v48 }
 0x180   : > { %v1000_v57 = vpop.f32.mrf.mxu0 }
 0x181   : > { %v1001_v58 = vadd.f32 %v10111_v53, %v1000_v57  ;;  %8110 = vmatprep.mubr.f32.mxu1 %v1157_v54  ;;  %v1160_v0 = vmax.f32 %v1006_v56, 0.0 }
 0x182   : > { %v7990_v59 = vpop.f32.mrf.mxu0  ;;  %8111 = vmatmul.mubr.f32.gmra.mxu1 %v1158_v55 }
 0x183   : > { %v1159_v61 = vmax.f32 %v1001_v58, 0.0  ;;  %v1016_v1 = vadd.f32 %v7990_v59, %v10111_v53 }
 0x184   : > { %v1010_v2 = vpop.f32.mrf.mxu0 }
 0x185   : > { %v1011_v3 = vadd.f32 %v10111_v53, %v1010_v2  ;;  %8113 = vmatprep.mubr.f32.mxu1 %v1159_v61  ;;  %v1162_v8 = vmax.f32 %v1016_v1, 0.0  ;;  %v6772_v1 = vld [vmem:[%s12644_s1 + $0x188] sm:$0xff] }
 0x186   : > { %v7993_v5 = vpop.f32.mrf.mxu0  ;;  %8114 = vmatmul.mubr.f32.gmra.mxu1 %v1160_v0  ;;  %8177 = vmatprep.subr.mxu0 %v6772_v1 }
 0x187   : > { %v1161_v7 = vmax.f32 %v1011_v3, 0.0  ;;  %v1026_v9 = vadd.f32 %v7993_v5, %v10111_v53  ;;  %8178 = vmatpush3.msra.mxu0 %v6772_v1 }
 0x188   : > { %v1020_v10 = vpop.f32.mrf.mxu0 }
 0x189   : > { %v1021_v11 = vadd.f32 %v10111_v53, %v1020_v10  ;;  %8116 = vmatprep.mubr.f32.mxu1 %v1161_v7  ;;  %v1164_v17 = vmax.f32 %v1026_v9, 0.0  ;;  %v6771_v10 = vld [vmem:[%s12644_s1 + $0x180] sm:$0xff] }
 0x18a   : > { %v7996_v13 = vpop.f32.mrf.mxu0  ;;  %8117 = vmatmul.mubr.f32.gmra.mxu1 %v1162_v8  ;;  %8179 = vmatprep.subr.mxu0 %v6771_v10 }
 0x18b   : > { %v1163_v15 = vmax.f32 %v1021_v11, 0.0  ;;  %v1036_v18 = vadd.f32 %v7996_v13, %v10111_v53  ;;  %8180 = vmatpush3.msra.mxu0 %v6771_v10  ;;  %v10276_v13 = vld [vmem:[%s12645_s2 + $0x1] ss:$0 sm:$0xff] }
 0x18c   : > { %v1030_v19 = vpop.f32.mrf.mxu0 }
 0x18d   : > { %v1031_v21 = vadd.f32 %v10111_v53, %v1030_v19  ;;  %8119 = vmatprep.mubr.f32.mxu1 %v1163_v15  ;;  %v1166_v25 = vmax.f32 %v1036_v18, 0.0 }
 0x18e   : > { %v7999_v23 = vpop.f32.mrf.mxu0  ;;  %8120 = vmatmul.mubr.f32.gmra.mxu1 %v1164_v17 }
 0x18f   : > { %v1165_v24 = vmax.f32 %v1031_v21, 0.0  ;;  %v1046_v26 = vadd.f32 %v7999_v23, %v10111_v53 }
 0x190   : > { %v1040_v27 = vpop.f32.mrf.mxu0 }
 0x191   : > { %v1041_v29 = vadd.f32 %v10111_v53, %v1040_v27  ;;  %8122 = vmatprep.mubr.f32.mxu1 %v1165_v24  ;;  %v1168_v34 = vmax.f32 %v1046_v26, 0.0 }
 0x192   : > { %v8002_v31 = vpop.f32.mrf.mxu0  ;;  %8123 = vmatmul.mubr.f32.gmra.mxu1 %v1166_v25 }
 0x193   : > { %v1167_v32 = vmax.f32 %v1041_v29, 0.0  ;;  %v1056_v35 = vadd.f32 %v8002_v31, %v10111_v53 }
 0x194   : > { %v1050_v38 = vpop.f32.mrf.mxu0 }
 0x195   : > { %v1051_v40 = vadd.f32 %v10111_v53, %v1050_v38  ;;  %8125 = vmatprep.mubr.f32.mxu1 %v1167_v32  ;;  %v1170_v44 = vmax.f32 %v1056_v35, 0.0 }
 0x196   : > { %v8005_v41 = vpop.f32.mrf.mxu0  ;;  %8126 = vmatmul.mubr.f32.gmra.mxu1 %v1168_v34 }
 0x197   : > { %v1169_v42 = vmax.f32 %v1051_v40, 0.0  ;;  %v1066_v46 = vadd.f32 %v8005_v41, %v10111_v53 }
 0x198   : > { %v1060_v47 = vpop.f32.mrf.mxu0 }
 0x199   : > { %v1061_v37 = vadd.f32 %v10111_v53, %v1060_v47  ;;  %8128 = vmatprep.mubr.f32.mxu1 %v1169_v42  ;;  %v1172_v4 = vmax.f32 %v1066_v46, 0.0 }
 0x19a   : > { %v8008_v51 = vpop.f32.mrf.mxu0  ;;  %8129 = vmatmul.mubr.f32.gmra.mxu1 %v1170_v44 }
 0x19b   : > { %v1171_v60 = vmax.f32 %v1061_v37, 0.0  ;;  %v1076_v6 = vadd.f32 %v8008_v51, %v10111_v53 }
 0x19c   : > { %v1070_v12 = vpop.f32.mrf.mxu0 }
 0x19d   : > { %v1071_v14 = vadd.f32 %v10111_v53, %v1070_v12  ;;  %8131 = vmatprep.mubr.f32.mxu1 %v1171_v60  ;;  %v1174_v28 = vmax.f32 %v1076_v6, 0.0 }
 0x19e   : > { %v8011_v20 = vpop.f32.mrf.mxu0  ;;  %8132 = vmatmul.mubr.f32.gmra.mxu1 %v1172_v4 }
 0x19f   : > { %v1173_v22 = vmax.f32 %v1071_v14, 0.0  ;;  %v1086_v30 = vadd.f32 %v8011_v20, %v10111_v53 }
 0x1a0   : > { %v1080_v36 = vpop.f32.mrf.mxu0 }
 0x1a1   : > { %v1081_v39 = vadd.f32 %v10111_v53, %v1080_v36  ;;  %8134 = vmatprep.mubr.f32.mxu1 %v1173_v22  ;;  %v1176_v49 = vmax.f32 %v1086_v30, 0.0 }
 0x1a2   : > { %v8014_v43 = vpop.f32.mrf.mxu0  ;;  %8135 = vmatmul.mubr.f32.gmra.mxu1 %v1174_v28 }
 0x1a3   : > { %v1175_v45 = vmax.f32 %v1081_v39, 0.0  ;;  %v1096_v50 = vadd.f32 %v8014_v43, %v10111_v53 }
 0x1a4   : > { %v1090_v52 = vpop.f32.mrf.mxu0 }
 0x1a5   : > { %v1091_v54 = vadd.f32 %v10111_v53, %v1090_v52  ;;  %8137 = vmatprep.mubr.f32.mxu1 %v1175_v45  ;;  %v1178_v57 = vmax.f32 %v1096_v50, 0.0 }
 0x1a6   : > { %v8017_v55 = vpop.f32.mrf.mxu0  ;;  %8138 = vmatmul.mubr.f32.gmra.mxu1 %v1176_v49 }
 0x1a7   : > { %v1177_v56 = vmax.f32 %v1091_v54, 0.0  ;;  %v1106_v58 = vadd.f32 %v8017_v55, %v10111_v53 }
 0x1a8   : > { %v1100_v59 = vpop.f32.mrf.mxu0 }
 0x1a9   : > { %v1101_v61 = vadd.f32 %v10111_v53, %v1100_v59  ;;  %8140 = vmatprep.mubr.f32.mxu1 %v1177_v56  ;;  %v1180_v2 = vmax.f32 %v1106_v58, 0.0 }
 0x1aa   : > { %v8020_v63 = vpop.f32.mrf.mxu0  ;;  %8141 = vmatmul.mubr.f32.gmra.mxu1 %v1178_v57 }
 0x1ab   : > { %v1179_v0 = vmax.f32 %v1101_v61, 0.0  ;;  %v1116_v3 = vadd.f32 %v8020_v63, %v10111_v53 }
 0x1ac   : > { %v1110_v5 = vpop.f32.mrf.mxu0 }
 0x1ad   : > { %v1111_v7 = vadd.f32 %v10111_v53, %v1110_v5  ;;  %8143 = vmatprep.mubr.f32.mxu1 %v1179_v0  ;;  %v1182_v9 = vmax.f32 %v1116_v3, 0.0 }
 0x1ae   : > { %8144 = vmatmul.mubr.f32.gmra.mxu1 %v1180_v2 }
 0x1af   : > { %v1181_v8 = vmax.f32 %v1111_v7, 0.0 }
 0x1b1   : > { %8146 = vmatprep.mubr.f32.mxu1 %v1181_v8 }
 0x1b2   : > { %8147 = vmatmul.mubr.f32.gmra.mxu1 %v1182_v9 }
 0x1f6   : > { %v8055_v11 = vpop.f32.mrf.mxu1 }
 0x1f7   : > { %v10282_v16 = vadd.f32 %v8055_v11, %v10276_v13 }
 0x1f8   : > { %v1271_v53 = vpop.f32.mrf.mxu1 }
 0x1f9   : > { %v10279_v15 = vadd.f32 %v10276_v13, %v1271_v53 }
 0x1fa   : > { %v8058_v17 = vpop.f32.mrf.mxu1 }
 0x1fb   : > { %8261 = vmatprep.mubr.f32.mxu1 %v10279_v15  ;;  %v10290_v21 = vadd.f32 %v8058_v17, %v10276_v13 }
 0x1fc   : > { %v1281_v18 = vpop.f32.mrf.mxu1  ;;  %8262 = vmatmul.mubr.f32.vlgmr.msra.gmra.mxu1 %v10282_v16 }
 0x1fd   : > { %v10287_v19 = vadd.f32 %v10276_v13, %v1281_v18 }
 0x1fe   : > { %v8061_v23 = vpop.f32.mrf.mxu1 }
 0x1ff   : > { %8264 = vmatprep.mubr.f32.mxu1 %v10287_v19  ;;  %v10298_v26 = vadd.f32 %v8061_v23, %v10276_v13 }
 0x200   : > { %v1291_v24 = vpop.f32.mrf.mxu1  ;;  %8265 = vmatmul.mubr.f32.gmra.mxu1 %v10290_v21 }
 0x201   : > { %v10295_v25 = vadd.f32 %v10276_v13, %v1291_v24 }
 0x202   : > { %v8064_v27 = vpop.f32.mrf.mxu1 }
 0x203   : > { %8267 = vmatprep.mubr.f32.mxu1 %v10295_v25  ;;  %v10306_v32 = vadd.f32 %v8064_v27, %v10276_v13 }
 0x204   : > { %v1301_v29 = vpop.f32.mrf.mxu1  ;;  %8268 = vmatmul.mubr.f32.gmra.mxu1 %v10298_v26 }
 0x205   : > { %v10303_v31 = vadd.f32 %v10276_v13, %v1301_v29 }
 0x206   : > { %v8067_v33 = vpop.f32.mrf.mxu1 }
 0x207   : > { %8270 = vmatprep.mubr.f32.mxu1 %v10303_v31  ;;  %v10314_v38 = vadd.f32 %v8067_v33, %v10276_v13 }
 0x208   : > { %v1311_v34 = vpop.f32.mrf.mxu1  ;;  %8271 = vmatmul.mubr.f32.gmra.mxu1 %v10306_v32 }
 0x209   : > { %v10311_v35 = vadd.f32 %v10276_v13, %v1311_v34 }
 0x20a   : > { %v8070_v40 = vpop.f32.mrf.mxu1 }
 0x20b   : > { %8273 = vmatprep.mubr.f32.mxu1 %v10311_v35  ;;  %v10322_v44 = vadd.f32 %v8070_v40, %v10276_v13 }
 0x20c   : > { %v1321_v41 = vpop.f32.mrf.mxu1  ;;  %8274 = vmatmul.mubr.f32.gmra.mxu1 %v10314_v38 }
 0x20d   : > { %v10319_v42 = vadd.f32 %v10276_v13, %v1321_v41 }
 0x20e   : > { %v8073_v46 = vpop.f32.mrf.mxu1 }
 0x20f   : > { %8276 = vmatprep.mubr.f32.mxu1 %v10319_v42  ;;  %v10330_v51 = vadd.f32 %v8073_v46, %v10276_v13 }
 0x210   : > { %v1331_v47 = vpop.f32.mrf.mxu1  ;;  %8277 = vmatmul.mubr.f32.gmra.mxu1 %v10322_v44 }
 0x211   : > { %v10327_v37 = vadd.f32 %v10276_v13, %v1331_v47 }
 0x212   : > { %v8076_v60 = vpop.f32.mrf.mxu1 }
 0x213   : > { %8279 = vmatprep.mubr.f32.mxu1 %v10327_v37  ;;  %v10338_v6 = vadd.f32 %v8076_v60, %v10276_v13 }
 0x214   : > { %v1341_v62 = vpop.f32.mrf.mxu1  ;;  %8280 = vmatmul.mubr.f32.gmra.mxu1 %v10330_v51 }
 0x215   : > { %v10335_v4 = vadd.f32 %v10276_v13, %v1341_v62  ;;  %12684 = vst [vmem:[#allocation5_spill] sm:$0xff] %v10338_v6  ;;  %v6820_v62 = vld [vmem:[%s12644_s1 + $0x2f8] sm:$0xff] }
 0x216   : > { %v8079_v12 = vpop.f32.mrf.mxu1  ;;  %8389 = vmatprep.subr.mxu1 %v6820_v62 }
 0x217   : > { %12683 = vst [vmem:[#allocation4_spill] sm:$0xff] %v10335_v4  ;;  %8282 = vmatprep.mubr.f32.mxu1 %v10335_v4  ;;  %v10346_v22 = vadd.f32 %v8079_v12, %v10276_v13  ;;  %8390 = vmatpush3.msra.mxu1 %v6820_v62  ;;  %v6815_v62 = vld [vmem:[%s12644_s1 + $0x2d0] sm:$0xff] }
 0x218   : > { %v1351_v14 = vpop.f32.mrf.mxu1  ;;  %8283 = vmatmul.mubr.f32.gmra.mxu1 %v10338_v6 }
 0x219   : > { %v10343_v20 = vadd.f32 %v10276_v13, %v1351_v14  ;;  %12686 = vst [vmem:[#allocation7_spill] sm:$0xff] %v10346_v22 }
 0x21a   : > { %v8082_v28 = vpop.f32.mrf.mxu1 }
 0x21b   : > { %12685 = vst [vmem:[#allocation6_spill] sm:$0xff] %v10343_v20  ;;  %8285 = vmatprep.mubr.f32.mxu1 %v10343_v20  ;;  %v10354_v39 = vadd.f32 %v8082_v28, %v10276_v13 }
 0x21c   : > { %v1361_v30 = vpop.f32.mrf.mxu1  ;;  %8286 = vmatmul.mubr.f32.gmra.mxu1 %v10346_v22 }
 0x21d   : > { %v10351_v36 = vadd.f32 %v10276_v13, %v1361_v30  ;;  %12688 = vst [vmem:[#allocation9_spill] sm:$0xff] %v10354_v39 }
 0x21e   : > { %v8085_v43 = vpop.f32.mrf.mxu1 }
 0x21f   : > { %12687 = vst [vmem:[#allocation8_spill] sm:$0xff] %v10351_v36  ;;  %8288 = vmatprep.mubr.f32.mxu1 %v10351_v36  ;;  %v10362_v49 = vadd.f32 %v8085_v43, %v10276_v13  ;;  %v6819_v43 = vld [vmem:[%s12644_s1 + $0x2f0] sm:$0xff] }
 0x220   : > { %v1371_v45 = vpop.f32.mrf.mxu1  ;;  %8289 = vmatmul.mubr.f32.gmra.mxu1 %v10354_v39  ;;  %8391 = vmatprep.subr.mxu1 %v6819_v43 }
 0x221   : > { %v10359_v48 = vadd.f32 %v10276_v13, %v1371_v45  ;;  %12690 = vst [vmem:[#allocation11_spill] sm:$0xff] %v10362_v49  ;;  %8392 = vmatpush3.msra.mxu1 %v6819_v43 }
 0x222   : > { %v8088_v50 = vpop.f32.mrf.mxu1 }
 0x223   : > { %12689 = vst [vmem:[#allocation10_spill] sm:$0xff] %v10359_v48  ;;  %8291 = vmatprep.mubr.f32.mxu1 %v10359_v48  ;;  %v10370_v55 = vadd.f32 %v8088_v50, %v10276_v13 }
 0x224   : > { %v1381_v52 = vpop.f32.mrf.mxu1  ;;  %8292 = vmatmul.mubr.f32.gmra.mxu1 %v10362_v49  ;;  %v10655_v49 = vld [vmem:[%s12645_s2 + $0x2] ss:$0 sm:$0xff] }
 0x225   : > { %v10367_v54 = vadd.f32 %v10276_v13, %v1381_v52  ;;  %12692 = vst [vmem:[#allocation13_spill] sm:$0xff] %v10370_v55 }
 0x226   : > { %v8091_v56 = vpop.f32.mrf.mxu1 }
 0x227   : > { %12691 = vst [vmem:[#allocation12_spill] sm:$0xff] %v10367_v54  ;;  %8294 = vmatprep.mubr.f32.mxu1 %v10367_v54  ;;  %v10378_v59 = vadd.f32 %v8091_v56, %v10276_v13 }
 0x228   : > { %v1391_v57 = vpop.f32.mrf.mxu1  ;;  %8295 = vmatmul.mubr.f32.gmra.mxu1 %v10370_v55 }
 0x229   : > { %v10375_v58 = vadd.f32 %v10276_v13, %v1391_v57  ;;  %12694 = vst [vmem:[#allocation15_spill] sm:$0xff] %v10378_v59  ;;  %v6818_v57 = vld [vmem:[%s12644_s1 + $0x2e8] sm:$0xff] }
 0x22a   : > { %v8094_v61 = vpop.f32.mrf.mxu1  ;;  %8393 = vmatprep.subr.mxu1 %v6818_v57 }
 0x22b   : > { %12693 = vst [vmem:[#allocation14_spill] sm:$0xff] %v10375_v58  ;;  %8297 = vmatprep.mubr.f32.mxu1 %v10375_v58  ;;  %v10386_v1 = vadd.f32 %v8094_v61, %v10276_v13  ;;  %8394 = vmatpush3.msra.mxu1 %v6818_v57 }
 0x22c   : > { %v1401_v63 = vpop.f32.mrf.mxu1  ;;  %8298 = vmatmul.mubr.f32.gmra.mxu1 %v10378_v59 }
 0x22d   : > { %v10383_v0 = vadd.f32 %v10276_v13, %v1401_v63  ;;  %12696 = vst [vmem:[#allocation17_spill] sm:$0xff] %v10386_v1 }
 0x22e   : > { %v8097_v2 = vpop.f32.mrf.mxu1 }
 0x22f   : > { %12695 = vst [vmem:[#allocation16_spill] sm:$0xff] %v10383_v0  ;;  %8300 = vmatprep.mubr.f32.mxu1 %v10383_v0  ;;  %v10394_v7 = vadd.f32 %v8097_v2, %v10276_v13 }
 0x230   : > { %v1411_v3 = vpop.f32.mrf.mxu1  ;;  %8301 = vmatmul.mubr.f32.gmra.mxu1 %v10386_v1 }
 0x231   : > { %v10391_v5 = vadd.f32 %v10276_v13, %v1411_v3  ;;  %12698 = vst [vmem:[#allocation19_spill] sm:$0xff] %v10394_v7 }
 0x232   : > { %v8100_v8 = vpop.f32.mrf.mxu1 }
 0x233   : > { %12697 = vst [vmem:[#allocation18_spill] sm:$0xff] %v10391_v5  ;;  %8303 = vmatprep.mubr.f32.mxu1 %v10391_v5  ;;  %v10402_v11 = vadd.f32 %v8100_v8, %v10276_v13  ;;  %v6817_v8 = vld [vmem:[%s12644_s1 + $0x2e0] sm:$0xff] }
 0x234   : > { %v1421_v9 = vpop.f32.mrf.mxu1  ;;  %8304 = vmatmul.mubr.f32.gmra.mxu1 %v10394_v7  ;;  %8395 = vmatprep.subr.mxu1 %v6817_v8 }
 0x235   : > { %v10399_v10 = vadd.f32 %v10276_v13, %v1421_v9  ;;  %12700 = vst [vmem:[#allocation21_spill] sm:$0xff] %v10402_v11  ;;  %8396 = vmatpush3.msra.mxu1 %v6817_v8 }
 0x236   : > { %v8103_v53 = vpop.f32.mrf.mxu1 }
 0x237   : > { %12699 = vst [vmem:[#allocation20_spill] sm:$0xff] %v10399_v10  ;;  %8306 = vmatprep.mubr.f32.mxu1 %v10399_v10  ;;  %v10410_v23 = vadd.f32 %v8103_v53, %v10276_v13 }
 0x238   : > { %v1431_v17 = vpop.f32.mrf.mxu1  ;;  %8307 = vmatmul.mubr.f32.gmra.mxu1 %v10402_v11 }
 0x239   : > { %v10407_v18 = vadd.f32 %v10276_v13, %v1431_v17 }
 0x23a   : > { %v8106_v24 = vpop.f32.mrf.mxu1 }
 0x23b   : > { %8181 = vmatprep.mubr.f32.mxu0 %v10407_v18  ;;  %v10418_v33 = vadd.f32 %v8106_v24, %v10276_v13 }
 0x23c   : > { %v1441_v27 = vpop.f32.mrf.mxu1  ;;  %8182 = vmatmul.mubr.f32.vlgmr.msra.gmra.mxu0 %v10410_v23 }
 0x23d   : > { %v10415_v29 = vadd.f32 %v10276_v13, %v1441_v27  ;;  %v6816_v27 = vld [vmem:[%s12644_s1 + $0x2d8] sm:$0xff] }
 0x23e   : > { %v8109_v34 = vpop.f32.mrf.mxu1  ;;  %8397 = vmatprep.subr.mxu1 %v6816_v27 }
 0x23f   : > { %8184 = vmatprep.mubr.f32.mxu0 %v10415_v29  ;;  %v10426_v46 = vadd.f32 %v8109_v34, %v10276_v13  ;;  %8398 = vmatpush3.msra.mxu1 %v6816_v27 }
 0x240   : > { %v1451_v40 = vpop.f32.mrf.mxu1  ;;  %8185 = vmatmul.mubr.f32.gmra.mxu0 %v10418_v33  ;;  %8399 = vmatprep.subr.mxu1 %v6815_v62 }
 0x241   : > { %v10423_v41 = vadd.f32 %v10276_v13, %v1451_v40  ;;  %8400 = vmatpush3.msra.mxu1 %v6815_v62  ;;  %v6812_v62 = vld [vmem:[%s12644_s1 + $0x2b8] sm:$0xff] }
 0x242   : > { %v8112_v47 = vpop.f32.mrf.mxu1 }
 0x243   : > { %8187 = vmatprep.mubr.f32.mxu0 %v10423_v41  ;;  %v10437_v14 = vadd.f32 %v8112_v47, %v10276_v13 }
 0x244   : > { %v1461_v60 = vpop.f32.mrf.mxu1  ;;  %8188 = vmatmul.mubr.f32.gmra.mxu0 %v10426_v46 }
 0x245   : > { %v10434_v12 = vadd.f32 %v10276_v13, %v1461_v60 }
 0x246   : > { %v8115_v28 = vpop.f32.mrf.mxu1 }
 0x247   : > { %8190 = vmatprep.mubr.f32.mxu0 %v10434_v12  ;;  %v10448_v50 = vadd.f32 %v8115_v28, %v10276_v13 }
 0x248   : > { %v1471_v30 = vpop.f32.mrf.mxu1  ;;  %8191 = vmatmul.mubr.f32.gmra.mxu0 %v10437_v14 }
 0x249   : > { %v10445_v45 = vadd.f32 %v10276_v13, %v1471_v30 }
 0x24a   : > { %v8118_v52 = vpop.f32.mrf.mxu1 }
 0x24b   : > { %8193 = vmatprep.mubr.f32.mxu0 %v10445_v45  ;;  %v10459_v63 = vadd.f32 %v8118_v52, %v10276_v13 }
 0x24c   : > { %v1481_v56 = vpop.f32.mrf.mxu1  ;;  %8194 = vmatmul.mubr.f32.gmra.mxu0 %v10448_v50 }
 0x24d   : > { %v10456_v61 = vadd.f32 %v10276_v13, %v1481_v56  ;;  %v6814_v56 = vld [vmem:[%s12644_s1 + $0x2c8] sm:$0xff] }
 0x24e   : > { %v8121_v2 = vpop.f32.mrf.mxu1  ;;  %8401 = vmatprep.subr.mxu1 %v6814_v56 }
 0x24f   : > { %8196 = vmatprep.mubr.f32.mxu0 %v10456_v61  ;;  %v10470_v53 = vadd.f32 %v8121_v2, %v10276_v13  ;;  %8402 = vmatpush3.msra.mxu1 %v6814_v56 }
 0x250   : > { %v1491_v3 = vpop.f32.mrf.mxu1  ;;  %8197 = vmatmul.mubr.f32.gmra.mxu0 %v10459_v63 }
 0x251   : > { %v10467_v9 = vadd.f32 %v10276_v13, %v1491_v3 }
 0x252   : > { %v8124_v17 = vpop.f32.mrf.mxu1 }
 0x253   : > { %8199 = vmatprep.mubr.f32.mxu0 %v10467_v9  ;;  %v10481_v40 = vadd.f32 %v8124_v17, %v10276_v13  ;;  %v6813_v17 = vld [vmem:[%s12644_s1 + $0x2c0] sm:$0xff] }
 0x254   : > { %v1501_v24 = vpop.f32.mrf.mxu1  ;;  %8200 = vmatmul.mubr.f32.gmra.mxu0 %v10470_v53  ;;  %8403 = vmatprep.subr.mxu1 %v6813_v17 }
 0x255   : > { %v10478_v34 = vadd.f32 %v10276_v13, %v1501_v24  ;;  %12701 = vst [vmem:[#allocation22_spill] sm:$0xff] %v10481_v40  ;;  %8404 = vmatpush3.msra.mxu1 %v6813_v17 }
 0x256   : > { %v8127_v47 = vpop.f32.mrf.mxu1  ;;  %8405 = vmatprep.subr.mxu1 %v6812_v62 }
 0x257   : > { %8202 = vmatprep.mubr.f32.mxu0 %v10478_v34  ;;  %v10492_v30 = vadd.f32 %v8127_v47, %v10276_v13  ;;  %8406 = vmatpush3.msra.mxu1 %v6812_v62  ;;  %v6801_v62 = vld [vmem:[%s12644_s1 + $0x268] sm:$0xff] }
 0x258   : > { %v1511_v60 = vpop.f32.mrf.mxu1  ;;  %8203 = vmatmul.mubr.f32.gmra.mxu0 %v10481_v40 }
 0x259   : > { %v10489_v28 = vadd.f32 %v10276_v13, %v1511_v60  ;;  %12703 = vst [vmem:[#allocation24_spill] sm:$0xff] %v10492_v30 }
 0x25a   : > { %v8130_v43 = vpop.f32.mrf.mxu1 }
 0x25b   : > { %12702 = vst [vmem:[#allocation23_spill] sm:$0xff] %v10489_v28  ;;  %8205 = vmatprep.mubr.f32.mxu0 %v10489_v28  ;;  %v10503_v2 = vadd.f32 %v8130_v43, %v10276_v13 }
 0x25c   : > { %v1521_v52 = vpop.f32.mrf.mxu1  ;;  %8206 = vmatmul.mubr.f32.gmra.mxu0 %v10492_v30 }
 0x25d   : > { %v10500_v57 = vadd.f32 %v10276_v13, %v1521_v52  ;;  %12705 = vst [vmem:[#allocation26_spill] sm:$0xff] %v10503_v2  ;;  %v6803_v52 = vld [vmem:[%s12644_s1 + $0x278] sm:$0xff] }
 0x25e   : > { %v8133_v3 = vpop.f32.mrf.mxu1  ;;  %8309 = vmatprep.subr.mxu0 %v6803_v52 }
 0x25f   : > { %12704 = vst [vmem:[#allocation25_spill] sm:$0xff] %v10500_v57  ;;  %8208 = vmatprep.mubr.f32.mxu0 %v10500_v57  ;;  %v10514_v27 = vadd.f32 %v8133_v3, %v10276_v13  ;;  %8310 = vmatpush3.msra.mxu0 %v6803_v52 }
 0x260   : > { %v1531_v8 = vpop.f32.mrf.mxu1  ;;  %8209 = vmatmul.mubr.f32.gmra.mxu0 %v10503_v2 }
 0x261   : > { %v10511_v24 = vadd.f32 %v10276_v13, %v1531_v8  ;;  %12707 = vst [vmem:[#allocation28_spill] sm:$0xff] %v10514_v27  ;;  %v6802_v8 = vld [vmem:[%s12644_s1 + $0x270] sm:$0xff] }
 0x262   : > { %v8136_v47 = vpop.f32.mrf.mxu1  ;;  %8311 = vmatprep.subr.mxu0 %v6802_v8 }
 0x263   : > { %12706 = vst [vmem:[#allocation27_spill] sm:$0xff] %v10511_v24  ;;  %8211 = vmatprep.mubr.f32.mxu0 %v10511_v24  ;;  %v10528_v56 = vadd.f32 %v8136_v47, %v10276_v13  ;;  %8312 = vmatpush3.msra.mxu0 %v6802_v8  ;;  %v6810_v8 = vld [vmem:[%s12644_s1 + $0x2a8] sm:$0xff] }
 0x264   : > { %v1541_v60 = vpop.f32.mrf.mxu1  ;;  %8212 = vmatmul.mubr.f32.gmra.mxu0 %v10514_v27  ;;  %8313 = vmatprep.subr.mxu0 %v6801_v62 }
 0x265   : > { %v10522_v43 = vadd.f32 %v10276_v13, %v1541_v60  ;;  %12709 = vst [vmem:[#allocation30_spill] sm:$0xff] %v10528_v56  ;;  %v6811_v60 = vld [vmem:[%s12644_s1 + $0x2b0] sm:$0xff]  ;;  %8314 = vmatpush3.msra.mxu0 %v6801_v62 }
 0x266   : > { %v8139_v3 = vpop.f32.mrf.mxu1  ;;  %8407 = vmatprep.subr.mxu1 %v6811_v60 }
 0x267   : > { %12708 = vst [vmem:[#allocation29_spill] sm:$0xff] %v10522_v43  ;;  %8214 = vmatprep.mubr.f32.mxu0 %v10522_v43  ;;  %v10545_v52 = vadd.f32 %v8139_v3, %v10276_v13  ;;  %8408 = vmatpush3.msra.mxu1 %v6811_v60  ;;  %v6799_v60 = vld [vmem:[%s12644_s1 + $0x258] sm:$0xff] }
 0x268   : > { %v1551_v17 = vpop.f32.mrf.mxu1  ;;  %8215 = vmatmul.mubr.f32.gmra.mxu0 %v10528_v56  ;;  %8409 = vmatprep.subr.mxu1 %v6810_v8 }
 0x269   : > { %v10539_v47 = vadd.f32 %v10276_v13, %v1551_v17  ;;  %12711 = vst [vmem:[#allocation32_spill] sm:$0xff] %v10545_v52  ;;  %v6800_v17 = vld [vmem:[%s12644_s1 + $0x260] sm:$0xff]  ;;  %8410 = vmatpush3.msra.mxu1 %v6810_v8  ;;  %v6797_v8 = vld [vmem:[%s12644_s1 + $0x248] sm:$0xff] }
 0x26a   : > { %v8142_v11 = vpop.f32.mrf.mxu1  ;;  %8315 = vmatprep.subr.mxu0 %v6800_v17 }
 0x26b   : > { %12710 = vst [vmem:[#allocation31_spill] sm:$0xff] %v10539_v47  ;;  %8217 = vmatprep.mubr.f32.mxu0 %v10539_v47  ;;  %8316 = vmatpush3.msra.mxu0 %v6800_v17  ;;  %v10562_v62 = vadd.f32 %v8142_v11, %v10276_v13  ;;  %v6809_v17 = vld [vmem:[%s12644_s1 + $0x2a0] sm:$0xff] }
 0x26c   : > { %v1561_v10 = vpop.f32.mrf.mxu1  ;;  %8218 = vmatmul.mubr.f32.gmra.mxu0 %v10545_v52  ;;  %8317 = vmatprep.subr.mxu0 %v6799_v60 }
 0x26d   : > { %v10556_v3 = vadd.f32 %v10276_v13, %v1561_v10  ;;  %12713 = vst [vmem:[#allocation34_spill] sm:$0xff] %v10562_v62  ;;  %8318 = vmatpush3.msra.mxu0 %v6799_v60  ;;  %v6798_v10 = vld [vmem:[%s12644_s1 + $0x250] sm:$0xff]  ;;  %8411 = vmatprep.subr.mxu1 %v6809_v17 }
 0x26e   : > { %v8145_v7 = vpop.f32.mrf.mxu1  ;;  %8319 = vmatprep.subr.mxu0 %v6798_v10  ;;  %8412 = vmatpush3.msra.mxu1 %v6809_v17  ;;  %v6795_v17 = vld [vmem:[%s12644_s1 + $0x238] sm:$0xff] }
 0x26f   : > { %12712 = vst [vmem:[#allocation33_spill] sm:$0xff] %v10556_v3  ;;  %8220 = vmatprep.mubr.f32.mxu0 %v10556_v3  ;;  %8320 = vmatpush3.msra.mxu0 %v6798_v10  ;;  %v10579_v60 = vadd.f32 %v8145_v7, %v10276_v13  ;;  %v6808_v10 = vld [vmem:[%s12644_s1 + $0x298] sm:$0xff] }
 0x270   : > { %v1571_v5 = vpop.f32.mrf.mxu1  ;;  %8221 = vmatmul.mubr.f32.gmra.mxu0 %v10562_v62  ;;  %8321 = vmatprep.subr.mxu0 %v6797_v8 }
 0x271   : > { %v10573_v11 = vadd.f32 %v10276_v13, %v1571_v5  ;;  %12715 = vst [vmem:[#allocation36_spill] sm:$0xff] %v10579_v60  ;;  %8322 = vmatpush3.msra.mxu0 %v6797_v8  ;;  %v6796_v5 = vld [vmem:[%s12644_s1 + $0x240] sm:$0xff]  ;;  %8413 = vmatprep.subr.mxu1 %v6808_v10 }
 0x272   : > { %v8148_v1 = vpop.f32.mrf.mxu1  ;;  %8323 = vmatprep.subr.mxu0 %v6796_v5  ;;  %8414 = vmatpush3.msra.mxu1 %v6808_v10  ;;  %v6806_v10 = vld [vmem:[%s12644_s1 + $0x288] sm:$0xff] }
 0x273   : > { %12714 = vst [vmem:[#allocation35_spill] sm:$0xff] %v10573_v11  ;;  %8223 = vmatprep.mubr.f32.mxu0 %v10573_v11  ;;  %8324 = vmatpush3.msra.mxu0 %v6796_v5  ;;  %v10596_v8 = vadd.f32 %v8148_v1, %v10276_v13  ;;  %v6792_v1 = vld [vmem:[%s12644_s1 + $0x220] sm:$0xff]  ;;  %v6791_v5 = vld [vmem:[%s12644_s1 + $0x218] sm:$0xff] }
 0x274   : > { %v1581_v62 = vpop.f32.mrf.mxu1  ;;  %8224 = vmatmul.mubr.f32.gmra.mxu0 %v10579_v60  ;;  %8325 = vmatprep.subr.mxu0 %v6795_v17  ;;  %v6794_v60 = vld [vmem:[%s12644_s1 + $0x230] sm:$0xff] }
 0x275   : > { %v10590_v7 = vadd.f32 %v10276_v13, %v1581_v62  ;;  %12717 = vst [vmem:[#allocation38_spill] sm:$0xff] %v10596_v8  ;;  %8326 = vmatpush3.msra.mxu0 %v6795_v17  ;;  %v6807_v62 = vld [vmem:[%s12644_s1 + $0x290] sm:$0xff]  ;;  %v6793_v13 = vld [vmem:[%s12644_s1 + $0x228] sm:$0xff] }
 0x276   : > { %8327 = vmatprep.subr.mxu0 %v6794_v60  ;;  %8415 = vmatprep.subr.mxu1 %v6807_v62  ;;  %v6789_v17 = vld [vmem:[%s12644_s1 + $0x208] sm:$0xff] }
 0x277   : > { %12716 = vst [vmem:[#allocation37_spill] sm:$0xff] %v10590_v7  ;;  %8226 = vmatprep.mubr.f32.mxu0 %v10590_v7  ;;  %8328 = vmatpush3.msra.mxu0 %v6794_v60  ;;  %v6790_v60 = vld [vmem:[%s12644_s1 + $0x210] sm:$0xff] }
 0x278   : > { %8227 = vmatmul.mubr.f32.gmra.mxu0 %v10596_v8  ;;  %8329 = vmatprep.subr.mxu0 %v6793_v13 }
 0x279   : > { %8416 = vmatpush3.msra.mxu1 %v6807_v62  ;;  %8330 = vmatpush3.msra.mxu0 %v6793_v13  ;;  %v6805_v62 = vld [vmem:[%s12644_s1 + $0x280] sm:$0xff] }
 0x27a   : > { %8331 = vmatprep.subr.mxu0 %v6792_v1  ;;  %8417 = vmatprep.subr.mxu1 %v6806_v10  ;;  %v6788_v13 = vld [vmem:[%s12644_s1 + $0x200] sm:$0xff] }
 0x27b   : > { %8332 = vmatpush3.msra.mxu0 %v6792_v1  ;;  %8418 = vmatpush3.msra.mxu1 %v6806_v10  ;;  %v6885_v1 = vld [vmem:[%s12644_s1 + $0x3f8] sm:$0xff] }
 0x27c   : > { %8333 = vmatprep.subr.mxu0 %v6791_v5  ;;  %8419 = vmatprep.subr.mxu1 %v6805_v62 }
 0x27d   : > { %8334 = vmatpush3.msra.mxu0 %v6791_v5  ;;  %8420 = vmatpush3.msra.mxu1 %v6805_v62  ;;  %v6869_v5 = vld [vmem:[%s12644_s1 + $0x378] sm:$0xff] }
 0x27e   : > { %8335 = vmatprep.subr.mxu0 %v6790_v60  ;;  %8549 = vmatprep.subr.mxu1 %v6869_v5 }
 0x27f   : > { %8336 = vmatpush3.msra.mxu0 %v6790_v60 }
 0x280   : > { %8337 = vmatprep.subr.mxu0 %v6789_v17 }
 0x281   : > { %8338 = vmatpush3.msra.mxu0 %v6789_v17 }
 0x282   : > { %8339 = vmatprep.subr.mxu0 %v6788_v13 }
 0x283   : > { %8340 = vmatpush3.msra.mxu0 %v6788_v13 }
 0x284   : > { %8469 = vmatprep.subr.mxu0 %v6885_v1 }
 0x2bc   : > { %v8263_v60 = vpop.f32.mrf.mxu1 }
 0x2be   : > { %v1915_v10 = vpop.f32.mrf.mxu1 }
 0x2c0   : > { %v8266_v17 = vpop.f32.mrf.mxu1 }
 0x2c2   : > { %v1925_v8 = vpop.f32.mrf.mxu1 }
 0x2c4   : > { %v8269_v7 = vpop.f32.mrf.mxu1 }
 0x2c6   : > { %v1935_v11 = vpop.f32.mrf.mxu1 }
 0x2c8   : > { %v8272_v0 = vpop.f32.mrf.mxu1 }
 0x2ca   : > { %v1945_v3 = vpop.f32.mrf.mxu1 }
 0x2cc   : > { %v10636_v62 = vpop.f32.mrf.mxu1 }
 0x2ce   : > { %v10638_v13 = vpop.f32.mrf.mxu1 }
 0x2d0   : > { %v10640_v59 = vpop.f32.mrf.mxu1 }
 0x2d2   : > { %v10642_v52 = vpop.f32.mrf.mxu1 }
 0x2d4   : > { %v10644_v58 = vpop.f32.mrf.mxu1 }
 0x2d6   : > { %v10646_v47 = vpop.f32.mrf.mxu1 }
 0x2d8   : > { %v10648_v55 = vpop.f32.mrf.mxu1 }
 0x2da   : > { %v10650_v56 = vpop.f32.mrf.mxu1 }
 0x2dc   : > { %v10657_v27 = vpop.f32.mrf.mxu1 }
 0x2de   : > { %v10661_v22 = vpop.f32.mrf.mxu1 }
 0x2fc   : > { %v8183_v54 = vpop.f32.mrf.mxu0 }
 0x2fd   : > { %v1921_v43 = vadd.f32 %v8263_v60, %v8183_v54 }
 0x2fe   : > { %v1690_v48 = vpop.f32.mrf.mxu0 }
 0x2ff   : > { %v1916_v24 = vadd.f32 %v1915_v10, %v1690_v48  ;;  %v2080_v39 = vadd.f32 %v10655_v49, %v1921_v43  ;;  %v6884_v48 = vld [vmem:[%s12644_s1 + $0x3f0] sm:$0xff] }
 0x300   : > { %v8186_v2 = vpop.f32.mrf.mxu0 }
 0x301   : > { %v2079_v36 = vadd.f32 %v10655_v49, %v1916_v24  ;;  %v1931_v57 = vadd.f32 %v8266_v17, %v8186_v2  ;;  %v2112_v60 = vmax.f32 %v2080_v39, 0.0  ;;  %v6868_v2 = vld [vmem:[%s12644_s1 + $0x370] sm:$0xff]  ;;  %v10671_v24 = vpop.f32.mrf.mxu1 }
 0x302   : > { %v1700_v30 = vpop.f32.mrf.mxu0 }
 0x303   : > { %v1926_v20 = vadd.f32 %v1925_v8, %v1700_v30  ;;  %v2111_v54 = vmax.f32 %v2079_v36, 0.0  ;;  %v2082_v28 = vadd.f32 %v10655_v49, %v1931_v57  ;;  %v6883_v8 = vld [vmem:[%s12644_s1 + $0x3e8] sm:$0xff] }
 0x304   : > { %v8189_v6 = vpop.f32.mrf.mxu0 }
 0x305   : > { %v2081_v40 = vadd.f32 %v10655_v49, %v1926_v20  ;;  %v1941_v4 = vadd.f32 %v8269_v7, %v8189_v6  ;;  %8341 = vmatprep.mubr.f32.mxu0 %v2111_v54  ;;  %8421 = vmatprep.mubr.f32.mxu1 %v2111_v54  ;;  %v2114_v6 = vmax.f32 %v2082_v28, 0.0 }
 0x306   : > { %v1710_v36 = vpop.f32.mrf.mxu0  ;;  %8342 = vmatmul.mubr.f32.vlgmr.msra.gmra.mxu0 %v2112_v60  ;;  %8422 = vmatmul.mubr.f32.vlgmr.msra.gmra.mxu1 %v2112_v60  ;;  %v6882_v60 = vld [vmem:[%s12644_s1 + $0x3e0] sm:$0xff] }
 0x307   : > { %v1936_v39 = vadd.f32 %v1935_v11, %v1710_v36  ;;  %v2113_v30 = vmax.f32 %v2081_v40, 0.0  ;;  %8470 = vmatpush3.msra.mxu0 %v6885_v1  ;;  %8550 = vmatpush3.msra.mxu1 %v6869_v5  ;;  %v2084_v20 = vadd.f32 %v10655_v49, %v1941_v4  ;;  %v6867_v40 = vld [vmem:[%s12644_s1 + $0x368] sm:$0xff]  ;;  %v10681_v11 = vpop.f32.mrf.mxu1 }
 0x308   : > { %v8192_v57 = vpop.f32.mrf.mxu0  ;;  %8471 = vmatprep.subr.mxu0 %v6884_v48  ;;  %8551 = vmatprep.subr.mxu1 %v6868_v2 }
 0x309   : > { %v2083_v43 = vadd.f32 %v10655_v49, %v1936_v39  ;;  %v1951_v7 = vadd.f32 %v8272_v0, %v8192_v57  ;;  %8344 = vmatprep.mubr.f32.mxu0 %v2113_v30  ;;  %8424 = vmatprep.mubr.f32.mxu1 %v2113_v30  ;;  %v2116_v0 = vmax.f32 %v2084_v20, 0.0 }
 0x30a   : > { %v1720_v28 = vpop.f32.mrf.mxu0  ;;  %8345 = vmatmul.mubr.f32.gmra.mxu0 %v2114_v6  ;;  %8425 = vmatmul.mubr.f32.gmra.mxu1 %v2114_v6 }
 0x30b   : > { %v1946_v4 = vadd.f32 %v1945_v3, %v1720_v28  ;;  %v2115_v1 = vmax.f32 %v2083_v43, 0.0  ;;  %8472 = vmatpush3.msra.mxu0 %v6884_v48  ;;  %8552 = vmatpush3.msra.mxu1 %v6868_v2  ;;  %v2086_v5 = vadd.f32 %v10655_v49, %v1951_v7  ;;  %v6866_v3 = vld [vmem:[%s12644_s1 + $0x360] sm:$0xff]  ;;  %v10692_v48 = vpop.f32.mrf.mxu1  ;;  %v6881_v43 = vld [vmem:[%s12644_s1 + $0x3d8] sm:$0xff] }
 0x30c   : > { %v8195_v10 = vpop.f32.mrf.mxu0  ;;  %8473 = vmatprep.subr.mxu0 %v6883_v8  ;;  %8553 = vmatprep.subr.mxu1 %v6867_v40 }
 0x30d   : > { %v2085_v17 = vadd.f32 %v10655_v49, %v1946_v4  ;;  %v1961_v54 = vadd.f32 %v10636_v62, %v8195_v10  ;;  %8347 = vmatprep.mubr.f32.mxu0 %v2115_v1  ;;  %8427 = vmatprep.mubr.f32.mxu1 %v2115_v1  ;;  %v2118_v62 = vmax.f32 %v2086_v5, 0.0  ;;  %v10704_v7 = vpop.f32.mrf.mxu1  ;;  %v6880_v10 = vld [vmem:[%s12644_s1 + $0x3d0] sm:$0xff] }
 0x30e   : > { %v1730_v2 = vpop.f32.mrf.mxu0  ;;  %8348 = vmatmul.mubr.f32.gmra.mxu0 %v2116_v0  ;;  %8428 = vmatmul.mubr.f32.gmra.mxu1 %v2116_v0 }
 0x30f   : > { %v1956_v36 = vadd.f32 %v10638_v13, %v1730_v2  ;;  %v2117_v39 = vmax.f32 %v2085_v17, 0.0  ;;  %8474 = vmatpush3.msra.mxu0 %v6883_v8  ;;  %8554 = vmatpush3.msra.mxu1 %v6867_v40  ;;  %v2088_v30 = vadd.f32 %v10655_v49, %v1961_v54  ;;  %v6865_v13 = vld [vmem:[%s12644_s1 + $0x358] sm:$0xff]  ;;  %v10716_v17 = vpop.f32.mrf.mxu1 }
 0x310   : > { %v8198_v6 = vpop.f32.mrf.mxu0  ;;  %8475 = vmatprep.subr.mxu0 %v6882_v60  ;;  %8555 = vmatprep.subr.mxu1 %v6866_v3 }
 0x311   : > { %v2087_v20 = vadd.f32 %v10655_v49, %v1956_v36  ;;  %v1971_v57 = vadd.f32 %v10640_v59, %v8198_v6  ;;  %8350 = vmatprep.mubr.f32.mxu0 %v2117_v39  ;;  %8430 = vmatprep.mubr.f32.mxu1 %v2117_v39  ;;  %v2120_v59 = vmax.f32 %v2088_v30, 0.0  ;;  %v6879_v30 = vld [vmem:[%s12644_s1 + $0x3c8] sm:$0xff]  ;;  %v10728_v6 = vpop.f32.mrf.mxu1 }
 0x312   : > { %v1740_v8 = vpop.f32.mrf.mxu0  ;;  %8351 = vmatmul.mubr.f32.gmra.mxu0 %v2118_v62  ;;  %8431 = vmatmul.mubr.f32.gmra.mxu1 %v2118_v62 }
 0x313   : > { %v1966_v40 = vadd.f32 %v10642_v52, %v1740_v8  ;;  %v2119_v28 = vmax.f32 %v2087_v20, 0.0  ;;  %8476 = vmatpush3.msra.mxu0 %v6882_v60  ;;  %8556 = vmatpush3.msra.mxu1 %v6866_v3  ;;  %v2090_v4 = vadd.f32 %v10655_v49, %v1971_v57  ;;  %v6864_v52 = vld [vmem:[%s12644_s1 + $0x350] sm:$0xff] }
 0x314   : > { %v8201_v1 = vpop.f32.mrf.mxu0  ;;  %8477 = vmatprep.subr.mxu0 %v6881_v43  ;;  %8557 = vmatprep.subr.mxu1 %v6865_v13 }
 0x315   : > { %v2089_v0 = vadd.f32 %v10655_v49, %v1966_v40  ;;  %v1981_v5 = vadd.f32 %v10644_v58, %v8201_v1  ;;  %8353 = vmatprep.mubr.f32.mxu0 %v2119_v28  ;;  %8433 = vmatprep.mubr.f32.mxu1 %v2119_v28  ;;  %v2122_v58 = vmax.f32 %v2090_v4, 0.0  ;;  %v10740_v4 = vpop.f32.mrf.mxu1 }
 0x316   : > { %v1750_v54 = vpop.f32.mrf.mxu0  ;;  %8354 = vmatmul.mubr.f32.gmra.mxu0 %v2120_v59  ;;  %8434 = vmatmul.mubr.f32.gmra.mxu1 %v2120_v59  ;;  %v6878_v59 = vld [vmem:[%s12644_s1 + $0x3c0] sm:$0xff] }
 0x317   : > { %v1976_v60 = vadd.f32 %v10646_v47, %v1750_v54  ;;  %v2121_v3 = vmax.f32 %v2089_v0, 0.0  ;;  %8478 = vmatpush3.msra.mxu0 %v6881_v43  ;;  %8558 = vmatpush3.msra.mxu1 %v6865_v13  ;;  %v2092_v2 = vadd.f32 %v10655_v49, %v1981_v5  ;;  %v6863_v47 = vld [vmem:[%s12644_s1 + $0x348] sm:$0xff] }
 0x318   : > { %v8204_v36 = vpop.f32.mrf.mxu0  ;;  %8479 = vmatprep.subr.mxu0 %v6880_v10  ;;  %8559 = vmatprep.subr.mxu1 %v6864_v52 }
 0x319   : > { %v2091_v39 = vadd.f32 %v10655_v49, %v1976_v60  ;;  %v1991_v62 = vadd.f32 %v10648_v55, %v8204_v36  ;;  %8356 = vmatprep.mubr.f32.mxu0 %v2121_v3  ;;  %8436 = vmatprep.mubr.f32.mxu1 %v2121_v3  ;;  %v2124_v55 = vmax.f32 %v2092_v2, 0.0  ;;  %v6877_v3 = vld [vmem:[%s12644_s1 + $0x3b8] sm:$0xff] }
 0x31a   : > { %v1760_v20 = vpop.f32.mrf.mxu0  ;;  %8357 = vmatmul.mubr.f32.gmra.mxu0 %v2122_v58  ;;  %8437 = vmatmul.mubr.f32.gmra.mxu1 %v2122_v58  ;;  %v2035_v58 = vpop.f32.mrf.mxu1 }
 0x31b   : > { %v1986_v57 = vadd.f32 %v10650_v56, %v1760_v20  ;;  %v2123_v43 = vmax.f32 %v2091_v39, 0.0  ;;  %8480 = vmatpush3.msra.mxu0 %v6880_v10  ;;  %8560 = vmatpush3.msra.mxu1 %v6864_v52  ;;  %v2094_v13 = vadd.f32 %v10655_v49, %v1991_v62  ;;  %v6862_v56 = vld [vmem:[%s12644_s1 + $0x340] sm:$0xff] }
 0x31c   : > { %v8207_v8 = vpop.f32.mrf.mxu0  ;;  %8481 = vmatprep.subr.mxu0 %v6879_v30  ;;  %8561 = vmatprep.subr.mxu1 %v6863_v47 }
 0x31d   : > { %v2093_v40 = vadd.f32 %v10655_v49, %v1986_v57  ;;  %v2001_v28 = vadd.f32 %v10657_v27, %v8207_v8  ;;  %8359 = vmatprep.mubr.f32.mxu0 %v2123_v43  ;;  %8439 = vmatprep.mubr.f32.mxu1 %v2123_v43  ;;  %v2126_v27 = vmax.f32 %v2094_v13, 0.0  ;;  %v6876_v57 = vld [vmem:[%s12644_s1 + $0x3b0] sm:$0xff]  ;;  %v8302_v43 = vpop.f32.mrf.mxu1 }
 0x31e   : > { %v1770_v1 = vpop.f32.mrf.mxu0  ;;  %8360 = vmatmul.mubr.f32.gmra.mxu0 %v2124_v55  ;;  %8440 = vmatmul.mubr.f32.gmra.mxu1 %v2124_v55 }
 0x31f   : > { %v1996_v0 = vadd.f32 %v10661_v22, %v1770_v1  ;;  %v2125_v5 = vmax.f32 %v2093_v40, 0.0  ;;  %8482 = vmatpush3.msra.mxu0 %v6879_v30  ;;  %8562 = vmatpush3.msra.mxu1 %v6863_v47  ;;  %v2096_v10 = vadd.f32 %v10655_v49, %v2001_v28  ;;  %v6861_v22 = vld [vmem:[%s12644_s1 + $0x338] sm:$0xff]  ;;  %v6875_v1 = vld [vmem:[%s12644_s1 + $0x3a8] sm:$0xff] }
 0x320   : > { %v8210_v52 = vpop.f32.mrf.mxu0  ;;  %8483 = vmatprep.subr.mxu0 %v6878_v59  ;;  %8563 = vmatprep.subr.mxu1 %v6862_v56 }
 0x321   : > { %v2095_v54 = vadd.f32 %v10655_v49, %v1996_v0  ;;  %v2011_v60 = vadd.f32 %v10671_v24, %v8210_v52  ;;  %8362 = vmatprep.mubr.f32.mxu0 %v2125_v5  ;;  %8442 = vmatprep.mubr.f32.mxu1 %v2125_v5  ;;  %v2128_v24 = vmax.f32 %v2096_v10, 0.0  ;;  %v2045_v0 = vpop.f32.mrf.mxu1 }
 0x322   : > { %v1780_v2 = vpop.f32.mrf.mxu0  ;;  %8363 = vmatmul.mubr.f32.gmra.mxu0 %v2126_v27  ;;  %8443 = vmatmul.mubr.f32.gmra.mxu1 %v2126_v27 }
 0x323   : > { %v2006_v36 = vadd.f32 %v10681_v11, %v1780_v2  ;;  %v2127_v39 = vmax.f32 %v2095_v54, 0.0  ;;  %8484 = vmatpush3.msra.mxu0 %v6878_v59  ;;  %8564 = vmatpush3.msra.mxu1 %v6862_v56  ;;  %v2098_v62 = vadd.f32 %v10655_v49, %v2011_v60  ;;  %v6860_v11 = vld [vmem:[%s12644_s1 + $0x330] sm:$0xff]  ;;  %v8305_v2 = vpop.f32.mrf.mxu1 }
 0x324   : > { %v8213_v30 = vpop.f32.mrf.mxu0  ;;  %8485 = vmatprep.subr.mxu0 %v6877_v3  ;;  %8565 = vmatprep.subr.mxu1 %v6861_v22 }
 0x325   : > { %v2097_v47 = vadd.f32 %v10655_v49, %v2006_v36  ;;  %v2021_v20 = vadd.f32 %v10692_v48, %v8213_v30  ;;  %8365 = vmatprep.mubr.f32.mxu0 %v2127_v39  ;;  %8445 = vmatprep.mubr.f32.mxu1 %v2127_v39  ;;  %v2130_v48 = vmax.f32 %v2098_v62, 0.0 }
 0x326   : > { %v1790_v55 = vpop.f32.mrf.mxu0  ;;  %8366 = vmatmul.mubr.f32.gmra.mxu0 %v2128_v24  ;;  %8446 = vmatmul.mubr.f32.gmra.mxu1 %v2128_v24 }
 0x327   : > { %v2016_v13 = vadd.f32 %v10704_v7, %v1790_v55  ;;  %v2129_v8 = vmax.f32 %v2097_v47, 0.0  ;;  %8486 = vmatpush3.msra.mxu0 %v6877_v3  ;;  %8566 = vmatpush3.msra.mxu1 %v6861_v22  ;;  %v2100_v40 = vadd.f32 %v10655_v49, %v2021_v20  ;;  %v6859_v7 = vld [vmem:[%s12644_s1 + $0x328] sm:$0xff]  ;;  %v6874_v22 = vld [vmem:[%s12644_s1 + $0x3a0] sm:$0xff] }
 0x328   : > { %v8216_v28 = vpop.f32.mrf.mxu0  ;;  %8487 = vmatprep.subr.mxu0 %v6876_v57  ;;  %8567 = vmatprep.subr.mxu1 %v6860_v11 }
 0x329   : > { %v2099_v59 = vadd.f32 %v10655_v49, %v2016_v13  ;;  %v2031_v56 = vadd.f32 %v10716_v17, %v8216_v28  ;;  %8368 = vmatprep.mubr.f32.mxu0 %v2129_v8  ;;  %8448 = vmatprep.mubr.f32.mxu1 %v2129_v8  ;;  %v2132_v17 = vmax.f32 %v2100_v40, 0.0 }
 0x32a   : > { %v1800_v5 = vpop.f32.mrf.mxu0  ;;  %8369 = vmatmul.mubr.f32.gmra.mxu0 %v2130_v48  ;;  %8449 = vmatmul.mubr.f32.gmra.mxu1 %v2130_v48 }
 0x32b   : > { %v2026_v27 = vadd.f32 %v10728_v6, %v1800_v5  ;;  %v2131_v10 = vmax.f32 %v2099_v59, 0.0  ;;  %8488 = vmatpush3.msra.mxu0 %v6876_v57  ;;  %8568 = vmatpush3.msra.mxu1 %v6860_v11  ;;  %v2102_v52 = vadd.f32 %v10655_v49, %v2031_v56  ;;  %v6858_v6 = vld [vmem:[%s12644_s1 + $0x320] sm:$0xff]  ;;  %v6873_v57 = vld [vmem:[%s12644_s1 + $0x398] sm:$0xff]  ;;  %v2055_v11 = vpop.f32.mrf.mxu1  ;;  %v6872_v56 = vld [vmem:[%s12644_s1 + $0x390] sm:$0xff] }
 0x32c   : > { %v8219_v54 = vpop.f32.mrf.mxu0  ;;  %8489 = vmatprep.subr.mxu0 %v6875_v1  ;;  %8569 = vmatprep.subr.mxu1 %v6859_v7 }
 0x32d   : > { %v2101_v60 = vadd.f32 %v10655_v49, %v2026_v27  ;;  %v2041_v3 = vadd.f32 %v10740_v4, %v8219_v54  ;;  %8371 = vmatprep.mubr.f32.mxu0 %v2131_v10  ;;  %8451 = vmatprep.mubr.f32.mxu1 %v2131_v10  ;;  %v2134_v62 = vmax.f32 %v2102_v52, 0.0 }
 0x32e   : > { %v1810_v36 = vpop.f32.mrf.mxu0  ;;  %8372 = vmatmul.mubr.f32.gmra.mxu0 %v2132_v17  ;;  %8452 = vmatmul.mubr.f32.gmra.mxu1 %v2132_v17 }
 0x32f   : > { %v2036_v39 = vadd.f32 %v2035_v58, %v1810_v36  ;;  %v2133_v24 = vmax.f32 %v2101_v60, 0.0  ;;  %8490 = vmatpush3.msra.mxu0 %v6875_v1  ;;  %8570 = vmatpush3.msra.mxu1 %v6859_v7  ;;  %v2104_v4 = vadd.f32 %v10655_v49, %v2041_v3  ;;  %v6857_v58 = vld [vmem:[%s12644_s1 + $0x318] sm:$0xff]  ;;  %v6856_v1 = vld [vmem:[%s12644_s1 + $0x310] sm:$0xff]  ;;  %v8308_v7 = vpop.f32.mrf.mxu1  ;;  %v6871_v3 = vld [vmem:[%s12644_s1 + $0x388] sm:$0xff] }
 0x330   : > { %v8222_v30 = vpop.f32.mrf.mxu0  ;;  %8491 = vmatprep.subr.mxu0 %v6874_v22  ;;  %8571 = vmatprep.subr.mxu1 %v6858_v6 }
 0x331   : > { %v2103_v47 = vadd.f32 %v10655_v49, %v2036_v39  ;;  %v2051_v20 = vadd.f32 %v8302_v43, %v8222_v30  ;;  %8374 = vmatprep.mubr.f32.mxu0 %v2133_v24  ;;  %8454 = vmatprep.mubr.f32.mxu1 %v2133_v24  ;;  %v2136_v48 = vmax.f32 %v2104_v4, 0.0  ;;  %v6870_v30 = vld [vmem:[%s12644_s1 + $0x380] sm:$0xff] }
 0x332   : > { %v1820_v55 = vpop.f32.mrf.mxu0  ;;  %8375 = vmatmul.mubr.f32.gmra.mxu0 %v2134_v62  ;;  %8455 = vmatmul.mubr.f32.gmra.mxu1 %v2134_v62 }
 0x333   : > { %v2046_v13 = vadd.f32 %v2045_v0, %v1820_v55  ;;  %v2135_v8 = vmax.f32 %v2103_v47, 0.0  ;;  %8492 = vmatpush3.msra.mxu0 %v6874_v22  ;;  %8572 = vmatpush3.msra.mxu1 %v6858_v6  ;;  %v2106_v43 = vadd.f32 %v10655_v49, %v2051_v20  ;;  %v6855_v22 = vld [vmem:[%s12644_s1 + $0x308] sm:$0xff]  ;;  %v2065_v6 = vpop.f32.mrf.mxu1  ;;  %v6854_v47 = vld [vmem:[%s12644_s1 + $0x300] sm:$0xff] }
 0x334   : > { %v8225_v40 = vpop.f32.mrf.mxu0  ;;  %8493 = vmatprep.subr.mxu0 %v6873_v57  ;;  %8573 = vmatprep.subr.mxu1 %v6857_v58  ;;  %v6890_v55 = vld [vmem:[%s12644_s1 + $0x420] sm:$0xff] }
 0x335   : > { %v2105_v28 = vadd.f32 %v10655_v49, %v2046_v13  ;;  %v2061_v59 = vadd.f32 %v8305_v2, %v8225_v40  ;;  %8377 = vmatprep.mubr.f32.mxu0 %v2135_v8  ;;  %8457 = vmatprep.mubr.f32.mxu1 %v2135_v8  ;;  %v2138_v10 = vmax.f32 %v2106_v43, 0.0  ;;  %v12739_v13 = vld [vmem:[#allocation32_spill] sm:$0xff]  ;;  %v12740_v8 = vld [vmem:[#allocation15_spill] sm:$0xff] }
 0x336   : > { %v1830_v0 = vpop.f32.mrf.mxu0  ;;  %8378 = vmatmul.mubr.f32.gmra.mxu0 %v2136_v48  ;;  %8458 = vmatmul.mubr.f32.gmra.mxu1 %v2136_v48  ;;  %v12741_v48 = vld [vmem:[#allocation33_spill] sm:$0xff]  ;;  %v12742_v43 = vld [vmem:[#allocation16_spill] sm:$0xff]  ;;  %v6889_v40 = vld [vmem:[%s12644_s1 + $0x418] sm:$0xff] }
 0x337   : > { %v2056_v5 = vadd.f32 %v2055_v11, %v1830_v0  ;;  %v2137_v27 = vmax.f32 %v2105_v28, 0.0  ;;  %8494 = vmatpush3.msra.mxu0 %v6873_v57  ;;  %8574 = vmatpush3.msra.mxu1 %v6857_v58  ;;  %v2108_v17 = vadd.f32 %v10655_v49, %v2061_v59  ;;  %v6900_v58 = vld [vmem:[%s12644_s1 + $0x470] sm:$0xff]  ;;  %v12744_v59 = vld [vmem:[#allocation17_spill] sm:$0xff]  ;;  %v12747_v0 = vld [vmem:[#allocation36_spill] sm:$0xff] }
 0x338   : > { %v8228_v52 = vpop.f32.mrf.mxu0  ;;  %8495 = vmatprep.subr.mxu0 %v6872_v56  ;;  %8575 = vmatprep.subr.mxu1 %v6856_v1  ;;  %v12738_v11 = vld [vmem:[#allocation14_spill] sm:$0xff] }
 0x339   : > { %v2107_v54 = vadd.f32 %v10655_v49, %v2056_v5  ;;  %v2071_v60 = vadd.f32 %v8308_v7, %v8228_v52  ;;  %8380 = vmatprep.mubr.f32.mxu0 %v2137_v27  ;;  %8460 = vmatprep.mubr.f32.mxu1 %v2137_v27  ;;  %v2140_v24 = vmax.f32 %v2108_v17, 0.0  ;;  %v12743_v28 = vld [vmem:[#allocation34_spill] sm:$0xff]  ;;  %v12748_v5 = vld [vmem:[#allocation19_spill] sm:$0xff]  ;;  %v12749_v27 = vld [vmem:[#allocation37_spill] sm:$0xff] }
 0x33a   : > { %v1840_v2 = vpop.f32.mrf.mxu0  ;;  %8381 = vmatmul.mubr.f32.gmra.mxu0 %v2138_v10  ;;  %8461 = vmatmul.mubr.f32.gmra.mxu1 %v2138_v10  ;;  %v6888_v7 = vld [vmem:[%s12644_s1 + $0x410] sm:$0xff]  ;;  %v12750_v10 = vld [vmem:[#allocation20_spill] sm:$0xff]  ;;  %v6887_v17 = vld [vmem:[%s12644_s1 + $0x408] sm:$0xff] }
 0x33b   : > { %v2066_v36 = vadd.f32 %v2065_v6, %v1840_v2  ;;  %v2139_v39 = vmax.f32 %v2107_v54, 0.0  ;;  %8496 = vmatpush3.msra.mxu0 %v6872_v56  ;;  %8576 = vmatpush3.msra.mxu1 %v6856_v1  ;;  %v2110_v62 = vadd.f32 %v10655_v49, %v2071_v60  ;;  %v12745_v56 = vld [vmem:[#allocation35_spill] sm:$0xff]  ;;  %v12746_v1 = vld [vmem:[#allocation18_spill] sm:$0xff]  ;;  %v12752_v54 = vld [vmem:[#allocation21_spill] sm:$0xff] }
 0x33c   : > { %8497 = vmatprep.subr.mxu0 %v6871_v3  ;;  %8577 = vmatprep.subr.mxu1 %v6855_v22  ;;  %v12751_v52 = vld [vmem:[#allocation38_spill] sm:$0xff]  ;;  %v6886_v60 = vld [vmem:[%s12644_s1 + $0x400] sm:$0xff] }
 0x33d   : > { %v2109_v4 = vadd.f32 %v10655_v49, %v2066_v36  ;;  %8383 = vmatprep.mubr.f32.mxu0 %v2139_v39  ;;  %8463 = vmatprep.mubr.f32.mxu1 %v2139_v39  ;;  %v2142_v57 = vmax.f32 %v2110_v62, 0.0  ;;  %v6901_v49 = vld [vmem:[%s12644_s1 + $0x478] sm:$0xff]  ;;  %v6917_v6 = vld [vmem:[%s12644_s1 + $0x4f0] sm:$0xff] }
 0x33e   : > { %8384 = vmatmul.mubr.f32.gmra.mxu0 %v2140_v24  ;;  %8464 = vmatmul.mubr.f32.gmra.mxu1 %v2140_v24  ;;  %v6916_v24 = vld [vmem:[%s12644_s1 + $0x4e8] sm:$0xff] }
 0x33f   : > { %v2141_v20 = vmax.f32 %v2109_v4, 0.0  ;;  %8498 = vmatpush3.msra.mxu0 %v6871_v3  ;;  %8578 = vmatpush3.msra.mxu1 %v6855_v22  ;;  %v10929_v3 = vld [vmem:[%s12645_s2 + $0x4] ss:$0 sm:$0xff]  ;;  %v6918_v22 = vld [vmem:[%s12644_s1 + $0x4f8] sm:$0xff] }
 0x340   : > { %8499 = vmatprep.subr.mxu0 %v6870_v30  ;;  %8579 = vmatprep.subr.mxu1 %v6854_v47 }
 0x341   : > { %8386 = vmatprep.mubr.f32.mxu0 %v2141_v20  ;;  %8466 = vmatprep.mubr.f32.mxu1 %v2141_v20  ;;  %v6915_v20 = vld [vmem:[%s12644_s1 + $0x4e0] sm:$0xff] }
 0x342   : > { %8387 = vmatmul.mubr.f32.gmra.mxu0 %v2142_v57  ;;  %8467 = vmatmul.mubr.f32.gmra.mxu1 %v2142_v57 }
 0x343   : > { %8501 = vmatprep.mubr.f32.mxu0 %v10407_v18  ;;  %8581 = vmatprep.mubr.f32.mxu1 %v10279_v15  ;;  %v6899_v15 = vld [vmem:[%s12644_s1 + $0x468] sm:$0xff]  ;;  %v12726_v18 = vld [vmem:[#allocation8_spill] sm:$0xff] }
 0x344   : > { %8500 = vmatpush3.msra.mxu0 %v6870_v30  ;;  %8580 = vmatpush3.msra.mxu1 %v6854_v47 }
 0x345   : > { %8629 = vmatprep.subr.mxu0 %v6901_v49  ;;  %8709 = vmatprep.subr.mxu1 %v6918_v22 }
 0x346   : > { %8502 = vmatmul.mubr.f32.vlgmr.msra.gmra.mxu0 %v10410_v23  ;;  %8582 = vmatmul.mubr.f32.vlgmr.msra.gmra.mxu1 %v10282_v16  ;;  %v6898_v16 = vld [vmem:[%s12644_s1 + $0x460] sm:$0xff]  ;;  %v6893_v23 = vld [vmem:[%s12644_s1 + $0x438] sm:$0xff] }
 0x347   : > { %8504 = vmatprep.mubr.f32.mxu0 %v10415_v29  ;;  %8584 = vmatprep.mubr.f32.mxu1 %v10287_v19  ;;  %v6897_v19 = vld [vmem:[%s12644_s1 + $0x458] sm:$0xff]  ;;  %v12727_v29 = vld [vmem:[#allocation26_spill] sm:$0xff] }
 0x348   : > { %8630 = vmatpush3.msra.mxu0 %v6901_v49  ;;  %8710 = vmatpush3.msra.mxu1 %v6918_v22 }
 0x349   : > { %8631 = vmatprep.subr.mxu0 %v6900_v58  ;;  %8711 = vmatprep.subr.mxu1 %v6917_v6 }
 0x34a   : > { %8505 = vmatmul.mubr.f32.gmra.mxu0 %v10418_v33  ;;  %8585 = vmatmul.mubr.f32.gmra.mxu1 %v10290_v21  ;;  %v6896_v21 = vld [vmem:[%s12644_s1 + $0x450] sm:$0xff]  ;;  %v12728_v33 = vld [vmem:[#allocation9_spill] sm:$0xff] }
 0x34b   : > { %8507 = vmatprep.mubr.f32.mxu0 %v10423_v41  ;;  %8587 = vmatprep.mubr.f32.mxu1 %v10295_v25  ;;  %v12718_v25 = vld [vmem:[#allocation4_spill] sm:$0xff]  ;;  %v12729_v41 = vld [vmem:[#allocation27_spill] sm:$0xff] }
 0x34c   : > { %8632 = vmatpush3.msra.mxu0 %v6900_v58  ;;  %8712 = vmatpush3.msra.mxu1 %v6917_v6 }
 0x34d   : > { %8633 = vmatprep.subr.mxu0 %v6899_v15  ;;  %8713 = vmatprep.subr.mxu1 %v6916_v24 }
 0x34e   : > { %8508 = vmatmul.mubr.f32.gmra.mxu0 %v10426_v46  ;;  %8588 = vmatmul.mubr.f32.gmra.mxu1 %v10298_v26  ;;  %v6895_v26 = vld [vmem:[%s12644_s1 + $0x448] sm:$0xff]  ;;  %v12730_v46 = vld [vmem:[#allocation10_spill] sm:$0xff] }
 0x34f   : > { %8510 = vmatprep.mubr.f32.mxu0 %v10434_v12  ;;  %8590 = vmatprep.mubr.f32.mxu1 %v10303_v31  ;;  %v12719_v31 = vld [vmem:[#allocation22_spill] sm:$0xff] }
 0x350   : > { %8634 = vmatpush3.msra.mxu0 %v6899_v15  ;;  %v6892_v12 = vld [vmem:[%s12644_s1 + $0x430] sm:$0xff]  ;;  %8714 = vmatpush3.msra.mxu1 %v6916_v24 }
 0x351   : > { %8635 = vmatprep.subr.mxu0 %v6898_v16  ;;  %8715 = vmatprep.subr.mxu1 %v6915_v20 }
 0x352   : > { %8511 = vmatmul.mubr.f32.gmra.mxu0 %v10437_v14  ;;  %8591 = vmatmul.mubr.f32.gmra.mxu1 %v10306_v32  ;;  %v12720_v32 = vld [vmem:[#allocation5_spill] sm:$0xff]  ;;  %v12731_v14 = vld [vmem:[#allocation28_spill] sm:$0xff] }
 0x353   : > { %8513 = vmatprep.mubr.f32.mxu0 %v10445_v45  ;;  %8593 = vmatprep.mubr.f32.mxu1 %v10311_v35  ;;  %v12721_v35 = vld [vmem:[#allocation23_spill] sm:$0xff] }
 0x354   : > { %8636 = vmatpush3.msra.mxu0 %v6898_v16  ;;  %v12732_v45 = vld [vmem:[#allocation11_spill] sm:$0xff]  ;;  %8716 = vmatpush3.msra.mxu1 %v6915_v20 }
 0x355   : > { %8637 = vmatprep.subr.mxu0 %v6897_v19  ;;  %v6914_v16 = vld [vmem:[%s12644_s1 + $0x4d8] sm:$0xff] }
 0x356   : > { %8514 = vmatmul.mubr.f32.gmra.mxu0 %v10448_v50  ;;  %8594 = vmatmul.mubr.f32.gmra.mxu1 %v10314_v38  ;;  %v12722_v38 = vld [vmem:[#allocation6_spill] sm:$0xff]  ;;  %v12733_v50 = vld [vmem:[#allocation29_spill] sm:$0xff] }
 0x357   : > { %8516 = vmatprep.mubr.f32.mxu0 %v10456_v61  ;;  %8596 = vmatprep.mubr.f32.mxu1 %v10319_v42  ;;  %v6894_v42 = vld [vmem:[%s12644_s1 + $0x440] sm:$0xff] }
 0x358   : > { %8638 = vmatpush3.msra.mxu0 %v6897_v19  ;;  %v12734_v61 = vld [vmem:[#allocation12_spill] sm:$0xff]  ;;  %8717 = vmatprep.subr.mxu1 %v6914_v16 }
 0x359   : > { %8639 = vmatprep.subr.mxu0 %v6896_v21  ;;  %8718 = vmatpush3.msra.mxu1 %v6914_v16 }
 0x35a   : > { %8517 = vmatmul.mubr.f32.gmra.mxu0 %v10459_v63  ;;  %8597 = vmatmul.mubr.f32.gmra.mxu1 %v10322_v44  ;;  %v12723_v44 = vld [vmem:[#allocation24_spill] sm:$0xff]  ;;  %v6891_v63 = vld [vmem:[%s12644_s1 + $0x428] sm:$0xff] }
 0x35b   : > { %8519 = vmatprep.mubr.f32.mxu0 %v10467_v9  ;;  %8599 = vmatprep.mubr.f32.mxu1 %v10327_v37  ;;  %v12724_v37 = vld [vmem:[#allocation7_spill] sm:$0xff]  ;;  %v12735_v9 = vld [vmem:[#allocation30_spill] sm:$0xff] }
 0x35c   : > { %8640 = vmatpush3.msra.mxu0 %v6896_v21 }
 0x35d   : > { %8641 = vmatprep.subr.mxu0 %v6895_v26 }
 0x35e   : > { %8520 = vmatmul.mubr.f32.gmra.mxu0 %v10470_v53  ;;  %8600 = vmatmul.mubr.f32.gmra.mxu1 %v10330_v51  ;;  %v12725_v51 = vld [vmem:[#allocation25_spill] sm:$0xff] }
 0x35f   : > { %8522 = vmatprep.mubr.f32.mxu0 %v10478_v34  ;;  %8602 = vmatprep.mubr.f32.mxu1 %v12718_v25  ;;  %v12736_v53 = vld [vmem:[#allocation13_spill] sm:$0xff]  ;;  %v12737_v34 = vld [vmem:[#allocation31_spill] sm:$0xff] }
 0x360   : > { %8642 = vmatpush3.msra.mxu0 %v6895_v26 }
 0x361   : > { %8643 = vmatprep.subr.mxu0 %v6894_v42 }
 0x362   : > { %8523 = vmatmul.mubr.f32.gmra.mxu0 %v12719_v31  ;;  %8603 = vmatmul.mubr.f32.gmra.mxu1 %v12720_v32  ;;  %v6913_v31 = vld [vmem:[%s12644_s1 + $0x4d0] sm:$0xff] }
 0x363   : > { %8525 = vmatprep.mubr.f32.mxu0 %v12721_v35  ;;  %8605 = vmatprep.mubr.f32.mxu1 %v12722_v38 }
 0x364   : > { %8644 = vmatpush3.msra.mxu0 %v6894_v42  ;;  %8719 = vmatprep.subr.mxu1 %v6913_v31 }
 0x365   : > { %8645 = vmatprep.subr.mxu0 %v6893_v23  ;;  %8720 = vmatpush3.msra.mxu1 %v6913_v31 }
 0x366   : > { %8526 = vmatmul.mubr.f32.gmra.mxu0 %v12723_v44  ;;  %8606 = vmatmul.mubr.f32.gmra.mxu1 %v12724_v37  ;;  %v6912_v44 = vld [vmem:[%s12644_s1 + $0x4c8] sm:$0xff] }
 0x367   : > { %8528 = vmatprep.mubr.f32.mxu0 %v12725_v51  ;;  %8608 = vmatprep.mubr.f32.mxu1 %v12726_v18 }
 0x368   : > { %8646 = vmatpush3.msra.mxu0 %v6893_v23  ;;  %8721 = vmatprep.subr.mxu1 %v6912_v44 }
 0x369   : > { %8647 = vmatprep.subr.mxu0 %v6892_v12  ;;  %8722 = vmatpush3.msra.mxu1 %v6912_v44 }
 0x36a   : > { %8529 = vmatmul.mubr.f32.gmra.mxu0 %v12727_v29  ;;  %8609 = vmatmul.mubr.f32.gmra.mxu1 %v12728_v33  ;;  %v6911_v29 = vld [vmem:[%s12644_s1 + $0x4c0] sm:$0xff] }
 0x36b   : > { %8531 = vmatprep.mubr.f32.mxu0 %v12729_v41  ;;  %8611 = vmatprep.mubr.f32.mxu1 %v12730_v46 }
 0x36c   : > { %8648 = vmatpush3.msra.mxu0 %v6892_v12  ;;  %8723 = vmatprep.subr.mxu1 %v6911_v29 }
 0x36d   : > { %8649 = vmatprep.subr.mxu0 %v6891_v63  ;;  %8724 = vmatpush3.msra.mxu1 %v6911_v29 }
 0x36e   : > { %8532 = vmatmul.mubr.f32.gmra.mxu0 %v12731_v14  ;;  %8612 = vmatmul.mubr.f32.gmra.mxu1 %v12732_v45  ;;  %v6910_v14 = vld [vmem:[%s12644_s1 + $0x4b8] sm:$0xff] }
 0x36f   : > { %8534 = vmatprep.mubr.f32.mxu0 %v12733_v50  ;;  %8614 = vmatprep.mubr.f32.mxu1 %v12734_v61 }
 0x370   : > { %8650 = vmatpush3.msra.mxu0 %v6891_v63  ;;  %8725 = vmatprep.subr.mxu1 %v6910_v14 }
 0x371   : > { %8651 = vmatprep.subr.mxu0 %v6890_v55  ;;  %8726 = vmatpush3.msra.mxu1 %v6910_v14 }
 0x372   : > { %8535 = vmatmul.mubr.f32.gmra.mxu0 %v12735_v9  ;;  %8615 = vmatmul.mubr.f32.gmra.mxu1 %v12736_v53  ;;  %v6909_v9 = vld [vmem:[%s12644_s1 + $0x4b0] sm:$0xff] }
 0x373   : > { %8537 = vmatprep.mubr.f32.mxu0 %v12737_v34  ;;  %8617 = vmatprep.mubr.f32.mxu1 %v12738_v11 }
 0x374   : > { %8652 = vmatpush3.msra.mxu0 %v6890_v55  ;;  %8727 = vmatprep.subr.mxu1 %v6909_v9 }
 0x375   : > { %8653 = vmatprep.subr.mxu0 %v6889_v40  ;;  %8728 = vmatpush3.msra.mxu1 %v6909_v9 }
 0x376   : > { %8538 = vmatmul.mubr.f32.gmra.mxu0 %v12739_v13  ;;  %8618 = vmatmul.mubr.f32.gmra.mxu1 %v12740_v8  ;;  %v6908_v13 = vld [vmem:[%s12644_s1 + $0x4a8] sm:$0xff] }
 0x377   : > { %8540 = vmatprep.mubr.f32.mxu0 %v12741_v48  ;;  %8620 = vmatprep.mubr.f32.mxu1 %v12742_v43 }
 0x378   : > { %8654 = vmatpush3.msra.mxu0 %v6889_v40  ;;  %8729 = vmatprep.subr.mxu1 %v6908_v13 }
 0x379   : > { %8655 = vmatprep.subr.mxu0 %v6888_v7  ;;  %8730 = vmatpush3.msra.mxu1 %v6908_v13 }
 0x37a   : > { %8541 = vmatmul.mubr.f32.gmra.mxu0 %v12743_v28  ;;  %8621 = vmatmul.mubr.f32.gmra.mxu1 %v12744_v59  ;;  %v6907_v28 = vld [vmem:[%s12644_s1 + $0x4a0] sm:$0xff] }
 0x37b   : > { %8543 = vmatprep.mubr.f32.mxu0 %v12745_v56  ;;  %8623 = vmatprep.mubr.f32.mxu1 %v12746_v1 }
 0x37c   : > { %8656 = vmatpush3.msra.mxu0 %v6888_v7  ;;  %8731 = vmatprep.subr.mxu1 %v6907_v28 }
 0x37d   : > { %8657 = vmatprep.subr.mxu0 %v6887_v17  ;;  %8732 = vmatpush3.msra.mxu1 %v6907_v28 }
 0x37e   : > { %8544 = vmatmul.mubr.f32.gmra.mxu0 %v12747_v0  ;;  %8624 = vmatmul.mubr.f32.gmra.mxu1 %v12748_v5 }
 0x37f   : > { %8546 = vmatprep.mubr.f32.mxu0 %v12749_v27  ;;  %8626 = vmatprep.mubr.f32.mxu1 %v12750_v10  ;;  %v6906_v27 = vld [vmem:[%s12644_s1 + $0x498] sm:$0xff] }
 0x380   : > { %8658 = vmatpush3.msra.mxu0 %v6887_v17  ;;  %8733 = vmatprep.subr.mxu1 %v6906_v27 }
 0x381   : > { %8659 = vmatprep.subr.mxu0 %v6886_v60  ;;  %8734 = vmatpush3.msra.mxu1 %v6906_v27 }
 0x382   : > { %8547 = vmatmul.mubr.f32.gmra.mxu0 %v12751_v52  ;;  %8627 = vmatmul.mubr.f32.gmra.mxu1 %v12752_v54 }
 0x383   : > { %8660 = vmatpush3.msra.mxu0 %v6886_v60  ;;  %v6905_v60 = vld [vmem:[%s12644_s1 + $0x490] sm:$0xff] }
 0x384   : > { %8735 = vmatprep.subr.mxu1 %v6905_v60 }
 0x385   : > { %8736 = vmatpush3.msra.mxu1 %v6905_v60 }
 0x3c6   : > { %v10937_v2 = vpop.f32.mrf.mxu0  ;;  %v8423_v36 = vpop.f32.mrf.mxu1 }
 0x3c7   : > { %v2484_v39 = vadd.f32 %v8423_v36, %v10929_v3 }
 0x3c8   : > { %v10943_v62 = vpop.f32.mrf.mxu0  ;;  %v2478_v4 = vpop.f32.mrf.mxu1 }
 0x3c9   : > { %v6823_v30 = vmul.f32 -1.442695, %v2484_v39  ;;  %v2479_v47 = vadd.f32 %v10929_v3, %v2478_v4 }
 0x3ca   : > { %v10949_v57 = vpop.f32.mrf.mxu0  ;;  %v8426_v49 = vpop.f32.mrf.mxu1 }
 0x3cb   : > { %9295 = vpow2.f32 %v6823_v30  ;;  %v6822_v58 = vmul.f32 -1.442695, %v2479_v47  ;;  %v2494_v15 = vadd.f32 %v8426_v49, %v10929_v3 }
 0x3cc   : > { %v10955_v19 = vpop.f32.mrf.mxu0  ;;  %v2488_v21 = vpop.f32.mrf.mxu1 }
 0x3cd   : > { %9297 = vpow2.f32 %v6822_v58  ;;  %v6825_v25 = vmul.f32 -1.442695, %v2494_v15  ;;  %v2489_v26 = vadd.f32 %v10929_v3, %v2488_v21 }
 0x3ce   : > { %v10961_v32 = vpop.f32.mrf.mxu0  ;;  %v8429_v35 = vpop.f32.mrf.mxu1 }
 0x3cf   : > { %9299 = vpow2.f32 %v6825_v25  ;;  %v6824_v38 = vmul.f32 -1.442695, %v2489_v26  ;;  %v2504_v42 = vadd.f32 %v8429_v35, %v10929_v3 }
 0x3d0   : > { %v10967_v37 = vpop.f32.mrf.mxu0  ;;  %v2498_v51 = vpop.f32.mrf.mxu1 }
 0x3d1   : > { %v6827_v18 = vmul.f32 -1.442695, %v2504_v42  ;;  %v2499_v23 = vadd.f32 %v10929_v3, %v2498_v51  ;;  %9301 = vpow2.f32 %v6824_v38 }
 0x3d2   : > { %v10973_v33 = vpop.f32.mrf.mxu0  ;;  %v8432_v41 = vpop.f32.mrf.mxu1 }
 0x3d3   : > { %9303 = vpow2.f32 %v6827_v18  ;;  %v6826_v46 = vmul.f32 -1.442695, %v2499_v23  ;;  %v2514_v12 = vadd.f32 %v8432_v41, %v10929_v3 }
 0x3d4   : > { %v10979_v45 = vpop.f32.mrf.mxu0  ;;  %v2508_v50 = vpop.f32.mrf.mxu1 }
 0x3d5   : > { %9305 = vpow2.f32 %v6826_v46  ;;  %v6829_v61 = vmul.f32 -1.442695, %v2514_v12  ;;  %v2509_v63 = vadd.f32 %v10929_v3, %v2508_v50 }
 0x3d6   : > { %v10985_v53 = vpop.f32.mrf.mxu0  ;;  %v8435_v34 = vpop.f32.mrf.mxu1 }
 0x3d7   : > { %9307 = vpow2.f32 %v6829_v61  ;;  %v6828_v11 = vmul.f32 -1.442695, %v2509_v63  ;;  %v2524_v55 = vadd.f32 %v8435_v34, %v10929_v3 }
 0x3d8   : > { %v9296_v8 = vpop.eup %9295  ;;  %v2518_v48 = vpop.f32.mrf.mxu1 }
 0x3d9   : > { %v2734_v43 = vadd.f32 1.0, %v9296_v8  ;;  %v6831_v40 = vmul.f32 -1.442695, %v2524_v55  ;;  %9309 = vpow2.f32 %v6828_v11  ;;  %v10994_v56 = vpop.f32.mrf.mxu0  ;;  %v2519_v1 = vadd.f32 %v10929_v3, %v2518_v48 }
 0x3da   : > { %v9298_v59 = vpop.eup %9297  ;;  %v8438_v7 = vpop.f32.mrf.mxu1 }
 0x3db   : > { %9311 = vrcp.f32 %v2734_v43  ;;  %v2733_v0 = vadd.f32 1.0, %v9298_v59  ;;  %v2534_v5 = vadd.f32 %v8438_v7, %v10929_v3  ;;  %v6830_v17 = vmul.f32 -1.442695, %v2519_v1  ;;  %v11004_v22 = vpop.f32.mrf.mxu0 }
 0x3dc   : > { %v9300_v10 = vpop.eup %9299  ;;  %9313 = vpow2.f32 %v6831_v40  ;;  %v2528_v52 = vpop.f32.mrf.mxu1 }
 0x3dd   : > { %9315 = vrcp.f32 %v2733_v0  ;;  %v2736_v54 = vadd.f32 1.0, %v9300_v10  ;;  %v6833_v6 = vmul.f32 -1.442695, %v2534_v5  ;;  %v2529_v36 = vadd.f32 %v10929_v3, %v2528_v52  ;;  %v11008_v21 = vpop.f32.mrf.mxu0  ;;  %v6706_v5 = vld [vmem:[%s9850_s11 + $0x208] sm:$0xff] }
 0x3de   : > { %9317 = vpow2.f32 %v6830_v17  ;;  %v8441_v39 = vpop.f32.mrf.mxu1  ;;  %v9302_v24 = vpop.eup %9301  ;;  %v11024_v17 = vld [vmem:[%s12645_s2 + $0x3] ss:$0 sm:$0xff] }
 0x3df   : > { %v2544_v4 = vadd.f32 %v8441_v39, %v10929_v3  ;;  %v6832_v47 = vmul.f32 -1.442695, %v2529_v36  ;;  %9319 = vrcp.f32 %v2736_v54  ;;  %v2735_v16 = vadd.f32 1.0, %v9302_v24  ;;  %v11012_v51 = vpop.f32.mrf.mxu0  ;;  %v6705_v24 = vld [vmem:[%s9850_s11 + $0x200] sm:$0xff] }
 0x3e0   : > { %v9304_v30 = vpop.eup %9303  ;;  %v2538_v20 = vpop.f32.mrf.mxu1  ;;  %9321 = vpow2.f32 %v6833_v6 }
 0x3e1   : > { %v2738_v49 = vadd.f32 1.0, %v9304_v30  ;;  %v6835_v58 = vmul.f32 -1.442695, %v2544_v4  ;;  %v2539_v25 = vadd.f32 %v10929_v3, %v2538_v20  ;;  %9323 = vpow2.f32 %v6832_v47  ;;  %v11016_v13 = vpop.f32.mrf.mxu0 }
 0x3e2   : > { %v9306_v15 = vpop.eup %9305  ;;  %v8444_v26 = vpop.f32.mrf.mxu1 }
 0x3e3   : > { %v2554_v31 = vadd.f32 %v8444_v26, %v10929_v3  ;;  %9325 = vrcp.f32 %v2738_v49  ;;  %v2737_v42 = vadd.f32 1.0, %v9306_v15  ;;  %v6834_v18 = vmul.f32 -1.442695, %v2539_v25  ;;  %v11026_v54 = vpop.f32.mrf.mxu0 }
 0x3e4   : > { %v9308_v35 = vpop.eup %9307  ;;  %v2548_v38 = vpop.f32.mrf.mxu1  ;;  %9327 = vpow2.f32 %v6835_v58  ;;  %v2237_v15 = vadd.f32 %v10937_v2, %v11024_v17 }
 0x3e5   : > { %v6837_v44 = vmul.f32 -1.442695, %v2554_v31  ;;  %9329 = vrcp.f32 %v2735_v16  ;;  %v2549_v23 = vadd.f32 %v10929_v3, %v2548_v38  ;;  %v2740_v46 = vadd.f32 1.0, %v9308_v35  ;;  %v11036_v35 = vpop.f32.mrf.mxu0 }
 0x3e6   : > { %v8447_v29 = vpop.f32.mrf.mxu1  ;;  %v9310_v41 = vpop.eup %9309  ;;  %v2232_v16 = vadd.f32 %v11024_v17, %v10943_v62 }
 0x3e7   : > { %v2564_v12 = vadd.f32 %v8447_v29, %v10929_v3  ;;  %9331 = vpow2.f32 %v6837_v44  ;;  %v6836_v50 = vmul.f32 -1.442695, %v2549_v23  ;;  %v2739_v55 = vadd.f32 1.0, %v9310_v41 }
 0x3e8   : > { %v9312_v14 = vpop.eup %9311  ;;  %v2558_v61 = vpop.f32.mrf.mxu1  ;;  %9333 = vrcp.f32 %v2737_v42 }
 0x3e9   : > { %v9314_v63 = vpop.eup %9313  ;;  %v2830_v9 = vmul.f32 0.9, %v9312_v14  ;;  %v6839_v34 = vmul.f32 -1.442695, %v2564_v12  ;;  %9335 = vpow2.f32 %v6834_v18  ;;  %v2559_v8 = vadd.f32 %v10929_v3, %v2558_v61 }
 0x3ea   : > { %v9316_v11 = vpop.eup %9315  ;;  %v8450_v48 = vpop.f32.mrf.mxu1  ;;  %9337 = vrcp.f32 %v2740_v46  ;;  %v2742_v40 = vadd.f32 1.0, %v9314_v63 }
 0x3eb   : > { %v9318_v43 = vpop.eup %9317  ;;  %v2574_v28 = vadd.f32 %v8450_v48, %v10929_v3  ;;  %v2862_v59 = vadd.f32 0.1, %v2830_v9  ;;  %9339 = vpow2.f32 %v6836_v50  ;;  %v6838_v1 = vmul.f32 -1.442695, %v2559_v8 }
 0x3ec   : > { %v2568_v7 = vpop.f32.mrf.mxu1  ;;  %v2829_v0 = vmul.f32 0.9, %v9316_v11  ;;  %9341 = vpow2.f32 %v6839_v34  ;;  %v9320_v10 = vpop.eup %9319  ;;  %v2741_v52 = vadd.f32 1.0, %v9318_v43  ;;  %v2247_v43 = vadd.f32 %v10949_v57, %v11024_v17 }
 0x3ed   : > { %v6841_v27 = vmul.f32 -1.442695, %v2574_v28  ;;  %9343 = vrcp.f32 %v2739_v55  ;;  %v2569_v60 = vadd.f32 %v10929_v3, %v2568_v7  ;;  %v9322_v39 = vpop.eup %9321  ;;  %v2894_v30 = vmul.f32 %v6706_v5, %v2862_v59  ;;  %v11040_v34 = vpop.f32.mrf.mxu0  ;;  %v6707_v59 = vld [vmem:[%s9850_s11 + $0x210] sm:$0xff] }
 0x3ee   : > { %v8453_v6 = vpop.f32.mrf.mxu1  ;;  %v2861_v36 = vadd.f32 0.1, %v2829_v0  ;;  %9345 = vpow2.f32 %v6838_v1  ;;  %v9324_v4 = vpop.eup %9323  ;;  %v2744_v31 = vadd.f32 1.0, %v9322_v39  ;;  %v2832_v23 = vmul.f32 0.9, %v9320_v10  ;;  %v6708_v10 = vld [vmem:[%s9850_s11 + $0x218] sm:$0xff] }
 0x3ef   : > { %9347 = vrcp.f32 %v2742_v40  ;;  %v6840_v47 = vmul.f32 -1.442695, %v2569_v60  ;;  %v2584_v20 = vadd.f32 %v8453_v6, %v10929_v3  ;;  %v2926_v41 = vadd.f32 %v2894_v30, %v2237_v15 }
 0x3f0   : > { %v2578_v49 = vpop.f32.mrf.mxu1  ;;  %v9326_v58 = vpop.eup %9325  ;;  %9349 = vpow2.f32 %v6841_v27  ;;  %v2893_v44 = vmul.f32 %v6705_v24, %v2861_v36  ;;  %v2743_v2 = vadd.f32 1.0, %v9324_v4  ;;  %v2864_v40 = vadd.f32 0.1, %v2832_v23  ;;  %v6710_v23 = vld [vmem:[%s9850_s11 + $0x228] sm:$0xff] }
 0x3f1   : > { %v2579_v25 = vadd.f32 %v10929_v3, %v2578_v49  ;;  %v9328_v26 = vpop.eup %9327  ;;  %9351 = vrcp.f32 %v2741_v52  ;;  %v6843_v38 = vmul.f32 -1.442695, %v2584_v20  ;;  %v2834_v50 = vmul.f32 0.9, %v9326_v58  ;;  %v11050_v24 = vpop.f32.mrf.mxu0 }
 0x3f2   : > { %v8456_v42 = vpop.f32.mrf.mxu1  ;;  %v9330_v18 = vpop.eup %9329  ;;  %9353 = vpow2.f32 %v6840_v47  ;;  %v2925_v62 = vadd.f32 %v2893_v44, %v2232_v16  ;;  %v2746_v61 = vadd.f32 1.0, %v9328_v26  ;;  %v2242_v60 = vadd.f32 %v11024_v17, %v10955_v19 }
 0x3f3   : > { %v6842_v29 = vmul.f32 -1.442695, %v2579_v25  ;;  %v2594_v46 = vadd.f32 %v8456_v42, %v10929_v3  ;;  %9355 = vpow2.f32 %v6843_v38  ;;  %v2831_v8 = vmul.f32 0.9, %v9330_v18 }
 0x3f4   : > { %v2588_v12 = vpop.f32.mrf.mxu1  ;;  %v9332_v14 = vpop.eup %9331  ;;  %9357 = vrcp.f32 %v2744_v31  ;;  %8661 = vmatprep.mubr.f32.mxu0 %v2925_v62  ;;  %v2866_v6 = vadd.f32 0.1, %v2834_v50  ;;  %v2896_v15 = vmul.f32 %v6708_v10, %v2864_v40  ;;  %v6709_v62 = vld [vmem:[%s9850_s11 + $0x220] sm:$0xff] }
 0x3f5   : > { %v2589_v63 = vadd.f32 %v10929_v3, %v2588_v12  ;;  %v9334_v9 = vpop.eup %9333  ;;  %v6845_v11 = vmul.f32 -1.442695, %v2594_v46  ;;  %v2748_v28 = vadd.f32 1.0, %v9332_v14  ;;  %9359 = vpow2.f32 %v6842_v29  ;;  %8662 = vmatmul.mubr.f32.vlgmr.msra.gmra.mxu0 %v2926_v41  ;;  %v11056_v46 = vpop.f32.mrf.mxu0 }
 0x3f6   : > { %v8459_v55 = vpop.f32.mrf.mxu1  ;;  %v9336_v48 = vpop.eup %9335  ;;  %9361 = vrcp.f32 %v2743_v2  ;;  %v2863_v5 = vadd.f32 0.1, %v2831_v8  ;;  %v2928_v44 = vadd.f32 %v2896_v15, %v2247_v43  ;;  %v2833_v18 = vmul.f32 0.9, %v9334_v9 }
 0x3f7   : > { %v9338_v1 = vpop.eup %9337  ;;  %v6844_v7 = vmul.f32 -1.442695, %v2589_v63  ;;  %v2604_v0 = vadd.f32 %v8459_v55, %v10929_v3  ;;  %9363 = vrcp.f32 %v2746_v61  ;;  %v2745_v39 = vadd.f32 1.0, %v9336_v48 }
 0x3f8   : > { %v2598_v27 = vpop.f32.mrf.mxu1  ;;  %v9340_v52 = vpop.eup %9339  ;;  %9365 = vpow2.f32 %v6845_v11  ;;  %v2895_v30 = vmul.f32 %v6707_v59, %v2863_v5  ;;  %v2836_v49 = vmul.f32 0.9, %v9338_v1  ;;  %v2257_v41 = vadd.f32 %v10961_v32, %v11024_v17  ;;  %v6712_v5 = vld [vmem:[%s9850_s11 + $0x238] sm:$0xff] }
 0x3f9   : > { %v2599_v57 = vadd.f32 %v10929_v3, %v2598_v27  ;;  %v9342_v36 = vpop.eup %9341  ;;  %v6847_v4 = vmul.f32 -1.442695, %v2604_v0  ;;  %9367 = vrcp.f32 %v2748_v28  ;;  %v2747_v19 = vadd.f32 1.0, %v9340_v52  ;;  %v11062_v59 = vpop.f32.mrf.mxu0 }
 0x3fa   : > { %v8462_v47 = vpop.f32.mrf.mxu1  ;;  %v9344_v20 = vpop.eup %9343  ;;  %9369 = vpow2.f32 %v6844_v7  ;;  %v2927_v25 = vadd.f32 %v2895_v30, %v2242_v60  ;;  %v2750_v42 = vadd.f32 1.0, %v9342_v36  ;;  %v2865_v61 = vadd.f32 0.1, %v2833_v18 }
 0x3fb   : > { %v6846_v58 = vmul.f32 -1.442695, %v2599_v57  ;;  %v9346_v16 = vpop.eup %9345  ;;  %v2614_v26 = vadd.f32 %v8462_v47, %v10929_v3  ;;  %9371 = vpow2.f32 %v6847_v4  ;;  %v2252_v11 = vadd.f32 %v11024_v17, %v10967_v37 }
 0x3fc   : > { %v2608_v31 = vpop.f32.mrf.mxu1  ;;  %v9348_v38 = vpop.eup %9347  ;;  %v2749_v2 = vadd.f32 1.0, %v9346_v16  ;;  %8664 = vmatprep.mubr.f32.mxu0 %v2927_v25  ;;  %v2868_v32 = vadd.f32 0.1, %v2836_v49  ;;  %v2898_v55 = vmul.f32 %v6710_v23, %v2866_v6  ;;  %v2897_v43 = vmul.f32 %v6709_v62, %v2865_v61  ;;  %v6711_v6 = vld [vmem:[%s9850_s11 + $0x230] sm:$0xff]  ;;  %v6713_v62 = vld [vmem:[%s9850_s11 + $0x240] sm:$0xff] }
 0x3fd   : > { %v9350_v29 = vpop.eup %9349  ;;  %9373 = vpow2.f32 %v6846_v58  ;;  %8665 = vmatmul.mubr.f32.gmra.mxu0 %v2928_v44  ;;  %v6849_v50 = vmul.f32 -1.442695, %v2614_v26  ;;  %v2609_v63 = vadd.f32 %v10929_v3, %v2608_v31  ;;  %v2835_v0 = vmul.f32 0.9, %v9344_v20 }
 0x3fe   : > { %v8465_v12 = vpop.f32.mrf.mxu1  ;;  %v9352_v14 = vpop.eup %9351  ;;  %9375 = vrcp.f32 %v2745_v39  ;;  %v2752_v48 = vadd.f32 1.0, %v9350_v29  ;;  %v2838_v10 = vmul.f32 0.9, %v9348_v38  ;;  %v2929_v52 = vadd.f32 %v2897_v43, %v2252_v11 }
 0x3ff   : > { %v9354_v9 = vpop.eup %9353  ;;  %9377 = vrcp.f32 %v2747_v19  ;;  %v6848_v40 = vmul.f32 -1.442695, %v2609_v63  ;;  %v2624_v7 = vadd.f32 %v8465_v12, %v10929_v3  ;;  %v2930_v60 = vadd.f32 %v2898_v55, %v2257_v41  ;;  %v11072_v19 = vpop.f32.mrf.mxu0 }
 0x400   : > { %v2618_v8 = vpop.f32.mrf.mxu1  ;;  %9379 = vrcp.f32 %v2750_v42  ;;  %v9356_v28 = vpop.eup %9355  ;;  %v2751_v1 = vadd.f32 1.0, %v9354_v9  ;;  %v2867_v4 = vadd.f32 0.1, %v2835_v0  ;;  %8667 = vmatprep.mubr.f32.mxu0 %v2929_v52  ;;  %v2900_v20 = vmul.f32 %v6712_v5, %v2868_v32 }
 0x401   : > { %9381 = vrcp.f32 %v2749_v2  ;;  %v9358_v37 = vpop.eup %9357  ;;  %v2754_v36 = vadd.f32 1.0, %v9356_v28  ;;  %v6851_v39 = vmul.f32 -1.442695, %v2624_v7  ;;  %v2619_v49 = vadd.f32 %v10929_v3, %v2618_v8  ;;  %8668 = vmatmul.mubr.f32.gmra.mxu0 %v2930_v60  ;;  %v11078_v61 = vpop.f32.mrf.mxu0 }
 0x402   : > { %v8468_v27 = vpop.f32.mrf.mxu1  ;;  %9383 = vpow2.f32 %v6849_v50  ;;  %v9360_v57 = vpop.eup %9359  ;;  %v2267_v15 = vadd.f32 %v10973_v33, %v11024_v17  ;;  %v2262_v16 = vadd.f32 %v11024_v17, %v10979_v45  ;;  %v2899_v25 = vmul.f32 %v6711_v6, %v2867_v4  ;;  %v6714_v45 = vld [vmem:[%s9850_s11 + $0x248] sm:$0xff] }
 0x403   : > { %9385 = vpow2.f32 %v6848_v40  ;;  %v9362_v30 = vpop.eup %9361  ;;  %v2753_v47 = vadd.f32 1.0, %v9360_v57  ;;  %v2870_v38 = vadd.f32 0.1, %v2838_v10  ;;  %v2840_v42 = vmul.f32 0.9, %v9358_v37  ;;  %v11087_v52 = vpop.f32.mrf.mxu0  ;;  %v6715_v57 = vld [vmem:[%s9850_s11 + $0x250] sm:$0xff] }
 0x404   : > { %9387 = vrcp.f32 %v2752_v48  ;;  %v9364_v58 = vpop.eup %9363  ;;  %v2628_v26 = vpop.f32.mrf.mxu1  ;;  %v6850_v44 = vmul.f32 -1.442695, %v2619_v49  ;;  %v2931_v23 = vadd.f32 %v2899_v25, %v2262_v16  ;;  %v2634_v33 = vadd.f32 %v8468_v27, %v10929_v3  ;;  %v6717_v25 = vld [vmem:[%s9850_s11 + $0x260] sm:$0xff] }
 0x405   : > { %9389 = vrcp.f32 %v2751_v1  ;;  %v9366_v31 = vpop.eup %9365  ;;  %v2837_v29 = vmul.f32 0.9, %v9352_v14  ;;  %v2932_v2 = vadd.f32 %v2900_v20, %v2267_v15  ;;  %v2629_v12 = vadd.f32 %v10929_v3, %v2628_v26  ;;  %v6716_v1 = vld [vmem:[%s9850_s11 + $0x258] sm:$0xff]  ;;  %v6718_v26 = vld [vmem:[%s9850_s11 + $0x268] sm:$0xff] }
 0x406   : > { %9391 = vpow2.f32 %v6851_v39  ;;  %v9368_v18 = vpop.eup %9367  ;;  %v2756_v63 = vadd.f32 1.0, %v9366_v31  ;;  %8670 = vmatprep.mubr.f32.mxu0 %v2931_v23  ;;  %v2272_v14 = vadd.f32 %v11024_v17, %v10994_v56  ;;  %v2872_v55 = vadd.f32 0.1, %v2840_v42 }
 0x407   : > { %9393 = vrcp.f32 %v2754_v36  ;;  %v9370_v41 = vpop.eup %9369  ;;  %v2869_v11 = vadd.f32 0.1, %v2837_v29  ;;  %8671 = vmatmul.mubr.f32.gmra.mxu0 %v2932_v2  ;;  %v6853_v8 = vmul.f32 -1.442695, %v2634_v33  ;;  %v2902_v48 = vmul.f32 %v6714_v45, %v2870_v38  ;;  %v11096_v38 = vpop.f32.mrf.mxu0  ;;  %v6719_v45 = vld [vmem:[%s9850_s11 + $0x270] sm:$0xff] }
 0x408   : > { %9395 = vrcp.f32 %v2753_v47  ;;  %v9372_v50 = vpop.eup %9371  ;;  %v2755_v9 = vadd.f32 1.0, %v9370_v41  ;;  %v2842_v40 = vmul.f32 0.9, %v9364_v58  ;;  %v2277_v0 = vadd.f32 %v10985_v53, %v11024_v17 }
 0x409   : > { %9397 = vpow2.f32 %v6850_v44  ;;  %v2901_v28 = vmul.f32 %v6713_v62, %v2869_v11  ;;  %v2287_v5 = vadd.f32 %v11004_v22, %v11024_v17  ;;  %v6852_v27 = vmul.f32 -1.442695, %v2629_v12 }
 0x40a   : > { %v9374_v32 = vpop.eup %9373  ;;  %9399 = vrcp.f32 %v2755_v9  ;;  %v2839_v56 = vmul.f32 0.9, %v9362_v30  ;;  %v2844_v10 = vmul.f32 0.9, %v9368_v18  ;;  %v2758_v60 = vadd.f32 1.0, %v9372_v50  ;;  %v6720_v50 = vld [vmem:[%s9850_s11 + $0x278] sm:$0xff] }
 0x40b   : > { %v9376_v43 = vpop.eup %9375  ;;  %v2757_v3 = vadd.f32 1.0, %v9374_v32  ;;  %9401 = vrcp.f32 %v2756_v63  ;;  %v2933_v6 = vadd.f32 %v2901_v28, %v2272_v14  ;;  %v2934_v39 = vadd.f32 %v2902_v48, %v2277_v0  ;;  %v11104_v48 = vpop.f32.mrf.mxu0 }
 0x40c   : > { %v9378_v7 = vpop.eup %9377  ;;  %9403 = vpow2.f32 %v6853_v8  ;;  %v2871_v4 = vadd.f32 0.1, %v2839_v56  ;;  %v2904_v53 = vmul.f32 %v6716_v1, %v2872_v55  ;;  %v2282_v22 = vadd.f32 %v11024_v17, %v11008_v21 }
 0x40d   : > { %v9380_v37 = vpop.eup %9379  ;;  %v2874_v30 = vadd.f32 0.1, %v2842_v40  ;;  %9405 = vrcp.f32 %v2757_v3  ;;  %8673 = vmatprep.mubr.f32.mxu0 %v2933_v6  ;;  %v2841_v49 = vmul.f32 0.9, %v9376_v43  ;;  %v2292_v58 = vadd.f32 %v11024_v17, %v11016_v13  ;;  %v6721_v3 = vld [vmem:[%s9850_s11 + $0x280] sm:$0xff]  ;;  %v6722_v6 = vld [vmem:[%s9850_s11 + $0x288] sm:$0xff] }
 0x40e   : > { %v9382_v36 = vpop.eup %9381  ;;  %v2846_v15 = vmul.f32 0.9, %v9380_v37  ;;  %9407 = vpow2.f32 %v6852_v27  ;;  %8674 = vmatmul.mubr.f32.gmra.mxu0 %v2934_v39  ;;  %v2903_v16 = vmul.f32 %v6715_v57, %v2871_v4  ;;  %v2843_v44 = vmul.f32 0.9, %v9378_v7  ;;  %v6723_v57 = vld [vmem:[%s9850_s11 + $0x290] sm:$0xff]  ;;  %v11113_v39 = vpop.f32.mrf.mxu0 }
 0x40f   : > { %v9384_v47 = vpop.eup %9383  ;;  %9409 = vrcp.f32 %v2758_v60  ;;  %v2873_v42 = vadd.f32 0.1, %v2841_v49  ;;  %v2876_v23 = vadd.f32 0.1, %v2844_v10  ;;  %v2936_v13 = vadd.f32 %v2904_v53, %v2287_v5 }
 0x410   : > { %v9386_v20 = vpop.eup %9385  ;;  %v2760_v33 = vadd.f32 1.0, %v9384_v47  ;;  %v2935_v29 = vadd.f32 %v2903_v16, %v2282_v22  ;;  %v2906_v62 = vmul.f32 %v6718_v26, %v2874_v30  ;;  %v2875_v12 = vadd.f32 0.1, %v2843_v44 }
 0x411   : > { %v9388_v31 = vpop.eup %9387  ;;  %v2759_v21 = vadd.f32 1.0, %v9386_v20  ;;  %v2905_v2 = vmul.f32 %v6717_v25, %v2873_v42  ;;  %v2297_v9 = vadd.f32 %v11012_v51, %v11024_v17  ;;  %v2302_v11 = vadd.f32 %v11024_v17, %v11036_v35 }
 0x412   : > { %v9390_v18 = vpop.eup %9389  ;;  %8676 = vmatprep.mubr.f32.mxu0 %v2935_v29  ;;  %v2845_v32 = vmul.f32 0.9, %v9382_v36  ;;  %v2878_v55 = vadd.f32 0.1, %v2846_v15  ;;  %v2848_v8 = vmul.f32 0.9, %v9388_v31  ;;  %v2907_v40 = vmul.f32 %v6719_v45, %v2875_v12 }
 0x413   : > { %v9392_v41 = vpop.eup %9391  ;;  %9411 = vrcp.f32 %v2759_v21  ;;  %8677 = vmatmul.mubr.f32.gmra.mxu0 %v2936_v13  ;;  %v2937_v43 = vadd.f32 %v2905_v2, %v2292_v58  ;;  %v2908_v51 = vmul.f32 %v6720_v50, %v2876_v23  ;;  %v2938_v35 = vadd.f32 %v2906_v62, %v2297_v9  ;;  %v6725_v58 = vld [vmem:[%s9850_s11 + $0x2a0] sm:$0xff]  ;;  %v6724_v21 = vld [vmem:[%s9850_s11 + $0x298] sm:$0xff]  ;;  %v6727_v12 = vld [vmem:[%s9850_s11 + $0x2b0] sm:$0xff] }
 0x414   : > { %v9394_v63 = vpop.eup %9393  ;;  %9413 = vrcp.f32 %v2760_v33  ;;  %v2762_v1 = vadd.f32 1.0, %v9392_v41  ;;  %v2877_v7 = vadd.f32 0.1, %v2845_v32  ;;  %v2939_v5 = vadd.f32 %v2907_v40, %v2302_v11  ;;  %v11121_v33 = vpop.f32.mrf.mxu0  ;;  %v6726_v9 = vld [vmem:[%s9850_s11 + $0x2a8] sm:$0xff] }
 0x415   : > { %v9396_v14 = vpop.eup %9395  ;;  %8679 = vmatprep.mubr.f32.mxu0 %v2937_v43  ;;  %v2847_v27 = vmul.f32 0.9, %v9390_v18  ;;  %v2307_v37 = vadd.f32 %v11026_v54, %v11024_v17  ;;  %v2312_v10 = vadd.f32 %v11024_v17, %v11050_v24  ;;  %v2850_v36 = vmul.f32 0.9, %v9394_v63 }
 0x416   : > { %v9398_v28 = vpop.eup %9397  ;;  %v2909_v60 = vmul.f32 %v6721_v3, %v2877_v7  ;;  %v2849_v53 = vmul.f32 0.9, %v9396_v14  ;;  %v2880_v22 = vadd.f32 0.1, %v2848_v8  ;;  %v2910_v24 = vmul.f32 %v6722_v6, %v2878_v55  ;;  %v2361_v14 = vpop.f32.mrf.mxu0 }
 0x417   : > { %v2761_v0 = vadd.f32 1.0, %v9398_v28  ;;  %v9400_v56 = vpop.eup %9399  ;;  %8680 = vmatmul.mubr.f32.gmra.mxu0 %v2938_v35  ;;  %v2879_v4 = vadd.f32 0.1, %v2847_v27  ;;  %v2940_v54 = vadd.f32 %v2908_v51, %v2307_v37  ;;  %v2322_v26 = vadd.f32 %v11024_v17, %v11062_v59 }
 0x418   : > { %v9402_v47 = vpop.eup %9401  ;;  %8682 = vmatprep.mubr.f32.mxu0 %v2939_v5  ;;  %v2941_v30 = vadd.f32 %v2909_v60, %v2312_v10  ;;  %v2881_v15 = vadd.f32 0.1, %v2849_v53  ;;  %v2851_v16 = vmul.f32 0.9, %v9400_v56  ;;  %v2317_v44 = vadd.f32 %v11040_v34, %v11024_v17  ;;  %v8385_v35 = vpop.f32.mrf.mxu0 }
 0x419   : > { %9415 = vrcp.f32 %v2761_v0  ;;  %v9404_v49 = vpop.eup %9403  ;;  %v2911_v20 = vmul.f32 %v6723_v57, %v2879_v4  ;;  %v2882_v18 = vadd.f32 0.1, %v2850_v36  ;;  %v2852_v23 = vmul.f32 0.9, %v9402_v47  ;;  %v6728_v0 = vld [vmem:[%s9850_s11 + $0x2b8] sm:$0xff]  ;;  %v6731_v4 = vld [vmem:[%s9850_s11 + $0x2d0] sm:$0xff] }
 0x41a   : > { %9417 = vrcp.f32 %v2762_v1  ;;  %v9406_v25 = vpop.eup %9405  ;;  %v2764_v31 = vadd.f32 1.0, %v9404_v49  ;;  %v2913_v41 = vmul.f32 %v6725_v58, %v2881_v15  ;;  %v2883_v2 = vadd.f32 0.1, %v2851_v16  ;;  %v6733_v16 = vld [vmem:[%s9850_s11 + $0x2e0] sm:$0xff] }
 0x41b   : > { %v9408_v42 = vpop.eup %9407  ;;  %8683 = vmatmul.mubr.f32.gmra.mxu0 %v2940_v54  ;;  %v2943_v45 = vadd.f32 %v2911_v20, %v2322_v26  ;;  %v2942_v59 = vadd.f32 %v2910_v24, %v2317_v44  ;;  %v2912_v62 = vmul.f32 %v6724_v21, %v2880_v22  ;;  %v2853_v50 = vmul.f32 0.9, %v9406_v25  ;;  %v2371_v22 = vpop.f32.mrf.mxu0  ;;  %v6732_v26 = vld [vmem:[%s9850_s11 + $0x2d8] sm:$0xff] }
 0x41c   : > { %v9410_v29 = vpop.eup %9409  ;;  %v2763_v13 = vadd.f32 1.0, %v9408_v42  ;;  %8685 = vmatprep.mubr.f32.mxu0 %v2941_v30  ;;  %9419 = vrcp.f32 %v2764_v31  ;;  %v2332_v34 = vadd.f32 %v11024_v17, %v11078_v61  ;;  %v2327_v11 = vadd.f32 %v11056_v46, %v11024_v17  ;;  %v6729_v61 = vld [vmem:[%s9850_s11 + $0x2c0] sm:$0xff] }
 0x41d   : > { %v2854_v32 = vmul.f32 0.9, %v9410_v29  ;;  %v2915_v8 = vmul.f32 %v6727_v12, %v2883_v2  ;;  %v2885_v43 = vadd.f32 0.1, %v2853_v50  ;;  %v2884_v28 = vadd.f32 0.1, %v2852_v23  ;;  %v8388_v21 = vpop.f32.mrf.mxu0 }
 0x41e   : > { %9421 = vrcp.f32 %v2763_v13  ;;  %v2945_v55 = vadd.f32 %v2913_v41, %v2332_v34  ;;  %v2944_v1 = vadd.f32 %v2912_v62, %v2327_v11  ;;  %v2914_v51 = vmul.f32 %v6726_v9, %v2882_v18  ;;  %v6735_v41 = vld [vmem:[%s9850_s11 + $0x2f0] sm:$0xff] }
 0x41f   : > { %8686 = vmatmul.mubr.f32.gmra.mxu0 %v2942_v59  ;;  %v2342_v7 = vadd.f32 %v11024_v17, %v11096_v38  ;;  %v2337_v46 = vadd.f32 %v11072_v19, %v11024_v17  ;;  %v2886_v27 = vadd.f32 0.1, %v2854_v32  ;;  %v2917_v37 = vmul.f32 %v6729_v61, %v2885_v43  ;;  %v6730_v19 = vld [vmem:[%s9850_s11 + $0x2c8] sm:$0xff] }
 0x420   : > { %v9412_v63 = vpop.eup %9411  ;;  %8688 = vmatprep.mubr.f32.mxu0 %v2943_v45  ;;  %v2916_v36 = vmul.f32 %v6728_v0, %v2884_v28  ;;  %v2352_v53 = vadd.f32 %v11024_v17, %v11113_v39  ;;  %v2347_v47 = vadd.f32 %v11087_v52, %v11024_v17  ;;  %v2362_v39 = vadd.f32 %v11024_v17, %v2361_v14  ;;  %v6734_v59 = vld [vmem:[%s9850_s11 + $0x2e8] sm:$0xff]  ;;  %v6736_v14 = vld [vmem:[%s9850_s11 + $0x2f8] sm:$0xff] }
 0x421   : > { %v2855_v40 = vmul.f32 0.9, %v9412_v63  ;;  %v9414_v3 = vpop.eup %9413  ;;  %v2947_v56 = vadd.f32 %v2915_v8, %v2342_v7  ;;  %v2946_v57 = vadd.f32 %v2914_v51, %v2337_v46  ;;  %v2918_v15 = vmul.f32 %v6730_v19, %v2886_v27  ;;  %v6903_v7 = vld [vmem:[%s12644_s1 + $0x480] sm:$0xff] }
 0x422   : > { %v2856_v6 = vmul.f32 0.9, %v9414_v3  ;;  %v2949_v54 = vadd.f32 %v2917_v37, %v2352_v53  ;;  %v2948_v58 = vadd.f32 %v2916_v36, %v2347_v47  ;;  %v2357_v52 = vadd.f32 %v11104_v48, %v11024_v17  ;;  %v2381_v48 = vpop.f32.mrf.mxu0  ;;  %v11197_v53 = vpop.f32.mrf.mxu1 }
 0x423   : > { %8689 = vmatmul.mubr.f32.gmra.mxu0 %v2944_v1  ;;  %v2887_v10 = vadd.f32 0.1, %v2855_v40  ;;  %v2372_v2 = vadd.f32 %v11024_v17, %v2371_v22  ;;  %v2367_v12 = vadd.f32 %v11121_v33, %v11024_v17  ;;  %v2382_v32 = vadd.f32 %v11024_v17, %v2381_v48  ;;  %v6904_v1 = vld [vmem:[%s12644_s1 + $0x488] sm:$0xff]  ;;  %v6922_v48 = vld [vmem:[%s12644_s1 + $0x510] sm:$0xff] }
 0x424   : > { %8691 = vmatprep.mubr.f32.mxu0 %v2945_v55  ;;  %v2888_v24 = vadd.f32 0.1, %v2856_v6  ;;  %v2950_v13 = vadd.f32 %v2918_v15, %v2357_v52  ;;  %v2377_v55 = vadd.f32 %v8385_v35, %v11024_v17  ;;  %v11154_v3 = vpop.f32.mrf.mxu0  ;;  %v2387_v33 = vadd.f32 %v8388_v21, %v11024_v17  ;;  %8737 = vmatprep.subr.mxu1 %v6904_v1  ;;  %v11201_v47 = vpop.f32.mrf.mxu1  ;;  %v6932_v15 = vld [vmem:[%s12644_s1 + $0x560] sm:$0xff]  ;;  %v6929_v52 = vld [vmem:[%s12644_s1 + $0x548] sm:$0xff] }
 0x425   : > { %v2919_v30 = vmul.f32 %v6731_v4, %v2887_v10  ;;  %8738 = vmatpush3.msra.mxu1 %v6904_v1 }
 0x426   : > { %v9416_v5 = vpop.eup %9415  ;;  %v2920_v45 = vmul.f32 %v6732_v26, %v2888_v24  ;;  %v11160_v51 = vpop.f32.mrf.mxu0  ;;  %8739 = vmatprep.subr.mxu1 %v6903_v7  ;;  %v6930_v26 = vld [vmem:[%s12644_s1 + $0x550] sm:$0xff] }
 0x427   : > { %v9418_v60 = vpop.eup %9417  ;;  %v2857_v38 = vmul.f32 0.9, %v9416_v5  ;;  %8692 = vmatmul.mubr.f32.gmra.mxu0 %v2946_v57  ;;  %v2951_v42 = vadd.f32 %v2919_v30, %v2362_v39  ;;  %8740 = vmatpush3.msra.mxu1 %v6903_v7  ;;  %v6935_v30 = vld [vmem:[%s12644_s1 + $0x578] sm:$0xff]  ;;  %v3283_v7 = vadd.f32 %v11201_v47, %v11160_v51 }
 0x428   : > { %8694 = vmatprep.mubr.f32.mxu0 %v2947_v56  ;;  %v2858_v20 = vmul.f32 0.9, %v9418_v60  ;;  %v2952_v9 = vadd.f32 %v2920_v45, %v2367_v12  ;;  %v11162_v61 = vpop.f32.mrf.mxu0  ;;  %8789 = vmatprep.subr.mxu0 %v6935_v30  ;;  %v6925_v45 = vld [vmem:[%s12644_s1 + $0x528] sm:$0xff] }
 0x429   : > { %v2889_v49 = vadd.f32 0.1, %v2857_v38  ;;  %v9420_v25 = vpop.eup %9419  ;;  %8790 = vmatpush3.msra.mxu0 %v6935_v30 }
 0x42a   : > { %v2890_v23 = vadd.f32 0.1, %v2858_v20  ;;  %v2860_v29 = vmul.f32 0.9, %v9420_v25  ;;  %v11167_v0 = vpop.f32.mrf.mxu0  ;;  %v6933_v20 = vld [vmem:[%s12644_s1 + $0x568] sm:$0xff]  ;;  %v6931_v25 = vld [vmem:[%s12644_s1 + $0x558] sm:$0xff] }
 0x42b   : > { %v9422_v31 = vpop.eup %9421  ;;  %8695 = vmatmul.mubr.f32.gmra.mxu0 %v2948_v58  ;;  %v2921_v44 = vmul.f32 %v6733_v16, %v2889_v49  ;;  %v6934_v49 = vld [vmem:[%s12644_s1 + $0x570] sm:$0xff] }
 0x42c   : > { %8697 = vmatprep.mubr.f32.mxu0 %v2949_v54  ;;  %v2859_v18 = vmul.f32 0.9, %v9422_v31  ;;  %v2892_v34 = vadd.f32 0.1, %v2860_v29  ;;  %v2922_v11 = vmul.f32 %v6734_v59, %v2890_v23  ;;  %v11169_v17 = vpop.f32.mrf.mxu0  ;;  %v11205_v54 = vpop.f32.mrf.mxu1  ;;  %8791 = vmatprep.subr.mxu0 %v6934_v49  ;;  %v6926_v29 = vld [vmem:[%s12644_s1 + $0x530] sm:$0xff] }
 0x42d   : > { %v2953_v50 = vadd.f32 %v2921_v44, %v2372_v2  ;;  %8792 = vmatpush3.msra.mxu0 %v6934_v49  ;;  %v6924_v2 = vld [vmem:[%s12644_s1 + $0x520] sm:$0xff] }
 0x42e   : > { %v2891_v62 = vadd.f32 0.1, %v2859_v18  ;;  %v2954_v43 = vadd.f32 %v2922_v11, %v2377_v55  ;;  %v2924_v40 = vmul.f32 %v6736_v14, %v2892_v34  ;;  %v11171_v46 = vpop.f32.mrf.mxu0  ;;  %v11218_v58 = vpop.f32.mrf.mxu1  ;;  %8793 = vmatprep.subr.mxu0 %v6933_v20  ;;  %v6927_v18 = vld [vmem:[%s12644_s1 + $0x538] sm:$0xff] }
 0x42f   : > { %8698 = vmatmul.mubr.f32.gmra.mxu0 %v2950_v13 }
 0x430   : > { %8700 = vmatprep.mubr.f32.mxu0 %v2951_v42  ;;  %v2923_v63 = vmul.f32 %v6735_v41, %v2891_v62  ;;  %v2956_v28 = vadd.f32 %v2924_v40, %v2387_v33  ;;  %v11173_v35 = vpop.f32.mrf.mxu0  ;;  %8794 = vmatpush3.msra.mxu0 %v6933_v20  ;;  %v11228_v39 = vpop.f32.mrf.mxu1  ;;  %v6928_v42 = vld [vmem:[%s12644_s1 + $0x540] sm:$0xff]  ;;  %v6923_v62 = vld [vmem:[%s12644_s1 + $0x518] sm:$0xff] }
 0x431   : > { %8795 = vmatprep.subr.mxu0 %v6932_v15  ;;  %v11307_v20 = vld [vmem:[%s12645_s2 + $0x5] ss:$0 sm:$0xff] }
 0x432   : > { %v2955_v8 = vadd.f32 %v2923_v63, %v2382_v32  ;;  %v11175_v5 = vpop.f32.mrf.mxu0  ;;  %8796 = vmatpush3.msra.mxu0 %v6932_v15  ;;  %v11238_v21 = vpop.f32.mrf.mxu1  ;;  %v6921_v63 = vld [vmem:[%s12644_s1 + $0x508] sm:$0xff] }
 0x433   : > { %8701 = vmatmul.mubr.f32.gmra.mxu0 %v2952_v9  ;;  %8797 = vmatprep.subr.mxu0 %v6931_v25 }
 0x434   : > { %8703 = vmatprep.mubr.f32.mxu0 %v2953_v50  ;;  %v11177_v27 = vpop.f32.mrf.mxu0  ;;  %8798 = vmatpush3.msra.mxu0 %v6931_v25  ;;  %v11248_v23 = vpop.f32.mrf.mxu1 }
 0x435   : > { %8799 = vmatprep.subr.mxu0 %v6930_v26 }
 0x436   : > { %v11179_v56 = vpop.f32.mrf.mxu0  ;;  %8800 = vmatpush3.msra.mxu0 %v6930_v26  ;;  %v11258_v41 = vpop.f32.mrf.mxu1 }
 0x437   : > { %8704 = vmatmul.mubr.f32.gmra.mxu0 %v2954_v43  ;;  %8801 = vmatprep.subr.mxu0 %v6929_v52 }
 0x438   : > { %8706 = vmatprep.mubr.f32.mxu0 %v2955_v8  ;;  %v11181_v37 = vpop.f32.mrf.mxu0  ;;  %8802 = vmatpush3.msra.mxu0 %v6929_v52  ;;  %v11268_v12 = vpop.f32.mrf.mxu1 }
 0x439   : > { %8803 = vmatprep.subr.mxu0 %v6928_v42 }
 0x43a   : > { %v11183_v10 = vpop.f32.mrf.mxu0  ;;  %8804 = vmatpush3.msra.mxu0 %v6928_v42  ;;  %v11278_v34 = vpop.f32.mrf.mxu1 }
 0x43b   : > { %8707 = vmatmul.mubr.f32.gmra.mxu0 %v2956_v28  ;;  %8805 = vmatprep.subr.mxu0 %v6927_v18  ;;  %v3288_v28 = vadd.f32 %v11197_v53, %v11154_v3  ;;  %v3298_v53 = vadd.f32 %v11205_v54, %v11162_v61  ;;  %v3308_v61 = vadd.f32 %v11228_v39, %v11169_v17 }
 0x43c   : > { %v11185_v60 = vpop.f32.mrf.mxu0  ;;  %8806 = vmatpush3.msra.mxu0 %v6927_v18  ;;  %v11282_v11 = vpop.f32.mrf.mxu1  ;;  %v3293_v18 = vadd.f32 %v11218_v58, %v11167_v0  ;;  %v3303_v0 = vadd.f32 %v11238_v21, %v11171_v46 }
 0x43d   : > { %8807 = vmatprep.subr.mxu0 %v6926_v29 }
 0x43e   : > { %v11187_v6 = vpop.f32.mrf.mxu0  ;;  %8808 = vmatpush3.msra.mxu0 %v6926_v29  ;;  %v11286_v14 = vpop.f32.mrf.mxu1 }
 0x43f   : > { %8809 = vmatprep.subr.mxu0 %v6925_v45 }
 0x440   : > { %v11189_v57 = vpop.f32.mrf.mxu0  ;;  %8810 = vmatpush3.msra.mxu0 %v6925_v45  ;;  %v11290_v8 = vpop.f32.mrf.mxu1 }
 0x441   : > { %8811 = vmatprep.subr.mxu0 %v6924_v2 }
 0x442   : > { %v11191_v36 = vpop.f32.mrf.mxu0  ;;  %8812 = vmatpush3.msra.mxu0 %v6924_v2  ;;  %v11294_v40 = vpop.f32.mrf.mxu1 }
 0x443   : > { %8813 = vmatprep.subr.mxu0 %v6923_v62 }
 0x444   : > { %v11193_v4 = vpop.f32.mrf.mxu0  ;;  %8814 = vmatpush3.msra.mxu0 %v6923_v62  ;;  %v11302_v30 = vpop.f32.mrf.mxu1 }
 0x445   : > { %8815 = vmatprep.subr.mxu0 %v6922_v48 }
 0x446   : > { %v11195_v38 = vpop.f32.mrf.mxu0  ;;  %8816 = vmatpush3.msra.mxu0 %v6922_v48  ;;  %v11310_v52 = vpop.f32.mrf.mxu1 }
 0x447   : > { %8817 = vmatprep.subr.mxu0 %v6921_v63 }
 0x448   : > { %v11199_v19 = vpop.f32.mrf.mxu0  ;;  %8818 = vmatpush3.msra.mxu0 %v6921_v63  ;;  %v11317_v29 = vpop.f32.mrf.mxu1 }
 0x44a   : > { %v11203_v22 = vpop.f32.mrf.mxu0  ;;  %v11320_v63 = vpop.f32.mrf.mxu1 }
 0x44c   : > { %v11213_v24 = vpop.f32.mrf.mxu0 }
 0x44e   : > { %v11223_v16 = vpop.f32.mrf.mxu0 }
 0x450   : > { %v11233_v31 = vpop.f32.mrf.mxu0 }
 0x452   : > { %v11243_v44 = vpop.f32.mrf.mxu0 }
 0x454   : > { %v11253_v13 = vpop.f32.mrf.mxu0 }
 0x456   : > { %v11263_v59 = vpop.f32.mrf.mxu0 }
 0x458   : > { %v11273_v50 = vpop.f32.mrf.mxu0 }
 0x45a   : > { %v11280_v9 = vpop.f32.mrf.mxu0 }
 0x45c   : > { %v11284_v32 = vpop.f32.mrf.mxu0 }
 0x45e   : > { %v11288_v55 = vpop.f32.mrf.mxu0 }
 0x460   : > { %v11292_v43 = vpop.f32.mrf.mxu0 }
 0x462   : > { %v11296_v33 = vpop.f32.mrf.mxu0 }
 0x4b5   : > { %v8663_v1 = vpop.f32.mrf.mxu0 }
 0x4b6   : > { %v3684_v49 = vadd.f32 %v8663_v1, %v3288_v28 }
 0x4b7   : > { %v3524_v15 = vpop.f32.mrf.mxu0 }
 0x4b8   : > { %v3683_v25 = vadd.f32 %v3524_v15, %v3283_v7  ;;  %v3721_v26 = vadd.f32 %v11307_v20, %v3684_v49  ;;  %v11327_v49 = vpop.f32.mrf.mxu1 }
 0x4ba   : > { %v3720_v3 = vadd.f32 %v11307_v20, %v3683_v25  ;;  %v3753_v47 = vmax.f32 %v3721_v26, 0.0  ;;  %v3318_v26 = vadd.f32 %v11248_v23, %v11173_v35  ;;  %v11335_v46 = vpop.f32.mrf.mxu1  ;;  %v3328_v35 = vadd.f32 %v11268_v12, %v11177_v27 }
 0x4bb   : > { %v3338_v27 = vadd.f32 %v11282_v11, %v11181_v37 }
 0x4bc   : > { %v3752_v51 = vmax.f32 %v3720_v3, 0.0  ;;  %v11340_v23 = vpop.f32.mrf.mxu1 }
 0x4bd   : > { %v8666_v42 = vpop.f32.mrf.mxu0 }
 0x4be   : > { %v3686_v45 = vadd.f32 %v8666_v42, %v3298_v53  ;;  %8741 = vmatprep.mubr.f32.mxu1 %v3752_v51  ;;  %v3313_v53 = vadd.f32 %v11258_v41, %v11175_v5  ;;  %v3323_v5 = vadd.f32 %v11278_v34, %v11179_v56  ;;  %v3333_v56 = vadd.f32 %v11286_v14, %v11183_v10 }
 0x4bf   : > { %v3534_v2 = vpop.f32.mrf.mxu0  ;;  %8742 = vmatmul.mubr.f32.vlgmr.msra.gmra.mxu1 %v3753_v47 }
 0x4c0   : > { %v3685_v62 = vadd.f32 %v3534_v2, %v3293_v18  ;;  %v3723_v48 = vadd.f32 %v11307_v20, %v3686_v45 }
 0x4c1   : > { %v8669_v54 = vpop.f32.mrf.mxu0 }
 0x4c2   : > { %v3722_v28 = vadd.f32 %v11307_v20, %v3685_v62  ;;  %v3755_v58 = vmax.f32 %v3723_v48, 0.0  ;;  %v3688_v7 = vadd.f32 %v8669_v54, %v3308_v61  ;;  %v11345_v54 = vpop.f32.mrf.mxu1 }
 0x4c3   : > { %v3544_v15 = vpop.f32.mrf.mxu0 }
 0x4c4   : > { %v3754_v1 = vmax.f32 %v3722_v28, 0.0  ;;  %v3687_v25 = vadd.f32 %v3544_v15, %v3303_v0  ;;  %v3725_v3 = vadd.f32 %v11307_v20, %v3688_v7  ;;  %v11353_v7 = vpop.f32.mrf.mxu1 }
 0x4c6   : > { %8744 = vmatprep.mubr.f32.mxu1 %v3754_v1  ;;  %v3724_v17 = vadd.f32 %v11307_v20, %v3687_v25  ;;  %v3757_v42 = vmax.f32 %v3725_v3, 0.0  ;;  %v3392_v14 = vpop.f32.mrf.mxu1 }
 0x4c7   : > { %8745 = vmatmul.mubr.f32.gmra.mxu1 %v3755_v58  ;;  %v8672_v39 = vpop.f32.mrf.mxu0 }
 0x4c8   : > { %v3690_v21 = vadd.f32 %v8672_v39, %v3318_v26  ;;  %v3756_v47 = vmax.f32 %v3724_v17, 0.0  ;;  %v3348_v26 = vadd.f32 %v11290_v8, %v11185_v60  ;;  %v3343_v39 = vadd.f32 %v11294_v40, %v11187_v6 }
 0x4c9   : > { %v3554_v51 = vpop.f32.mrf.mxu0 }
 0x4ca   : > { %v3689_v18 = vadd.f32 %v3554_v51, %v3313_v53  ;;  %v3727_v45 = vadd.f32 %v11307_v20, %v3690_v21  ;;  %8747 = vmatprep.mubr.f32.mxu1 %v3756_v47  ;;  %v3358_v51 = vadd.f32 %v11302_v30, %v11189_v57 }
 0x4cb   : > { %8748 = vmatmul.mubr.f32.gmra.mxu1 %v3757_v42 }
 0x4cc   : > { %v3726_v2 = vadd.f32 %v11307_v20, %v3689_v18  ;;  %v3759_v28 = vmax.f32 %v3727_v45, 0.0  ;;  %v3353_v45 = vadd.f32 %v11310_v52, %v11191_v36 }
 0x4ce   : > { %v8675_v62 = vpop.f32.mrf.mxu0  ;;  %v3758_v48 = vmax.f32 %v3726_v2, 0.0 }
 0x4cf   : > { %v3692_v41 = vadd.f32 %v8675_v62, %v3328_v35  ;;  %v8619_v35 = vpop.f32.mrf.mxu1  ;;  %v3368_v62 = vadd.f32 %v11317_v29, %v11193_v4 }
 0x4d0   : > { %v3564_v61 = vpop.f32.mrf.mxu0  ;;  %8750 = vmatprep.mubr.f32.mxu1 %v3758_v48 }
 0x4d1   : > { %v3691_v1 = vadd.f32 %v3564_v61, %v3323_v5  ;;  %v3729_v12 = vadd.f32 %v11307_v20, %v3692_v41  ;;  %8751 = vmatmul.mubr.f32.gmra.mxu1 %v3759_v28  ;;  %v3363_v28 = vadd.f32 %v11320_v63, %v11195_v38  ;;  %v3402_v61 = vpop.f32.mrf.mxu1 }
 0x4d3   : > { %v3728_v0 = vadd.f32 %v11307_v20, %v3691_v1  ;;  %v8678_v58 = vpop.f32.mrf.mxu0  ;;  %v3761_v3 = vmax.f32 %v3729_v12, 0.0 }
 0x4d4   : > { %v3694_v34 = vadd.f32 %v8678_v58, %v3338_v27  ;;  %v3378_v27 = vadd.f32 %v11327_v49, %v11199_v19 }
 0x4d5   : > { %v3574_v15 = vpop.f32.mrf.mxu0  ;;  %v3760_v25 = vmax.f32 %v3728_v0, 0.0 }
 0x4d6   : > { %v3693_v17 = vadd.f32 %v3574_v15, %v3333_v56  ;;  %v3731_v37 = vadd.f32 %v11307_v20, %v3694_v34  ;;  %v3373_v56 = vadd.f32 %v11335_v46, %v11203_v22  ;;  %v8622_v34 = vpop.f32.mrf.mxu1 }
 0x4d7   : > { %v8681_v11 = vpop.f32.mrf.mxu0  ;;  %8753 = vmatprep.mubr.f32.mxu1 %v3760_v25  ;;  %v3388_v25 = vadd.f32 %v11340_v23, %v11213_v24 }
 0x4d8   : > { %v3730_v53 = vadd.f32 %v11307_v20, %v3693_v17  ;;  %v3696_v10 = vadd.f32 %v8681_v11, %v3348_v26  ;;  %8754 = vmatmul.mubr.f32.gmra.mxu1 %v3761_v3  ;;  %v3763_v8 = vmax.f32 %v3731_v37, 0.0  ;;  %v3383_v37 = vadd.f32 %v11345_v54, %v11223_v16  ;;  %v3412_v11 = vpop.f32.mrf.mxu1 }
 0x4d9   : > { %v3584_v21 = vpop.f32.mrf.mxu0 }
 0x4da   : > { %v3695_v47 = vadd.f32 %v3584_v21, %v3343_v39  ;;  %v3762_v60 = vmax.f32 %v3730_v53, 0.0  ;;  %v3733_v42 = vadd.f32 %v11307_v20, %v3696_v10  ;;  %v3398_v53 = vadd.f32 %v11353_v7, %v11233_v31 }
 0x4db   : > { %v8684_v18 = vpop.f32.mrf.mxu0 }
 0x4dc   : > { %v3732_v6 = vadd.f32 %v11307_v20, %v3695_v47  ;;  %v3698_v40 = vadd.f32 %v8684_v18, %v3358_v51  ;;  %8756 = vmatprep.mubr.f32.mxu1 %v3762_v60  ;;  %v3765_v5 = vmax.f32 %v3733_v42, 0.0  ;;  %v3393_v47 = vadd.f32 %v3392_v14, %v11243_v44  ;;  %v8625_v60 = vpop.f32.mrf.mxu1 }
 0x4dd   : > { %v3594_v2 = vpop.f32.mrf.mxu0  ;;  %8757 = vmatmul.mubr.f32.gmra.mxu1 %v3763_v8  ;;  %v3408_v42 = vadd.f32 %v8619_v35, %v11253_v13 }
 0x4de   : > { %v3697_v57 = vadd.f32 %v3594_v2, %v3353_v45  ;;  %v3764_v30 = vmax.f32 %v3732_v6, 0.0  ;;  %v3735_v41 = vadd.f32 %v11307_v20, %v3698_v40  ;;  %v3403_v40 = vadd.f32 %v3402_v61, %v11263_v59  ;;  %v3422_v14 = vpop.f32.mrf.mxu1 }
 0x4df   : > { %v8687_v48 = vpop.f32.mrf.mxu0  ;;  %v3428_v61 = vadd.f32 %v8625_v60, %v11284_v32  ;;  %v6941_v60 = vld [vmem:[%s12644_s1 + $0x5a0] sm:$0xff] }
 0x4e0   : > { %v3734_v36 = vadd.f32 %v11307_v20, %v3697_v57  ;;  %v3700_v52 = vadd.f32 %v8687_v48, %v3368_v62  ;;  %8759 = vmatprep.mubr.f32.mxu1 %v3764_v30  ;;  %v3767_v12 = vmax.f32 %v3735_v41, 0.0  ;;  %v3418_v57 = vadd.f32 %v8622_v34, %v11273_v50 }
 0x4e1   : > { %v3604_v1 = vpop.f32.mrf.mxu0  ;;  %8760 = vmatmul.mubr.f32.gmra.mxu1 %v3765_v5  ;;  %v3413_v48 = vadd.f32 %v3412_v11, %v11280_v9 }
 0x4e2   : > { %v3699_v4 = vadd.f32 %v3604_v1, %v3363_v28  ;;  %v3766_v29 = vmax.f32 %v3734_v36, 0.0  ;;  %v3737_v0 = vadd.f32 %v11307_v20, %v3700_v52  ;;  %v8628_v36 = vpop.f32.mrf.mxu1 }
 0x4e3   : > { %v8690_v58 = vpop.f32.mrf.mxu0 }
 0x4e4   : > { %v3736_v38 = vadd.f32 %v11307_v20, %v3699_v4  ;;  %v3702_v63 = vadd.f32 %v8690_v58, %v3378_v27  ;;  %8762 = vmatprep.mubr.f32.mxu1 %v3766_v29  ;;  %v3769_v26 = vmax.f32 %v3737_v0, 0.0  ;;  %v3432_v58 = vpop.f32.mrf.mxu1 }
 0x4e5   : > { %v3614_v15 = vpop.f32.mrf.mxu0  ;;  %8763 = vmatmul.mubr.f32.gmra.mxu1 %v3767_v12  ;;  %v3423_v12 = vadd.f32 %v3422_v14, %v11288_v55 }
 0x4e6   : > { %v3768_v19 = vmax.f32 %v3736_v38, 0.0  ;;  %v3701_v49 = vadd.f32 %v3614_v15, %v3373_v56  ;;  %v3739_v3 = vadd.f32 %v11307_v20, %v3702_v63  ;;  %v3438_v38 = vadd.f32 %v8628_v36, %v11292_v43 }
 0x4e7   : > { %v8693_v17 = vpop.f32.mrf.mxu0 }
 0x4e8   : > { %v3738_v22 = vadd.f32 %v11307_v20, %v3701_v49  ;;  %v3704_v46 = vadd.f32 %v8693_v17, %v3388_v25  ;;  %8765 = vmatprep.mubr.f32.mxu1 %v3768_v19  ;;  %v3771_v10 = vmax.f32 %v3739_v3, 0.0  ;;  %v3433_v19 = vadd.f32 %v3432_v58, %v11296_v33  ;;  %v6920_v33 = vld [vmem:[%s12644_s1 + $0x500] sm:$0xff] }
 0x4e9   : > { %v3624_v39 = vpop.f32.mrf.mxu0  ;;  %8766 = vmatmul.mubr.f32.gmra.mxu1 %v3769_v26  ;;  %8819 = vmatprep.subr.mxu0 %v6920_v33 }
 0x4ea   : > { %v3770_v24 = vmax.f32 %v3738_v22, 0.0  ;;  %v3703_v23 = vadd.f32 %v3624_v39, %v3383_v37  ;;  %v3741_v21 = vadd.f32 %v11307_v20, %v3704_v46  ;;  %8820 = vmatpush3.msra.mxu0 %v6920_v33  ;;  %v6952_v39 = vld [vmem:[%s12644_s1 + $0x5f8] sm:$0xff] }
 0x4eb   : > { %v8696_v51 = vpop.f32.mrf.mxu0  ;;  %8869 = vmatprep.subr.mxu1 %v6952_v39 }
 0x4ec   : > { %v3740_v16 = vadd.f32 %v11307_v20, %v3703_v23  ;;  %v3706_v54 = vadd.f32 %v8696_v51, %v3398_v53  ;;  %8768 = vmatprep.mubr.f32.mxu1 %v3770_v24  ;;  %v3773_v31 = vmax.f32 %v3741_v21, 0.0  ;;  %8870 = vmatpush3.msra.mxu1 %v6952_v39  ;;  %v6950_v53 = vld [vmem:[%s12644_s1 + $0x5e8] sm:$0xff]  ;;  %v6949_v24 = vld [vmem:[%s12644_s1 + $0x5e0] sm:$0xff]  ;;  %v6948_v23 = vld [vmem:[%s12644_s1 + $0x5d8] sm:$0xff] }
 0x4ed   : > { %v3634_v8 = vpop.f32.mrf.mxu0  ;;  %8769 = vmatmul.mubr.f32.gmra.mxu1 %v3771_v10  ;;  %v6947_v10 = vld [vmem:[%s12644_s1 + $0x5d0] sm:$0xff]  ;;  %v6946_v21 = vld [vmem:[%s12644_s1 + $0x5c8] sm:$0xff]  ;;  %v6945_v51 = vld [vmem:[%s12644_s1 + $0x5c0] sm:$0xff] }
 0x4ee   : > { %v3772_v18 = vmax.f32 %v3740_v16, 0.0  ;;  %v3705_v45 = vadd.f32 %v3634_v8, %v3393_v47  ;;  %v3743_v7 = vadd.f32 %v11307_v20, %v3706_v54  ;;  %v6944_v47 = vld [vmem:[%s12644_s1 + $0x5b8] sm:$0xff]  ;;  %v6943_v16 = vld [vmem:[%s12644_s1 + $0x5b0] sm:$0xff]  ;;  %v6942_v54 = vld [vmem:[%s12644_s1 + $0x5a8] sm:$0xff] }
 0x4ef   : > { %v8699_v6 = vpop.f32.mrf.mxu0  ;;  %v6940_v8 = vld [vmem:[%s12644_s1 + $0x598] sm:$0xff] }
 0x4f0   : > { %v3742_v2 = vadd.f32 %v11307_v20, %v3705_v45  ;;  %v3708_v44 = vadd.f32 %v8699_v6, %v3408_v42  ;;  %8771 = vmatprep.mubr.f32.mxu1 %v3772_v18  ;;  %v3775_v13 = vmax.f32 %v3743_v7, 0.0  ;;  %v6939_v42 = vld [vmem:[%s12644_s1 + $0x590] sm:$0xff]  ;;  %v6938_v18 = vld [vmem:[%s12644_s1 + $0x588] sm:$0xff]  ;;  %v11459_v45 = vld [vmem:[%s12645_s2 + $0x6] ss:$0 sm:$0xff] }
 0x4f1   : > { %v3644_v62 = vpop.f32.mrf.mxu0  ;;  %8772 = vmatmul.mubr.f32.gmra.mxu1 %v3773_v31 }
 0x4f2   : > { %v3774_v30 = vmax.f32 %v3742_v2, 0.0  ;;  %v3707_v5 = vadd.f32 %v3644_v62, %v3403_v40  ;;  %v3745_v35 = vadd.f32 %v11307_v20, %v3708_v44 }
 0x4f3   : > { %v8702_v41 = vpop.f32.mrf.mxu0 }
 0x4f4   : > { %v3744_v28 = vadd.f32 %v11307_v20, %v3707_v5  ;;  %v3710_v59 = vadd.f32 %v8702_v41, %v3418_v57  ;;  %8774 = vmatprep.mubr.f32.mxu1 %v3774_v30  ;;  %v3777_v50 = vmax.f32 %v3745_v35, 0.0 }
 0x4f5   : > { %v3654_v52 = vpop.f32.mrf.mxu0  ;;  %8775 = vmatmul.mubr.f32.gmra.mxu1 %v3775_v13 }
 0x4f6   : > { %v3776_v1 = vmax.f32 %v3744_v28, 0.0  ;;  %v3709_v27 = vadd.f32 %v3654_v52, %v3413_v48  ;;  %v3747_v4 = vadd.f32 %v11307_v20, %v3710_v59 }
 0x4f7   : > { %v8705_v29 = vpop.f32.mrf.mxu0 }
 0x4f8   : > { %v3746_v0 = vadd.f32 %v11307_v20, %v3709_v27  ;;  %v3712_v9 = vadd.f32 %v8705_v29, %v3428_v61  ;;  %8777 = vmatprep.mubr.f32.mxu1 %v3776_v1  ;;  %v3779_v32 = vmax.f32 %v3747_v4, 0.0 }
 0x4f9   : > { %v3664_v56 = vpop.f32.mrf.mxu0  ;;  %8778 = vmatmul.mubr.f32.gmra.mxu1 %v3777_v50 }
 0x4fa   : > { %v3778_v63 = vmax.f32 %v3746_v0, 0.0  ;;  %v3711_v34 = vadd.f32 %v3664_v56, %v3423_v12  ;;  %v3749_v15 = vadd.f32 %v11307_v20, %v3712_v9 }
 0x4fb   : > { %v8708_v25 = vpop.f32.mrf.mxu0 }
 0x4fc   : > { %v3748_v49 = vadd.f32 %v11307_v20, %v3711_v34  ;;  %v3714_v55 = vadd.f32 %v8708_v25, %v3438_v38  ;;  %8780 = vmatprep.mubr.f32.mxu1 %v3778_v63  ;;  %v3781_v37 = vmax.f32 %v3749_v15, 0.0 }
 0x4fd   : > { %v3674_v26 = vpop.f32.mrf.mxu0  ;;  %8781 = vmatmul.mubr.f32.gmra.mxu1 %v3779_v32 }
 0x4fe   : > { %v3780_v3 = vmax.f32 %v3748_v49, 0.0  ;;  %v3713_v17 = vadd.f32 %v3674_v26, %v3433_v19  ;;  %v3751_v22 = vadd.f32 %v11307_v20, %v3714_v55 }
 0x500   : > { %v3750_v43 = vadd.f32 %v11307_v20, %v3713_v17  ;;  %8783 = vmatprep.mubr.f32.mxu1 %v3780_v3  ;;  %v3783_v11 = vmax.f32 %v3751_v22, 0.0  ;;  %v6951_v20 = vld [vmem:[%s12644_s1 + $0x5f0] sm:$0xff] }
 0x501   : > { %8784 = vmatmul.mubr.f32.gmra.mxu1 %v3781_v37  ;;  %8871 = vmatprep.subr.mxu1 %v6951_v20 }
 0x502   : > { %v3782_v46 = vmax.f32 %v3750_v43, 0.0  ;;  %8872 = vmatpush3.msra.mxu1 %v6951_v20 }
 0x503   : > { %8873 = vmatprep.subr.mxu1 %v6950_v53 }
 0x504   : > { %8786 = vmatprep.mubr.f32.mxu1 %v3782_v46  ;;  %8874 = vmatpush3.msra.mxu1 %v6950_v53 }
 0x505   : > { %8787 = vmatmul.mubr.f32.gmra.mxu1 %v3783_v11  ;;  %8875 = vmatprep.subr.mxu1 %v6949_v24 }
 0x506   : > { %8876 = vmatpush3.msra.mxu1 %v6949_v24 }
 0x507   : > { %8877 = vmatprep.subr.mxu1 %v6948_v23 }
 0x508   : > { %8878 = vmatpush3.msra.mxu1 %v6948_v23 }
 0x509   : > { %8879 = vmatprep.subr.mxu1 %v6947_v10 }
 0x50a   : > { %8880 = vmatpush3.msra.mxu1 %v6947_v10 }
 0x50b   : > { %8881 = vmatprep.subr.mxu1 %v6946_v21 }
 0x50c   : > { %8882 = vmatpush3.msra.mxu1 %v6946_v21 }
 0x50d   : > { %8883 = vmatprep.subr.mxu1 %v6945_v51 }
 0x50e   : > { %8884 = vmatpush3.msra.mxu1 %v6945_v51 }
 0x50f   : > { %8885 = vmatprep.subr.mxu1 %v6944_v47 }
 0x510   : > { %8886 = vmatpush3.msra.mxu1 %v6944_v47 }
 0x511   : > { %8887 = vmatprep.subr.mxu1 %v6943_v16 }
 0x512   : > { %8888 = vmatpush3.msra.mxu1 %v6943_v16 }
 0x513   : > { %8889 = vmatprep.subr.mxu1 %v6942_v54 }
 0x514   : > { %8890 = vmatpush3.msra.mxu1 %v6942_v54 }
 0x515   : > { %8891 = vmatprep.subr.mxu1 %v6941_v60 }
 0x516   : > { %8892 = vmatpush3.msra.mxu1 %v6941_v60 }
 0x517   : > { %8893 = vmatprep.subr.mxu1 %v6940_v8 }
 0x518   : > { %8894 = vmatpush3.msra.mxu1 %v6940_v8 }
 0x519   : > { %8895 = vmatprep.subr.mxu1 %v6939_v42 }
 0x51a   : > { %8896 = vmatpush3.msra.mxu1 %v6939_v42 }
 0x51b   : > { %8897 = vmatprep.subr.mxu1 %v6938_v18 }
 0x51c   : > { %8898 = vmatpush3.msra.mxu1 %v6938_v18 }
 0x57f   : > { %v8743_v31 = vpop.f32.mrf.mxu1 }
 0x580   : > { %v3878_v7 = vadd.f32 %v8743_v31, %v11459_v45 }
 0x581   : > { %v3872_v6 = vpop.f32.mrf.mxu1 }
 0x582   : > { %v3873_v40 = vadd.f32 %v11459_v45, %v3872_v6  ;;  %v4032_v44 = vmax.f32 %v3878_v7, 0.0 }
 0x584   : > { %v4031_v2 = vmax.f32 %v3873_v40, 0.0 }
 0x586   : > { %8821 = vmatprep.mubr.f32.mxu0 %v4031_v2 }
 0x587   : > { %v8746_v14 = vpop.f32.mrf.mxu1  ;;  %8822 = vmatmul.mubr.f32.vlgmr.msra.gmra.mxu0 %v4032_v44 }
 0x588   : > { %v3888_v62 = vadd.f32 %v8746_v14, %v11459_v45 }
 0x589   : > { %v3882_v57 = vpop.f32.mrf.mxu1 }
 0x58a   : > { %v3883_v30 = vadd.f32 %v11459_v45, %v3882_v57  ;;  %v4034_v13 = vmax.f32 %v3888_v62, 0.0 }
 0x58b   : > { %v8749_v35 = vpop.f32.mrf.mxu1 }
 0x58c   : > { %v4033_v5 = vmax.f32 %v3883_v30, 0.0  ;;  %v3898_v41 = vadd.f32 %v8749_v35, %v11459_v45 }
 0x58d   : > { %v3892_v48 = vpop.f32.mrf.mxu1 }
 0x58e   : > { %8824 = vmatprep.mubr.f32.mxu0 %v4033_v5  ;;  %v3893_v28 = vadd.f32 %v11459_v45, %v3892_v48  ;;  %v4036_v52 = vmax.f32 %v3898_v41, 0.0 }
 0x58f   : > { %8825 = vmatmul.mubr.f32.gmra.mxu0 %v4034_v13 }
 0x590   : > { %v4035_v59 = vmax.f32 %v3893_v28, 0.0 }
 0x591   : > { %v8752_v36 = vpop.f32.mrf.mxu1 }
 0x592   : > { %v3908_v61 = vadd.f32 %v8752_v36, %v11459_v45  ;;  %8827 = vmatprep.mubr.f32.mxu0 %v4035_v59 }
 0x593   : > { %v3902_v1 = vpop.f32.mrf.mxu1  ;;  %8828 = vmatmul.mubr.f32.gmra.mxu0 %v4036_v52 }
 0x594   : > { %v3903_v27 = vadd.f32 %v11459_v45, %v3902_v1  ;;  %v4038_v4 = vmax.f32 %v3908_v61, 0.0 }
 0x596   : > { %v4037_v50 = vmax.f32 %v3903_v27, 0.0 }
 0x598   : > { %v8755_v29 = vpop.f32.mrf.mxu1  ;;  %8830 = vmatprep.mubr.f32.mxu0 %v4037_v50 }
 0x599   : > { %v3918_v12 = vadd.f32 %v8755_v29, %v11459_v45  ;;  %8831 = vmatmul.mubr.f32.gmra.mxu0 %v4038_v4 }
 0x59a   : > { %v3912_v0 = vpop.f32.mrf.mxu1 }
 0x59b   : > { %v3913_v9 = vadd.f32 %v11459_v45, %v3912_v0  ;;  %v4040_v38 = vmax.f32 %v3918_v12, 0.0 }
 0x59d   : > { %v4039_v58 = vmax.f32 %v3913_v9, 0.0  ;;  %v8758_v56 = vpop.f32.mrf.mxu1 }
 0x59e   : > { %v3928_v63 = vadd.f32 %v8758_v56, %v11459_v45 }
 0x59f   : > { %v3922_v34 = vpop.f32.mrf.mxu1  ;;  %8833 = vmatprep.mubr.f32.mxu0 %v4039_v58 }
 0x5a0   : > { %v3923_v32 = vadd.f32 %v11459_v45, %v3922_v34  ;;  %8834 = vmatmul.mubr.f32.gmra.mxu0 %v4040_v38  ;;  %v4042_v19 = vmax.f32 %v3928_v63, 0.0 }
 0x5a1   : > { %v8761_v15 = vpop.f32.mrf.mxu1 }
 0x5a2   : > { %v4041_v25 = vmax.f32 %v3923_v32, 0.0  ;;  %v3938_v49 = vadd.f32 %v8761_v15, %v11459_v45  ;;  %v6937_v32 = vld [vmem:[%s12644_s1 + $0x580] sm:$0xff]  ;;  %v6969_v15 = vld [vmem:[%s12644_s1 + $0x678] sm:$0xff] }
 0x5a3   : > { %v3932_v55 = vpop.f32.mrf.mxu1  ;;  %8899 = vmatprep.subr.mxu1 %v6937_v32  ;;  %8949 = vmatprep.subr.mxu0 %v6969_v15 }
 0x5a4   : > { %v3933_v26 = vadd.f32 %v11459_v45, %v3932_v55  ;;  %8836 = vmatprep.mubr.f32.mxu0 %v4041_v25  ;;  %v4044_v37 = vmax.f32 %v3938_v49, 0.0  ;;  %8900 = vmatpush3.msra.mxu1 %v6937_v32  ;;  %v6967_v25 = vld [vmem:[%s12644_s1 + $0x668] sm:$0xff]  ;;  %v6965_v49 = vld [vmem:[%s12644_s1 + $0x658] sm:$0xff]  ;;  %v6964_v55 = vld [vmem:[%s12644_s1 + $0x650] sm:$0xff] }
 0x5a5   : > { %v8764_v3 = vpop.f32.mrf.mxu1  ;;  %8837 = vmatmul.mubr.f32.gmra.mxu0 %v4042_v19  ;;  %v6966_v19 = vld [vmem:[%s12644_s1 + $0x660] sm:$0xff] }
 0x5a6   : > { %v4043_v17 = vmax.f32 %v3933_v26, 0.0  ;;  %v3948_v22 = vadd.f32 %v8764_v3, %v11459_v45  ;;  %8950 = vmatpush3.msra.mxu0 %v6969_v15  ;;  %v6963_v26 = vld [vmem:[%s12644_s1 + $0x648] sm:$0xff]  ;;  %v6962_v3 = vld [vmem:[%s12644_s1 + $0x640] sm:$0xff] }
 0x5a7   : > { %v3942_v43 = vpop.f32.mrf.mxu1 }
 0x5a8   : > { %v3943_v46 = vadd.f32 %v11459_v45, %v3942_v43  ;;  %8839 = vmatprep.mubr.f32.mxu0 %v4043_v17  ;;  %v4046_v39 = vmax.f32 %v3948_v22, 0.0  ;;  %v6961_v17 = vld [vmem:[%s12644_s1 + $0x638] sm:$0xff]  ;;  %v6959_v22 = vld [vmem:[%s12644_s1 + $0x628] sm:$0xff]  ;;  %v6958_v43 = vld [vmem:[%s12644_s1 + $0x620] sm:$0xff] }
 0x5a9   : > { %v8767_v11 = vpop.f32.mrf.mxu1  ;;  %8840 = vmatmul.mubr.f32.gmra.mxu0 %v4044_v37  ;;  %v6960_v37 = vld [vmem:[%s12644_s1 + $0x630] sm:$0xff] }
 0x5aa   : > { %v4045_v33 = vmax.f32 %v3943_v46, 0.0  ;;  %v3958_v20 = vadd.f32 %v8767_v11, %v11459_v45  ;;  %v6957_v46 = vld [vmem:[%s12644_s1 + $0x618] sm:$0xff]  ;;  %v6956_v11 = vld [vmem:[%s12644_s1 + $0x610] sm:$0xff] }
 0x5ab   : > { %v3952_v53 = vpop.f32.mrf.mxu1 }
 0x5ac   : > { %v3953_v24 = vadd.f32 %v11459_v45, %v3952_v53  ;;  %8842 = vmatprep.mubr.f32.mxu0 %v4045_v33  ;;  %v4048_v21 = vmax.f32 %v3958_v20, 0.0  ;;  %v6955_v33 = vld [vmem:[%s12644_s1 + $0x608] sm:$0xff] }
 0x5ad   : > { %v8770_v23 = vpop.f32.mrf.mxu1  ;;  %8843 = vmatmul.mubr.f32.gmra.mxu0 %v4046_v39  ;;  %v11544_v39 = vld [vmem:[%s12645_s2 + $0x7] ss:$0 sm:$0xff] }
 0x5ae   : > { %v4047_v10 = vmax.f32 %v3953_v24, 0.0  ;;  %v3968_v51 = vadd.f32 %v8770_v23, %v11459_v45 }
 0x5af   : > { %v3962_v47 = vpop.f32.mrf.mxu1 }
 0x5b0   : > { %v3963_v16 = vadd.f32 %v11459_v45, %v3962_v47  ;;  %8845 = vmatprep.mubr.f32.mxu0 %v4047_v10  ;;  %v4050_v8 = vmax.f32 %v3968_v51, 0.0 }
 0x5b1   : > { %v8773_v54 = vpop.f32.mrf.mxu1  ;;  %8846 = vmatmul.mubr.f32.gmra.mxu0 %v4048_v21 }
 0x5b2   : > { %v4049_v60 = vmax.f32 %v3963_v16, 0.0  ;;  %v3978_v42 = vadd.f32 %v8773_v54, %v11459_v45 }
 0x5b3   : > { %v3972_v18 = vpop.f32.mrf.mxu1 }
 0x5b4   : > { %v3973_v31 = vadd.f32 %v11459_v45, %v3972_v18  ;;  %8848 = vmatprep.mubr.f32.mxu0 %v4049_v60  ;;  %v4052_v40 = vmax.f32 %v3978_v42, 0.0 }
 0x5b5   : > { %v8776_v7 = vpop.f32.mrf.mxu1  ;;  %8849 = vmatmul.mubr.f32.gmra.mxu0 %v4050_v8 }
 0x5b6   : > { %v4051_v6 = vmax.f32 %v3973_v31, 0.0  ;;  %v3988_v2 = vadd.f32 %v8776_v7, %v11459_v45 }
 0x5b7   : > { %v3982_v44 = vpop.f32.mrf.mxu1 }
 0x5b8   : > { %v3983_v14 = vadd.f32 %v11459_v45, %v3982_v44  ;;  %8851 = vmatprep.mubr.f32.mxu0 %v4051_v6  ;;  %v4054_v30 = vmax.f32 %v3988_v2, 0.0 }
 0x5b9   : > { %v8779_v62 = vpop.f32.mrf.mxu1  ;;  %8852 = vmatmul.mubr.f32.gmra.mxu0 %v4052_v40 }
 0x5ba   : > { %v4053_v57 = vmax.f32 %v3983_v14, 0.0  ;;  %v3998_v5 = vadd.f32 %v8779_v62, %v11459_v45 }
 0x5bb   : > { %v3992_v13 = vpop.f32.mrf.mxu1 }
 0x5bc   : > { %v3993_v35 = vadd.f32 %v11459_v45, %v3992_v13  ;;  %8854 = vmatprep.mubr.f32.mxu0 %v4053_v57  ;;  %v4056_v28 = vmax.f32 %v3998_v5, 0.0 }
 0x5bd   : > { %v8782_v41 = vpop.f32.mrf.mxu1  ;;  %8855 = vmatmul.mubr.f32.gmra.mxu0 %v4054_v30 }
 0x5be   : > { %v4055_v48 = vmax.f32 %v3993_v35, 0.0  ;;  %v4008_v59 = vadd.f32 %v8782_v41, %v11459_v45 }
 0x5bf   : > { %v4002_v36 = vpop.f32.mrf.mxu1 }
 0x5c0   : > { %v4003_v52 = vadd.f32 %v11459_v45, %v4002_v36  ;;  %8857 = vmatprep.mubr.f32.mxu0 %v4055_v48  ;;  %v4058_v27 = vmax.f32 %v4008_v59, 0.0 }
 0x5c1   : > { %v8785_v61 = vpop.f32.mrf.mxu1  ;;  %8858 = vmatmul.mubr.f32.gmra.mxu0 %v4056_v28 }
 0x5c2   : > { %v4057_v1 = vmax.f32 %v4003_v52, 0.0  ;;  %v4018_v50 = vadd.f32 %v8785_v61, %v11459_v45 }
 0x5c3   : > { %v4012_v4 = vpop.f32.mrf.mxu1 }
 0x5c4   : > { %v4013_v29 = vadd.f32 %v11459_v45, %v4012_v4  ;;  %8860 = vmatprep.mubr.f32.mxu0 %v4057_v1  ;;  %v4060_v9 = vmax.f32 %v4018_v50, 0.0 }
 0x5c5   : > { %v8788_v12 = vpop.f32.mrf.mxu1  ;;  %8861 = vmatmul.mubr.f32.gmra.mxu0 %v4058_v27 }
 0x5c6   : > { %v4059_v0 = vmax.f32 %v4013_v29, 0.0  ;;  %v4028_v58 = vadd.f32 %v8788_v12, %v11459_v45 }
 0x5c7   : > { %v4022_v56 = vpop.f32.mrf.mxu1 }
 0x5c8   : > { %v4023_v38 = vadd.f32 %v11459_v45, %v4022_v56  ;;  %8863 = vmatprep.mubr.f32.mxu0 %v4059_v0  ;;  %v4062_v34 = vmax.f32 %v4028_v58, 0.0  ;;  %v6968_v45 = vld [vmem:[%s12644_s1 + $0x670] sm:$0xff] }
 0x5c9   : > { %8864 = vmatmul.mubr.f32.gmra.mxu0 %v4060_v9  ;;  %8951 = vmatprep.subr.mxu0 %v6968_v45 }
 0x5ca   : > { %v4061_v63 = vmax.f32 %v4023_v38, 0.0  ;;  %8952 = vmatpush3.msra.mxu0 %v6968_v45 }
 0x5cb   : > { %8953 = vmatprep.subr.mxu0 %v6967_v25 }
 0x5cc   : > { %8866 = vmatprep.mubr.f32.mxu0 %v4061_v63  ;;  %8954 = vmatpush3.msra.mxu0 %v6967_v25 }
 0x5cd   : > { %8867 = vmatmul.mubr.f32.gmra.mxu0 %v4062_v34  ;;  %8955 = vmatprep.subr.mxu0 %v6966_v19 }
 0x5ce   : > { %8956 = vmatpush3.msra.mxu0 %v6966_v19 }
 0x5cf   : > { %8957 = vmatprep.subr.mxu0 %v6965_v49 }
 0x5d0   : > { %8958 = vmatpush3.msra.mxu0 %v6965_v49 }
 0x5d1   : > { %8959 = vmatprep.subr.mxu0 %v6964_v55 }
 0x5d2   : > { %8960 = vmatpush3.msra.mxu0 %v6964_v55 }
 0x5d3   : > { %8961 = vmatprep.subr.mxu0 %v6963_v26 }
 0x5d4   : > { %8962 = vmatpush3.msra.mxu0 %v6963_v26 }
 0x5d5   : > { %8963 = vmatprep.subr.mxu0 %v6962_v3 }
 0x5d6   : > { %8964 = vmatpush3.msra.mxu0 %v6962_v3 }
 0x5d7   : > { %8965 = vmatprep.subr.mxu0 %v6961_v17 }
 0x5d8   : > { %8966 = vmatpush3.msra.mxu0 %v6961_v17 }
 0x5d9   : > { %8967 = vmatprep.subr.mxu0 %v6960_v37 }
 0x5da   : > { %8968 = vmatpush3.msra.mxu0 %v6960_v37 }
 0x5db   : > { %8969 = vmatprep.subr.mxu0 %v6959_v22 }
 0x5dc   : > { %8970 = vmatpush3.msra.mxu0 %v6959_v22 }
 0x5dd   : > { %8971 = vmatprep.subr.mxu0 %v6958_v43 }
 0x5de   : > { %8972 = vmatpush3.msra.mxu0 %v6958_v43 }
 0x5df   : > { %8973 = vmatprep.subr.mxu0 %v6957_v46 }
 0x5e0   : > { %8974 = vmatpush3.msra.mxu0 %v6957_v46 }
 0x5e1   : > { %8975 = vmatprep.subr.mxu0 %v6956_v11 }
 0x5e2   : > { %8976 = vmatpush3.msra.mxu0 %v6956_v11 }
 0x5e3   : > { %8977 = vmatprep.subr.mxu0 %v6955_v33 }
 0x5e4   : > { %8978 = vmatpush3.msra.mxu0 %v6955_v33 }
 0x647   : > { %v8823_v20 = vpop.f32.mrf.mxu0 }
 0x648   : > { %v4157_v53 = vadd.f32 %v8823_v20, %v11544_v39 }
 0x649   : > { %v4151_v24 = vpop.f32.mrf.mxu0 }
 0x64a   : > { %v4152_v23 = vadd.f32 %v11544_v39, %v4151_v24  ;;  %v4311_v21 = vmax.f32 %v4157_v53, 0.0 }
 0x64c   : > { %v4310_v10 = vmax.f32 %v4152_v23, 0.0 }
 0x64e   : > { %8901 = vmatprep.mubr.f32.mxu1 %v4310_v10 }
 0x64f   : > { %v8826_v51 = vpop.f32.mrf.mxu0  ;;  %8902 = vmatmul.mubr.f32.vlgmr.msra.gmra.mxu1 %v4311_v21 }
 0x650   : > { %v4167_v47 = vadd.f32 %v8826_v51, %v11544_v39 }
 0x651   : > { %v4161_v16 = vpop.f32.mrf.mxu0 }
 0x652   : > { %v4162_v54 = vadd.f32 %v11544_v39, %v4161_v16  ;;  %v4313_v8 = vmax.f32 %v4167_v47, 0.0 }
 0x653   : > { %v8829_v42 = vpop.f32.mrf.mxu0 }
 0x654   : > { %v4312_v60 = vmax.f32 %v4162_v54, 0.0  ;;  %v4177_v18 = vadd.f32 %v8829_v42, %v11544_v39 }
 0x655   : > { %v4171_v31 = vpop.f32.mrf.mxu0 }
 0x656   : > { %8904 = vmatprep.mubr.f32.mxu1 %v4312_v60  ;;  %v4172_v7 = vadd.f32 %v11544_v39, %v4171_v31  ;;  %v4315_v2 = vmax.f32 %v4177_v18, 0.0 }
 0x657   : > { %8905 = vmatmul.mubr.f32.gmra.mxu1 %v4313_v8 }
 0x658   : > { %v4314_v6 = vmax.f32 %v4172_v7, 0.0 }
 0x659   : > { %v8832_v40 = vpop.f32.mrf.mxu0 }
 0x65a   : > { %v4187_v44 = vadd.f32 %v8832_v40, %v11544_v39  ;;  %8907 = vmatprep.mubr.f32.mxu1 %v4314_v6 }
 0x65b   : > { %v4181_v14 = vpop.f32.mrf.mxu0  ;;  %8908 = vmatmul.mubr.f32.gmra.mxu1 %v4315_v2 }
 0x65c   : > { %v4182_v62 = vadd.f32 %v11544_v39, %v4181_v14  ;;  %v4317_v30 = vmax.f32 %v4187_v44, 0.0 }
 0x65e   : > { %v4316_v57 = vmax.f32 %v4182_v62, 0.0 }
 0x660   : > { %v8835_v5 = vpop.f32.mrf.mxu0  ;;  %8910 = vmatprep.mubr.f32.mxu1 %v4316_v57 }
 0x661   : > { %v4197_v13 = vadd.f32 %v8835_v5, %v11544_v39  ;;  %8911 = vmatmul.mubr.f32.gmra.mxu1 %v4317_v30 }
 0x662   : > { %v4191_v35 = vpop.f32.mrf.mxu0 }
 0x663   : > { %v4192_v41 = vadd.f32 %v11544_v39, %v4191_v35  ;;  %v4319_v59 = vmax.f32 %v4197_v13, 0.0 }
 0x665   : > { %v4318_v48 = vmax.f32 %v4192_v41, 0.0  ;;  %v8838_v28 = vpop.f32.mrf.mxu0 }
 0x666   : > { %v4207_v36 = vadd.f32 %v8838_v28, %v11544_v39 }
 0x667   : > { %v4201_v52 = vpop.f32.mrf.mxu0  ;;  %8913 = vmatprep.mubr.f32.mxu1 %v4318_v48 }
 0x668   : > { %v4202_v61 = vadd.f32 %v11544_v39, %v4201_v52  ;;  %8914 = vmatmul.mubr.f32.gmra.mxu1 %v4319_v59  ;;  %v4321_v50 = vmax.f32 %v4207_v36, 0.0 }
 0x669   : > { %v8841_v1 = vpop.f32.mrf.mxu0 }
 0x66a   : > { %v4320_v27 = vmax.f32 %v4202_v61, 0.0  ;;  %v4217_v4 = vadd.f32 %v8841_v1, %v11544_v39  ;;  %v6954_v61 = vld [vmem:[%s12644_s1 + $0x600] sm:$0xff]  ;;  %v6986_v1 = vld [vmem:[%s12644_s1 + $0x6f8] sm:$0xff] }
 0x66b   : > { %v4211_v29 = vpop.f32.mrf.mxu0  ;;  %8979 = vmatprep.subr.mxu0 %v6954_v61  ;;  %9029 = vmatprep.subr.mxu1 %v6986_v1 }
 0x66c   : > { %v4212_v12 = vadd.f32 %v11544_v39, %v4211_v29  ;;  %8916 = vmatprep.mubr.f32.mxu1 %v4320_v27  ;;  %v4323_v58 = vmax.f32 %v4217_v4, 0.0  ;;  %8980 = vmatpush3.msra.mxu0 %v6954_v61  ;;  %v6984_v27 = vld [vmem:[%s12644_s1 + $0x6e8] sm:$0xff]  ;;  %v6982_v4 = vld [vmem:[%s12644_s1 + $0x6d8] sm:$0xff]  ;;  %v6981_v29 = vld [vmem:[%s12644_s1 + $0x6d0] sm:$0xff] }
 0x66d   : > { %v8844_v0 = vpop.f32.mrf.mxu0  ;;  %8917 = vmatmul.mubr.f32.gmra.mxu1 %v4321_v50  ;;  %v6983_v50 = vld [vmem:[%s12644_s1 + $0x6e0] sm:$0xff] }
 0x66e   : > { %v4322_v9 = vmax.f32 %v4212_v12, 0.0  ;;  %v4227_v56 = vadd.f32 %v8844_v0, %v11544_v39  ;;  %9030 = vmatpush3.msra.mxu1 %v6986_v1  ;;  %v6980_v12 = vld [vmem:[%s12644_s1 + $0x6c8] sm:$0xff]  ;;  %v6979_v0 = vld [vmem:[%s12644_s1 + $0x6c0] sm:$0xff] }
 0x66f   : > { %v4221_v38 = vpop.f32.mrf.mxu0 }
 0x670   : > { %v4222_v63 = vadd.f32 %v11544_v39, %v4221_v38  ;;  %8919 = vmatprep.mubr.f32.mxu1 %v4322_v9  ;;  %v4325_v15 = vmax.f32 %v4227_v56, 0.0  ;;  %v6978_v9 = vld [vmem:[%s12644_s1 + $0x6b8] sm:$0xff]  ;;  %v6976_v56 = vld [vmem:[%s12644_s1 + $0x6a8] sm:$0xff]  ;;  %v6975_v38 = vld [vmem:[%s12644_s1 + $0x6a0] sm:$0xff] }
 0x671   : > { %v8847_v34 = vpop.f32.mrf.mxu0  ;;  %8920 = vmatmul.mubr.f32.gmra.mxu1 %v4323_v58  ;;  %v6977_v58 = vld [vmem:[%s12644_s1 + $0x6b0] sm:$0xff] }
 0x672   : > { %v4324_v32 = vmax.f32 %v4222_v63, 0.0  ;;  %v4237_v45 = vadd.f32 %v8847_v34, %v11544_v39  ;;  %v6974_v63 = vld [vmem:[%s12644_s1 + $0x698] sm:$0xff]  ;;  %v6973_v34 = vld [vmem:[%s12644_s1 + $0x690] sm:$0xff] }
 0x673   : > { %v4231_v25 = vpop.f32.mrf.mxu0 }
 0x674   : > { %v4232_v19 = vadd.f32 %v11544_v39, %v4231_v25  ;;  %8922 = vmatprep.mubr.f32.mxu1 %v4324_v32  ;;  %v4327_v26 = vmax.f32 %v4237_v45, 0.0  ;;  %v6972_v32 = vld [vmem:[%s12644_s1 + $0x688] sm:$0xff] }
 0x675   : > { %v8850_v49 = vpop.f32.mrf.mxu0  ;;  %8923 = vmatmul.mubr.f32.gmra.mxu1 %v4325_v15  ;;  %v11629_v15 = vld [vmem:[%s12645_s2 + $0x8] ss:$0 sm:$0xff] }
 0x676   : > { %v4326_v55 = vmax.f32 %v4232_v19, 0.0  ;;  %v4247_v3 = vadd.f32 %v8850_v49, %v11544_v39 }
 0x677   : > { %v4241_v17 = vpop.f32.mrf.mxu0 }
 0x678   : > { %v4242_v37 = vadd.f32 %v11544_v39, %v4241_v17  ;;  %8925 = vmatprep.mubr.f32.mxu1 %v4326_v55  ;;  %v4329_v46 = vmax.f32 %v4247_v3, 0.0 }
 0x679   : > { %v8853_v22 = vpop.f32.mrf.mxu0  ;;  %8926 = vmatmul.mubr.f32.gmra.mxu1 %v4327_v26 }
 0x67a   : > { %v4328_v43 = vmax.f32 %v4242_v37, 0.0  ;;  %v4257_v11 = vadd.f32 %v8853_v22, %v11544_v39 }
 0x67b   : > { %v4251_v33 = vpop.f32.mrf.mxu0 }
 0x67c   : > { %v4252_v20 = vadd.f32 %v11544_v39, %v4251_v33  ;;  %8928 = vmatprep.mubr.f32.mxu1 %v4328_v43  ;;  %v4331_v23 = vmax.f32 %v4257_v11, 0.0 }
 0x67d   : > { %v8856_v53 = vpop.f32.mrf.mxu0  ;;  %8929 = vmatmul.mubr.f32.gmra.mxu1 %v4329_v46 }
 0x67e   : > { %v4330_v24 = vmax.f32 %v4252_v20, 0.0  ;;  %v4267_v10 = vadd.f32 %v8856_v53, %v11544_v39 }
 0x67f   : > { %v4261_v21 = vpop.f32.mrf.mxu0 }
 0x680   : > { %v4262_v51 = vadd.f32 %v11544_v39, %v4261_v21  ;;  %8931 = vmatprep.mubr.f32.mxu1 %v4330_v24  ;;  %v4333_v54 = vmax.f32 %v4267_v10, 0.0 }
 0x681   : > { %v8859_v47 = vpop.f32.mrf.mxu0  ;;  %8932 = vmatmul.mubr.f32.gmra.mxu1 %v4331_v23 }
 0x682   : > { %v4332_v16 = vmax.f32 %v4262_v51, 0.0  ;;  %v4277_v60 = vadd.f32 %v8859_v47, %v11544_v39 }
 0x683   : > { %v4271_v8 = vpop.f32.mrf.mxu0 }
 0x684   : > { %v4272_v42 = vadd.f32 %v11544_v39, %v4271_v8  ;;  %8934 = vmatprep.mubr.f32.mxu1 %v4332_v16  ;;  %v4335_v7 = vmax.f32 %v4277_v60, 0.0 }
 0x685   : > { %v8862_v18 = vpop.f32.mrf.mxu0  ;;  %8935 = vmatmul.mubr.f32.gmra.mxu1 %v4333_v54 }
 0x686   : > { %v4334_v31 = vmax.f32 %v4272_v42, 0.0  ;;  %v4287_v6 = vadd.f32 %v8862_v18, %v11544_v39 }
 0x687   : > { %v4281_v40 = vpop.f32.mrf.mxu0 }
 0x688   : > { %v4282_v2 = vadd.f32 %v11544_v39, %v4281_v40  ;;  %8937 = vmatprep.mubr.f32.mxu1 %v4334_v31  ;;  %v4337_v62 = vmax.f32 %v4287_v6, 0.0 }
 0x689   : > { %v8865_v44 = vpop.f32.mrf.mxu0  ;;  %8938 = vmatmul.mubr.f32.gmra.mxu1 %v4335_v7 }
 0x68a   : > { %v4336_v14 = vmax.f32 %v4282_v2, 0.0  ;;  %v4297_v57 = vadd.f32 %v8865_v44, %v11544_v39 }
 0x68b   : > { %v4291_v30 = vpop.f32.mrf.mxu0 }
 0x68c   : > { %v4292_v5 = vadd.f32 %v11544_v39, %v4291_v30  ;;  %8940 = vmatprep.mubr.f32.mxu1 %v4336_v14  ;;  %v4339_v41 = vmax.f32 %v4297_v57, 0.0 }
 0x68d   : > { %v8868_v13 = vpop.f32.mrf.mxu0  ;;  %8941 = vmatmul.mubr.f32.gmra.mxu1 %v4337_v62 }
 0x68e   : > { %v4338_v35 = vmax.f32 %v4292_v5, 0.0  ;;  %v4307_v48 = vadd.f32 %v8868_v13, %v11544_v39 }
 0x68f   : > { %v4301_v28 = vpop.f32.mrf.mxu0 }
 0x690   : > { %v4302_v59 = vadd.f32 %v11544_v39, %v4301_v28  ;;  %8943 = vmatprep.mubr.f32.mxu1 %v4338_v35  ;;  %v4341_v52 = vmax.f32 %v4307_v48, 0.0  ;;  %v6985_v39 = vld [vmem:[%s12644_s1 + $0x6f0] sm:$0xff] }
 0x691   : > { %8944 = vmatmul.mubr.f32.gmra.mxu1 %v4339_v41  ;;  %9031 = vmatprep.subr.mxu1 %v6985_v39 }
 0x692   : > { %v4340_v36 = vmax.f32 %v4302_v59, 0.0  ;;  %9032 = vmatpush3.msra.mxu1 %v6985_v39 }
 0x693   : > { %9033 = vmatprep.subr.mxu1 %v6984_v27 }
 0x694   : > { %8946 = vmatprep.mubr.f32.mxu1 %v4340_v36  ;;  %9034 = vmatpush3.msra.mxu1 %v6984_v27 }
 0x695   : > { %8947 = vmatmul.mubr.f32.gmra.mxu1 %v4341_v52  ;;  %9035 = vmatprep.subr.mxu1 %v6983_v50 }
 0x696   : > { %9036 = vmatpush3.msra.mxu1 %v6983_v50 }
 0x697   : > { %9037 = vmatprep.subr.mxu1 %v6982_v4 }
 0x698   : > { %9038 = vmatpush3.msra.mxu1 %v6982_v4 }
 0x699   : > { %9039 = vmatprep.subr.mxu1 %v6981_v29 }
 0x69a   : > { %9040 = vmatpush3.msra.mxu1 %v6981_v29 }
 0x69b   : > { %9041 = vmatprep.subr.mxu1 %v6980_v12 }
 0x69c   : > { %9042 = vmatpush3.msra.mxu1 %v6980_v12 }
 0x69d   : > { %9043 = vmatprep.subr.mxu1 %v6979_v0 }
 0x69e   : > { %9044 = vmatpush3.msra.mxu1 %v6979_v0 }
 0x69f   : > { %9045 = vmatprep.subr.mxu1 %v6978_v9 }
 0x6a0   : > { %9046 = vmatpush3.msra.mxu1 %v6978_v9 }
 0x6a1   : > { %9047 = vmatprep.subr.mxu1 %v6977_v58 }
 0x6a2   : > { %9048 = vmatpush3.msra.mxu1 %v6977_v58 }
 0x6a3   : > { %9049 = vmatprep.subr.mxu1 %v6976_v56 }
 0x6a4   : > { %9050 = vmatpush3.msra.mxu1 %v6976_v56 }
 0x6a5   : > { %9051 = vmatprep.subr.mxu1 %v6975_v38 }
 0x6a6   : > { %9052 = vmatpush3.msra.mxu1 %v6975_v38 }
 0x6a7   : > { %9053 = vmatprep.subr.mxu1 %v6974_v63 }
 0x6a8   : > { %9054 = vmatpush3.msra.mxu1 %v6974_v63 }
 0x6a9   : > { %9055 = vmatprep.subr.mxu1 %v6973_v34 }
 0x6aa   : > { %9056 = vmatpush3.msra.mxu1 %v6973_v34 }
 0x6ab   : > { %9057 = vmatprep.subr.mxu1 %v6972_v32 }
 0x6ac   : > { %9058 = vmatpush3.msra.mxu1 %v6972_v32 }
 0x70f   : > { %v8903_v45 = vpop.f32.mrf.mxu1 }
 0x710   : > { %v4436_v25 = vadd.f32 %v8903_v45, %v11629_v15 }
 0x711   : > { %v4430_v19 = vpop.f32.mrf.mxu1 }
 0x712   : > { %v4431_v49 = vadd.f32 %v11629_v15, %v4430_v19  ;;  %v4590_v26 = vmax.f32 %v4436_v25, 0.0 }
 0x714   : > { %v4589_v55 = vmax.f32 %v4431_v49, 0.0 }
 0x716   : > { %8981 = vmatprep.mubr.f32.mxu0 %v4589_v55 }
 0x717   : > { %v8906_v3 = vpop.f32.mrf.mxu1  ;;  %8982 = vmatmul.mubr.f32.vlgmr.msra.gmra.mxu0 %v4590_v26 }
 0x718   : > { %v4446_v17 = vadd.f32 %v8906_v3, %v11629_v15 }
 0x719   : > { %v4440_v37 = vpop.f32.mrf.mxu1 }
 0x71a   : > { %v4441_v22 = vadd.f32 %v11629_v15, %v4440_v37  ;;  %v4592_v46 = vmax.f32 %v4446_v17, 0.0 }
 0x71b   : > { %v8909_v11 = vpop.f32.mrf.mxu1 }
 0x71c   : > { %v4591_v43 = vmax.f32 %v4441_v22, 0.0  ;;  %v4456_v33 = vadd.f32 %v8909_v11, %v11629_v15 }
 0x71d   : > { %v4450_v20 = vpop.f32.mrf.mxu1 }
 0x71e   : > { %8984 = vmatprep.mubr.f32.mxu0 %v4591_v43  ;;  %v4451_v53 = vadd.f32 %v11629_v15, %v4450_v20  ;;  %v4594_v10 = vmax.f32 %v4456_v33, 0.0 }
 0x71f   : > { %8985 = vmatmul.mubr.f32.gmra.mxu0 %v4592_v46 }
 0x720   : > { %v4593_v24 = vmax.f32 %v4451_v53, 0.0 }
 0x721   : > { %v8912_v23 = vpop.f32.mrf.mxu1 }
 0x722   : > { %v4466_v21 = vadd.f32 %v8912_v23, %v11629_v15  ;;  %8987 = vmatprep.mubr.f32.mxu0 %v4593_v24 }
 0x723   : > { %v4460_v51 = vpop.f32.mrf.mxu1  ;;  %8988 = vmatmul.mubr.f32.gmra.mxu0 %v4594_v10 }
 0x724   : > { %v4461_v47 = vadd.f32 %v11629_v15, %v4460_v51  ;;  %v4596_v54 = vmax.f32 %v4466_v21, 0.0 }
 0x726   : > { %v4595_v16 = vmax.f32 %v4461_v47, 0.0 }
 0x728   : > { %v8915_v60 = vpop.f32.mrf.mxu1  ;;  %8990 = vmatprep.mubr.f32.mxu0 %v4595_v16 }
 0x729   : > { %v4476_v8 = vadd.f32 %v8915_v60, %v11629_v15  ;;  %8991 = vmatmul.mubr.f32.gmra.mxu0 %v4596_v54 }
 0x72a   : > { %v4470_v42 = vpop.f32.mrf.mxu1 }
 0x72b   : > { %v4471_v18 = vadd.f32 %v11629_v15, %v4470_v42  ;;  %v4598_v6 = vmax.f32 %v4476_v8, 0.0 }
 0x72d   : > { %v4597_v31 = vmax.f32 %v4471_v18, 0.0  ;;  %v8918_v7 = vpop.f32.mrf.mxu1 }
 0x72e   : > { %v4486_v40 = vadd.f32 %v8918_v7, %v11629_v15 }
 0x72f   : > { %v4480_v2 = vpop.f32.mrf.mxu1  ;;  %8993 = vmatprep.mubr.f32.mxu0 %v4597_v31 }
 0x730   : > { %v4481_v44 = vadd.f32 %v11629_v15, %v4480_v2  ;;  %8994 = vmatmul.mubr.f32.gmra.mxu0 %v4598_v6  ;;  %v4600_v57 = vmax.f32 %v4486_v40, 0.0 }
 0x731   : > { %v8921_v14 = vpop.f32.mrf.mxu1 }
 0x732   : > { %v4599_v62 = vmax.f32 %v4481_v44, 0.0  ;;  %v4496_v30 = vadd.f32 %v8921_v14, %v11629_v15  ;;  %v6971_v44 = vld [vmem:[%s12644_s1 + $0x680] sm:$0xff]  ;;  %v7020_v14 = vld [vmem:[%s12644_s1 + $0x7f8] sm:$0xff] }
 0x733   : > { %v4490_v5 = vpop.f32.mrf.mxu1  ;;  %9059 = vmatprep.subr.mxu1 %v6971_v44 }
 0x734   : > { %v4491_v13 = vadd.f32 %v11629_v15, %v4490_v5  ;;  %8996 = vmatprep.mubr.f32.mxu0 %v4599_v62  ;;  %v4602_v48 = vmax.f32 %v4496_v30, 0.0  ;;  %9060 = vmatpush3.msra.mxu1 %v6971_v44  ;;  %v7002_v62 = vld [vmem:[%s12644_s1 + $0x770] sm:$0xff]  ;;  %v7000_v30 = vld [vmem:[%s12644_s1 + $0x760] sm:$0xff]  ;;  %v6999_v5 = vld [vmem:[%s12644_s1 + $0x758] sm:$0xff] }
 0x735   : > { %v8924_v35 = vpop.f32.mrf.mxu1  ;;  %8997 = vmatmul.mubr.f32.gmra.mxu0 %v4600_v57  ;;  %9189 = vmatprep.subr.mxu1 %v7020_v14  ;;  %v7001_v57 = vld [vmem:[%s12644_s1 + $0x768] sm:$0xff] }
 0x736   : > { %v4601_v41 = vmax.f32 %v4491_v13, 0.0  ;;  %v4506_v28 = vadd.f32 %v8924_v35, %v11629_v15  ;;  %v6998_v13 = vld [vmem:[%s12644_s1 + $0x750] sm:$0xff]  ;;  %v6997_v35 = vld [vmem:[%s12644_s1 + $0x748] sm:$0xff] }
 0x737   : > { %v4500_v59 = vpop.f32.mrf.mxu1 }
 0x738   : > { %v4501_v36 = vadd.f32 %v11629_v15, %v4500_v59  ;;  %8999 = vmatprep.mubr.f32.mxu0 %v4601_v41  ;;  %v4604_v1 = vmax.f32 %v4506_v28, 0.0  ;;  %v6996_v41 = vld [vmem:[%s12644_s1 + $0x740] sm:$0xff]  ;;  %v6994_v28 = vld [vmem:[%s12644_s1 + $0x730] sm:$0xff]  ;;  %v6993_v59 = vld [vmem:[%s12644_s1 + $0x728] sm:$0xff] }
 0x739   : > { %v8927_v52 = vpop.f32.mrf.mxu1  ;;  %9000 = vmatmul.mubr.f32.gmra.mxu0 %v4602_v48  ;;  %v6995_v48 = vld [vmem:[%s12644_s1 + $0x738] sm:$0xff] }
 0x73a   : > { %v4603_v61 = vmax.f32 %v4501_v36, 0.0  ;;  %v4516_v39 = vadd.f32 %v8927_v52, %v11629_v15  ;;  %v6992_v36 = vld [vmem:[%s12644_s1 + $0x720] sm:$0xff]  ;;  %v11708_v52 = vld [vmem:[%s12645_s2 + $0x9] ss:$0 sm:$0xff] }
 0x73b   : > { %v4510_v27 = vpop.f32.mrf.mxu1 }
 0x73c   : > { %v4511_v50 = vadd.f32 %v11629_v15, %v4510_v27  ;;  %9002 = vmatprep.mubr.f32.mxu0 %v4603_v61  ;;  %v4606_v12 = vmax.f32 %v4516_v39, 0.0 }
 0x73d   : > { %v8930_v4 = vpop.f32.mrf.mxu1  ;;  %9003 = vmatmul.mubr.f32.gmra.mxu0 %v4604_v1 }
 0x73e   : > { %v4605_v29 = vmax.f32 %v4511_v50, 0.0  ;;  %v4526_v0 = vadd.f32 %v8930_v4, %v11629_v15 }
 0x73f   : > { %v4520_v9 = vpop.f32.mrf.mxu1 }
 0x740   : > { %v4521_v58 = vadd.f32 %v11629_v15, %v4520_v9  ;;  %9005 = vmatprep.mubr.f32.mxu0 %v4605_v29  ;;  %v4608_v63 = vmax.f32 %v4526_v0, 0.0  ;;  %v7019_v29 = vld [vmem:[%s12644_s1 + $0x7f0] sm:$0xff]  ;;  %v7018_v0 = vld [vmem:[%s12644_s1 + $0x7e8] sm:$0xff] }
 0x741   : > { %v8933_v56 = vpop.f32.mrf.mxu1  ;;  %9006 = vmatmul.mubr.f32.gmra.mxu0 %v4606_v12 }
 0x742   : > { %v4607_v38 = vmax.f32 %v4521_v58, 0.0  ;;  %v4536_v34 = vadd.f32 %v8933_v56, %v11629_v15 }
 0x743   : > { %v4530_v32 = vpop.f32.mrf.mxu1 }
 0x744   : > { %v4531_v45 = vadd.f32 %v11629_v15, %v4530_v32  ;;  %9008 = vmatprep.mubr.f32.mxu0 %v4607_v38  ;;  %v4610_v49 = vmax.f32 %v4536_v34, 0.0  ;;  %v7017_v38 = vld [vmem:[%s12644_s1 + $0x7e0] sm:$0xff]  ;;  %v7016_v34 = vld [vmem:[%s12644_s1 + $0x7d8] sm:$0xff] }
 0x745   : > { %v8936_v25 = vpop.f32.mrf.mxu1  ;;  %9009 = vmatmul.mubr.f32.gmra.mxu0 %v4608_v63 }
 0x746   : > { %v4609_v19 = vmax.f32 %v4531_v45, 0.0  ;;  %v4546_v55 = vadd.f32 %v8936_v25, %v11629_v15  ;;  %v7015_v25 = vld [vmem:[%s12644_s1 + $0x7d0] sm:$0xff] }
 0x747   : > { %v4540_v26 = vpop.f32.mrf.mxu1 }
 0x748   : > { %v4541_v3 = vadd.f32 %v11629_v15, %v4540_v26  ;;  %9011 = vmatprep.mubr.f32.mxu0 %v4609_v19  ;;  %v4612_v22 = vmax.f32 %v4546_v55, 0.0  ;;  %v7014_v55 = vld [vmem:[%s12644_s1 + $0x7c8] sm:$0xff] }
 0x749   : > { %v8939_v17 = vpop.f32.mrf.mxu1  ;;  %9012 = vmatmul.mubr.f32.gmra.mxu0 %v4610_v49 }
 0x74a   : > { %v4611_v37 = vmax.f32 %v4541_v3, 0.0  ;;  %v4556_v43 = vadd.f32 %v8939_v17, %v11629_v15  ;;  %v7013_v3 = vld [vmem:[%s12644_s1 + $0x7c0] sm:$0xff] }
 0x74b   : > { %v4550_v46 = vpop.f32.mrf.mxu1 }
 0x74c   : > { %v4551_v11 = vadd.f32 %v11629_v15, %v4550_v46  ;;  %9014 = vmatprep.mubr.f32.mxu0 %v4611_v37  ;;  %v4614_v53 = vmax.f32 %v4556_v43, 0.0 }
 0x74d   : > { %v8942_v33 = vpop.f32.mrf.mxu1  ;;  %9015 = vmatmul.mubr.f32.gmra.mxu0 %v4612_v22 }
 0x74e   : > { %v4613_v20 = vmax.f32 %v4551_v11, 0.0  ;;  %v4566_v24 = vadd.f32 %v8942_v33, %v11629_v15  ;;  %v7012_v11 = vld [vmem:[%s12644_s1 + $0x7b8] sm:$0xff] }
 0x74f   : > { %v4560_v23 = vpop.f32.mrf.mxu1 }
 0x750   : > { %v4561_v10 = vadd.f32 %v11629_v15, %v4560_v23  ;;  %9017 = vmatprep.mubr.f32.mxu0 %v4613_v20  ;;  %v4616_v47 = vmax.f32 %v4566_v24, 0.0  ;;  %v7011_v20 = vld [vmem:[%s12644_s1 + $0x7b0] sm:$0xff] }
 0x751   : > { %v8945_v21 = vpop.f32.mrf.mxu1  ;;  %9018 = vmatmul.mubr.f32.gmra.mxu0 %v4614_v53 }
 0x752   : > { %v4615_v51 = vmax.f32 %v4561_v10, 0.0  ;;  %v4576_v16 = vadd.f32 %v8945_v21, %v11629_v15  ;;  %v7010_v10 = vld [vmem:[%s12644_s1 + $0x7a8] sm:$0xff] }
 0x753   : > { %v4570_v54 = vpop.f32.mrf.mxu1 }
 0x754   : > { %v4571_v60 = vadd.f32 %v11629_v15, %v4570_v54  ;;  %9020 = vmatprep.mubr.f32.mxu0 %v4615_v51  ;;  %v4618_v18 = vmax.f32 %v4576_v16, 0.0  ;;  %v7009_v16 = vld [vmem:[%s12644_s1 + $0x7a0] sm:$0xff] }
 0x755   : > { %v8948_v8 = vpop.f32.mrf.mxu1  ;;  %9021 = vmatmul.mubr.f32.gmra.mxu0 %v4616_v47 }
 0x756   : > { %v4617_v42 = vmax.f32 %v4571_v60, 0.0  ;;  %v4586_v31 = vadd.f32 %v8948_v8, %v11629_v15  ;;  %v7008_v8 = vld [vmem:[%s12644_s1 + $0x798] sm:$0xff] }
 0x757   : > { %v4580_v7 = vpop.f32.mrf.mxu1 }
 0x758   : > { %v4581_v6 = vadd.f32 %v11629_v15, %v4580_v7  ;;  %9023 = vmatprep.mubr.f32.mxu0 %v4617_v42  ;;  %v4620_v2 = vmax.f32 %v4586_v31, 0.0  ;;  %v7003_v15 = vld [vmem:[%s12644_s1 + $0x778] sm:$0xff]  ;;  %v7007_v7 = vld [vmem:[%s12644_s1 + $0x790] sm:$0xff] }
 0x759   : > { %9024 = vmatmul.mubr.f32.gmra.mxu0 %v4618_v18  ;;  %9109 = vmatprep.subr.mxu0 %v7003_v15 }
 0x75a   : > { %v4619_v40 = vmax.f32 %v4581_v6, 0.0  ;;  %9110 = vmatpush3.msra.mxu0 %v7003_v15 }
 0x75b   : > { %9111 = vmatprep.subr.mxu0 %v7002_v62 }
 0x75c   : > { %9026 = vmatprep.mubr.f32.mxu0 %v4619_v40  ;;  %9112 = vmatpush3.msra.mxu0 %v7002_v62 }
 0x75d   : > { %9027 = vmatmul.mubr.f32.gmra.mxu0 %v4620_v2  ;;  %9113 = vmatprep.subr.mxu0 %v7001_v57  ;;  %v7006_v2 = vld [vmem:[%s12644_s1 + $0x788] sm:$0xff] }
 0x75e   : > { %9114 = vmatpush3.msra.mxu0 %v7001_v57 }
 0x75f   : > { %9115 = vmatprep.subr.mxu0 %v7000_v30 }
 0x760   : > { %9116 = vmatpush3.msra.mxu0 %v7000_v30 }
 0x761   : > { %9117 = vmatprep.subr.mxu0 %v6999_v5 }
 0x762   : > { %9118 = vmatpush3.msra.mxu0 %v6999_v5 }
 0x763   : > { %9119 = vmatprep.subr.mxu0 %v6998_v13 }
 0x764   : > { %9120 = vmatpush3.msra.mxu0 %v6998_v13 }
 0x765   : > { %9121 = vmatprep.subr.mxu0 %v6997_v35 }
 0x766   : > { %9122 = vmatpush3.msra.mxu0 %v6997_v35 }
 0x767   : > { %9123 = vmatprep.subr.mxu0 %v6996_v41 }
 0x768   : > { %9124 = vmatpush3.msra.mxu0 %v6996_v41 }
 0x769   : > { %9125 = vmatprep.subr.mxu0 %v6995_v48 }
 0x76a   : > { %9126 = vmatpush3.msra.mxu0 %v6995_v48 }
 0x76b   : > { %9127 = vmatprep.subr.mxu0 %v6994_v28 }
 0x76c   : > { %9128 = vmatpush3.msra.mxu0 %v6994_v28 }
 0x76d   : > { %9129 = vmatprep.subr.mxu0 %v6993_v59 }
 0x76e   : > { %9130 = vmatpush3.msra.mxu0 %v6993_v59 }
 0x76f   : > { %9131 = vmatprep.subr.mxu0 %v6992_v36 }
 0x770   : > { %9132 = vmatpush3.msra.mxu0 %v6992_v36 }
 0x7d7   : > { %v8983_v61 = vpop.f32.mrf.mxu0 }
 0x7d8   : > { %v4715_v1 = vadd.f32 %v8983_v61, %v11708_v52 }
 0x7d9   : > { %v4709_v39 = vpop.f32.mrf.mxu0 }
 0x7da   : > { %v4710_v27 = vadd.f32 %v11708_v52, %v4709_v39  ;;  %v4869_v4 = vmax.f32 %v4715_v1, 0.0 }
 0x7dc   : > { %v4868_v50 = vmax.f32 %v4710_v27, 0.0 }
 0x7de   : > { %9061 = vmatprep.mubr.f32.mxu1 %v4868_v50 }
 0x7df   : > { %v8986_v12 = vpop.f32.mrf.mxu0  ;;  %9062 = vmatmul.mubr.f32.vlgmr.msra.gmra.mxu1 %v4869_v4 }
 0x7e0   : > { %9190 = vmatpush3.msra.mxu1 %v7020_v14  ;;  %v4725_v9 = vadd.f32 %v8986_v12, %v11708_v52 }
 0x7e1   : > { %v4719_v58 = vpop.f32.mrf.mxu0  ;;  %9191 = vmatprep.subr.mxu1 %v7019_v29 }
 0x7e2   : > { %v4720_v56 = vadd.f32 %v11708_v52, %v4719_v58  ;;  %9192 = vmatpush3.msra.mxu1 %v7019_v29  ;;  %v4871_v32 = vmax.f32 %v4725_v9, 0.0 }
 0x7e3   : > { %9193 = vmatprep.subr.mxu1 %v7018_v0  ;;  %v8989_v45 = vpop.f32.mrf.mxu0 }
 0x7e4   : > { %v4870_v63 = vmax.f32 %v4720_v56, 0.0  ;;  %9194 = vmatpush3.msra.mxu1 %v7018_v0  ;;  %v4735_v19 = vadd.f32 %v8989_v45, %v11708_v52 }
 0x7e5   : > { %9195 = vmatprep.subr.mxu1 %v7017_v38  ;;  %v4729_v49 = vpop.f32.mrf.mxu0 }
 0x7e6   : > { %9064 = vmatprep.mubr.f32.mxu1 %v4870_v63  ;;  %9196 = vmatpush3.msra.mxu1 %v7017_v38  ;;  %v4730_v26 = vadd.f32 %v11708_v52, %v4729_v49  ;;  %v4873_v22 = vmax.f32 %v4735_v19, 0.0 }
 0x7e7   : > { %9065 = vmatmul.mubr.f32.gmra.mxu1 %v4871_v32  ;;  %9197 = vmatprep.subr.mxu1 %v7016_v34 }
 0x7e8   : > { %9198 = vmatpush3.msra.mxu1 %v7016_v34  ;;  %v4872_v17 = vmax.f32 %v4730_v26, 0.0 }
 0x7e9   : > { %9199 = vmatprep.subr.mxu1 %v7015_v25  ;;  %v8992_v37 = vpop.f32.mrf.mxu0 }
 0x7ea   : > { %9200 = vmatpush3.msra.mxu1 %v7015_v25  ;;  %v4745_v43 = vadd.f32 %v8992_v37, %v11708_v52  ;;  %9067 = vmatprep.mubr.f32.mxu1 %v4872_v17 }
 0x7eb   : > { %9201 = vmatprep.subr.mxu1 %v7014_v55  ;;  %v4739_v46 = vpop.f32.mrf.mxu0  ;;  %9068 = vmatmul.mubr.f32.gmra.mxu1 %v4873_v22 }
 0x7ec   : > { %9202 = vmatpush3.msra.mxu1 %v7014_v55  ;;  %v4740_v33 = vadd.f32 %v11708_v52, %v4739_v46  ;;  %v4875_v24 = vmax.f32 %v4745_v43, 0.0 }
 0x7ed   : > { %9203 = vmatprep.subr.mxu1 %v7013_v3 }
 0x7ee   : > { %9204 = vmatpush3.msra.mxu1 %v7013_v3  ;;  %v4874_v53 = vmax.f32 %v4740_v33, 0.0 }
 0x7ef   : > { %9205 = vmatprep.subr.mxu1 %v7012_v11 }
 0x7f0   : > { %v8995_v23 = vpop.f32.mrf.mxu0  ;;  %9206 = vmatpush3.msra.mxu1 %v7012_v11  ;;  %9070 = vmatprep.mubr.f32.mxu1 %v4874_v53 }
 0x7f1   : > { %9207 = vmatprep.subr.mxu1 %v7011_v20  ;;  %v4755_v21 = vadd.f32 %v8995_v23, %v11708_v52  ;;  %9071 = vmatmul.mubr.f32.gmra.mxu1 %v4875_v24 }
 0x7f2   : > { %v4749_v51 = vpop.f32.mrf.mxu0  ;;  %9208 = vmatpush3.msra.mxu1 %v7011_v20 }
 0x7f3   : > { %v4750_v47 = vadd.f32 %v11708_v52, %v4749_v51  ;;  %9209 = vmatprep.subr.mxu1 %v7010_v10  ;;  %v4877_v42 = vmax.f32 %v4755_v21, 0.0 }
 0x7f4   : > { %9210 = vmatpush3.msra.mxu1 %v7010_v10 }
 0x7f5   : > { %v4876_v54 = vmax.f32 %v4750_v47, 0.0  ;;  %v8998_v60 = vpop.f32.mrf.mxu0  ;;  %9211 = vmatprep.subr.mxu1 %v7009_v16 }
 0x7f6   : > { %v4765_v18 = vadd.f32 %v8998_v60, %v11708_v52  ;;  %9212 = vmatpush3.msra.mxu1 %v7009_v16 }
 0x7f7   : > { %v4759_v31 = vpop.f32.mrf.mxu0  ;;  %9073 = vmatprep.mubr.f32.mxu1 %v4876_v54  ;;  %9213 = vmatprep.subr.mxu1 %v7008_v8 }
 0x7f8   : > { %v4760_v6 = vadd.f32 %v11708_v52, %v4759_v31  ;;  %9074 = vmatmul.mubr.f32.gmra.mxu1 %v4877_v42  ;;  %v4879_v14 = vmax.f32 %v4765_v18, 0.0 }
 0x7f9   : > { %v9001_v40 = vpop.f32.mrf.mxu0  ;;  %9214 = vmatpush3.msra.mxu1 %v7008_v8 }
 0x7fa   : > { %v4878_v44 = vmax.f32 %v4760_v6, 0.0  ;;  %9215 = vmatprep.subr.mxu1 %v7007_v7  ;;  %v4775_v15 = vadd.f32 %v9001_v40, %v11708_v52 }
 0x7fb   : > { %v4769_v62 = vpop.f32.mrf.mxu0  ;;  %9216 = vmatpush3.msra.mxu1 %v7007_v7  ;;  %v6991_v7 = vld [vmem:[%s12644_s1 + $0x718] sm:$0xff] }
 0x7fc   : > { %v4770_v57 = vadd.f32 %v11708_v52, %v4769_v62  ;;  %9076 = vmatprep.mubr.f32.mxu1 %v4878_v44  ;;  %9217 = vmatprep.subr.mxu1 %v7006_v2  ;;  %v4881_v13 = vmax.f32 %v4775_v15, 0.0  ;;  %v7005_v44 = vld [vmem:[%s12644_s1 + $0x780] sm:$0xff]  ;;  %v11802_v15 = vld [vmem:[%s12645_s2 + $0xa] ss:$0 sm:$0xff] }
 0x7fd   : > { %v9004_v30 = vpop.f32.mrf.mxu0  ;;  %9077 = vmatmul.mubr.f32.gmra.mxu1 %v4879_v14  ;;  %9133 = vmatprep.subr.mxu0 %v6991_v7  ;;  %v6988_v14 = vld [vmem:[%s12644_s1 + $0x700] sm:$0xff] }
 0x7fe   : > { %v4880_v5 = vmax.f32 %v4770_v57, 0.0  ;;  %9218 = vmatpush3.msra.mxu1 %v7006_v2  ;;  %v4785_v35 = vadd.f32 %v9004_v30, %v11708_v52  ;;  %9134 = vmatpush3.msra.mxu0 %v6991_v7  ;;  %v6990_v2 = vld [vmem:[%s12644_s1 + $0x710] sm:$0xff] }
 0x7ff   : > { %v4779_v41 = vpop.f32.mrf.mxu0  ;;  %9135 = vmatprep.subr.mxu0 %v6990_v2  ;;  %9219 = vmatprep.subr.mxu1 %v7005_v44 }
 0x800   : > { %v4780_v48 = vadd.f32 %v11708_v52, %v4779_v41  ;;  %9079 = vmatprep.mubr.f32.mxu1 %v4880_v5  ;;  %v4883_v36 = vmax.f32 %v4785_v35, 0.0  ;;  %9136 = vmatpush3.msra.mxu0 %v6990_v2 }
 0x801   : > { %v9007_v28 = vpop.f32.mrf.mxu0  ;;  %9080 = vmatmul.mubr.f32.gmra.mxu1 %v4881_v13 }
 0x802   : > { %v4882_v59 = vmax.f32 %v4780_v48, 0.0  ;;  %v4795_v61 = vadd.f32 %v9007_v28, %v11708_v52  ;;  %9220 = vmatpush3.msra.mxu1 %v7005_v44 }
 0x803   : > { %v4789_v1 = vpop.f32.mrf.mxu0 }
 0x804   : > { %v4790_v39 = vadd.f32 %v11708_v52, %v4789_v1  ;;  %9082 = vmatprep.mubr.f32.mxu1 %v4882_v59  ;;  %v4885_v4 = vmax.f32 %v4795_v61, 0.0 }
 0x805   : > { %v9010_v27 = vpop.f32.mrf.mxu0  ;;  %9083 = vmatmul.mubr.f32.gmra.mxu1 %v4883_v36 }
 0x806   : > { %v4884_v50 = vmax.f32 %v4790_v39, 0.0  ;;  %v4805_v29 = vadd.f32 %v9010_v27, %v11708_v52 }
 0x807   : > { %v4799_v12 = vpop.f32.mrf.mxu0 }
 0x808   : > { %v4800_v0 = vadd.f32 %v11708_v52, %v4799_v12  ;;  %9085 = vmatprep.mubr.f32.mxu1 %v4884_v50  ;;  %v4887_v56 = vmax.f32 %v4805_v29, 0.0 }
 0x809   : > { %v9013_v9 = vpop.f32.mrf.mxu0  ;;  %9086 = vmatmul.mubr.f32.gmra.mxu1 %v4885_v4 }
 0x80a   : > { %v4886_v58 = vmax.f32 %v4800_v0, 0.0  ;;  %v4815_v38 = vadd.f32 %v9013_v9, %v11708_v52 }
 0x80b   : > { %v4809_v63 = vpop.f32.mrf.mxu0 }
 0x80c   : > { %v4810_v34 = vadd.f32 %v11708_v52, %v4809_v63  ;;  %9088 = vmatprep.mubr.f32.mxu1 %v4886_v58  ;;  %v4889_v25 = vmax.f32 %v4815_v38, 0.0 }
 0x80d   : > { %v9016_v32 = vpop.f32.mrf.mxu0  ;;  %9089 = vmatmul.mubr.f32.gmra.mxu1 %v4887_v56 }
 0x80e   : > { %v4888_v45 = vmax.f32 %v4810_v34, 0.0  ;;  %v4825_v19 = vadd.f32 %v9016_v32, %v11708_v52 }
 0x80f   : > { %v4819_v49 = vpop.f32.mrf.mxu0 }
 0x810   : > { %v4820_v55 = vadd.f32 %v11708_v52, %v4819_v49  ;;  %9091 = vmatprep.mubr.f32.mxu1 %v4888_v45  ;;  %v4891_v17 = vmax.f32 %v4825_v19, 0.0 }
 0x811   : > { %v9019_v26 = vpop.f32.mrf.mxu0  ;;  %9092 = vmatmul.mubr.f32.gmra.mxu1 %v4889_v25 }
 0x812   : > { %v4890_v3 = vmax.f32 %v4820_v55, 0.0  ;;  %v4835_v37 = vadd.f32 %v9019_v26, %v11708_v52 }
 0x813   : > { %v4829_v22 = vpop.f32.mrf.mxu0 }
 0x814   : > { %v4830_v43 = vadd.f32 %v11708_v52, %v4829_v22  ;;  %9094 = vmatprep.mubr.f32.mxu1 %v4890_v3  ;;  %v4893_v33 = vmax.f32 %v4835_v37, 0.0 }
 0x815   : > { %v9022_v46 = vpop.f32.mrf.mxu0  ;;  %9095 = vmatmul.mubr.f32.gmra.mxu1 %v4891_v17 }
 0x816   : > { %v4892_v11 = vmax.f32 %v4830_v43, 0.0  ;;  %v4845_v20 = vadd.f32 %v9022_v46, %v11708_v52 }
 0x817   : > { %v4839_v53 = vpop.f32.mrf.mxu0 }
 0x818   : > { %v4840_v24 = vadd.f32 %v11708_v52, %v4839_v53  ;;  %9097 = vmatprep.mubr.f32.mxu1 %v4892_v11  ;;  %v4895_v21 = vmax.f32 %v4845_v20, 0.0 }
 0x819   : > { %v9025_v23 = vpop.f32.mrf.mxu0  ;;  %9098 = vmatmul.mubr.f32.gmra.mxu1 %v4893_v33 }
 0x81a   : > { %v4894_v10 = vmax.f32 %v4840_v24, 0.0  ;;  %v4855_v51 = vadd.f32 %v9025_v23, %v11708_v52 }
 0x81b   : > { %v4849_v47 = vpop.f32.mrf.mxu0 }
 0x81c   : > { %v4850_v16 = vadd.f32 %v11708_v52, %v4849_v47  ;;  %9100 = vmatprep.mubr.f32.mxu1 %v4894_v10  ;;  %v4897_v8 = vmax.f32 %v4855_v51, 0.0 }
 0x81d   : > { %v9028_v54 = vpop.f32.mrf.mxu0  ;;  %9101 = vmatmul.mubr.f32.gmra.mxu1 %v4895_v21 }
 0x81e   : > { %v4896_v60 = vmax.f32 %v4850_v16, 0.0  ;;  %v4865_v42 = vadd.f32 %v9028_v54, %v11708_v52 }
 0x81f   : > { %v4859_v18 = vpop.f32.mrf.mxu0 }
 0x820   : > { %v4860_v31 = vadd.f32 %v11708_v52, %v4859_v18  ;;  %9103 = vmatprep.mubr.f32.mxu1 %v4896_v60  ;;  %v4899_v40 = vmax.f32 %v4865_v42, 0.0  ;;  %v6989_v52 = vld [vmem:[%s12644_s1 + $0x708] sm:$0xff] }
 0x821   : > { %9104 = vmatmul.mubr.f32.gmra.mxu1 %v4897_v8  ;;  %9137 = vmatprep.subr.mxu0 %v6989_v52 }
 0x822   : > { %v4898_v6 = vmax.f32 %v4860_v31, 0.0  ;;  %9138 = vmatpush3.msra.mxu0 %v6989_v52 }
 0x823   : > { %9139 = vmatprep.subr.mxu0 %v6988_v14 }
 0x824   : > { %9106 = vmatprep.mubr.f32.mxu1 %v4898_v6  ;;  %9140 = vmatpush3.msra.mxu0 %v6988_v14 }
 0x825   : > { %9107 = vmatmul.mubr.f32.gmra.mxu1 %v4899_v40 }
 0x89f   : > { %v9063_v62 = vpop.f32.mrf.mxu1 }
 0x8a0   : > { %v4994_v57 = vadd.f32 %v9063_v62, %v11802_v15 }
 0x8a1   : > { %v4988_v30 = vpop.f32.mrf.mxu1 }
 0x8a2   : > { %v4989_v5 = vadd.f32 %v11802_v15, %v4988_v30  ;;  %v5148_v35 = vmax.f32 %v4994_v57, 0.0 }
 0x8a4   : > { %v5147_v13 = vmax.f32 %v4989_v5, 0.0 }
 0x8a6   : > { %9141 = vmatprep.mubr.f32.mxu0 %v5147_v13  ;;  %9221 = vmatprep.mubr.f32.mxu1 %v5147_v13 }
 0x8a7   : > { %v9066_v41 = vpop.f32.mrf.mxu1  ;;  %9142 = vmatmul.mubr.f32.vlgmr.msra.gmra.mxu0 %v5148_v35  ;;  %9222 = vmatmul.mubr.f32.vlgmr.msra.gmra.mxu1 %v5148_v35 }
 0x8a8   : > { %v5004_v48 = vadd.f32 %v9066_v41, %v11802_v15 }
 0x8a9   : > { %v4998_v28 = vpop.f32.mrf.mxu1 }
 0x8aa   : > { %v4999_v59 = vadd.f32 %v11802_v15, %v4998_v28  ;;  %v5150_v61 = vmax.f32 %v5004_v48, 0.0 }
 0x8ab   : > { %v9069_v1 = vpop.f32.mrf.mxu1 }
 0x8ac   : > { %v5149_v36 = vmax.f32 %v4999_v59, 0.0  ;;  %v5014_v39 = vadd.f32 %v9069_v1, %v11802_v15 }
 0x8ad   : > { %v5008_v27 = vpop.f32.mrf.mxu1 }
 0x8ae   : > { %9144 = vmatprep.mubr.f32.mxu0 %v5149_v36  ;;  %9224 = vmatprep.mubr.f32.mxu1 %v5149_v36  ;;  %v5009_v50 = vadd.f32 %v11802_v15, %v5008_v27  ;;  %v5152_v12 = vmax.f32 %v5014_v39, 0.0 }
 0x8af   : > { %9145 = vmatmul.mubr.f32.gmra.mxu0 %v5150_v61  ;;  %9225 = vmatmul.mubr.f32.gmra.mxu1 %v5150_v61 }
 0x8b0   : > { %v5151_v4 = vmax.f32 %v5009_v50, 0.0 }
 0x8b1   : > { %v9072_v29 = vpop.f32.mrf.mxu1 }
 0x8b2   : > { %v5024_v0 = vadd.f32 %v9072_v29, %v11802_v15  ;;  %9147 = vmatprep.mubr.f32.mxu0 %v5151_v4  ;;  %9227 = vmatprep.mubr.f32.mxu1 %v5151_v4 }
 0x8b3   : > { %v5018_v9 = vpop.f32.mrf.mxu1  ;;  %9148 = vmatmul.mubr.f32.gmra.mxu0 %v5152_v12  ;;  %9228 = vmatmul.mubr.f32.gmra.mxu1 %v5152_v12 }
 0x8b4   : > { %v5019_v58 = vadd.f32 %v11802_v15, %v5018_v9  ;;  %v5154_v38 = vmax.f32 %v5024_v0, 0.0 }
 0x8b6   : > { %v5153_v56 = vmax.f32 %v5019_v58, 0.0 }
 0x8b8   : > { %v9075_v63 = vpop.f32.mrf.mxu1  ;;  %9150 = vmatprep.mubr.f32.mxu0 %v5153_v56  ;;  %9230 = vmatprep.mubr.f32.mxu1 %v5153_v56 }
 0x8b9   : > { %v5034_v34 = vadd.f32 %v9075_v63, %v11802_v15  ;;  %9151 = vmatmul.mubr.f32.gmra.mxu0 %v5154_v38  ;;  %9231 = vmatmul.mubr.f32.gmra.mxu1 %v5154_v38 }
 0x8ba   : > { %v5028_v32 = vpop.f32.mrf.mxu1 }
 0x8bb   : > { %v5029_v45 = vadd.f32 %v11802_v15, %v5028_v32  ;;  %v5156_v49 = vmax.f32 %v5034_v34, 0.0 }
 0x8bd   : > { %v5155_v25 = vmax.f32 %v5029_v45, 0.0  ;;  %v9078_v19 = vpop.f32.mrf.mxu1 }
 0x8be   : > { %v5044_v55 = vadd.f32 %v9078_v19, %v11802_v15 }
 0x8bf   : > { %v5038_v26 = vpop.f32.mrf.mxu1  ;;  %9153 = vmatprep.mubr.f32.mxu0 %v5155_v25  ;;  %9233 = vmatprep.mubr.f32.mxu1 %v5155_v25 }
 0x8c0   : > { %v5039_v3 = vadd.f32 %v11802_v15, %v5038_v26  ;;  %9154 = vmatmul.mubr.f32.gmra.mxu0 %v5156_v49  ;;  %9234 = vmatmul.mubr.f32.gmra.mxu1 %v5156_v49  ;;  %v5158_v22 = vmax.f32 %v5044_v55, 0.0 }
 0x8c1   : > { %v9081_v17 = vpop.f32.mrf.mxu1 }
 0x8c2   : > { %v5157_v37 = vmax.f32 %v5039_v3, 0.0  ;;  %v5054_v43 = vadd.f32 %v9081_v17, %v11802_v15  ;;  %v11841_v3 = vld [vmem:[%s12645_s2 + $0xb] ss:$0 sm:$0xff] }
 0x8c3   : > { %v5048_v46 = vpop.f32.mrf.mxu1 }
 0x8c4   : > { %v5049_v11 = vadd.f32 %v11802_v15, %v5048_v46  ;;  %9156 = vmatprep.mubr.f32.mxu0 %v5157_v37  ;;  %9236 = vmatprep.mubr.f32.mxu1 %v5157_v37  ;;  %v5160_v53 = vmax.f32 %v5054_v43, 0.0 }
 0x8c5   : > { %v9084_v33 = vpop.f32.mrf.mxu1  ;;  %9157 = vmatmul.mubr.f32.gmra.mxu0 %v5158_v22  ;;  %9237 = vmatmul.mubr.f32.gmra.mxu1 %v5158_v22 }
 0x8c6   : > { %v5159_v20 = vmax.f32 %v5049_v11, 0.0  ;;  %v5064_v24 = vadd.f32 %v9084_v33, %v11802_v15 }
 0x8c7   : > { %v5058_v23 = vpop.f32.mrf.mxu1 }
 0x8c8   : > { %v5059_v10 = vadd.f32 %v11802_v15, %v5058_v23  ;;  %9159 = vmatprep.mubr.f32.mxu0 %v5159_v20  ;;  %9239 = vmatprep.mubr.f32.mxu1 %v5159_v20  ;;  %v5162_v47 = vmax.f32 %v5064_v24, 0.0 }
 0x8c9   : > { %v9087_v21 = vpop.f32.mrf.mxu1  ;;  %9160 = vmatmul.mubr.f32.gmra.mxu0 %v5160_v53  ;;  %9240 = vmatmul.mubr.f32.gmra.mxu1 %v5160_v53 }
 0x8ca   : > { %v5161_v51 = vmax.f32 %v5059_v10, 0.0  ;;  %v5074_v16 = vadd.f32 %v9087_v21, %v11802_v15 }
 0x8cb   : > { %v5068_v54 = vpop.f32.mrf.mxu1 }
 0x8cc   : > { %v5069_v60 = vadd.f32 %v11802_v15, %v5068_v54  ;;  %9162 = vmatprep.mubr.f32.mxu0 %v5161_v51  ;;  %9242 = vmatprep.mubr.f32.mxu1 %v5161_v51  ;;  %v5164_v18 = vmax.f32 %v5074_v16, 0.0 }
 0x8cd   : > { %v9090_v8 = vpop.f32.mrf.mxu1  ;;  %9163 = vmatmul.mubr.f32.gmra.mxu0 %v5162_v47  ;;  %9243 = vmatmul.mubr.f32.gmra.mxu1 %v5162_v47 }
 0x8ce   : > { %v5163_v42 = vmax.f32 %v5069_v60, 0.0  ;;  %v5084_v31 = vadd.f32 %v9090_v8, %v11802_v15 }
 0x8cf   : > { %v5078_v7 = vpop.f32.mrf.mxu1 }
 0x8d0   : > { %v5079_v6 = vadd.f32 %v11802_v15, %v5078_v7  ;;  %9165 = vmatprep.mubr.f32.mxu0 %v5163_v42  ;;  %9245 = vmatprep.mubr.f32.mxu1 %v5163_v42  ;;  %v5166_v44 = vmax.f32 %v5084_v31, 0.0 }
 0x8d1   : > { %v9093_v40 = vpop.f32.mrf.mxu1  ;;  %9166 = vmatmul.mubr.f32.gmra.mxu0 %v5164_v18  ;;  %9246 = vmatmul.mubr.f32.gmra.mxu1 %v5164_v18 }
 0x8d2   : > { %v5165_v2 = vmax.f32 %v5079_v6, 0.0  ;;  %v5094_v52 = vadd.f32 %v9093_v40, %v11802_v15 }
 0x8d3   : > { %v5088_v14 = vpop.f32.mrf.mxu1 }
 0x8d4   : > { %v5089_v62 = vadd.f32 %v11802_v15, %v5088_v14  ;;  %9168 = vmatprep.mubr.f32.mxu0 %v5165_v2  ;;  %9248 = vmatprep.mubr.f32.mxu1 %v5165_v2  ;;  %v5168_v5 = vmax.f32 %v5094_v52, 0.0 }
 0x8d5   : > { %v9096_v57 = vpop.f32.mrf.mxu1  ;;  %9169 = vmatmul.mubr.f32.gmra.mxu0 %v5166_v44  ;;  %9249 = vmatmul.mubr.f32.gmra.mxu1 %v5166_v44 }
 0x8d6   : > { %v5167_v30 = vmax.f32 %v5089_v62, 0.0  ;;  %v5104_v13 = vadd.f32 %v9096_v57, %v11802_v15 }
 0x8d7   : > { %v5098_v35 = vpop.f32.mrf.mxu1 }
 0x8d8   : > { %v5099_v41 = vadd.f32 %v11802_v15, %v5098_v35  ;;  %9171 = vmatprep.mubr.f32.mxu0 %v5167_v30  ;;  %9251 = vmatprep.mubr.f32.mxu1 %v5167_v30  ;;  %v5170_v59 = vmax.f32 %v5104_v13, 0.0 }
 0x8d9   : > { %v9099_v48 = vpop.f32.mrf.mxu1  ;;  %9172 = vmatmul.mubr.f32.gmra.mxu0 %v5168_v5  ;;  %9252 = vmatmul.mubr.f32.gmra.mxu1 %v5168_v5 }
 0x8da   : > { %v5169_v28 = vmax.f32 %v5099_v41, 0.0  ;;  %v5114_v36 = vadd.f32 %v9099_v48, %v11802_v15 }
 0x8db   : > { %v5108_v61 = vpop.f32.mrf.mxu1 }
 0x8dc   : > { %v5109_v1 = vadd.f32 %v11802_v15, %v5108_v61  ;;  %9174 = vmatprep.mubr.f32.mxu0 %v5169_v28  ;;  %9254 = vmatprep.mubr.f32.mxu1 %v5169_v28  ;;  %v5172_v50 = vmax.f32 %v5114_v36, 0.0 }
 0x8dd   : > { %v9102_v39 = vpop.f32.mrf.mxu1  ;;  %9175 = vmatmul.mubr.f32.gmra.mxu0 %v5170_v59  ;;  %9255 = vmatmul.mubr.f32.gmra.mxu1 %v5170_v59 }
 0x8de   : > { %v5171_v27 = vmax.f32 %v5109_v1, 0.0  ;;  %v5124_v4 = vadd.f32 %v9102_v39, %v11802_v15 }
 0x8df   : > { %v5118_v29 = vpop.f32.mrf.mxu1 }
 0x8e0   : > { %v5119_v12 = vadd.f32 %v11802_v15, %v5118_v29  ;;  %9177 = vmatprep.mubr.f32.mxu0 %v5171_v27  ;;  %9257 = vmatprep.mubr.f32.mxu1 %v5171_v27  ;;  %v5174_v58 = vmax.f32 %v5124_v4, 0.0 }
 0x8e1   : > { %v9105_v0 = vpop.f32.mrf.mxu1  ;;  %9178 = vmatmul.mubr.f32.gmra.mxu0 %v5172_v50  ;;  %9258 = vmatmul.mubr.f32.gmra.mxu1 %v5172_v50 }
 0x8e2   : > { %v5173_v9 = vmax.f32 %v5119_v12, 0.0  ;;  %v5134_v56 = vadd.f32 %v9105_v0, %v11802_v15 }
 0x8e3   : > { %v5128_v38 = vpop.f32.mrf.mxu1 }
 0x8e4   : > { %v5129_v63 = vadd.f32 %v11802_v15, %v5128_v38  ;;  %9180 = vmatprep.mubr.f32.mxu0 %v5173_v9  ;;  %9260 = vmatprep.mubr.f32.mxu1 %v5173_v9  ;;  %v5176_v45 = vmax.f32 %v5134_v56, 0.0 }
 0x8e5   : > { %v9108_v34 = vpop.f32.mrf.mxu1  ;;  %9181 = vmatmul.mubr.f32.gmra.mxu0 %v5174_v58  ;;  %9261 = vmatmul.mubr.f32.gmra.mxu1 %v5174_v58 }
 0x8e6   : > { %v5175_v32 = vmax.f32 %v5129_v63, 0.0  ;;  %v5144_v25 = vadd.f32 %v9108_v34, %v11802_v15 }
 0x8e7   : > { %v5138_v19 = vpop.f32.mrf.mxu1 }
 0x8e8   : > { %v5139_v49 = vadd.f32 %v11802_v15, %v5138_v19  ;;  %9183 = vmatprep.mubr.f32.mxu0 %v5175_v32  ;;  %9263 = vmatprep.mubr.f32.mxu1 %v5175_v32  ;;  %v5178_v26 = vmax.f32 %v5144_v25, 0.0  ;;  %v11846_v15 = vld [vmem:[%s12645_s2 + $0xc] ss:$0 sm:$0xff] }
 0x8e9   : > { %9184 = vmatmul.mubr.f32.gmra.mxu0 %v5176_v45  ;;  %9264 = vmatmul.mubr.f32.gmra.mxu1 %v5176_v45 }
 0x8ea   : > { %v5177_v55 = vmax.f32 %v5139_v49, 0.0 }
 0x8ec   : > { %9186 = vmatprep.mubr.f32.mxu0 %v5177_v55  ;;  %9266 = vmatprep.mubr.f32.mxu1 %v5177_v55 }
 0x8ed   : > { %9187 = vmatmul.mubr.f32.gmra.mxu0 %v5178_v26  ;;  %9267 = vmatmul.mubr.f32.gmra.mxu1 %v5178_v26 }
 0x967   : > { %v9143_v17 = vpop.f32.mrf.mxu0  ;;  %v9223_v37 = vpop.f32.mrf.mxu1 }
 0x968   : > { %v5273_v22 = vadd.f32 %v9143_v17, %v11841_v3  ;;  %v11850_v43 = vadd.f32 %v9223_v37, %v11846_v15 }
 0x969   : > { %v5267_v46 = vpop.f32.mrf.mxu0  ;;  %v5514_v11 = vpop.f32.mrf.mxu1 }
 0x96a   : > { %6250 = vst [vmem:[%s11852_s12 + $0x8] sm:$0xff] %v5273_v22  ;;  %v5770_v33 = vand.u32 2147483647, %v11850_v43  ;;  %v5268_v20 = vadd.f32 %v11841_v3, %v5267_v46  ;;  %v11858_v53 = vadd.f32 %v11846_v15, %v5514_v11  ;;  %vm5706_vm0 = vcmp.ne.f32.partialorder %v11850_v43, %v11850_v43 }
 0x96c   : > { %v5802_v24 = vsub.f32 0.0, %v5770_v33  ;;  %6249 = vst [vmem:[%s11852_s12] sm:$0xff] %v5268_v20  ;;  %v5769_v23 = vand.u32 2147483647, %v11858_v53  ;;  %vm5705_vm1 = vcmp.ne.f32.partialorder %v11858_v53, %v11858_v53 }
 0x96e   : > { %v5835_v10 = vmul.f32 1.442695, %v5802_v24  ;;  %v5801_v21 = vsub.f32 0.0, %v5769_v23 }
 0x96f   : > { %v9146_v51 = vpop.f32.mrf.mxu0  ;;  %v9226_v47 = vpop.f32.mrf.mxu1 }
 0x970   : > { %9423 = vpow2.f32 %v5835_v10  ;;  %v5283_v16 = vadd.f32 %v9146_v51, %v11841_v3  ;;  %v11864_v54 = vadd.f32 %v9226_v47, %v11846_v15  ;;  %v5833_v60 = vmul.f32 1.442695, %v5801_v21 }
 0x971   : > { %v5277_v8 = vpop.f32.mrf.mxu0  ;;  %v5524_v42 = vpop.f32.mrf.mxu1 }
 0x972   : > { %6252 = vst [vmem:[%s11852_s12 + $0x18] sm:$0xff] %v5283_v16  ;;  %v5772_v18 = vand.u32 2147483647, %v11864_v54  ;;  %v5278_v31 = vadd.f32 %v11841_v3, %v5277_v8  ;;  %9425 = vpow2.f32 %v5833_v60  ;;  %v11870_v7 = vadd.f32 %v11846_v15, %v5524_v42 }
 0x973   : > { %v9149_v44 = vpop.f32.mrf.mxu0  ;;  %v9229_v52 = vpop.f32.mrf.mxu1  ;;  %v5674_v16 = vmax.f32 %v11850_v43, 0.0  ;;  %vm5708_vm4 = vcmp.ne.f32.partialorder %v11864_v54, %v11864_v54 }
 0x974   : > { %v5804_v6 = vsub.f32 0.0, %v5772_v18  ;;  %6251 = vst [vmem:[%s11852_s12 + $0x10] sm:$0xff] %v5278_v31  ;;  %v5771_v40 = vand.u32 2147483647, %v11870_v7  ;;  %v5293_v62 = vadd.f32 %v9149_v44, %v11841_v3  ;;  %v11876_v57 = vadd.f32 %v9229_v52, %v11846_v15 }
 0x975   : > { %v5287_v30 = vpop.f32.mrf.mxu0  ;;  %v5534_v5 = vpop.f32.mrf.mxu1  ;;  %v5673_v31 = vmax.f32 %v11858_v53, 0.0  ;;  %vm5707_vm6 = vcmp.ne.f32.partialorder %v11870_v7, %v11870_v7 }
 0x976   : > { %v5839_v2 = vmul.f32 1.442695, %v5804_v6  ;;  %v5803_v14 = vsub.f32 0.0, %v5771_v40  ;;  %6254 = vst [vmem:[%s11852_s12 + $0x28] sm:$0xff] %v5293_v62  ;;  %v5774_v35 = vand.u32 2147483647, %v11876_v57  ;;  %v5288_v41 = vadd.f32 %v11841_v3, %v5287_v30 }
 0x977   : > { %v11882_v48 = vadd.f32 %v11846_v15, %v5534_v5  ;;  %v5676_v6 = vmax.f32 %v11864_v54, 0.0  ;;  %v5675_v40 = vmax.f32 %v11870_v7, 0.0  ;;  %v5678_v44 = vmax.f32 %v11876_v57, 0.0 }
 0x978   : > { %9427 = vpow2.f32 %v5839_v2  ;;  %v5837_v13 = vmul.f32 1.442695, %v5803_v14  ;;  %v5806_v28 = vsub.f32 0.0, %v5774_v35  ;;  %6253 = vst [vmem:[%s11852_s12 + $0x20] sm:$0xff] %v5288_v41  ;;  %vm5710_vm8 = vcmp.ne.f32.partialorder %v11876_v57, %v11876_v57 }
 0x979   : > { %v9152_v59 = vpop.f32.mrf.mxu0  ;;  %v9232_v36 = vpop.f32.mrf.mxu1  ;;  %v5773_v61 = vand.u32 2147483647, %v11882_v48  ;;  %vm5709_vm10 = vcmp.ne.f32.partialorder %v11882_v48, %v11882_v48 }
 0x97a   : > { %9429 = vpow2.f32 %v5837_v13  ;;  %v5303_v1 = vadd.f32 %v9152_v59, %v11841_v3  ;;  %v5843_v27 = vmul.f32 1.442695, %v5806_v28  ;;  %v11890_v50 = vadd.f32 %v9232_v36, %v11846_v15 }
 0x97b   : > { %v5297_v4 = vpop.f32.mrf.mxu0  ;;  %v5544_v29 = vpop.f32.mrf.mxu1  ;;  %v5805_v0 = vsub.f32 0.0, %v5773_v61 }
 0x97c   : > { %6256 = vst [vmem:[%s11852_s12 + $0x38] sm:$0xff] %v5303_v1  ;;  %9431 = vpow2.f32 %v5843_v27  ;;  %v5776_v9 = vand.u32 2147483647, %v11890_v50  ;;  %v5298_v45 = vadd.f32 %v11841_v3, %v5297_v4  ;;  %v11900_v25 = vadd.f32 %v11846_v15, %v5544_v29 }
 0x97d   : > { %v11887_v39 = vpop.eup %9423  ;;  %v5841_v56 = vmul.f32 1.442695, %v5805_v0  ;;  %vm5712_vm13 = vcmp.ne.f32.partialorder %v11890_v50, %v11890_v50 }
 0x97e   : > { %v5906_v12 = vadd.f32 1.0, %v11887_v39  ;;  %v5808_v63 = vsub.f32 0.0, %v5776_v9  ;;  %6255 = vst [vmem:[%s11852_s12 + $0x30] sm:$0xff] %v5298_v45  ;;  %v5775_v55 = vand.u32 2147483647, %v11900_v25  ;;  %v5909_v37 = vmul.f32 -0.5, %v11887_v39 }
 0x97f   : > { %v11895_v58 = vpop.eup %9425  ;;  %v5912_v2 = vand.u32 2147483647, %v11887_v39  ;;  %vm5711_vm15 = vcmp.ne.f32.partialorder %v11900_v25, %v11900_v25 }
 0x980   : > { %9433 = vlog2.f32 %v5906_v12  ;;  %v5897_v38 = vadd.f32 1.0, %v11895_v58  ;;  %v9155_v34 = vpop.f32.mrf.mxu0  ;;  %v9235_v32 = vpop.f32.mrf.mxu1  ;;  %v5847_v19 = vmul.f32 1.442695, %v5808_v63  ;;  %v5807_v20 = vsub.f32 0.0, %v5775_v55 }
 0x981   : > { %9435 = vpow2.f32 %v5841_v56  ;;  %v5313_v26 = vadd.f32 %v9155_v34, %v11841_v3  ;;  %v11909_v22 = vadd.f32 %v9235_v32, %v11846_v15  ;;  %v5900_v21 = vmul.f32 -0.5, %v11895_v58 }
 0x982   : > { %9437 = vlog2.f32 %v5897_v38  ;;  %v5307_v49 = vpop.f32.mrf.mxu0  ;;  %v5554_v11 = vpop.f32.mrf.mxu1  ;;  %v5845_v51 = vmul.f32 1.442695, %v5807_v20  ;;  %v5910_v60 = vadd.f32 1.0, %v5909_v37  ;;  %v5903_v59 = vand.u32 2147483647, %v11895_v58 }
 0x983   : > { %9439 = vpow2.f32 %v5847_v19  ;;  %v5308_v46 = vadd.f32 %v11841_v3, %v5307_v49  ;;  %6258 = vst [vmem:[%s11852_s12 + $0x48] sm:$0xff] %v5313_v26  ;;  %v5778_v23 = vand.u32 2147483647, %v11909_v22  ;;  %v11920_v47 = vadd.f32 %v11846_v15, %v5554_v11 }
 0x984   : > { %v5901_v30 = vadd.f32 1.0, %v5900_v21  ;;  %v5911_v28 = vmul.f32 %v11887_v39, %v5910_v60  ;;  %vm5913_vm2 = vcmp.lt.f32.partialorder %v5912_v2, 0.0004427343  ;;  %v5677_v12 = vmax.f32 %v11882_v48, 0.0 }
 0x985   : > { %v11905_v17 = vpop.eup %9427  ;;  %v9158_v24 = vpop.f32.mrf.mxu0  ;;  %6257 = vst [vmem:[%s11852_s12 + $0x40] sm:$0xff] %v5308_v46  ;;  %v5810_v42 = vsub.f32 0.0, %v5778_v23  ;;  %v5777_v5 = vand.u32 2147483647, %v11920_v47  ;;  %vm5904_vm3 = vcmp.lt.f32.partialorder %v5903_v59, 0.0004427343 }
 0x986   : > { %v5924_v33 = vadd.f32 1.0, %v11905_v17  ;;  %v9238_v14 = vpop.f32.mrf.mxu1  ;;  %v5323_v13 = vadd.f32 %v9158_v24, %v11841_v3  ;;  %v5927_v36 = vmul.f32 -0.5, %v11905_v17  ;;  %v5902_v56 = vmul.f32 %v11895_v58, %v5901_v30 }
 0x987   : > { %v11916_v10 = vpop.eup %9429  ;;  %v5317_v18 = vpop.f32.mrf.mxu0  ;;  %v5851_v52 = vmul.f32 1.442695, %v5810_v42  ;;  %v5809_v27 = vsub.f32 0.0, %v5777_v5  ;;  %v11944_v4 = vadd.f32 %v9238_v14, %v11846_v15  ;;  %v5930_v38 = vand.u32 2147483647, %v11905_v17 }
 0x988   : > { %9441 = vlog2.f32 %v5924_v33  ;;  %v5915_v8 = vadd.f32 1.0, %v11916_v10  ;;  %v5318_v35 = vadd.f32 %v11841_v3, %v5317_v18  ;;  %6260 = vst [vmem:[%s11852_s12 + $0x58] sm:$0xff] %v5323_v13  ;;  %v5918_v39 = vmul.f32 -0.5, %v11916_v10  ;;  %v5564_v26 = vpop.f32.mrf.mxu1 }
 0x989   : > { %9443 = vpow2.f32 %v5845_v51  ;;  %v11931_v62 = vpop.eup %9431  ;;  %v5928_v45 = vadd.f32 1.0, %v5927_v36  ;;  %v5849_v19 = vmul.f32 1.442695, %v5809_v27  ;;  %v5921_v55 = vand.u32 2147483647, %v11916_v10  ;;  %v9161_v37 = vpop.f32.mrf.mxu0 }
 0x98a   : > { %9445 = vlog2.f32 %v5915_v8  ;;  %v5942_v61 = vadd.f32 1.0, %v11931_v62  ;;  %6259 = vst [vmem:[%s11852_s12 + $0x50] sm:$0xff] %v5318_v35  ;;  %v5780_v58 = vand.u32 2147483647, %v11944_v4  ;;  %v5919_v33 = vadd.f32 1.0, %v5918_v39 }
 0x98b   : > { %9447 = vpow2.f32 %v5851_v52  ;;  %vm11966_vm5 = vcmp.lt.f32.partialorder %v5930_v38, 0.0004427343  ;;  %v5945_v21 = vmul.f32 -0.5, %v11931_v62  ;;  %v11975_v60 = vadd.f32 %v11846_v15, %v5564_v26 }
 0x98c   : > { %9449 = vlog2.f32 %v5942_v61  ;;  %v5920_v52 = vmul.f32 %v11916_v10, %v5919_v33  ;;  %vm11987_vm7 = vcmp.lt.f32.partialorder %v5921_v55, 0.0004427343  ;;  %v5948_v30 = vand.u32 2147483647, %v11931_v62 }
 0x98d   : > { %v9434_v41 = vpop.eup %9433  ;;  %v5779_v61 = vand.u32 2147483647, %v11975_v60 }
 0x98e   : > { %v5908_v1 = vmul.f32 0.6931472, %v9434_v41  ;;  %v11947_v29 = vpop.eup %9435  ;;  %v5946_v41 = vadd.f32 1.0, %v5945_v21  ;;  %vm12018_vm9 = vcmp.lt.f32.partialorder %v5948_v30, 0.0004427343 }
 0x98f   : > { %v9438_v0 = vpop.eup %9437  ;;  %v5933_v63 = vadd.f32 1.0, %v11947_v29  ;;  %v5936_v18 = vmul.f32 -0.5, %v11947_v29  ;;  %v5939_v27 = vand.u32 2147483647, %v11947_v29  ;;  %v5811_v38 = vsub.f32 0.0, %v5779_v61 }
 0x990   : > { %v5914_v9 = vsel %vm5913_vm2, %v5911_v28, %v5908_v1  ;;  %v5899_v32 = vmul.f32 0.6931472, %v9438_v0  ;;  %v11954_v49 = vpop.eup %9439  ;;  %v5947_v26 = vmul.f32 %v11931_v62, %v5946_v41  ;;  %v5679_v61 = vmax.f32 %v11900_v25, 0.0 }
 0x991   : > { %v6186_v34 = vadd.f32 %v5914_v9, %v5674_v16  ;;  %9451 = vlog2.f32 %v5933_v63  ;;  %v5960_v20 = vadd.f32 1.0, %v11954_v49  ;;  %v5929_v16 = vmul.f32 %v11905_v17, %v5928_v45  ;;  %v5327_v17 = vpop.f32.mrf.mxu0 }
 0x992   : > { %v5905_v11 = vsel %vm5904_vm3, %v5902_v56, %v5899_v32  ;;  %9453 = vpow2.f32 %v5849_v19  ;;  %v5963_v28 = vmul.f32 -0.5, %v11954_v49  ;;  %v5937_v1 = vadd.f32 1.0, %v5936_v18 }
 0x993   : > { %v6218_v46 = vsel %vm5706_vm0, %v11850_v43, %v6186_v34  ;;  %v6185_v24 = vadd.f32 %v5905_v11, %v5673_v31  ;;  %9455 = vlog2.f32 %v5960_v20  ;;  %v5812_v43 = vsub.f32 0.0, %v5780_v58  ;;  %v9164_v0 = vpop.f32.mrf.mxu0 }
 0x994   : > { %7023 = vst [vmem:[%s11852_s12 + $0x108] sm:$0xff] %v6218_v46  ;;  %v5333_v31 = vadd.f32 %v9161_v37, %v11841_v3  ;;  %v5328_v63 = vadd.f32 %v11841_v3, %v5327_v17  ;;  %v5853_v46 = vmul.f32 1.442695, %v5811_v38  ;;  %v5938_v11 = vmul.f32 %v11947_v29, %v5937_v1 }
 0x995   : > { %v9442_v51 = vpop.eup %9441  ;;  %v6217_v8 = vsel %vm5705_vm1, %v11858_v53, %v6185_v24  ;;  %v5855_v5 = vmul.f32 1.442695, %v5812_v43  ;;  %v9241_v53 = vpop.f32.mrf.mxu1  ;;  %vm12033_vm11 = vcmp.lt.f32.partialorder %v5939_v27, 0.0004427343  ;;  %v5966_v23 = vand.u32 2147483647, %v11954_v49 }
 0x996   : > { %v5926_v42 = vmul.f32 0.6931472, %v9442_v51  ;;  %v11983_v2 = vpop.eup %9443  ;;  %7022 = vst [vmem:[%s11852_s12 + $0x100] sm:$0xff] %v6217_v8  ;;  %6262 = vst [vmem:[%s11852_s12 + $0x68] sm:$0xff] %v5333_v31  ;;  %v12004_v39 = vadd.f32 %v9241_v53, %v11846_v15  ;;  %v5337_v20 = vpop.f32.mrf.mxu0  ;;  %v5343_v31 = vadd.f32 %v9164_v0, %v11841_v3  ;;  %vm5714_vm1 = vcmp.ne.f32.partialorder %v11909_v22, %v11909_v22 }
 0x997   : > { %v9446_v13 = vpop.eup %9445  ;;  %v5951_v59 = vadd.f32 1.0, %v11983_v2  ;;  %9457 = vpow2.f32 %v5855_v5  ;;  %v5574_v55 = vpop.f32.mrf.mxu1  ;;  %v5954_v37 = vmul.f32 -0.5, %v11983_v2  ;;  %6261 = vst [vmem:[%s11852_s12 + $0x60] sm:$0xff] %v5328_v63  ;;  %v5338_v17 = vadd.f32 %v11841_v3, %v5337_v20 }
 0x998   : > { %v5932_v35 = vsel %vm11966_vm5, %v5929_v16, %v5926_v42  ;;  %v5917_v36 = vmul.f32 0.6931472, %v9446_v13  ;;  %v12006_v9 = vpop.eup %9447  ;;  %v5782_v21 = vand.u32 2147483647, %v12004_v39  ;;  %v5957_v16 = vand.u32 2147483647, %v11983_v2  ;;  %v9167_v38 = vpop.f32.mrf.mxu0 }
 0x999   : > { %v6188_v10 = vadd.f32 %v5932_v35, %v5676_v6  ;;  %9459 = vlog2.f32 %v5951_v59  ;;  %v9450_v34 = vpop.eup %9449  ;;  %v5978_v19 = vadd.f32 1.0, %v12006_v9  ;;  %v9244_v43 = vpop.f32.mrf.mxu1  ;;  %v5955_v42 = vadd.f32 1.0, %v5954_v37  ;;  %6264 = vst [vmem:[%s11852_s12 + $0x78] sm:$0xff] %v5343_v31  ;;  %6263 = vst [vmem:[%s11852_s12 + $0x70] sm:$0xff] %v5338_v17 }
 0x99a   : > { %v5923_v56 = vsel %vm11987_vm7, %v5920_v52, %v5917_v36  ;;  %v5944_v58 = vmul.f32 0.6931472, %v9450_v34  ;;  %v5814_v18 = vsub.f32 0.0, %v5782_v21  ;;  %v12058_v30 = vadd.f32 %v11846_v15, %v5574_v55  ;;  %v5347_v20 = vpop.f32.mrf.mxu0 }
 0x99b   : > { %v6220_v6 = vsel %vm5708_vm4, %v11864_v54, %v6188_v10  ;;  %v6187_v32 = vadd.f32 %v5923_v56, %v5675_v40  ;;  %v5964_v54 = vadd.f32 1.0, %v5963_v28  ;;  %9461 = vlog2.f32 %v5978_v19  ;;  %v5584_v28 = vpop.f32.mrf.mxu1 }
 0x99c   : > { %7025 = vst [vmem:[%s11852_s12 + $0x118] sm:$0xff] %v6220_v6  ;;  %v5950_v62 = vsel %vm12018_vm9, %v5947_v26, %v5944_v58  ;;  %9463 = vpow2.f32 %v5853_v46  ;;  %v5981_v13 = vmul.f32 -0.5, %v12006_v9  ;;  %v5859_v35 = vmul.f32 1.442695, %v5814_v18 }
 0x99d   : > { %v6219_v40 = vsel %vm5707_vm6, %v11870_v7, %v6187_v32  ;;  %v6190_v7 = vadd.f32 %v5950_v62, %v5678_v44  ;;  %v5965_v51 = vmul.f32 %v11954_v49, %v5964_v54  ;;  %vm5967_vm12 = vcmp.lt.f32.partialorder %v5966_v23, 0.0004427343  ;;  %v9247_v54 = vpop.f32.mrf.mxu1 }
 0x99e   : > { %v9452_v24 = vpop.eup %9451  ;;  %7024 = vst [vmem:[%s11852_s12 + $0x110] sm:$0xff] %v6219_v40  ;;  %v12068_v41 = vadd.f32 %v9244_v43, %v11846_v15  ;;  %v5781_v1 = vand.u32 2147483647, %v12058_v30  ;;  %v5956_v0 = vmul.f32 %v11983_v2, %v5955_v42  ;;  %vm12082_vm14 = vcmp.lt.f32.partialorder %v5957_v16, 0.0004427343 }
 0x99f   : > { %v5935_v29 = vmul.f32 0.6931472, %v9452_v24  ;;  %v12046_v8 = vpop.eup %9453  ;;  %v6222_v44 = vsel %vm5710_vm8, %v11876_v57, %v6190_v7  ;;  %v5680_v57 = vmax.f32 %v11890_v50, 0.0  ;;  %v5984_v19 = vand.u32 2147483647, %v12006_v9  ;;  %v5594_v7 = vpop.f32.mrf.mxu1 }
 0x9a0   : > { %v9456_v52 = vpop.eup %9455  ;;  %v5969_v14 = vadd.f32 1.0, %v12046_v8  ;;  %7027 = vst [vmem:[%s11852_s12 + $0x128] sm:$0xff] %v6222_v44  ;;  %v5813_v32 = vsub.f32 0.0, %v5781_v1  ;;  %v5784_v45 = vand.u32 2147483647, %v12068_v41  ;;  %v5972_v2 = vmul.f32 -0.5, %v12046_v8 }
 0x9a1   : > { %v5941_v49 = vsel %vm12033_vm11, %v5938_v11, %v5935_v29  ;;  %v5962_v53 = vmul.f32 0.6931472, %v9456_v52  ;;  %v12093_v55 = vadd.f32 %v11846_v15, %v5584_v28  ;;  %v5353_v37 = vadd.f32 %v9167_v38, %v11841_v3  ;;  %v9170_v52 = vpop.f32.mrf.mxu0 }
 0x9a2   : > { %v6189_v5 = vadd.f32 %v5941_v49, %v5677_v12  ;;  %9465 = vlog2.f32 %v5969_v14  ;;  %v5857_v26 = vmul.f32 1.442695, %v5813_v32  ;;  %v5682_v11 = vmax.f32 %v11909_v22, 0.0  ;;  %v9250_v14 = vpop.f32.mrf.mxu1 }
 0x9a3   : > { %v5968_v12 = vsel %vm5967_vm12, %v5965_v51, %v5962_v53  ;;  %9467 = vpow2.f32 %v5859_v35  ;;  %v5783_v21 = vand.u32 2147483647, %v12093_v55  ;;  %6266 = vst [vmem:[%s11852_s12 + $0x88] sm:$0xff] %v5353_v37  ;;  %vm5985_vm0 = vcmp.lt.f32.partialorder %v5984_v19, 0.0004427343 }
 0x9a4   : > { %v6221_v59 = vsel %vm5709_vm10, %v11882_v48, %v6189_v5  ;;  %v12074_v10 = vpop.eup %9457  ;;  %v6192_v36 = vadd.f32 %v5968_v12, %v5680_v57  ;;  %v5982_v48 = vadd.f32 1.0, %v5981_v13  ;;  %v5973_v51 = vadd.f32 1.0, %v5972_v2 }
 0x9a5   : > { %7026 = vst [vmem:[%s11852_s12 + $0x120] sm:$0xff] %v6221_v59  ;;  %v5996_v56 = vadd.f32 1.0, %v12074_v10  ;;  %v12110_v42 = vadd.f32 %v9247_v54, %v11846_v15  ;;  %v5975_v31 = vand.u32 2147483647, %v12046_v8  ;;  %v5999_v17 = vmul.f32 -0.5, %v12074_v10 }
 0x9a6   : > { %v9460_v27 = vpop.eup %9459  ;;  %v6224_v63 = vsel %vm5712_vm13, %v11890_v50, %v6192_v36  ;;  %v5816_v50 = vsub.f32 0.0, %v5784_v45  ;;  %v5983_v33 = vmul.f32 %v12006_v9, %v5982_v48  ;;  %v5815_v9 = vsub.f32 0.0, %v5783_v21  ;;  %v5604_v48 = vpop.f32.mrf.mxu1 }
 0x9a7   : > { %v5953_v34 = vmul.f32 0.6931472, %v9460_v27  ;;  %7029 = vst [vmem:[%s11852_s12 + $0x138] sm:$0xff] %v6224_v63  ;;  %9469 = vlog2.f32 %v5996_v56  ;;  %v5786_v49 = vand.u32 2147483647, %v12110_v42  ;;  %v5974_v13 = vmul.f32 %v12046_v8, %v5973_v51 }
 0x9a8   : > { %v9462_v46 = vpop.eup %9461  ;;  %9471 = vpow2.f32 %v5857_v26  ;;  %v5863_v23 = vmul.f32 1.442695, %v5816_v50  ;;  %v5861_v44 = vmul.f32 1.442695, %v5815_v9  ;;  %v5348_v35 = vadd.f32 %v11841_v3, %v5347_v20  ;;  %v9253_v9 = vpop.f32.mrf.mxu1 }
 0x9a9   : > { %v5959_v58 = vsel %vm12082_vm14, %v5956_v0, %v5953_v34  ;;  %v12102_v24 = vpop.eup %9463  ;;  %v5980_v62 = vmul.f32 0.6931472, %v9462_v46  ;;  %v12122_v57 = vadd.f32 %v11846_v15, %v5594_v7  ;;  %v5818_v12 = vsub.f32 0.0, %v5786_v49 }
 0x9aa   : > { %v6191_v40 = vadd.f32 %v5959_v58, %v5679_v61  ;;  %v5987_v16 = vadd.f32 1.0, %v12102_v24  ;;  %9473 = vpow2.f32 %v5863_v23  ;;  %v5363_v36 = vadd.f32 %v9170_v52, %v11841_v3  ;;  %6265 = vst [vmem:[%s11852_s12 + $0x80] sm:$0xff] %v5348_v35  ;;  %v5357_v61 = vpop.f32.mrf.mxu0 }
 0x9ab   : > { %v5986_v43 = vsel %vm5985_vm0, %v5983_v33, %v5980_v62  ;;  %vm5713_vm2 = vcmp.ne.f32.partialorder %v11920_v47, %v11920_v47  ;;  %vm5976_vm3 = vcmp.lt.f32.partialorder %v5975_v31, 0.0004427343  ;;  %v6002_v27 = vand.u32 2147483647, %v12074_v10 }
 0x9ac   : > { %v6223_v29 = vsel %vm5711_vm15, %v11900_v25, %v6191_v40  ;;  %v6194_v18 = vadd.f32 %v5986_v43, %v5682_v11  ;;  %9475 = vlog2.f32 %v5987_v16  ;;  %v5681_v25 = vmax.f32 %v11920_v47, 0.0  ;;  %6268 = vst [vmem:[%s11852_s12 + $0x98] sm:$0xff] %v5363_v36  ;;  %v9173_v46 = vpop.f32.mrf.mxu0  ;;  %v5614_v36 = vpop.f32.mrf.mxu1 }
 0x9ad   : > { %7028 = vst [vmem:[%s11852_s12 + $0x130] sm:$0xff] %v6223_v29  ;;  %9477 = vpow2.f32 %v5861_v44  ;;  %v5867_v0 = vmul.f32 1.442695, %v5818_v12  ;;  %v5785_v6 = vand.u32 2147483647, %v12122_v57  ;;  %v5684_v38 = vmax.f32 %v11944_v4, 0.0 }
 0x9ae   : > { %v6226_v53 = vsel %vm5714_vm1, %v11909_v22, %v6194_v18  ;;  %v6000_v22 = vadd.f32 1.0, %v5999_v17  ;;  %v5990_v63 = vmul.f32 -0.5, %v12102_v24  ;;  %v12138_v45 = vadd.f32 %v9250_v14, %v11846_v15  ;;  %v5367_v52 = vpop.f32.mrf.mxu0 }
 0x9af   : > { %v9466_v5 = vpop.eup %9465  ;;  %7031 = vst [vmem:[%s11852_s12 + $0x148] sm:$0xff] %v6226_v53  ;;  %v5817_v32 = vsub.f32 0.0, %v5785_v6  ;;  %v5358_v54 = vadd.f32 %v11841_v3, %v5357_v61  ;;  %v12147_v26 = vadd.f32 %v11846_v15, %v5604_v48  ;;  %vm6003_vm4 = vcmp.lt.f32.partialorder %v6002_v27, 0.0004427343 }
 0x9b0   : > { %v12124_v28 = vpop.eup %9467  ;;  %v5971_v59 = vmul.f32 0.6931472, %v9466_v5  ;;  %v6001_v58 = vmul.f32 %v12074_v10, %v6000_v22  ;;  %v5788_v37 = vand.u32 2147483647, %v12138_v45  ;;  %vm5716_vm5 = vcmp.ne.f32.partialorder %v11944_v4, %v11944_v4  ;;  %v9176_v22 = vpop.f32.mrf.mxu0 }
 0x9b1   : > { %v6014_v8 = vadd.f32 1.0, %v12124_v28  ;;  %v5865_v50 = vmul.f32 1.442695, %v5817_v32  ;;  %6267 = vst [vmem:[%s11852_s12 + $0x90] sm:$0xff] %v5358_v54  ;;  %v5787_v10 = vand.u32 2147483647, %v12147_v26  ;;  %v5373_v51 = vadd.f32 %v9173_v46, %v11841_v3 }
 0x9b2   : > { %v5977_v1 = vsel %vm5976_vm3, %v5974_v13, %v5971_v59  ;;  %v5993_v20 = vand.u32 2147483647, %v12102_v24  ;;  %v6017_v62 = vmul.f32 -0.5, %v12124_v28  ;;  %v5820_v7 = vsub.f32 0.0, %v5788_v37 }
 0x9b3   : > { %v6193_v56 = vadd.f32 %v5977_v1, %v5681_v25  ;;  %9479 = vlog2.f32 %v6014_v8  ;;  %v5819_v29 = vsub.f32 0.0, %v5787_v10  ;;  %6270 = vst [vmem:[%s11852_s12 + $0xa8] sm:$0xff] %v5373_v51  ;;  %v5683_v25 = vmax.f32 %v11975_v60, 0.0 }
 0x9b4   : > { %v9470_v34 = vpop.eup %9469  ;;  %9481 = vpow2.f32 %v5867_v0  ;;  %vm5994_vm6 = vcmp.lt.f32.partialorder %v5993_v20, 0.0004427343  ;;  %v6018_v44 = vadd.f32 1.0, %v6017_v62  ;;  %v5871_v49 = vmul.f32 1.442695, %v5820_v7 }
 0x9b5   : > { %v6225_v19 = vsel %vm5713_vm2, %v11920_v47, %v6193_v56  ;;  %v5998_v2 = vmul.f32 0.6931472, %v9470_v34  ;;  %v12152_v40 = vpop.eup %9471  ;;  %v5991_v47 = vadd.f32 1.0, %v5990_v63  ;;  %9483 = vpow2.f32 %v5865_v50 }
 0x9b6   : > { %7030 = vst [vmem:[%s11852_s12 + $0x140] sm:$0xff] %v6225_v19  ;;  %v6005_v23 = vadd.f32 1.0, %v12152_v40  ;;  %v12172_v53 = vadd.f32 %v9253_v9, %v11846_v15  ;;  %vm5715_vm7 = vcmp.ne.f32.partialorder %v11975_v60, %v11975_v60  ;;  %v6020_v13 = vand.u32 2147483647, %v12124_v28  ;;  %v9256_v19 = vpop.f32.mrf.mxu1 }
 0x9b7   : > { %v6004_v11 = vsel %vm6003_vm4, %v6001_v58, %v5998_v2  ;;  %v12160_v21 = vpop.eup %9473  ;;  %v5992_v31 = vmul.f32 %v12102_v24, %v5991_v47  ;;  %v5686_v59 = vmax.f32 %v12004_v39, 0.0  ;;  %vm5718_vm8 = vcmp.ne.f32.partialorder %v12004_v39, %v12004_v39  ;;  %v5377_v2 = vpop.f32.mrf.mxu0 }
 0x9b8   : > { %v6196_v33 = vadd.f32 %v6004_v11, %v5684_v38  ;;  %9485 = vlog2.f32 %v6005_v23  ;;  %v6032_v17 = vadd.f32 1.0, %v12160_v21  ;;  %v5685_v12 = vmax.f32 %v12058_v30, 0.0 }
 0x9b9   : > { %v9476_v16 = vpop.eup %9475  ;;  %v6019_v1 = vmul.f32 %v12124_v28, %v6018_v44  ;;  %v6008_v27 = vmul.f32 -0.5, %v12152_v40  ;;  %v5790_v48 = vand.u32 2147483647, %v12172_v53  ;;  %v5368_v56 = vadd.f32 %v11841_v3, %v5367_v52  ;;  %v9179_v9 = vpop.f32.mrf.mxu0 }
 0x9ba   : > { %v6228_v43 = vsel %vm5716_vm5, %v11944_v4, %v6196_v33  ;;  %v5989_v18 = vmul.f32 0.6931472, %v9476_v16  ;;  %v12169_v14 = vpop.eup %9477  ;;  %9487 = vlog2.f32 %v6032_v17  ;;  %v5869_v4 = vmul.f32 1.442695, %v5819_v29 }
 0x9bb   : > { %7033 = vst [vmem:[%s11852_s12 + $0x158] sm:$0xff] %v6228_v43  ;;  %v6023_v35 = vadd.f32 1.0, %v12169_v14  ;;  %9489 = vpow2.f32 %v5871_v49  ;;  %vm6021_vm9 = vcmp.lt.f32.partialorder %v6020_v13, 0.0004427343  ;;  %v6011_v38 = vand.u32 2147483647, %v12152_v40  ;;  %v5624_v43 = vpop.f32.mrf.mxu1 }
 0x9bc   : > { %v5995_v5 = vsel %vm5994_vm6, %v5992_v31, %v5989_v18  ;;  %v5822_v34 = vsub.f32 0.0, %v5790_v48  ;;  %6269 = vst [vmem:[%s11852_s12 + $0xa0] sm:$0xff] %v5368_v56  ;;  %v12195_v32 = vadd.f32 %v11846_v15, %v5614_v36  ;;  %v5383_v54 = vadd.f32 %v9176_v22, %v11841_v3  ;;  %v5387_v56 = vpop.f32.mrf.mxu0 }
 0x9bd   : > { %v6195_v24 = vadd.f32 %v5995_v5, %v5683_v25  ;;  %9491 = vlog2.f32 %v6023_v35  ;;  %vm5717_vm10 = vcmp.ne.f32.partialorder %v12058_v30, %v12058_v30  ;;  %v6009_v50 = vadd.f32 1.0, %v6008_v27 }
 0x9be   : > { %9493 = vpow2.f32 %v5869_v4  ;;  %v6026_v37 = vmul.f32 -0.5, %v12169_v14  ;;  %v5688_v46 = vmax.f32 %v12068_v41, 0.0  ;;  %v5687_v11 = vmax.f32 %v12093_v55, 0.0  ;;  %6272 = vst [vmem:[%s11852_s12 + $0xb8] sm:$0xff] %v5383_v54 }
 0x9bf   : > { %v6227_v61 = vsel %vm5715_vm7, %v11975_v60, %v6195_v24  ;;  %v6035_v60 = vmul.f32 -0.5, %v12160_v21  ;;  %v5875_v47 = vmul.f32 1.442695, %v5822_v34  ;;  %v5789_v10 = vand.u32 2147483647, %v12195_v32  ;;  %v9259_v34 = vpop.f32.mrf.mxu1 }
 0x9c0   : > { %v9480_v8 = vpop.eup %9479  ;;  %7032 = vst [vmem:[%s11852_s12 + $0x150] sm:$0xff] %v6227_v61  ;;  %vm12211_vm11 = vcmp.lt.f32.partialorder %v6011_v38, 0.0004427343  ;;  %v12216_v23 = vadd.f32 %v9256_v19, %v11846_v15  ;;  %v5378_v7 = vadd.f32 %v11841_v3, %v5377_v2  ;;  %vm5720_vm12 = vcmp.ne.f32.partialorder %v12068_v41, %v12068_v41 }
 0x9c1   : > { %v12185_v0 = vpop.eup %9481  ;;  %v6016_v6 = vmul.f32 0.6931472, %v9480_v8  ;;  %v6036_v51 = vadd.f32 1.0, %v6035_v60  ;;  %v6038_v16 = vand.u32 2147483647, %v12160_v21  ;;  %v6010_v31 = vmul.f32 %v12152_v40, %v6009_v50 }
 0x9c2   : > { %v6050_v63 = vadd.f32 1.0, %v12185_v0  ;;  %v12205_v33 = vpop.eup %9483  ;;  %v6027_v17 = vadd.f32 1.0, %v6026_v37  ;;  %v5821_v52 = vsub.f32 0.0, %v5789_v10  ;;  %6271 = vst [vmem:[%s11852_s12 + $0xb0] sm:$0xff] %v5378_v7  ;;  %v6029_v25 = vand.u32 2147483647, %v12169_v14  ;;  %v5634_v7 = vpop.f32.mrf.mxu1 }
 0x9c3   : > { %v6022_v28 = vsel %vm6021_vm9, %v6019_v1, %v6016_v6  ;;  %v6053_v44 = vmul.f32 -0.5, %v12185_v0  ;;  %v5792_v49 = vand.u32 2147483647, %v12216_v23  ;;  %vm5719_vm13 = vcmp.ne.f32.partialorder %v12093_v55, %v12093_v55 }
 0x9c4   : > { %v6198_v58 = vadd.f32 %v6022_v28, %v5686_v59  ;;  %9495 = vlog2.f32 %v6050_v63  ;;  %v5873_v24 = vmul.f32 1.442695, %v5821_v52  ;;  %v12234_v40 = vadd.f32 %v11846_v15, %v5624_v43 }
 0x9c5   : > { %v9486_v29 = vpop.eup %9485  ;;  %9497 = vpow2.f32 %v5875_v47  ;;  %v5393_v13 = vadd.f32 %v9179_v9, %v11841_v3  ;;  %v6037_v36 = vmul.f32 %v12160_v21, %v6036_v51  ;;  %v5824_v22 = vsub.f32 0.0, %v5792_v49 }
 0x9c6   : > { %v6230_v20 = vsel %vm5718_vm8, %v12004_v39, %v6198_v58  ;;  %v6041_v39 = vadd.f32 1.0, %v12205_v33  ;;  %v6007_v18 = vmul.f32 0.6931472, %v9486_v29  ;;  %vm6039_vm14 = vcmp.lt.f32.partialorder %v6038_v16, 0.0004427343 }
 0x9c7   : > { %7035 = vst [vmem:[%s11852_s12 + $0x168] sm:$0xff] %v6230_v20  ;;  %v9488_v5 = vpop.eup %9487  ;;  %v6028_v61 = vmul.f32 %v12169_v14, %v6027_v17  ;;  %v6056_v1 = vand.u32 2147483647, %v12185_v0  ;;  %6274 = vst [vmem:[%s11852_s12 + $0xc8] sm:$0xff] %v5393_v13  ;;  %v6054_v48 = vadd.f32 1.0, %v6053_v44  ;;  %v6044_v54 = vmul.f32 -0.5, %v12205_v33 }
 0x9c8   : > { %9499 = vlog2.f32 %v6041_v39  ;;  %v6013_v4 = vsel %vm12211_vm11, %v6010_v31, %v6007_v18  ;;  %v6034_v59 = vmul.f32 0.6931472, %v9488_v5  ;;  %v12240_v8 = vpop.eup %9489  ;;  %v5879_v63 = vmul.f32 1.442695, %v5824_v22  ;;  %v12293_v17 = vld [vmem:[%s12645_s2 + $0xc] ss:$0 sm:$0xff]  ;;  %v9262_v5 = vpop.f32.mrf.mxu1 }
 0x9c9   : > { %v6197_v35 = vadd.f32 %v6013_v4, %v5685_v12  ;;  %9501 = vpow2.f32 %v5873_v24  ;;  %v6068_v21 = vadd.f32 1.0, %v12240_v8  ;;  %v5791_v28 = vand.u32 2147483647, %v12234_v40 }
 0x9ca   : > { %v9492_v27 = vpop.eup %9491  ;;  %v6040_v6 = vsel %vm6039_vm14, %v6037_v36, %v6034_v59  ;;  %vm6030_vm15 = vcmp.lt.f32.partialorder %v6029_v25, 0.0004427343  ;;  %v5690_v58 = vmax.f32 %v12110_v42, 0.0  ;;  %vm5722_vm0 = vcmp.ne.f32.partialorder %v12110_v42, %v12110_v42 }
 0x9cb   : > { %v6229_v12 = vsel %vm5717_vm10, %v12058_v30, %v6197_v35  ;;  %v12250_v38 = vpop.eup %9493  ;;  %v6200_v14 = vadd.f32 %v6040_v6, %v5688_v46  ;;  %v6025_v60 = vmul.f32 0.6931472, %v9492_v27  ;;  %9503 = vlog2.f32 %v6068_v21 }
 0x9cc   : > { %7034 = vst [vmem:[%s11852_s12 + $0x160] sm:$0xff] %v6229_v12  ;;  %v6059_v30 = vadd.f32 1.0, %v12250_v38  ;;  %v6055_v46 = vmul.f32 %v12185_v0, %v6054_v48  ;;  %vm12267_vm1 = vcmp.lt.f32.partialorder %v6056_v1, 0.0004427343  ;;  %v6047_v20 = vand.u32 2147483647, %v12205_v33 }
 0x9cd   : > { %v6232_v19 = vsel %vm5720_vm12, %v12068_v41, %v6200_v14  ;;  %v6031_v2 = vsel %vm6030_vm15, %v6028_v61, %v6025_v60  ;;  %v9182_v41 = vpop.f32.mrf.mxu0  ;;  %v5823_v62 = vsub.f32 0.0, %v5791_v28  ;;  %v6045_v29 = vadd.f32 1.0, %v6044_v54 }
 0x9ce   : > { %7037 = vst [vmem:[%s11852_s12 + $0x178] sm:$0xff] %v6232_v19  ;;  %v6199_v37 = vadd.f32 %v6031_v2, %v5687_v11  ;;  %9505 = vlog2.f32 %v6059_v30  ;;  %v12277_v0 = vadd.f32 %v9259_v34, %v11846_v15  ;;  %v5388_v51 = vadd.f32 %v11841_v3, %v5387_v56 }
 0x9cf   : > { %9507 = vpow2.f32 %v5879_v63  ;;  %v6071_v43 = vmul.f32 -0.5, %v12240_v8  ;;  %v5877_v9 = vmul.f32 1.442695, %v5823_v62  ;;  %v5403_v18 = vadd.f32 %v9182_v41, %v11841_v3  ;;  %v5397_v4 = vpop.f32.mrf.mxu0  ;;  %v5644_v63 = vpop.f32.mrf.mxu1 }
 0x9d0   : > { %v6231_v11 = vsel %vm5719_vm13, %v12093_v55, %v6199_v37  ;;  %v5689_v55 = vmax.f32 %v12122_v57, 0.0  ;;  %6273 = vst [vmem:[%s11852_s12 + $0xc0] sm:$0xff] %v5388_v51  ;;  %v12296_v52 = vadd.f32 %v12293_v17, %v5634_v7  ;;  %v6074_v44 = vand.u32 2147483647, %v12240_v8 }
 0x9d1   : > { %v9496_v50 = vpop.eup %9495  ;;  %7036 = vst [vmem:[%s11852_s12 + $0x170] sm:$0xff] %v6231_v11  ;;  %v6062_v3 = vmul.f32 -0.5, %v12250_v38  ;;  %9509 = vpow2.f32 %v5877_v9  ;;  %v5794_v49 = vand.u32 2147483647, %v12277_v0  ;;  %6276 = vst [vmem:[%s11852_s12 + $0xd8] sm:$0xff] %v5403_v18  ;;  %v6046_v35 = vmul.f32 %v12205_v33, %v6045_v29  ;;  %v9185_v21 = vpop.f32.mrf.mxu0 }
 0x9d2   : > { %v6052_v10 = vmul.f32 0.6931472, %v9496_v50  ;;  %v12280_v16 = vpop.eup %9497  ;;  %vm5721_vm2 = vcmp.ne.f32.partialorder %v12122_v57, %v12122_v57  ;;  %vm6048_vm3 = vcmp.lt.f32.partialorder %v6047_v20, 0.0004427343  ;;  %v6072_v59 = vadd.f32 1.0, %v6071_v43  ;;  %v9265_v51 = vpop.f32.mrf.mxu1 }
 0x9d3   : > { %v6086_v15 = vadd.f32 1.0, %v12280_v16  ;;  %v5826_v36 = vsub.f32 0.0, %v5794_v49  ;;  %v5692_v1 = vmax.f32 %v12138_v45, 0.0  ;;  %v5793_v27 = vand.u32 2147483647, %v12296_v52  ;;  %v5407_v41 = vpop.f32.mrf.mxu0 }
 0x9d4   : > { %v6058_v39 = vsel %vm12267_vm1, %v6055_v46, %v6052_v10  ;;  %vm12317_vm4 = vcmp.lt.f32.partialorder %v6074_v44, 0.0004427343  ;;  %v6063_v6 = vadd.f32 1.0, %v6062_v3  ;;  %vm5724_vm5 = vcmp.ne.f32.partialorder %v12138_v45, %v12138_v45 }
 0x9d5   : > { %v6202_v31 = vadd.f32 %v6058_v39, %v5690_v58  ;;  %v9500_v25 = vpop.eup %9499  ;;  %9511 = vlog2.f32 %v6086_v15  ;;  %v6065_v56 = vand.u32 2147483647, %v12250_v38  ;;  %v5883_v14 = vmul.f32 1.442695, %v5826_v36 }
 0x9d6   : > { %v6043_v13 = vmul.f32 0.6931472, %v9500_v25  ;;  %v12310_v22 = vpop.eup %9501  ;;  %v5825_v60 = vsub.f32 0.0, %v5793_v27  ;;  %v6073_v54 = vmul.f32 %v12240_v8, %v6072_v59  ;;  %v6089_v30 = vmul.f32 -0.5, %v12280_v16  ;;  %v9188_v25 = vpop.f32.mrf.mxu0 }
 0x9d7   : > { %v6234_v24 = vsel %vm5722_vm0, %v12110_v42, %v6202_v31  ;;  %v12315_v42 = vadd.f32 %v12293_v17, %v9262_v5  ;;  %v6077_v48 = vadd.f32 1.0, %v12310_v22  ;;  %v6064_v37 = vmul.f32 %v12250_v38, %v6063_v6 }
 0x9d8   : > { %7039 = vst [vmem:[%s11852_s12 + $0x188] sm:$0xff] %v6234_v24  ;;  %v6049_v61 = vsel %vm6048_vm3, %v6046_v35, %v6043_v13  ;;  %v9504_v28 = vpop.eup %9503  ;;  %v5881_v2 = vmul.f32 1.442695, %v5825_v60  ;;  %v12338_v8 = vadd.f32 %v12293_v17, %v5644_v63  ;;  %v5691_v11 = vmax.f32 %v12147_v26, 0.0  ;;  %v5654_v13 = vpop.f32.mrf.mxu1 }
 0x9d9   : > { %v6201_v33 = vadd.f32 %v6049_v61, %v5689_v55  ;;  %9513 = vlog2.f32 %v6077_v48  ;;  %v6070_v19 = vmul.f32 0.6931472, %v9504_v28  ;;  %v5796_v58 = vand.u32 2147483647, %v12315_v42  ;;  %v5417_v27 = vpop.f32.mrf.mxu0 }
 0x9da   : > { %9515 = vpow2.f32 %v5883_v14  ;;  %vm6066_vm6 = vcmp.lt.f32.partialorder %v6065_v56, 0.0004427343  ;;  %v6090_v43 = vadd.f32 1.0, %v6089_v30  ;;  %v6092_v9 = vand.u32 2147483647, %v12280_v16  ;;  %v9268_v60 = vpop.f32.mrf.mxu1 }
 0x9db   : > { %v6233_v34 = vsel %vm5721_vm2, %v12122_v57, %v6201_v33  ;;  %v9506_v50 = vpop.eup %9505  ;;  %v9552_v57 = vld [vmem:[%s12645_s2 + $0xb] ss:$0 sm:$0xff]  ;;  %v6076_v20 = vsel %vm12317_vm4, %v6073_v54, %v6070_v19  ;;  %9517 = vpow2.f32 %v5881_v2  ;;  %v5828_v7 = vsub.f32 0.0, %v5796_v58 }
 0x9dc   : > { %7038 = vst [vmem:[%s11852_s12 + $0x180] sm:$0xff] %v6233_v34  ;;  %v5398_v46 = vadd.f32 %v9552_v57, %v5397_v4  ;;  %v5413_v47 = vadd.f32 %v9552_v57, %v9185_v21  ;;  %v12340_v10 = vpop.eup %9507  ;;  %v6061_v62 = vmul.f32 0.6931472, %v9506_v50  ;;  %v6204_v38 = vadd.f32 %v6076_v20, %v5692_v1 }
 0x9dd   : > { %v6104_v29 = vadd.f32 1.0, %v12340_v10  ;;  %v5887_v18 = vmul.f32 1.442695, %v5828_v7  ;;  %v6080_v15 = vmul.f32 -0.5, %v12310_v22  ;;  %vm5723_vm7 = vcmp.ne.f32.partialorder %v12147_v26, %v12147_v26 }
 0x9de   : > { %6275 = vst [vmem:[%s11852_s12 + $0xd0] sm:$0xff] %v5398_v46  ;;  %6278 = vst [vmem:[%s11852_s12 + $0xe8] sm:$0xff] %v5413_v47  ;;  %v6067_v39 = vsel %vm6066_vm6, %v6064_v37, %v6061_v62  ;;  %v6236_v31 = vsel %vm5724_vm5, %v12138_v45, %v6204_v38  ;;  %v12354_v44 = vpop.eup %9509  ;;  %v5795_v3 = vand.u32 2147483647, %v12338_v8  ;;  %v12361_v49 = vadd.f32 %v12293_v17, %v9265_v51 }
 0x9df   : > { %v6203_v55 = vadd.f32 %v6067_v39, %v5691_v11  ;;  %9519 = vlog2.f32 %v6104_v29  ;;  %7041 = vst [vmem:[%s11852_s12 + $0x198] sm:$0xff] %v6236_v31  ;;  %v5694_v4 = vmax.f32 %v12172_v53, 0.0  ;;  %vm5726_vm8 = vcmp.ne.f32.partialorder %v12172_v53, %v12172_v53 }
 0x9e0   : > { %9521 = vpow2.f32 %v5887_v18  ;;  %v6095_v24 = vadd.f32 1.0, %v12354_v44  ;;  %v6091_v59 = vmul.f32 %v12280_v16, %v6090_v43  ;;  %v6083_v36 = vand.u32 2147483647, %v12310_v22  ;;  %v5664_v43 = vpop.f32.mrf.mxu1 }
 0x9e1   : > { %v6235_v45 = vsel %vm5723_vm7, %v12147_v26, %v6203_v55  ;;  %v5827_v61 = vsub.f32 0.0, %v5795_v3  ;;  %vm6093_vm9 = vcmp.lt.f32.partialorder %v6092_v9, 0.0004427343  ;;  %v6081_v1 = vadd.f32 1.0, %v6080_v15 }
 0x9e2   : > { %v9512_v5 = vpop.eup %9511  ;;  %7040 = vst [vmem:[%s11852_s12 + $0x190] sm:$0xff] %v6235_v45  ;;  %9523 = vlog2.f32 %v6095_v24  ;;  %v5798_v26 = vand.u32 2147483647, %v12361_v49  ;;  %v6107_v12 = vmul.f32 -0.5, %v12340_v10  ;;  %v5408_v48 = vadd.f32 %v9552_v57, %v5407_v41 }
 0x9e3   : > { %v6088_v35 = vmul.f32 0.6931472, %v9512_v5  ;;  %v5885_v6 = vmul.f32 1.442695, %v5827_v61  ;;  %v5693_v56 = vmax.f32 %v12195_v32, 0.0  ;;  %v12375_v14 = vadd.f32 %v12293_v17, %v5654_v13 }
 0x9e4   : > { %v5830_v16 = vsub.f32 0.0, %v5798_v26  ;;  %vm12377_vm10 = vcmp.lt.f32.partialorder %v6083_v36, 0.0004427343  ;;  %6277 = vst [vmem:[%s11852_s12 + $0xe0] sm:$0xff] %v5408_v48  ;;  %v5423_v34 = vadd.f32 %v9552_v57, %v9188_v25  ;;  %v5418_v54 = vadd.f32 %v9552_v57, %v5417_v27 }
 0x9e5   : > { %v6094_v33 = vsel %vm6093_vm9, %v6091_v59, %v6088_v35  ;;  %9525 = vpow2.f32 %v5885_v6  ;;  %v6082_v58 = vmul.f32 %v12310_v22, %v6081_v1  ;;  %v6108_v37 = vadd.f32 1.0, %v6107_v12 }
 0x9e6   : > { %v6206_v21 = vadd.f32 %v6094_v33, %v5694_v4  ;;  %v9514_v63 = vpop.eup %9513  ;;  %v5891_v50 = vmul.f32 1.442695, %v5830_v16  ;;  %v6110_v46 = vand.u32 2147483647, %v12340_v10  ;;  %6280 = vst [vmem:[%s11852_s12 + $0xf8] sm:$0xff] %v5423_v34  ;;  %v12394_v57 = vadd.f32 %v12293_v17, %v9268_v60  ;;  %6279 = vst [vmem:[%s11852_s12 + $0xf0] sm:$0xff] %v5418_v54 }
 0x9e7   : > { %v12382_v30 = vpop.eup %9515  ;;  %v6079_v2 = vmul.f32 0.6931472, %v9514_v63  ;;  %v6098_v22 = vmul.f32 -0.5, %v12354_v44  ;;  %v5797_v20 = vand.u32 2147483647, %v12375_v14  ;;  %vm5725_vm11 = vcmp.ne.f32.partialorder %v12195_v32, %v12195_v32 }
 0x9e8   : > { %v6238_v19 = vsel %vm5726_vm8, %v12172_v53, %v6206_v21  ;;  %v6122_v47 = vadd.f32 1.0, %v12382_v30  ;;  %v12397_v41 = vpop.eup %9517  ;;  %9527 = vpow2.f32 %v5891_v50  ;;  %vm12407_vm12 = vcmp.lt.f32.partialorder %v6110_v46, 0.0004427343 }
 0x9e9   : > { %7043 = vst [vmem:[%s11852_s12 + $0x1a8] sm:$0xff] %v6238_v19  ;;  %v6085_v53 = vsel %vm12377_vm10, %v6082_v58, %v6079_v2  ;;  %v6113_v7 = vadd.f32 1.0, %v12397_v41  ;;  %v5829_v38 = vsub.f32 0.0, %v5797_v20  ;;  %v5800_v39 = vand.u32 2147483647, %v12394_v57 }
 0x9ea   : > { %v6205_v62 = vadd.f32 %v6085_v53, %v5693_v56  ;;  %9529 = vlog2.f32 %v6122_v47  ;;  %v6109_v31 = vmul.f32 %v12340_v10, %v6108_v37  ;;  %v6099_v55 = vadd.f32 1.0, %v6098_v22 }
 0x9eb   : > { %9531 = vlog2.f32 %v6113_v7  ;;  %v5696_v15 = vmax.f32 %v12216_v23, 0.0  ;;  %v6101_v25 = vand.u32 2147483647, %v12354_v44  ;;  %v5889_v3 = vmul.f32 1.442695, %v5829_v38 }
 0x9ec   : > { %v9520_v11 = vpop.eup %9519  ;;  %v6237_v29 = vsel %vm5725_vm11, %v12195_v32, %v6205_v62  ;;  %v5832_v45 = vsub.f32 0.0, %v5800_v39  ;;  %v12422_v4 = vadd.f32 %v12293_v17, %v5664_v43  ;;  %vm5728_vm13 = vcmp.ne.f32.partialorder %v12216_v23, %v12216_v23 }
 0x9ed   : > { %v12412_v9 = vpop.eup %9521  ;;  %7042 = vst [vmem:[%s11852_s12 + $0x1a0] sm:$0xff] %v6237_v29  ;;  %v6106_v18 = vmul.f32 0.6931472, %v9520_v11  ;;  %v6125_v13 = vmul.f32 -0.5, %v12382_v30  ;;  %v6100_v59 = vmul.f32 %v12354_v44, %v6099_v55  ;;  %v5695_v1 = vmax.f32 %v12234_v40, 0.0 }
 0x9ee   : > { %v6140_v32 = vadd.f32 1.0, %v12412_v9  ;;  %v5895_v36 = vmul.f32 1.442695, %v5832_v45  ;;  %vm6102_vm14 = vcmp.lt.f32.partialorder %v6101_v25, 0.0004427343  ;;  %v6116_v33 = vmul.f32 -0.5, %v12397_v41 }
 0x9ef   : > { %v6112_v5 = vsel %vm12407_vm12, %v6109_v31, %v6106_v18  ;;  %v9524_v24 = vpop.eup %9523  ;;  %v5799_v17 = vand.u32 2147483647, %v12422_v4  ;;  %v6126_v6 = vadd.f32 1.0, %v6125_v13  ;;  %vm5727_vm15 = vcmp.ne.f32.partialorder %v12234_v40, %v12234_v40 }
 0x9f0   : > { %v6208_v10 = vadd.f32 %v6112_v5, %v5696_v15  ;;  %9533 = vlog2.f32 %v6140_v32  ;;  %v6097_v35 = vmul.f32 0.6931472, %v9524_v24  ;;  %v6143_v16 = vmul.f32 -0.5, %v12412_v9 }
 0x9f1   : > { %9535 = vpow2.f32 %v5889_v3  ;;  %v5831_v48 = vsub.f32 0.0, %v5799_v17  ;;  %v6117_v63 = vadd.f32 1.0, %v6116_v33  ;;  %v6127_v19 = vmul.f32 %v12382_v30, %v6126_v6 }
 0x9f2   : > { %v6240_v61 = vsel %vm5728_vm13, %v12216_v23, %v6208_v10  ;;  %v12431_v26 = vpop.eup %9525  ;;  %v6103_v27 = vsel %vm6102_vm14, %v6100_v59, %v6097_v35  ;;  %9537 = vpow2.f32 %v5895_v36  ;;  %v6128_v23 = vand.u32 2147483647, %v12382_v30 }
 0x9f3   : > { %7045 = vst [vmem:[%s11852_s12 + $0x1b8] sm:$0xff] %v6240_v61  ;;  %v6207_v12 = vadd.f32 %v6103_v27, %v5695_v1  ;;  %v6131_v44 = vadd.f32 1.0, %v12431_v26  ;;  %v5893_v34 = vmul.f32 1.442695, %v5831_v48  ;;  %v6119_v2 = vand.u32 2147483647, %v12397_v41 }
 0x9f4   : > { %v5698_v58 = vmax.f32 %v12277_v0, 0.0  ;;  %vm6129_vm0 = vcmp.lt.f32.partialorder %v6128_v23, 0.0004427343  ;;  %v6144_v37 = vadd.f32 1.0, %v6143_v16  ;;  %v6118_v53 = vmul.f32 %v12397_v41, %v6117_v63 }
 0x9f5   : > { %v12439_v21 = vpop.eup %9527  ;;  %v6239_v56 = vsel %vm5727_vm15, %v12234_v40, %v6207_v12  ;;  %9539 = vlog2.f32 %v6131_v44  ;;  %v6146_v22 = vand.u32 2147483647, %v12412_v9  ;;  %vm5730_vm1 = vcmp.ne.f32.partialorder %v12277_v0, %v12277_v0 }
 0x9f6   : > { %7044 = vst [vmem:[%s11852_s12 + $0x1b0] sm:$0xff] %v6239_v56  ;;  %v6158_v28 = vadd.f32 1.0, %v12439_v21  ;;  %v5697_v30 = vmax.f32 %v12296_v52, 0.0  ;;  %vm6120_vm2 = vcmp.lt.f32.partialorder %v6119_v2, 0.0004427343  ;;  %v6134_v20 = vmul.f32 -0.5, %v12431_v26 }
 0x9f7   : > { %v9530_v60 = vpop.eup %9529  ;;  %vm5729_vm3 = vcmp.ne.f32.partialorder %v12296_v52, %v12296_v52  ;;  %v6145_v51 = vmul.f32 %v12412_v9, %v6144_v37  ;;  %v5700_v39 = vmax.f32 %v12315_v42, 0.0  ;;  %vm6147_vm4 = vcmp.lt.f32.partialorder %v6146_v22, 0.0004427343 }
 0x9f8   : > { %v6124_v54 = vmul.f32 0.6931472, %v9530_v60  ;;  %9541 = vlog2.f32 %v6158_v28  ;;  %v9532_v50 = vpop.eup %9531  ;;  %v6161_v43 = vmul.f32 -0.5, %v12439_v21  ;;  %v6135_v15 = vadd.f32 1.0, %v6134_v20 }
 0x9f9   : > { %9543 = vpow2.f32 %v5893_v34  ;;  %v6115_v47 = vmul.f32 0.6931472, %v9532_v50  ;;  %v6137_v32 = vand.u32 2147483647, %v12431_v26  ;;  %vm5732_vm5 = vcmp.ne.f32.partialorder %v12315_v42, %v12315_v42 }
 0x9fa   : > { %v6130_v40 = vsel %vm6129_vm0, %v6127_v19, %v6124_v54  ;;  %v6162_v45 = vadd.f32 1.0, %v6161_v43  ;;  %v6136_v10 = vmul.f32 %v12431_v26, %v6135_v15  ;;  %v5699_v13 = vmax.f32 %v12338_v8, 0.0  ;;  %v6490_v43 = vld [vmem:[%s11852_s12 + $0x30] sm:$0xff] (%p9627_p5)  ;;  %v6500_v15 = vld [vmem:[%s11852_s12 + $0x58] sm:$0xff] (%p9627_p5) }
 0x9fb   : > { %v6210_v46 = vadd.f32 %v6130_v40, %v5698_v58  ;;  %v6121_v38 = vsel %vm6120_vm2, %v6118_v53, %v6115_v47  ;;  %vm6138_vm6 = vcmp.lt.f32.partialorder %v6137_v32, 0.0004427343  ;;  %vm5731_vm7 = vcmp.ne.f32.partialorder %v12338_v8, %v12338_v8  ;;  %6491 = vst [vmem:[%s12506_s20 + $0x30] sm:$0xff] (%p9627_p5), %v6490_v43  ;;  %6501 = vst [vmem:[%s12506_s20 + $0x58] sm:$0xff] (%p9627_p5), %v6500_v15  ;;  %v6504_v32 = vld [vmem:[%s11852_s12 + $0x68] sm:$0xff] (%p9627_p5) }
 0x9fc   : > { %v6209_v41 = vadd.f32 %v6121_v38, %v5697_v30  ;;  %v6163_v17 = vmul.f32 %v12439_v21, %v6162_v45  ;;  %v5702_v26 = vmax.f32 %v12361_v49, 0.0  ;;  %vm5734_vm9 = vcmp.ne.f32.partialorder %v12361_v49, %v12361_v49  ;;  %6505 = vst [vmem:[%s12506_s20 + $0x68] sm:$0xff] (%p9627_p5), %v6504_v32  ;;  %v6512_v45 = vld [vmem:[%s11852_s12 + $0x88] sm:$0xff] (%p9627_p5) }
 0x9fd   : > { %v9534_v62 = vpop.eup %9533  ;;  %v6242_v7 = vsel %vm5730_vm1, %v12277_v0, %v6210_v46  ;;  %vm5733_vm11 = vcmp.ne.f32.partialorder %v12375_v14, %v12375_v14  ;;  %vm5736_vm13 = vcmp.ne.f32.partialorder %v12394_v57, %v12394_v57  ;;  %vm5735_vm15 = vcmp.ne.f32.partialorder %v12422_v4, %v12422_v4  ;;  %6513 = vst [vmem:[%s12506_s20 + $0x88] sm:$0xff] (%p9627_p5), %v6512_v45 }
 0x9fe   : > { %v9536_v11 = vpop.eup %9535  ;;  %7047 = vst [vmem:[%s11852_s12 + $0x1c8] sm:$0xff] %v6242_v7  ;;  %v6142_v29 = vmul.f32 0.6931472, %v9534_v62  ;;  %v6241_v0 = vsel %vm5729_vm3, %v12296_v52, %v6209_v41  ;;  %v6164_v52 = vand.u32 2147483647, %v12439_v21  ;;  %v5703_v7 = vmax.f32 %v12422_v4, 0.0 }
 0x9ff   : > { %v6149_v18 = vadd.f32 1.0, %v9536_v11  ;;  %v9538_v31 = vpop.eup %9537  ;;  %7046 = vst [vmem:[%s11852_s12 + $0x1c0] sm:$0xff] %v6241_v0  ;;  %v6155_v21 = vand.u32 2147483647, %v9536_v11  ;;  %v6480_v41 = vld [vmem:[%s11852_s12 + $0x8] sm:$0xff] (%p9627_p5) }
 0xa00   : > { %v6148_v55 = vsel %vm6147_vm4, %v6145_v51, %v6142_v29  ;;  %v6176_v9 = vadd.f32 1.0, %v9538_v31  ;;  %vm6165_vm8 = vcmp.lt.f32.partialorder %v6164_v52, 0.0004427343  ;;  %v6179_v44 = vmul.f32 -0.5, %v9538_v31  ;;  %v6482_v29 = vld [vmem:[%s11852_s12 + $0x10] sm:$0xff] (%p9627_p5)  ;;  %v6486_v51 = vld [vmem:[%s11852_s12 + $0x20] sm:$0xff] (%p9627_p5) }
 0xa01   : > { %v6212_v25 = vadd.f32 %v6148_v55, %v5700_v39  ;;  %9545 = vlog2.f32 %v6149_v18  ;;  %v6182_v28 = vand.u32 2147483647, %v9538_v31  ;;  %vm6156_vm10 = vcmp.lt.f32.partialorder %v6155_v21, 0.0004427343  ;;  %v6488_v39 = vld [vmem:[%s11852_s12 + $0x28] sm:$0xff] (%p9627_p5)  ;;  %6481 = vst [vmem:[%s12506_s20 + $0x8] sm:$0xff] (%p9627_p5), %v6480_v41 }
 0xa02   : > { %v9540_v3 = vpop.eup %9539  ;;  %9547 = vlog2.f32 %v6176_v9  ;;  %v6180_v16 = vadd.f32 1.0, %v6179_v44  ;;  %6483 = vst [vmem:[%s12506_s20 + $0x10] sm:$0xff] (%p9627_p5), %v6482_v29  ;;  %6487 = vst [vmem:[%s12506_s20 + $0x20] sm:$0xff] (%p9627_p5), %v6486_v51  ;;  %v6492_v18 = vld [vmem:[%s11852_s12 + $0x38] sm:$0xff] (%p9627_p5)  ;;  %v6496_v0 = vld [vmem:[%s11852_s12 + $0x48] sm:$0xff] (%p9627_p5) }
 0xa03   : > { %v6244_v5 = vsel %vm5732_vm5, %v12315_v42, %v6212_v25  ;;  %v6133_v24 = vmul.f32 0.6931472, %v9540_v3  ;;  %v6152_v42 = vmul.f32 -0.5, %v9536_v11  ;;  %vm6183_vm12 = vcmp.lt.f32.partialorder %v6182_v28, 0.0004427343  ;;  %6489 = vst [vmem:[%s12506_s20 + $0x28] sm:$0xff] (%p9627_p5), %v6488_v39 }
 0xa04   : > { %7049 = vst [vmem:[%s11852_s12 + $0x1d8] sm:$0xff] %v6244_v5  ;;  %v6181_v50 = vmul.f32 %v9538_v31, %v6180_v16  ;;  %v6494_v31 = vld [vmem:[%s11852_s12 + $0x40] sm:$0xff] (%p9627_p5)  ;;  %6493 = vst [vmem:[%s12506_s20 + $0x38] sm:$0xff] (%p9627_p5), %v6492_v18  ;;  %v6498_v55 = vld [vmem:[%s11852_s12 + $0x50] sm:$0xff] (%p9627_p5) }
 0xa05   : > { %v9542_v35 = vpop.eup %9541  ;;  %v6139_v59 = vsel %vm6138_vm6, %v6136_v10, %v6133_v24  ;;  %v6153_v23 = vadd.f32 1.0, %v6152_v42  ;;  %6495 = vst [vmem:[%s12506_s20 + $0x40] sm:$0xff] (%p9627_p5), %v6494_v31  ;;  %6497 = vst [vmem:[%s12506_s20 + $0x48] sm:$0xff] (%p9627_p5), %v6496_v0  ;;  %v6502_v25 = vld [vmem:[%s11852_s12 + $0x60] sm:$0xff] (%p9627_p5)  ;;  %v6506_v9 = vld [vmem:[%s11852_s12 + $0x70] sm:$0xff] (%p9627_p5) }
 0xa06   : > { %v9544_v36 = vpop.eup %9543  ;;  %v6211_v61 = vadd.f32 %v6139_v59, %v5699_v13  ;;  %v6160_v1 = vmul.f32 0.6931472, %v9542_v35  ;;  %6499 = vst [vmem:[%s12506_s20 + $0x50] sm:$0xff] (%p9627_p5), %v6498_v55  ;;  %6503 = vst [vmem:[%s12506_s20 + $0x60] sm:$0xff] (%p9627_p5), %v6502_v25  ;;  %v6508_v3 = vld [vmem:[%s11852_s12 + $0x78] sm:$0xff] (%p9627_p5)  ;;  %v6510_v5 = vld [vmem:[%s11852_s12 + $0x80] sm:$0xff] (%p9627_p5) }
 0xa07   : > { %v6167_v27 = vadd.f32 1.0, %v9544_v36  ;;  %v6154_v63 = vmul.f32 %v9536_v11, %v6153_v23  ;;  %v6170_v34 = vmul.f32 -0.5, %v9544_v36  ;;  %v6173_v53 = vand.u32 2147483647, %v9544_v36  ;;  %6507 = vst [vmem:[%s12506_s20 + $0x70] sm:$0xff] (%p9627_p5), %v6506_v9  ;;  %6509 = vst [vmem:[%s12506_s20 + $0x78] sm:$0xff] (%p9627_p5), %v6508_v3 }
 0xa08   : > { %v6243_v33 = vsel %vm5731_vm7, %v12338_v8, %v6211_v61  ;;  %v6166_v12 = vsel %vm6165_vm8, %v6163_v17, %v6160_v1  ;;  %v5701_v8 = vmax.f32 %v12375_v14, 0.0  ;;  %6511 = vst [vmem:[%s12506_s20 + $0x80] sm:$0xff] (%p9627_p5), %v6510_v5  ;;  %v6514_v24 = vld [vmem:[%s11852_s12 + $0x90] sm:$0xff] (%p9627_p5)  ;;  %v6516_v10 = vld [vmem:[%s11852_s12 + $0x98] sm:$0xff] (%p9627_p5)  ;;  %v6518_v52 = vld [vmem:[%s11852_s12 + $0xa0] sm:$0xff] (%p9627_p5) }
 0xa09   : > { %7048 = vst [vmem:[%s11852_s12 + $0x1d0] sm:$0xff] %v6243_v33  ;;  %v6214_v6 = vadd.f32 %v6166_v12, %v5702_v26  ;;  %9549 = vlog2.f32 %v6167_v27  ;;  %v6171_v46 = vadd.f32 1.0, %v6170_v34  ;;  %vm6174_vm14 = vcmp.lt.f32.partialorder %v6173_v53, 0.0004427343  ;;  %6515 = vst [vmem:[%s12506_s20 + $0x90] sm:$0xff] (%p9627_p5), %v6514_v24  ;;  %v6520_v13 = vld [vmem:[%s11852_s12 + $0xa8] sm:$0xff] (%p9627_p5) }
 0xa0a   : > { %6517 = vst [vmem:[%s12506_s20 + $0x98] sm:$0xff] (%p9627_p5), %v6516_v10  ;;  %6519 = vst [vmem:[%s12506_s20 + $0xa0] sm:$0xff] (%p9627_p5), %v6518_v52  ;;  %v6522_v35 = vld [vmem:[%s11852_s12 + $0xb0] sm:$0xff] (%p9627_p5)  ;;  %v6524_v59 = vld [vmem:[%s11852_s12 + $0xb8] sm:$0xff] (%p9627_p5) }
 0xa0b   : > { %v6246_v48 = vsel %vm5734_vm9, %v12361_v49, %v6214_v6  ;;  %v5704_v49 = vmax.f32 %v12394_v57, 0.0  ;;  %v6172_v62 = vmul.f32 %v9544_v36, %v6171_v46  ;;  %6521 = vst [vmem:[%s12506_s20 + $0xa8] sm:$0xff] (%p9627_p5), %v6520_v13  ;;  %6523 = vst [vmem:[%s12506_s20 + $0xb0] sm:$0xff] (%p9627_p5), %v6522_v35  ;;  %v6526_v36 = vld [vmem:[%s11852_s12 + $0xc0] sm:$0xff] (%p9627_p5)  ;;  %v6528_v61 = vld [vmem:[%s11852_s12 + $0xc8] sm:$0xff] (%p9627_p5) }
 0xa0c   : > { %7051 = vst [vmem:[%s11852_s12 + $0x1e8] sm:$0xff] %v6246_v48  ;;  %6525 = vst [vmem:[%s12506_s20 + $0xb8] sm:$0xff] (%p9627_p5), %v6524_v59  ;;  %v6530_v1 = vld [vmem:[%s11852_s12 + $0xd0] sm:$0xff] (%p9627_p5)  ;;  %v6532_v17 = vld [vmem:[%s11852_s12 + $0xd8] sm:$0xff] (%p9627_p5) }
 0xa0d   : > { %6527 = vst [vmem:[%s12506_s20 + $0xc0] sm:$0xff] (%p9627_p5), %v6526_v36  ;;  %6529 = vst [vmem:[%s12506_s20 + $0xc8] sm:$0xff] (%p9627_p5), %v6528_v61  ;;  %v6534_v42 = vld [vmem:[%s11852_s12 + $0xe0] sm:$0xff] (%p9627_p5)  ;;  %v6536_v26 = vld [vmem:[%s11852_s12 + $0xe8] sm:$0xff] (%p9627_p5) }
 0xa0e   : > { %v9546_v56 = vpop.eup %9545  ;;  %6531 = vst [vmem:[%s12506_s20 + $0xd0] sm:$0xff] (%p9627_p5), %v6530_v1  ;;  %6533 = vst [vmem:[%s12506_s20 + $0xd8] sm:$0xff] (%p9627_p5), %v6532_v17  ;;  %v6538_v27 = vld [vmem:[%s11852_s12 + $0xf0] sm:$0xff] (%p9627_p5)  ;;  %v6540_v33 = vld [vmem:[%s11852_s12 + $0xf8] sm:$0xff] (%p9627_p5) }
 0xa0f   : > { %v6151_v60 = vmul.f32 0.6931472, %v9546_v56  ;;  %v9548_v54 = vpop.eup %9547  ;;  %6535 = vst [vmem:[%s12506_s20 + $0xe0] sm:$0xff] (%p9627_p5), %v6534_v42  ;;  %6537 = vst [vmem:[%s12506_s20 + $0xe8] sm:$0xff] (%p9627_p5), %v6536_v26  ;;  %v6542_v12 = vld [vmem:[%s11852_s12 + $0x100] sm:$0xff] (%p9627_p5)  ;;  %v6544_v6 = vld [vmem:[%s11852_s12 + $0x108] sm:$0xff] (%p9627_p5) }
 0xa10   : > { %v6178_v58 = vmul.f32 0.6931472, %v9548_v54  ;;  %6539 = vst [vmem:[%s12506_s20 + $0xf0] sm:$0xff] (%p9627_p5), %v6538_v27  ;;  %6541 = vst [vmem:[%s12506_s20 + $0xf8] sm:$0xff] (%p9627_p5), %v6540_v33  ;;  %v6546_v44 = vld [vmem:[%s11852_s12 + $0x110] sm:$0xff] (%p9627_p5)  ;;  %v6548_v23 = vld [vmem:[%s11852_s12 + $0x118] sm:$0xff] (%p9627_p5) }
 0xa11   : > { %v6157_v19 = vsel %vm6156_vm10, %v6154_v63, %v6151_v60  ;;  %6543 = vst [vmem:[%s12506_s20 + $0x200] sm:$0xff] (%p9627_p5), %v6542_v12  ;;  %6545 = vst [vmem:[%s12506_s20 + $0x208] sm:$0xff] (%p9627_p5), %v6544_v6  ;;  %v6550_v48 = vld [vmem:[%s11852_s12 + $0x120] sm:$0xff] (%p9627_p5)  ;;  %v6552_v21 = vld [vmem:[%s11852_s12 + $0x128] sm:$0xff] (%p9627_p5) }
 0xa12   : > { %v6213_v2 = vadd.f32 %v6157_v19, %v5701_v8  ;;  %v6184_v37 = vsel %vm6183_vm12, %v6181_v50, %v6178_v58  ;;  %6547 = vst [vmem:[%s12506_s20 + $0x210] sm:$0xff] (%p9627_p5), %v6546_v44  ;;  %6549 = vst [vmem:[%s12506_s20 + $0x218] sm:$0xff] (%p9627_p5), %v6548_v23  ;;  %v6554_v56 = vld [vmem:[%s11852_s12 + $0x130] sm:$0xff] (%p9627_p5)  ;;  %v6556_v16 = vld [vmem:[%s11852_s12 + $0x138] sm:$0xff] (%p9627_p5) }
 0xa13   : > { %v6216_v47 = vadd.f32 %v6184_v37, %v5704_v49  ;;  %6551 = vst [vmem:[%s12506_s20 + $0x220] sm:$0xff] (%p9627_p5), %v6550_v48  ;;  %6553 = vst [vmem:[%s12506_s20 + $0x228] sm:$0xff] (%p9627_p5), %v6552_v21  ;;  %v6558_v60 = vld [vmem:[%s11852_s12 + $0x140] sm:$0xff] (%p9627_p5)  ;;  %v6560_v63 = vld [vmem:[%s11852_s12 + $0x148] sm:$0xff] (%p9627_p5) }
 0xa14   : > { %v6245_v40 = vsel %vm5733_vm11, %v12375_v14, %v6213_v2  ;;  %6555 = vst [vmem:[%s12506_s20 + $0x230] sm:$0xff] (%p9627_p5), %v6554_v56  ;;  %6557 = vst [vmem:[%s12506_s20 + $0x238] sm:$0xff] (%p9627_p5), %v6556_v16  ;;  %v6562_v28 = vld [vmem:[%s11852_s12 + $0x150] sm:$0xff] (%p9627_p5)  ;;  %v6564_v8 = vld [vmem:[%s11852_s12 + $0x158] sm:$0xff] (%p9627_p5) }
 0xa15   : > { %7050 = vst [vmem:[%s11852_s12 + $0x1e0] sm:$0xff] %v6245_v40  ;;  %v6248_v30 = vsel %vm5736_vm13, %v12394_v57, %v6216_v47  ;;  %v6478_v57 = vld [vmem:[%s11852_s12] sm:$0xff] (%p9627_p5)  ;;  %6559 = vst [vmem:[%s12506_s20 + $0x240] sm:$0xff] (%p9627_p5), %v6558_v60  ;;  %v6568_v54 = vld [vmem:[%s11852_s12 + $0x168] sm:$0xff] (%p9627_p5) }
 0xa16   : > { %v9550_v22 = vpop.eup %9549  ;;  %7053 = vst [vmem:[%s11852_s12 + $0x1f8] sm:$0xff] %v6248_v30  ;;  %6479 = vst [vmem:[%s12506_s20] sm:$0xff] (%p9627_p5), %v6478_v57  ;;  %v6566_v34 = vld [vmem:[%s11852_s12 + $0x160] sm:$0xff] (%p9627_p5)  ;;  %v6570_v19 = vld [vmem:[%s11852_s12 + $0x170] sm:$0xff] (%p9627_p5) }
 0xa17   : > { %v6169_v20 = vmul.f32 0.6931472, %v9550_v22  ;;  %6561 = vst [vmem:[%s12506_s20 + $0x248] sm:$0xff] (%p9627_p5), %v6560_v63  ;;  %6563 = vst [vmem:[%s12506_s20 + $0x250] sm:$0xff] (%p9627_p5), %v6562_v28  ;;  %v6572_v2 = vld [vmem:[%s11852_s12 + $0x178] sm:$0xff] (%p9627_p5)  ;;  %v6574_v58 = vld [vmem:[%s11852_s12 + $0x180] sm:$0xff] (%p9627_p5) }
 0xa18   : > { %6565 = vst [vmem:[%s12506_s20 + $0x258] sm:$0xff] (%p9627_p5), %v6564_v8  ;;  %6567 = vst [vmem:[%s12506_s20 + $0x260] sm:$0xff] (%p9627_p5), %v6566_v34  ;;  %v6576_v50 = vld [vmem:[%s11852_s12 + $0x188] sm:$0xff] (%p9627_p5)  ;;  %v6578_v49 = vld [vmem:[%s11852_s12 + $0x190] sm:$0xff] (%p9627_p5) }
 0xa19   : > { %v6175_v38 = vsel %vm6174_vm14, %v6172_v62, %v6169_v20  ;;  %6320 = sbr.rel (!%p9627_p5) target bundleno = 2598 (0xa26), region = 74  ;;  %6569 = vst [vmem:[%s12506_s20 + $0x268] sm:$0xff] (%p9627_p5), %v6568_v54  ;;  %6571 = vst [vmem:[%s12506_s20 + $0x270] sm:$0xff] (%p9627_p5), %v6570_v19  ;;  %v6580_v40 = vld [vmem:[%s11852_s12 + $0x198] sm:$0xff] (%p9627_p5)  ;;  %v6582_v37 = vld [vmem:[%s11852_s12 + $0x1a0] sm:$0xff] (%p9627_p5) }
 0xa1a   : > { %v6215_v14 = vadd.f32 %v6175_v38, %v5703_v7  ;;  %6573 = vst [vmem:[%s12506_s20 + $0x278] sm:$0xff] (%p9627_p5), %v6572_v2  ;;  %6575 = vst [vmem:[%s12506_s20 + $0x280] sm:$0xff] (%p9627_p5), %v6574_v58  ;;  %v6584_v46 = vld [vmem:[%s11852_s12 + $0x1a8] sm:$0xff] (%p9627_p5)  ;;  %v6586_v47 = vld [vmem:[%s11852_s12 + $0x1b0] sm:$0xff] (%p9627_p5) }
 0xa1b   : > { %6577 = vst [vmem:[%s12506_s20 + $0x288] sm:$0xff] (%p9627_p5), %v6576_v50  ;;  %6579 = vst [vmem:[%s12506_s20 + $0x290] sm:$0xff] (%p9627_p5), %v6578_v49  ;;  %v6588_v53 = vld [vmem:[%s11852_s12 + $0x1b8] sm:$0xff] (%p9627_p5)  ;;  %v6590_v22 = vld [vmem:[%s11852_s12 + $0x1c0] sm:$0xff] (%p9627_p5) }
 0xa1c   : > { %v6247_v11 = vsel %vm5735_vm15, %v12422_v4, %v6215_v14  ;;  %v6484_v4 = vld [vmem:[%s11852_s12 + $0x18] sm:$0xff] (%p9627_p5)  ;;  %6581 = vst [vmem:[%s12506_s20 + $0x298] sm:$0xff] (%p9627_p5), %v6580_v40  ;;  %6583 = vst [vmem:[%s12506_s20 + $0x2a0] sm:$0xff] (%p9627_p5), %v6582_v37  ;;  %v6592_v30 = vld [vmem:[%s11852_s12 + $0x1c8] sm:$0xff] (%p9627_p5) }
 0xa1d   : > { %7052 = vst [vmem:[%s11852_s12 + $0x1f0] sm:$0xff] %v6247_v11  ;;  %6485 = vst [vmem:[%s12506_s20 + $0x18] sm:$0xff] (%p9627_p5), %v6484_v4  ;;  %v6594_v20 = vld [vmem:[%s11852_s12 + $0x1d0] sm:$0xff] (%p9627_p5)  ;;  %v6596_v62 = vld [vmem:[%s11852_s12 + $0x1d8] sm:$0xff] (%p9627_p5) }
 0xa1e   : > { %6585 = vst [vmem:[%s12506_s20 + $0x2a8] sm:$0xff] %v6584_v46  ;;  %6587 = vst [vmem:[%s12506_s20 + $0x2b0] sm:$0xff] %v6586_v47  ;;  %v6598_v7 = vld [vmem:[%s11852_s12 + $0x1e0] sm:$0xff]  ;;  %v6600_v38 = vld [vmem:[%s11852_s12 + $0x1e8] sm:$0xff] }
 0xa1f   : > { %6589 = vst [vmem:[%s12506_s20 + $0x2b8] sm:$0xff] %v6588_v53  ;;  %6591 = vst [vmem:[%s12506_s20 + $0x2c0] sm:$0xff] %v6590_v22  ;;  %v6604_v11 = vld [vmem:[%s11852_s12 + $0x1f8] sm:$0xff] }
 0xa20   : > { %6593 = vst [vmem:[%s12506_s20 + $0x2c8] sm:$0xff] %v6592_v30  ;;  %6595 = vst [vmem:[%s12506_s20 + $0x2d0] sm:$0xff] %v6594_v20 }
 0xa21   : > { %6597 = vst [vmem:[%s12506_s20 + $0x2d8] sm:$0xff] %v6596_v62  ;;  %6599 = vst [vmem:[%s12506_s20 + $0x2e0] sm:$0xff] %v6598_v7 }
 0xa22   : > { %6601 = vst [vmem:[%s12506_s20 + $0x2e8] sm:$0xff] %v6600_v38  ;;  %6605 = vst [vmem:[%s12506_s20 + $0x2f8] sm:$0xff] %v6604_v11 }
 0xa24   : > { %v6602_v14 = vld [vmem:[%s11852_s12 + $0x1f0] sm:$0xff] }
 0xa25   : > { %6603 = vst [vmem:[%s12506_s20 + $0x2f0] sm:$0xff] %v6602_v14 }
 0xa26 PF: > { %p10_p10 = scmp.ge.s32.totalorder %s9614_s16, 4   ;;  %s12773_s12 = smov %s9571_s13 }
 0xa27   : > { %s12774_s13 = smov %s9625_s19  ;;  %s12775_s14 = smov %s9614_s16 }
 0xa28   :  { %12 = sbr.rel (!%p10_p10) target bundleno = 2 (0x2), region = 161 }

</bundles_post_ra>
